<compile_context>
chip_gen: v7x
topology: tpu7x:2x2x1
jax: 0.10.0
libtpu: 0.0.40
codegen_flags: <defaults>
</compile_context>

<pallas_src>
import functools

import numpy as np

import jax
import jax.numpy as jnp
from jax.experimental import pallas as pl
from jax.experimental.pallas import tpu as pltpu


# ----------------------------------------------------------------------------
# Fused forward kernel (one grid step == one image)
# ----------------------------------------------------------------------------
def _fsrcnn_kernel(
    x_ref, xpos_ref,
    ew_ref, eb_ref, ea_ref,            # extract  (5x5, 1->d) + PReLU
    sw_ref, sb_ref, sa_ref,            # shrink   (1x1, d->s) + PReLU
    rcw_ref, rcb_ref,                  # RCAB 3x3 conv weights / biases
    caw_ref, cab1_ref, cab2_ref,       # RCAB channel-attention params
    rw_ref, rb_ref,                    # RIR tail 3x3 conv
    xw_ref, xb_ref, xa_ref,            # expand   (1x1, s->d) + PReLU
    dw_ref, db_ref,                    # sub-pixel deconv phase weights / bias
    o_ref,
    *, H, W, n_blocks, deconv_offs):
    f32 = jnp.float32
    HW = H * W
    xpos = xpos_ref[...]                                      # (1, HW) int32 = col % W

    def shifted(v, dy, dx):
        """plane[c, y*W+x] = v[c, (y+dy)*W + (x+dx)], or 0 if out of bounds."""
        c = v.shape[0]
        t = dy * W + dx
        if t > 0:
            s = jnp.concatenate([v[:, t:], jnp.zeros((c, t), f32)], axis=1)
        elif t < 0:
            s = jnp.concatenate([jnp.zeros((c, -t), f32), v[:, :HW + t]], axis=1)
        else:
            s = v
        # vertical OOB is already zero (slice + zero pad); mask horizontal edges
        if dx > 0:
            s = jnp.where(xpos < W - dx, s, 0.0)
        elif dx < 0:
            s = jnp.where(xpos >= -dx, s, 0.0)
        return s

    def conv(v, offsets, w, b):
        """im2col once -> single MXU dot.  v: (Cin, HW), w: (Cout, n_taps*Cin)."""
        planes = [shifted(v, dy, dx) for dy, dx in offsets]
        patches = jnp.concatenate(planes, axis=0) if len(planes) > 1 else planes[0]
        return jnp.dot(w, patches, preferred_element_type=f32) + b

    def prelu(v, a):
        return jnp.where(v > 0, v, a * v)

    offs3 = tuple((dy, dx) for dy in (-1, 0, 1) for dx in (-1, 0, 1))
    offs5 = tuple((dy, dx) for dy in (-2, -1, 0, 1, 2) for dx in (-2, -1, 0, 1, 2))

    x = x_ref[0]                                                          # (1, HW)

    # extract (5x5, 1->d) + PReLU,  shrink (1x1, d->s) + PReLU
    cur = prelu(conv(x, offs5, ew_ref[...], eb_ref[...]), ea_ref[...])    # (d, HW)
    cur = prelu(jnp.dot(sw_ref[...], cur, preferred_element_type=f32)
                + sb_ref[...], sa_ref[...])                               # (s, HW)

    # mapping: RIR = n_blocks RCABs + 3x3 conv, with long skip
    rir_in = cur
    for blk in range(n_blocks):
        body = jnp.maximum(conv(cur, offs3, rcw_ref[blk, 0], rcb_ref[blk, 0]), 0.0)
        body = conv(body, offs3, rcw_ref[blk, 1], rcb_ref[blk, 1])
        # channel attention: squeeze/excite on the VPU (no M=1 matmuls)
        pool = jnp.mean(body, axis=1, keepdims=True)                      # (s, 1)
        hid = jnp.sum(pool * caw_ref[blk, 0], axis=0, keepdims=True) + cab1_ref[blk]
        hid = jnp.maximum(hid, 0.0)                                       # (1, cr)
        att = jnp.sum(hid * caw_ref[blk, 1], axis=1, keepdims=True) + cab2_ref[blk]
        att = 1.0 / (1.0 + jnp.exp(-att))                                 # (s, 1)
        cur = cur + body * att                                            # residual
    cur = rir_in + conv(cur, offs3, rw_ref[...], rb_ref[...])

    # expand (1x1, s->d) + PReLU
    cur = prelu(jnp.dot(xw_ref[...], cur, preferred_element_type=f32)
                + xb_ref[...], xa_ref[...])                               # (d, HW)

    # sub-pixel deconv: all scale^2 output phases in one dot, clamp fused
    phases = conv(cur, deconv_offs, dw_ref[...], db_ref[...])             # (scale^2, HW)
    o_ref[0] = jnp.clip(phases, 0.0, 1.0)


# ----------------------------------------------------------------------------
# Weight packing (done once, outside jit)
# ----------------------------------------------------------------------------
def _deconv_offsets(scale, k=9, padding=4):
    return sorted({(r + padding - kk) // scale
                   for r in range(scale) for kk in range(k)
                   if (r + padding - kk) % scale == 0})


def _pack_deconv(w_t, scale, k=9, padding=4):
    """ConvTranspose2d weight (Cin, 1, k, k) -> (scale^2, n_off^2*Cin) phase matrix
    whose column ordering matches the kernel's (offset, channel) patch rows."""
    w = np.asarray(w_t)
    cin = w.shape[0]
    offs = _deconv_offsets(scale, k, padding)
    n = len(offs)
    mat = np.zeros((scale * scale, n * n * cin), np.float32)
    for ry in range(scale):
        for rx in range(scale):
            ph = ry * scale + rx
            for ky in range(k):
                if (ry + padding - ky) % scale:
                    continue
                iy = offs.index((ry + padding - ky) // scale)
                for kx in range(k):
                    if (rx + padding - kx) % scale:
                        continue
                    ix = offs.index((rx + padding - kx) // scale)
                    c0 = (iy * n + ix) * cin
                    mat[ph, c0:c0 + cin] = w[:, 0, ky, kx]
    return jnp.asarray(mat)


def pack_params(p, scale):
    def pk(w):                       # (KH, KW, Cin, Cout) -> (Cout, KH*KW*Cin)
        kh, kw, cin, cout = w.shape
        return jnp.transpose(w, (3, 0, 1, 2)).reshape(cout, kh * kw * cin)

    def col(v):
        return v.reshape(-1, 1)

    packed = {
        "ew": pk(p["extract_w"]), "eb": col(p["extract_b"]), "ea": col(p["extract_a"]),
        "sw": pk(p["shrink_w"]), "sb": col(p["shrink_b"]), "sa": col(p["shrink_a"]),
        "rcw": jnp.stack([jnp.stack([pk(b["w1"]), pk(b["w2"])]) for b in p["rcabs"]]),
        "rcb": jnp.stack([jnp.stack([col(b["b1"]), col(b["b2"])]) for b in p["rcabs"]]),
        "caw": jnp.stack([jnp.stack([b["ca_w1"], b["ca_w2"].T]) for b in p["rcabs"]]),
        "cab1": jnp.stack([b["ca_b1"].reshape(1, -1) for b in p["rcabs"]]),
        "cab2": jnp.stack([col(b["ca_b2"]) for b in p["rcabs"]]),
        "rw": pk(p["rir_w"]), "rb": col(p["rir_b"]),
        "xw": pk(p["expand_w"]), "xb": col(p["expand_b"]), "xa": col(p["expand_a"]),
        "dw": _pack_deconv(p["deconv_w"], scale),
        "db": p["deconv_b"].reshape(1, 1),
    }
    return jax.tree_util.tree_map(lambda a: a.astype(jnp.float32), packed)


_W_ORDER = ("ew", "eb", "ea", "sw", "sb", "sa", "rcw", "rcb",
            "caw", "cab1", "cab2", "rw", "rb", "xw", "xb", "xa", "dw", "db")


def _const_spec(arr):
    nd = arr.ndim

    def imap(i):
        return (0,) * nd

    return pl.BlockSpec(arr.shape, imap)


# ----------------------------------------------------------------------------
# Forward wrapper (single pallas_call + tiny depth-to-space glue)
# ----------------------------------------------------------------------------
def fsrcnn_ca_forward(packed, x_nchw, *, scale):
    n, _, h, w = x_nchw.shape
    hw = h * w
    n_blocks = packed["rcw"].shape[0]
    x_flat = x_nchw.astype(jnp.float32).reshape(n, 1, hw)
    xpos = jnp.asarray((np.arange(hw, dtype=np.int32) % w).reshape(1, hw))

    offs = _deconv_offsets(scale)
    dpairs = tuple((dy, dx) for dy in offs for dx in offs)

    weights = [packed[k] for k in _W_ORDER]
    kernel = functools.partial(_fsrcnn_kernel, H=h, W=w, n_blocks=n_blocks,
                               deconv_offs=dpairs)

    phases = pl.pallas_call(
        kernel,
        out_shape=jax.ShapeDtypeStruct((n, scale * scale, hw), jnp.float32),
        grid=(n,),
        in_specs=[pl.BlockSpec((1, 1, hw), lambda i: (i, 0, 0)),
                  pl.BlockSpec((1, hw), lambda i: (0, 0))]
                 + [_const_spec(wt) for wt in weights],
        out_specs=pl.BlockSpec((1, scale * scale, hw), lambda i: (i, 0, 0)),
        compiler_params=pltpu.CompilerParams(dimension_semantics=("parallel",)),
    )(x_flat, xpos, *weights)

    # depth-to-space (pixel shuffle) of the scale^2 phase maps: tiny XLA glue.
    p = phases.reshape(n, scale, scale, h, w)
    p = jnp.transpose(p, (0, 3, 1, 4, 2))
    return p.reshape(n, 1, h * scale, w * scale)


# ----------------------------------------------------------------------------
# Deterministic parameter init (mirrors the PyTorch __init__ shapes)
# ----------------------------------------------------------------------------
def _kaiming(key, kh, kw, cin, cout):
    std = (2.0 / (cin * kh * kw)) ** 0.5
    return jax.random.normal(key, (kh, kw, cin, cout), jnp.float32) * std


def init_params(key, scale, d=56, s=12, n_blocks=4, reduction=8):
    keys = iter(jax.random.split(key, 64))
    p = {}
    p["extract_w"] = _kaiming(next(keys), 5, 5, 1, d)
    p["extract_b"] = jnp.zeros((d,), jnp.float32)
    p["extract_a"] = jnp.full((d,), 0.25, jnp.float32)
    p["shrink_w"] = _kaiming(next(keys), 1, 1, d, s)
    p["shrink_b"] = jnp.zeros((s,), jnp.float32)
    p["shrink_a"] = jnp.full((s,), 0.25, jnp.float32)
    cr = s // reduction
    rcabs = []
    for _ in range(n_blocks):
        blk = {
            "w1": _kaiming(next(keys), 3, 3, s, s),
            "b1": jnp.zeros((s,), jnp.float32),
            "w2": _kaiming(next(keys), 3, 3, s, s),
            "b2": jnp.zeros((s,), jnp.float32),
            "ca_w1": jax.random.normal(next(keys), (s, cr), jnp.float32) * (2.0 / s) ** 0.5,
            "ca_b1": jnp.zeros((cr,), jnp.float32),
            "ca_w2": jax.random.normal(next(keys), (cr, s), jnp.float32) * (2.0 / cr) ** 0.5,
            "ca_b2": jnp.zeros((s,), jnp.float32),
        }
        rcabs.append(blk)
    p["rcabs"] = rcabs
    p["rir_w"] = _kaiming(next(keys), 3, 3, s, s)
    p["rir_b"] = jnp.zeros((s,), jnp.float32)
    p["expand_w"] = _kaiming(next(keys), 1, 1, s, d)
    p["expand_b"] = jnp.zeros((d,), jnp.float32)
    p["expand_a"] = jnp.full((d,), 0.25, jnp.float32)
    p["deconv_w"] = jax.random.normal(next(keys), (d, 1, 9, 9), jnp.float32) * 1e-3
    p["deconv_b"] = jnp.zeros((1,), jnp.float32)
    return p


# ----------------------------------------------------------------------------
# Pure-JAX (XLA) reference forward, used only to verify the Pallas kernel
# ----------------------------------------------------------------------------
def _reference_forward(p, x, *, scale):
    prec = jax.lax.Precision.HIGHEST

    def conv(v, w, b, pad):
        dn = jax.lax.conv_dimension_numbers(v.shape, w.shape, ("NCHW", "HWIO", "NCHW"))
        out = jax.lax.conv_general_dilated(v, w, (1, 1), [(pad, pad)] * 2,
                                           dimension_numbers=dn, precision=prec)
        return out + b.reshape(1, -1, 1, 1)

    def prelu(v, a):
        return jnp.where(v > 0, v, a.reshape(1, -1, 1, 1) * v)

    x = x.astype(jnp.float32)
    x = prelu(conv(x, p["extract_w"], p["extract_b"], 2), p["extract_a"])
    x = prelu(conv(x, p["shrink_w"], p["shrink_b"], 0), p["shrink_a"])
    rir_in = x
    for blk in p["rcabs"]:
        inp = x
        y = jnp.maximum(conv(inp, blk["w1"], blk["b1"], 1), 0.0)
        y = conv(y, blk["w2"], blk["b2"], 1)
        pool = jnp.mean(y, axis=(2, 3), keepdims=True)
        hid = jnp.maximum(jnp.einsum("ncij,cr->nrij", pool, blk["ca_w1"], precision=prec)
                          + blk["ca_b1"].reshape(1, -1, 1, 1), 0.0)
        att = jax.nn.sigmoid(jnp.einsum("nrij,rc->ncij", hid, blk["ca_w2"], precision=prec)
                             + blk["ca_b2"].reshape(1, -1, 1, 1))
        x = inp + y * att
    x = rir_in + conv(x, p["rir_w"], p["rir_b"], 1)
    x = prelu(conv(x, p["expand_w"], p["expand_b"], 0), p["expand_a"])
    # ConvTranspose2d(k=9, stride=scale, padding=4, output_padding=scale-1)
    w_conv = jnp.transpose(jnp.flip(p["deconv_w"], (2, 3)), (2, 3, 0, 1))
    dn = jax.lax.conv_dimension_numbers(x.shape, w_conv.shape, ("NCHW", "HWIO", "NCHW"))
    lo = 9 - 1 - 4
    hi = 9 - 1 - 4 + (scale - 1)
    y = jax.lax.conv_general_dilated(x, w_conv, (1, 1), [(lo, hi), (lo, hi)],
                                     lhs_dilation=(scale, scale),
                                     dimension_numbers=dn, precision=prec)
    y = y + p["deconv_b"].reshape(1, -1, 1, 1)
    return jnp.clip(y, 0.0, 1.0)


if __name__ == "__main__":
    scale = 2
    key = jax.random.PRNGKey(0)
    k_param, k_input = jax.random.split(key)

    params = init_params(k_param, scale)
    x = jax.random.uniform(k_input, (2, 1, 16, 16), dtype=jnp.float32)

    packed = pack_params(params, scale)
    fwd = jax.jit(functools.partial(fsrcnn_ca_forward, scale=scale))
    out = jax.block_until_ready(fwd(packed, x))

    assert out.shape == (2, 1, 16 * scale, 16 * scale), out.shape
    assert bool(jnp.all(out >= 0.0)) and bool(jnp.all(out <= 1.0))

    ref = jax.block_until_ready(
        jax.jit(functools.partial(_reference_forward, scale=scale))(params, x))
    err = float(jnp.max(jnp.abs(out - ref)))
    assert err < 2e-3, f"max abs err vs reference: {err}"

    print("KERNEL_OK")
</pallas_src>

<mosaic_0001>
module attributes {stable_mosaic.version = 11 : i64} {
  func.func @_fsrcnn_kernel(%arg0: i32, %arg1: memref<1x1x256xf32, #tpu.memory_space<vmem>>, %arg2: memref<1x256xi32, #tpu.memory_space<vmem>>, %arg3: memref<56x25xf32, #tpu.memory_space<vmem>>, %arg4: memref<56x1xf32, #tpu.memory_space<vmem>>, %arg5: memref<56x1xf32, #tpu.memory_space<vmem>>, %arg6: memref<12x56xf32, #tpu.memory_space<vmem>>, %arg7: memref<12x1xf32, #tpu.memory_space<vmem>>, %arg8: memref<12x1xf32, #tpu.memory_space<vmem>>, %arg9: memref<4x2x12x108xf32, #tpu.memory_space<vmem>>, %arg10: memref<4x2x12x1xf32, #tpu.memory_space<vmem>>, %arg11: memref<4x2x12x1xf32, #tpu.memory_space<vmem>>, %arg12: memref<4x1x1xf32, #tpu.memory_space<vmem>>, %arg13: memref<4x12x1xf32, #tpu.memory_space<vmem>>, %arg14: memref<12x108xf32, #tpu.memory_space<vmem>>, %arg15: memref<12x1xf32, #tpu.memory_space<vmem>>, %arg16: memref<56x12xf32, #tpu.memory_space<vmem>>, %arg17: memref<56x1xf32, #tpu.memory_space<vmem>>, %arg18: memref<56x1xf32, #tpu.memory_space<vmem>>, %arg19: memref<4x1400xf32, #tpu.memory_space<vmem>>, %arg20: memref<1x1xf32, #tpu.memory_space<vmem>>, %arg21: memref<1x4x256xf32, #tpu.memory_space<vmem>>) attributes {dimension_semantics = [#tpu.dimension_semantics<parallel>], iteration_bounds = array<i64: 2>, scalar_prefetch = 0 : i64, scratch_operands = 0 : i64, tpu.core_type = #tpu.core_type<tc>, window_params = [{transform_indices = @transform_0, window_bounds = array<i64: 1, 1, 256>}, {pipeline_mode = #tpu.pipeline_mode<synchronous>, transform_indices = @transform_1, window_bounds = array<i64: 1, 256>}, {pipeline_mode = #tpu.pipeline_mode<synchronous>, transform_indices = @transform_2, window_bounds = array<i64: 56, 25>}, {pipeline_mode = #tpu.pipeline_mode<synchronous>, transform_indices = @transform_3, window_bounds = array<i64: 56, 1>}, {pipeline_mode = #tpu.pipeline_mode<synchronous>, transform_indices = @transform_4, window_bounds = array<i64: 56, 1>}, {pipeline_mode = #tpu.pipeline_mode<synchronous>, transform_indices = @transform_5, window_bounds = array<i64: 12, 56>}, {pipeline_mode = #tpu.pipeline_mode<synchronous>, transform_indices = @transform_6, window_bounds = array<i64: 12, 1>}, {pipeline_mode = #tpu.pipeline_mode<synchronous>, transform_indices = @transform_7, window_bounds = array<i64: 12, 1>}, {pipeline_mode = #tpu.pipeline_mode<synchronous>, transform_indices = @transform_8, window_bounds = array<i64: 4, 2, 12, 108>}, {pipeline_mode = #tpu.pipeline_mode<synchronous>, transform_indices = @transform_9, window_bounds = array<i64: 4, 2, 12, 1>}, {pipeline_mode = #tpu.pipeline_mode<synchronous>, transform_indices = @transform_10, window_bounds = array<i64: 4, 2, 12, 1>}, {pipeline_mode = #tpu.pipeline_mode<synchronous>, transform_indices = @transform_11, window_bounds = array<i64: 4, 1, 1>}, {pipeline_mode = #tpu.pipeline_mode<synchronous>, transform_indices = @transform_12, window_bounds = array<i64: 4, 12, 1>}, {pipeline_mode = #tpu.pipeline_mode<synchronous>, transform_indices = @transform_13, window_bounds = array<i64: 12, 108>}, {pipeline_mode = #tpu.pipeline_mode<synchronous>, transform_indices = @transform_14, window_bounds = array<i64: 12, 1>}, {pipeline_mode = #tpu.pipeline_mode<synchronous>, transform_indices = @transform_15, window_bounds = array<i64: 56, 12>}, {pipeline_mode = #tpu.pipeline_mode<synchronous>, transform_indices = @transform_16, window_bounds = array<i64: 56, 1>}, {pipeline_mode = #tpu.pipeline_mode<synchronous>, transform_indices = @transform_17, window_bounds = array<i64: 56, 1>}, {pipeline_mode = #tpu.pipeline_mode<synchronous>, transform_indices = @transform_18, window_bounds = array<i64: 4, 1400>}, {pipeline_mode = #tpu.pipeline_mode<synchronous>, transform_indices = @transform_19, window_bounds = array<i64: 1, 1>}, {transform_indices = @transform_20, window_bounds = array<i64: 1, 4, 256>}]} {
    %c0 = arith.constant 0 : index
    %c0_0 = arith.constant 0 : index
    %0 = vector.load %arg2[%c0, %c0_0] : memref<1x256xi32, #tpu.memory_space<vmem>>, vector<1x256xi32>
    %c0_1 = arith.constant 0 : index
    %c0_2 = arith.constant 0 : index
    %c0_3 = arith.constant 0 : index
    %1 = vector.load %arg1[%c0_1, %c0_2, %c0_3] : memref<1x1x256xf32, #tpu.memory_space<vmem>>, vector<1x1x256xf32>
    %2 = vector.shape_cast %1 : vector<1x1x256xf32> to vector<1x256xf32>
    %c0_4 = arith.constant 0 : index
    %c0_5 = arith.constant 0 : index
    %3 = vector.load %arg3[%c0_4, %c0_5] : memref<56x25xf32, #tpu.memory_space<vmem>>, vector<56x25xf32>
    %c0_6 = arith.constant 0 : index
    %c0_7 = arith.constant 0 : index
    %4 = vector.load %arg4[%c0_6, %c0_7] : memref<56x1xf32, #tpu.memory_space<vmem>>, vector<56x1xf32>
    %cst = arith.constant 0.000000e+00 : f32
    %5 = vector.broadcast %cst : f32 to vector<1x34xf32>
    %6 = vector.extract_strided_slice %2 {offsets = [0, 0], sizes = [1, 222], strides = [1, 1]} : vector<1x256xf32> to vector<1x222xf32>
    %7 = tpu.concatenate %5, %6 in 1 : vector<1x34xf32>, vector<1x222xf32> -> vector<1x256xf32>
    %c2_i32 = arith.constant 2 : i32
    %8 = vector.broadcast %c2_i32 : i32 to vector<1x256xi32>
    %9 = arith.cmpi sge, %0, %8 : vector<1x256xi32>
    %cst_8 = arith.constant 0.000000e+00 : f32
    %10 = vector.broadcast %cst_8 : f32 to vector<1x256xf32>
    %11 = arith.select %9, %7, %10 : vector<1x256xi1>, vector<1x256xf32>
    %cst_9 = arith.constant 0.000000e+00 : f32
    %12 = vector.broadcast %cst_9 : f32 to vector<1x33xf32>
    %13 = vector.extract_strided_slice %2 {offsets = [0, 0], sizes = [1, 223], strides = [1, 1]} : vector<1x256xf32> to vector<1x223xf32>
    %14 = tpu.concatenate %12, %13 in 1 : vector<1x33xf32>, vector<1x223xf32> -> vector<1x256xf32>
    %c1_i32 = arith.constant 1 : i32
    %15 = vector.broadcast %c1_i32 : i32 to vector<1x256xi32>
    %16 = arith.cmpi sge, %0, %15 : vector<1x256xi32>
    %cst_10 = arith.constant 0.000000e+00 : f32
    %17 = vector.broadcast %cst_10 : f32 to vector<1x256xf32>
    %18 = arith.select %16, %14, %17 : vector<1x256xi1>, vector<1x256xf32>
    %cst_11 = arith.constant 0.000000e+00 : f32
    %19 = vector.broadcast %cst_11 : f32 to vector<1x32xf32>
    %20 = vector.extract_strided_slice %2 {offsets = [0, 0], sizes = [1, 224], strides = [1, 1]} : vector<1x256xf32> to vector<1x224xf32>
    %21 = tpu.concatenate %19, %20 in 1 : vector<1x32xf32>, vector<1x224xf32> -> vector<1x256xf32>
    %cst_12 = arith.constant 0.000000e+00 : f32
    %22 = vector.broadcast %cst_12 : f32 to vector<1x31xf32>
    %23 = vector.extract_strided_slice %2 {offsets = [0, 0], sizes = [1, 225], strides = [1, 1]} : vector<1x256xf32> to vector<1x225xf32>
    %24 = tpu.concatenate %22, %23 in 1 : vector<1x31xf32>, vector<1x225xf32> -> vector<1x256xf32>
    %c15_i32 = arith.constant 15 : i32
    %25 = vector.broadcast %c15_i32 : i32 to vector<1x256xi32>
    %26 = arith.cmpi slt, %0, %25 : vector<1x256xi32>
    %cst_13 = arith.constant 0.000000e+00 : f32
    %27 = vector.broadcast %cst_13 : f32 to vector<1x256xf32>
    %28 = arith.select %26, %24, %27 : vector<1x256xi1>, vector<1x256xf32>
    %cst_14 = arith.constant 0.000000e+00 : f32
    %29 = vector.broadcast %cst_14 : f32 to vector<1x30xf32>
    %30 = vector.extract_strided_slice %2 {offsets = [0, 0], sizes = [1, 226], strides = [1, 1]} : vector<1x256xf32> to vector<1x226xf32>
    %31 = tpu.concatenate %29, %30 in 1 : vector<1x30xf32>, vector<1x226xf32> -> vector<1x256xf32>
    %c14_i32 = arith.constant 14 : i32
    %32 = vector.broadcast %c14_i32 : i32 to vector<1x256xi32>
    %33 = arith.cmpi slt, %0, %32 : vector<1x256xi32>
    %cst_15 = arith.constant 0.000000e+00 : f32
    %34 = vector.broadcast %cst_15 : f32 to vector<1x256xf32>
    %35 = arith.select %33, %31, %34 : vector<1x256xi1>, vector<1x256xf32>
    %cst_16 = arith.constant 0.000000e+00 : f32
    %36 = vector.broadcast %cst_16 : f32 to vector<1x18xf32>
    %37 = vector.extract_strided_slice %2 {offsets = [0, 0], sizes = [1, 238], strides = [1, 1]} : vector<1x256xf32> to vector<1x238xf32>
    %38 = tpu.concatenate %36, %37 in 1 : vector<1x18xf32>, vector<1x238xf32> -> vector<1x256xf32>
    %c2_i32_17 = arith.constant 2 : i32
    %39 = vector.broadcast %c2_i32_17 : i32 to vector<1x256xi32>
    %40 = arith.cmpi sge, %0, %39 : vector<1x256xi32>
    %cst_18 = arith.constant 0.000000e+00 : f32
    %41 = vector.broadcast %cst_18 : f32 to vector<1x256xf32>
    %42 = arith.select %40, %38, %41 : vector<1x256xi1>, vector<1x256xf32>
    %cst_19 = arith.constant 0.000000e+00 : f32
    %43 = vector.broadcast %cst_19 : f32 to vector<1x17xf32>
    %44 = vector.extract_strided_slice %2 {offsets = [0, 0], sizes = [1, 239], strides = [1, 1]} : vector<1x256xf32> to vector<1x239xf32>
    %45 = tpu.concatenate %43, %44 in 1 : vector<1x17xf32>, vector<1x239xf32> -> vector<1x256xf32>
    %c1_i32_20 = arith.constant 1 : i32
    %46 = vector.broadcast %c1_i32_20 : i32 to vector<1x256xi32>
    %47 = arith.cmpi sge, %0, %46 : vector<1x256xi32>
    %cst_21 = arith.constant 0.000000e+00 : f32
    %48 = vector.broadcast %cst_21 : f32 to vector<1x256xf32>
    %49 = arith.select %47, %45, %48 : vector<1x256xi1>, vector<1x256xf32>
    %cst_22 = arith.constant 0.000000e+00 : f32
    %50 = vector.broadcast %cst_22 : f32 to vector<1x16xf32>
    %51 = vector.extract_strided_slice %2 {offsets = [0, 0], sizes = [1, 240], strides = [1, 1]} : vector<1x256xf32> to vector<1x240xf32>
    %52 = tpu.concatenate %50, %51 in 1 : vector<1x16xf32>, vector<1x240xf32> -> vector<1x256xf32>
    %cst_23 = arith.constant 0.000000e+00 : f32
    %53 = vector.broadcast %cst_23 : f32 to vector<1x15xf32>
    %54 = vector.extract_strided_slice %2 {offsets = [0, 0], sizes = [1, 241], strides = [1, 1]} : vector<1x256xf32> to vector<1x241xf32>
    %55 = tpu.concatenate %53, %54 in 1 : vector<1x15xf32>, vector<1x241xf32> -> vector<1x256xf32>
    %c15_i32_24 = arith.constant 15 : i32
    %56 = vector.broadcast %c15_i32_24 : i32 to vector<1x256xi32>
    %57 = arith.cmpi slt, %0, %56 : vector<1x256xi32>
    %cst_25 = arith.constant 0.000000e+00 : f32
    %58 = vector.broadcast %cst_25 : f32 to vector<1x256xf32>
    %59 = arith.select %57, %55, %58 : vector<1x256xi1>, vector<1x256xf32>
    %cst_26 = arith.constant 0.000000e+00 : f32
    %60 = vector.broadcast %cst_26 : f32 to vector<1x14xf32>
    %61 = vector.extract_strided_slice %2 {offsets = [0, 0], sizes = [1, 242], strides = [1, 1]} : vector<1x256xf32> to vector<1x242xf32>
    %62 = tpu.concatenate %60, %61 in 1 : vector<1x14xf32>, vector<1x242xf32> -> vector<1x256xf32>
    %c14_i32_27 = arith.constant 14 : i32
    %63 = vector.broadcast %c14_i32_27 : i32 to vector<1x256xi32>
    %64 = arith.cmpi slt, %0, %63 : vector<1x256xi32>
    %cst_28 = arith.constant 0.000000e+00 : f32
    %65 = vector.broadcast %cst_28 : f32 to vector<1x256xf32>
    %66 = arith.select %64, %62, %65 : vector<1x256xi1>, vector<1x256xf32>
    %cst_29 = arith.constant 0.000000e+00 : f32
    %67 = vector.broadcast %cst_29 : f32 to vector<1x2xf32>
    %68 = vector.extract_strided_slice %2 {offsets = [0, 0], sizes = [1, 254], strides = [1, 1]} : vector<1x256xf32> to vector<1x254xf32>
    %69 = tpu.concatenate %67, %68 in 1 : vector<1x2xf32>, vector<1x254xf32> -> vector<1x256xf32>
    %c2_i32_30 = arith.constant 2 : i32
    %70 = vector.broadcast %c2_i32_30 : i32 to vector<1x256xi32>
    %71 = arith.cmpi sge, %0, %70 : vector<1x256xi32>
    %cst_31 = arith.constant 0.000000e+00 : f32
    %72 = vector.broadcast %cst_31 : f32 to vector<1x256xf32>
    %73 = arith.select %71, %69, %72 : vector<1x256xi1>, vector<1x256xf32>
    %cst_32 = arith.constant 0.000000e+00 : f32
    %74 = vector.broadcast %cst_32 : f32 to vector<1x1xf32>
    %75 = vector.extract_strided_slice %2 {offsets = [0, 0], sizes = [1, 255], strides = [1, 1]} : vector<1x256xf32> to vector<1x255xf32>
    %76 = tpu.concatenate %74, %75 in 1 : vector<1x1xf32>, vector<1x255xf32> -> vector<1x256xf32>
    %c1_i32_33 = arith.constant 1 : i32
    %77 = vector.broadcast %c1_i32_33 : i32 to vector<1x256xi32>
    %78 = arith.cmpi sge, %0, %77 : vector<1x256xi32>
    %cst_34 = arith.constant 0.000000e+00 : f32
    %79 = vector.broadcast %cst_34 : f32 to vector<1x256xf32>
    %80 = arith.select %78, %76, %79 : vector<1x256xi1>, vector<1x256xf32>
    %81 = vector.extract_strided_slice %2 {offsets = [0, 1], sizes = [1, 255], strides = [1, 1]} : vector<1x256xf32> to vector<1x255xf32>
    %cst_35 = arith.constant 0.000000e+00 : f32
    %82 = vector.broadcast %cst_35 : f32 to vector<1x1xf32>
    %83 = tpu.concatenate %81, %82 in 1 : vector<1x255xf32>, vector<1x1xf32> -> vector<1x256xf32>
    %c15_i32_36 = arith.constant 15 : i32
    %84 = vector.broadcast %c15_i32_36 : i32 to vector<1x256xi32>
    %85 = arith.cmpi slt, %0, %84 : vector<1x256xi32>
    %cst_37 = arith.constant 0.000000e+00 : f32
    %86 = vector.broadcast %cst_37 : f32 to vector<1x256xf32>
    %87 = arith.select %85, %83, %86 : vector<1x256xi1>, vector<1x256xf32>
    %88 = vector.extract_strided_slice %2 {offsets = [0, 2], sizes = [1, 254], strides = [1, 1]} : vector<1x256xf32> to vector<1x254xf32>
    %cst_38 = arith.constant 0.000000e+00 : f32
    %89 = vector.broadcast %cst_38 : f32 to vector<1x2xf32>
    %90 = tpu.concatenate %88, %89 in 1 : vector<1x254xf32>, vector<1x2xf32> -> vector<1x256xf32>
    %c14_i32_39 = arith.constant 14 : i32
    %91 = vector.broadcast %c14_i32_39 : i32 to vector<1x256xi32>
    %92 = arith.cmpi slt, %0, %91 : vector<1x256xi32>
    %cst_40 = arith.constant 0.000000e+00 : f32
    %93 = vector.broadcast %cst_40 : f32 to vector<1x256xf32>
    %94 = arith.select %92, %90, %93 : vector<1x256xi1>, vector<1x256xf32>
    %95 = vector.extract_strided_slice %2 {offsets = [0, 14], sizes = [1, 242], strides = [1, 1]} : vector<1x256xf32> to vector<1x242xf32>
    %cst_41 = arith.constant 0.000000e+00 : f32
    %96 = vector.broadcast %cst_41 : f32 to vector<1x14xf32>
    %97 = tpu.concatenate %95, %96 in 1 : vector<1x242xf32>, vector<1x14xf32> -> vector<1x256xf32>
    %c2_i32_42 = arith.constant 2 : i32
    %98 = vector.broadcast %c2_i32_42 : i32 to vector<1x256xi32>
    %99 = arith.cmpi sge, %0, %98 : vector<1x256xi32>
    %cst_43 = arith.constant 0.000000e+00 : f32
    %100 = vector.broadcast %cst_43 : f32 to vector<1x256xf32>
    %101 = arith.select %99, %97, %100 : vector<1x256xi1>, vector<1x256xf32>
    %102 = vector.extract_strided_slice %2 {offsets = [0, 15], sizes = [1, 241], strides = [1, 1]} : vector<1x256xf32> to vector<1x241xf32>
    %cst_44 = arith.constant 0.000000e+00 : f32
    %103 = vector.broadcast %cst_44 : f32 to vector<1x15xf32>
    %104 = tpu.concatenate %102, %103 in 1 : vector<1x241xf32>, vector<1x15xf32> -> vector<1x256xf32>
    %c1_i32_45 = arith.constant 1 : i32
    %105 = vector.broadcast %c1_i32_45 : i32 to vector<1x256xi32>
    %106 = arith.cmpi sge, %0, %105 : vector<1x256xi32>
    %cst_46 = arith.constant 0.000000e+00 : f32
    %107 = vector.broadcast %cst_46 : f32 to vector<1x256xf32>
    %108 = arith.select %106, %104, %107 : vector<1x256xi1>, vector<1x256xf32>
    %109 = vector.extract_strided_slice %2 {offsets = [0, 16], sizes = [1, 240], strides = [1, 1]} : vector<1x256xf32> to vector<1x240xf32>
    %cst_47 = arith.constant 0.000000e+00 : f32
    %110 = vector.broadcast %cst_47 : f32 to vector<1x16xf32>
    %111 = tpu.concatenate %109, %110 in 1 : vector<1x240xf32>, vector<1x16xf32> -> vector<1x256xf32>
    %112 = vector.extract_strided_slice %2 {offsets = [0, 17], sizes = [1, 239], strides = [1, 1]} : vector<1x256xf32> to vector<1x239xf32>
    %cst_48 = arith.constant 0.000000e+00 : f32
    %113 = vector.broadcast %cst_48 : f32 to vector<1x17xf32>
    %114 = tpu.concatenate %112, %113 in 1 : vector<1x239xf32>, vector<1x17xf32> -> vector<1x256xf32>
    %c15_i32_49 = arith.constant 15 : i32
    %115 = vector.broadcast %c15_i32_49 : i32 to vector<1x256xi32>
    %116 = arith.cmpi slt, %0, %115 : vector<1x256xi32>
    %cst_50 = arith.constant 0.000000e+00 : f32
    %117 = vector.broadcast %cst_50 : f32 to vector<1x256xf32>
    %118 = arith.select %116, %114, %117 : vector<1x256xi1>, vector<1x256xf32>
    %119 = vector.extract_strided_slice %2 {offsets = [0, 18], sizes = [1, 238], strides = [1, 1]} : vector<1x256xf32> to vector<1x238xf32>
    %cst_51 = arith.constant 0.000000e+00 : f32
    %120 = vector.broadcast %cst_51 : f32 to vector<1x18xf32>
    %121 = tpu.concatenate %119, %120 in 1 : vector<1x238xf32>, vector<1x18xf32> -> vector<1x256xf32>
    %c14_i32_52 = arith.constant 14 : i32
    %122 = vector.broadcast %c14_i32_52 : i32 to vector<1x256xi32>
    %123 = arith.cmpi slt, %0, %122 : vector<1x256xi32>
    %cst_53 = arith.constant 0.000000e+00 : f32
    %124 = vector.broadcast %cst_53 : f32 to vector<1x256xf32>
    %125 = arith.select %123, %121, %124 : vector<1x256xi1>, vector<1x256xf32>
    %126 = vector.extract_strided_slice %2 {offsets = [0, 30], sizes = [1, 226], strides = [1, 1]} : vector<1x256xf32> to vector<1x226xf32>
    %cst_54 = arith.constant 0.000000e+00 : f32
    %127 = vector.broadcast %cst_54 : f32 to vector<1x30xf32>
    %128 = tpu.concatenate %126, %127 in 1 : vector<1x226xf32>, vector<1x30xf32> -> vector<1x256xf32>
    %c2_i32_55 = arith.constant 2 : i32
    %129 = vector.broadcast %c2_i32_55 : i32 to vector<1x256xi32>
    %130 = arith.cmpi sge, %0, %129 : vector<1x256xi32>
    %cst_56 = arith.constant 0.000000e+00 : f32
    %131 = vector.broadcast %cst_56 : f32 to vector<1x256xf32>
    %132 = arith.select %130, %128, %131 : vector<1x256xi1>, vector<1x256xf32>
    %133 = vector.extract_strided_slice %2 {offsets = [0, 31], sizes = [1, 225], strides = [1, 1]} : vector<1x256xf32> to vector<1x225xf32>
    %cst_57 = arith.constant 0.000000e+00 : f32
    %134 = vector.broadcast %cst_57 : f32 to vector<1x31xf32>
    %135 = tpu.concatenate %133, %134 in 1 : vector<1x225xf32>, vector<1x31xf32> -> vector<1x256xf32>
    %c1_i32_58 = arith.constant 1 : i32
    %136 = vector.broadcast %c1_i32_58 : i32 to vector<1x256xi32>
    %137 = arith.cmpi sge, %0, %136 : vector<1x256xi32>
    %cst_59 = arith.constant 0.000000e+00 : f32
    %138 = vector.broadcast %cst_59 : f32 to vector<1x256xf32>
    %139 = arith.select %137, %135, %138 : vector<1x256xi1>, vector<1x256xf32>
    %140 = vector.extract_strided_slice %2 {offsets = [0, 32], sizes = [1, 224], strides = [1, 1]} : vector<1x256xf32> to vector<1x224xf32>
    %cst_60 = arith.constant 0.000000e+00 : f32
    %141 = vector.broadcast %cst_60 : f32 to vector<1x32xf32>
    %142 = tpu.concatenate %140, %141 in 1 : vector<1x224xf32>, vector<1x32xf32> -> vector<1x256xf32>
    %143 = vector.extract_strided_slice %2 {offsets = [0, 33], sizes = [1, 223], strides = [1, 1]} : vector<1x256xf32> to vector<1x223xf32>
    %cst_61 = arith.constant 0.000000e+00 : f32
    %144 = vector.broadcast %cst_61 : f32 to vector<1x33xf32>
    %145 = tpu.concatenate %143, %144 in 1 : vector<1x223xf32>, vector<1x33xf32> -> vector<1x256xf32>
    %c15_i32_62 = arith.constant 15 : i32
    %146 = vector.broadcast %c15_i32_62 : i32 to vector<1x256xi32>
    %147 = arith.cmpi slt, %0, %146 : vector<1x256xi32>
    %cst_63 = arith.constant 0.000000e+00 : f32
    %148 = vector.broadcast %cst_63 : f32 to vector<1x256xf32>
    %149 = arith.select %147, %145, %148 : vector<1x256xi1>, vector<1x256xf32>
    %150 = vector.extract_strided_slice %2 {offsets = [0, 34], sizes = [1, 222], strides = [1, 1]} : vector<1x256xf32> to vector<1x222xf32>
    %cst_64 = arith.constant 0.000000e+00 : f32
    %151 = vector.broadcast %cst_64 : f32 to vector<1x34xf32>
    %152 = tpu.concatenate %150, %151 in 1 : vector<1x222xf32>, vector<1x34xf32> -> vector<1x256xf32>
    %c14_i32_65 = arith.constant 14 : i32
    %153 = vector.broadcast %c14_i32_65 : i32 to vector<1x256xi32>
    %154 = arith.cmpi slt, %0, %153 : vector<1x256xi32>
    %cst_66 = arith.constant 0.000000e+00 : f32
    %155 = vector.broadcast %cst_66 : f32 to vector<1x256xf32>
    %156 = arith.select %154, %152, %155 : vector<1x256xi1>, vector<1x256xf32>
    %157 = tpu.concatenate %11, %18, %21, %28, %35, %42, %49, %52, %59, %66, %73, %80, %2, %87, %94, %101 in 0 : vector<1x256xf32>, vector<1x256xf32>, vector<1x256xf32>, vector<1x256xf32>, vector<1x256xf32>, vector<1x256xf32>, vector<1x256xf32>, vector<1x256xf32>, vector<1x256xf32>, vector<1x256xf32>, vector<1x256xf32>, vector<1x256xf32>, vector<1x256xf32>, vector<1x256xf32>, vector<1x256xf32>, vector<1x256xf32> -> vector<16x256xf32>
    %158 = tpu.concatenate %108, %111, %118, %125, %132, %139, %142, %149, %156 in 0 : vector<1x256xf32>, vector<1x256xf32>, vector<1x256xf32>, vector<1x256xf32>, vector<1x256xf32>, vector<1x256xf32>, vector<1x256xf32>, vector<1x256xf32>, vector<1x256xf32> -> vector<9x256xf32>
    %159 = tpu.concatenate %157, %158 in 0 : vector<16x256xf32>, vector<9x256xf32> -> vector<25x256xf32>
    %cst_67 = arith.constant dense<0.000000e+00> : vector<56x256xf32>
    %160 = tpu.matmul %3, %159, %cst_67 {dimension_numbers = #tpu.dot_dimension_numbers<[1], [0], [0], [1], [0, 0, 1, 1], [], []>} : vector<56x25xf32>, vector<25x256xf32>, vector<56x256xf32> -> vector<56x256xf32>
    %161 = vector.broadcast %4 : vector<56x1xf32> to vector<56x256xf32>
    %162 = arith.addf %160, %161 : vector<56x256xf32>
    %c0_68 = arith.constant 0 : index
    %c0_69 = arith.constant 0 : index
    %163 = vector.load %arg5[%c0_68, %c0_69] : memref<56x1xf32, #tpu.memory_space<vmem>>, vector<56x1xf32>
    %cst_70 = arith.constant 0.000000e+00 : f32
    %164 = vector.broadcast %cst_70 : f32 to vector<56x256xf32>
    %165 = arith.cmpf ogt, %162, %164 : vector<56x256xf32>
    %166 = vector.broadcast %163 : vector<56x1xf32> to vector<56x256xf32>
    %167 = arith.mulf %166, %162 : vector<56x256xf32>
    %168 = arith.select %165, %162, %167 : vector<56x256xi1>, vector<56x256xf32>
    %c0_71 = arith.constant 0 : index
    %c0_72 = arith.constant 0 : index
    %169 = vector.load %arg6[%c0_71, %c0_72] : memref<12x56xf32, #tpu.memory_space<vmem>>, vector<12x56xf32>
    %cst_73 = arith.constant dense<0.000000e+00> : vector<12x256xf32>
    %170 = tpu.matmul %169, %168, %cst_73 {dimension_numbers = #tpu.dot_dimension_numbers<[1], [0], [0], [1], [0, 0, 1, 1], [], []>} : vector<12x56xf32>, vector<56x256xf32>, vector<12x256xf32> -> vector<12x256xf32>
    %c0_74 = arith.constant 0 : index
    %c0_75 = arith.constant 0 : index
    %171 = vector.load %arg7[%c0_74, %c0_75] : memref<12x1xf32, #tpu.memory_space<vmem>>, vector<12x1xf32>
    %172 = vector.broadcast %171 : vector<12x1xf32> to vector<12x256xf32>
    %173 = arith.addf %170, %172 : vector<12x256xf32>
    %c0_76 = arith.constant 0 : index
    %c0_77 = arith.constant 0 : index
    %174 = vector.load %arg8[%c0_76, %c0_77] : memref<12x1xf32, #tpu.memory_space<vmem>>, vector<12x1xf32>
    %cst_78 = arith.constant 0.000000e+00 : f32
    %175 = vector.broadcast %cst_78 : f32 to vector<12x256xf32>
    %176 = arith.cmpf ogt, %173, %175 : vector<12x256xf32>
    %177 = vector.broadcast %174 : vector<12x1xf32> to vector<12x256xf32>
    %178 = arith.mulf %177, %173 : vector<12x256xf32>
    %179 = arith.select %176, %173, %178 : vector<12x256xi1>, vector<12x256xf32>
    %c0_79 = arith.constant 0 : index
    %c0_80 = arith.constant 0 : index
    %c0_81 = arith.constant 0 : index
    %c0_82 = arith.constant 0 : index
    %180 = vector.load %arg9[%c0_79, %c0_80, %c0_81, %c0_82] : memref<4x2x12x108xf32, #tpu.memory_space<vmem>>, vector<1x1x12x108xf32>
    %181 = vector.shape_cast %180 : vector<1x1x12x108xf32> to vector<12x108xf32>
    %c0_83 = arith.constant 0 : index
    %c0_84 = arith.constant 0 : index
    %c0_85 = arith.constant 0 : index
    %c0_86 = arith.constant 0 : index
    %182 = vector.load %arg10[%c0_83, %c0_84, %c0_85, %c0_86] : memref<4x2x12x1xf32, #tpu.memory_space<vmem>>, vector<1x1x12x1xf32>
    %183 = vector.shape_cast %182 : vector<1x1x12x1xf32> to vector<12x1xf32>
    %cst_87 = arith.constant 0.000000e+00 : f32
    %184 = vector.broadcast %cst_87 : f32 to vector<12x17xf32>
    %185 = vector.extract_strided_slice %179 {offsets = [0, 0], sizes = [12, 239], strides = [1, 1]} : vector<12x256xf32> to vector<12x239xf32>
    %186 = tpu.concatenate %184, %185 in 1 : vector<12x17xf32>, vector<12x239xf32> -> vector<12x256xf32>
    %c1_i32_88 = arith.constant 1 : i32
    %187 = vector.broadcast %c1_i32_88 : i32 to vector<1x256xi32>
    %188 = arith.cmpi sge, %0, %187 : vector<1x256xi32>
    %cst_89 = arith.constant 0.000000e+00 : f32
    %189 = vector.shape_cast %188 : vector<1x256xi1> to vector<1x256xi1>
    %190 = vector.broadcast %189 : vector<1x256xi1> to vector<12x256xi1>
    %191 = vector.broadcast %cst_89 : f32 to vector<12x256xf32>
    %192 = arith.select %190, %186, %191 : vector<12x256xi1>, vector<12x256xf32>
    %cst_90 = arith.constant 0.000000e+00 : f32
    %193 = vector.broadcast %cst_90 : f32 to vector<12x16xf32>
    %194 = vector.extract_strided_slice %179 {offsets = [0, 0], sizes = [12, 240], strides = [1, 1]} : vector<12x256xf32> to vector<12x240xf32>
    %195 = tpu.concatenate %193, %194 in 1 : vector<12x16xf32>, vector<12x240xf32> -> vector<12x256xf32>
    %cst_91 = arith.constant 0.000000e+00 : f32
    %196 = vector.broadcast %cst_91 : f32 to vector<12x15xf32>
    %197 = vector.extract_strided_slice %179 {offsets = [0, 0], sizes = [12, 241], strides = [1, 1]} : vector<12x256xf32> to vector<12x241xf32>
    %198 = tpu.concatenate %196, %197 in 1 : vector<12x15xf32>, vector<12x241xf32> -> vector<12x256xf32>
    %c15_i32_92 = arith.constant 15 : i32
    %199 = vector.broadcast %c15_i32_92 : i32 to vector<1x256xi32>
    %200 = arith.cmpi slt, %0, %199 : vector<1x256xi32>
    %cst_93 = arith.constant 0.000000e+00 : f32
    %201 = vector.shape_cast %200 : vector<1x256xi1> to vector<1x256xi1>
    %202 = vector.broadcast %201 : vector<1x256xi1> to vector<12x256xi1>
    %203 = vector.broadcast %cst_93 : f32 to vector<12x256xf32>
    %204 = arith.select %202, %198, %203 : vector<12x256xi1>, vector<12x256xf32>
    %cst_94 = arith.constant 0.000000e+00 : f32
    %205 = vector.broadcast %cst_94 : f32 to vector<12x1xf32>
    %206 = vector.extract_strided_slice %179 {offsets = [0, 0], sizes = [12, 255], strides = [1, 1]} : vector<12x256xf32> to vector<12x255xf32>
    %207 = tpu.concatenate %205, %206 in 1 : vector<12x1xf32>, vector<12x255xf32> -> vector<12x256xf32>
    %c1_i32_95 = arith.constant 1 : i32
    %208 = vector.broadcast %c1_i32_95 : i32 to vector<1x256xi32>
    %209 = arith.cmpi sge, %0, %208 : vector<1x256xi32>
    %cst_96 = arith.constant 0.000000e+00 : f32
    %210 = vector.shape_cast %209 : vector<1x256xi1> to vector<1x256xi1>
    %211 = vector.broadcast %210 : vector<1x256xi1> to vector<12x256xi1>
    %212 = vector.broadcast %cst_96 : f32 to vector<12x256xf32>
    %213 = arith.select %211, %207, %212 : vector<12x256xi1>, vector<12x256xf32>
    %214 = vector.extract_strided_slice %179 {offsets = [0, 1], sizes = [12, 255], strides = [1, 1]} : vector<12x256xf32> to vector<12x255xf32>
    %cst_97 = arith.constant 0.000000e+00 : f32
    %215 = vector.broadcast %cst_97 : f32 to vector<12x1xf32>
    %216 = tpu.concatenate %214, %215 in 1 : vector<12x255xf32>, vector<12x1xf32> -> vector<12x256xf32>
    %c15_i32_98 = arith.constant 15 : i32
    %217 = vector.broadcast %c15_i32_98 : i32 to vector<1x256xi32>
    %218 = arith.cmpi slt, %0, %217 : vector<1x256xi32>
    %cst_99 = arith.constant 0.000000e+00 : f32
    %219 = vector.shape_cast %218 : vector<1x256xi1> to vector<1x256xi1>
    %220 = vector.broadcast %219 : vector<1x256xi1> to vector<12x256xi1>
    %221 = vector.broadcast %cst_99 : f32 to vector<12x256xf32>
    %222 = arith.select %220, %216, %221 : vector<12x256xi1>, vector<12x256xf32>
    %223 = vector.extract_strided_slice %179 {offsets = [0, 15], sizes = [12, 241], strides = [1, 1]} : vector<12x256xf32> to vector<12x241xf32>
    %cst_100 = arith.constant 0.000000e+00 : f32
    %224 = vector.broadcast %cst_100 : f32 to vector<12x15xf32>
    %225 = tpu.concatenate %223, %224 in 1 : vector<12x241xf32>, vector<12x15xf32> -> vector<12x256xf32>
    %c1_i32_101 = arith.constant 1 : i32
    %226 = vector.broadcast %c1_i32_101 : i32 to vector<1x256xi32>
    %227 = arith.cmpi sge, %0, %226 : vector<1x256xi32>
    %cst_102 = arith.constant 0.000000e+00 : f32
    %228 = vector.shape_cast %227 : vector<1x256xi1> to vector<1x256xi1>
    %229 = vector.broadcast %228 : vector<1x256xi1> to vector<12x256xi1>
    %230 = vector.broadcast %cst_102 : f32 to vector<12x256xf32>
    %231 = arith.select %229, %225, %230 : vector<12x256xi1>, vector<12x256xf32>
    %232 = vector.extract_strided_slice %179 {offsets = [0, 16], sizes = [12, 240], strides = [1, 1]} : vector<12x256xf32> to vector<12x240xf32>
    %cst_103 = arith.constant 0.000000e+00 : f32
    %233 = vector.broadcast %cst_103 : f32 to vector<12x16xf32>
    %234 = tpu.concatenate %232, %233 in 1 : vector<12x240xf32>, vector<12x16xf32> -> vector<12x256xf32>
    %235 = vector.extract_strided_slice %179 {offsets = [0, 17], sizes = [12, 239], strides = [1, 1]} : vector<12x256xf32> to vector<12x239xf32>
    %cst_104 = arith.constant 0.000000e+00 : f32
    %236 = vector.broadcast %cst_104 : f32 to vector<12x17xf32>
    %237 = tpu.concatenate %235, %236 in 1 : vector<12x239xf32>, vector<12x17xf32> -> vector<12x256xf32>
    %c15_i32_105 = arith.constant 15 : i32
    %238 = vector.broadcast %c15_i32_105 : i32 to vector<1x256xi32>
    %239 = arith.cmpi slt, %0, %238 : vector<1x256xi32>
    %cst_106 = arith.constant 0.000000e+00 : f32
    %240 = vector.shape_cast %239 : vector<1x256xi1> to vector<1x256xi1>
    %241 = vector.broadcast %240 : vector<1x256xi1> to vector<12x256xi1>
    %242 = vector.broadcast %cst_106 : f32 to vector<12x256xf32>
    %243 = arith.select %241, %237, %242 : vector<12x256xi1>, vector<12x256xf32>
    %244 = tpu.concatenate %192, %195, %204, %213, %179, %222, %231, %234, %243 in 0 : vector<12x256xf32>, vector<12x256xf32>, vector<12x256xf32>, vector<12x256xf32>, vector<12x256xf32>, vector<12x256xf32>, vector<12x256xf32>, vector<12x256xf32>, vector<12x256xf32> -> vector<108x256xf32>
    %cst_107 = arith.constant dense<0.000000e+00> : vector<12x256xf32>
    %245 = tpu.matmul %181, %244, %cst_107 {dimension_numbers = #tpu.dot_dimension_numbers<[1], [0], [0], [1], [0, 0, 1, 1], [], []>} : vector<12x108xf32>, vector<108x256xf32>, vector<12x256xf32> -> vector<12x256xf32>
    %246 = vector.broadcast %183 : vector<12x1xf32> to vector<12x256xf32>
    %247 = arith.addf %245, %246 : vector<12x256xf32>
    %cst_108 = arith.constant 0.000000e+00 : f32
    %248 = vector.broadcast %cst_108 : f32 to vector<12x256xf32>
    %249 = arith.maximumf %247, %248 : vector<12x256xf32>
    %c0_109 = arith.constant 0 : index
    %c1 = arith.constant 1 : index
    %c0_110 = arith.constant 0 : index
    %c0_111 = arith.constant 0 : index
    %250 = vector.load %arg9[%c0_109, %c1, %c0_110, %c0_111] : memref<4x2x12x108xf32, #tpu.memory_space<vmem>>, vector<1x1x12x108xf32>
    %251 = vector.shape_cast %250 : vector<1x1x12x108xf32> to vector<12x108xf32>
    %c0_112 = arith.constant 0 : index
    %c1_113 = arith.constant 1 : index
    %c0_114 = arith.constant 0 : index
    %c0_115 = arith.constant 0 : index
    %252 = vector.load %arg10[%c0_112, %c1_113, %c0_114, %c0_115] : memref<4x2x12x1xf32, #tpu.memory_space<vmem>>, vector<1x1x12x1xf32>
    %253 = vector.shape_cast %252 : vector<1x1x12x1xf32> to vector<12x1xf32>
    %cst_116 = arith.constant 0.000000e+00 : f32
    %254 = vector.broadcast %cst_116 : f32 to vector<12x17xf32>
    %255 = vector.extract_strided_slice %249 {offsets = [0, 0], sizes = [12, 239], strides = [1, 1]} : vector<12x256xf32> to vector<12x239xf32>
    %256 = tpu.concatenate %254, %255 in 1 : vector<12x17xf32>, vector<12x239xf32> -> vector<12x256xf32>
    %c1_i32_117 = arith.constant 1 : i32
    %257 = vector.broadcast %c1_i32_117 : i32 to vector<1x256xi32>
    %258 = arith.cmpi sge, %0, %257 : vector<1x256xi32>
    %cst_118 = arith.constant 0.000000e+00 : f32
    %259 = vector.shape_cast %258 : vector<1x256xi1> to vector<1x256xi1>
    %260 = vector.broadcast %259 : vector<1x256xi1> to vector<12x256xi1>
    %261 = vector.broadcast %cst_118 : f32 to vector<12x256xf32>
    %262 = arith.select %260, %256, %261 : vector<12x256xi1>, vector<12x256xf32>
    %cst_119 = arith.constant 0.000000e+00 : f32
    %263 = vector.broadcast %cst_119 : f32 to vector<12x16xf32>
    %264 = vector.extract_strided_slice %249 {offsets = [0, 0], sizes = [12, 240], strides = [1, 1]} : vector<12x256xf32> to vector<12x240xf32>
    %265 = tpu.concatenate %263, %264 in 1 : vector<12x16xf32>, vector<12x240xf32> -> vector<12x256xf32>
    %cst_120 = arith.constant 0.000000e+00 : f32
    %266 = vector.broadcast %cst_120 : f32 to vector<12x15xf32>
    %267 = vector.extract_strided_slice %249 {offsets = [0, 0], sizes = [12, 241], strides = [1, 1]} : vector<12x256xf32> to vector<12x241xf32>
    %268 = tpu.concatenate %266, %267 in 1 : vector<12x15xf32>, vector<12x241xf32> -> vector<12x256xf32>
    %c15_i32_121 = arith.constant 15 : i32
    %269 = vector.broadcast %c15_i32_121 : i32 to vector<1x256xi32>
    %270 = arith.cmpi slt, %0, %269 : vector<1x256xi32>
    %cst_122 = arith.constant 0.000000e+00 : f32
    %271 = vector.shape_cast %270 : vector<1x256xi1> to vector<1x256xi1>
    %272 = vector.broadcast %271 : vector<1x256xi1> to vector<12x256xi1>
    %273 = vector.broadcast %cst_122 : f32 to vector<12x256xf32>
    %274 = arith.select %272, %268, %273 : vector<12x256xi1>, vector<12x256xf32>
    %cst_123 = arith.constant 0.000000e+00 : f32
    %275 = vector.broadcast %cst_123 : f32 to vector<12x1xf32>
    %276 = vector.extract_strided_slice %249 {offsets = [0, 0], sizes = [12, 255], strides = [1, 1]} : vector<12x256xf32> to vector<12x255xf32>
    %277 = tpu.concatenate %275, %276 in 1 : vector<12x1xf32>, vector<12x255xf32> -> vector<12x256xf32>
    %c1_i32_124 = arith.constant 1 : i32
    %278 = vector.broadcast %c1_i32_124 : i32 to vector<1x256xi32>
    %279 = arith.cmpi sge, %0, %278 : vector<1x256xi32>
    %cst_125 = arith.constant 0.000000e+00 : f32
    %280 = vector.shape_cast %279 : vector<1x256xi1> to vector<1x256xi1>
    %281 = vector.broadcast %280 : vector<1x256xi1> to vector<12x256xi1>
    %282 = vector.broadcast %cst_125 : f32 to vector<12x256xf32>
    %283 = arith.select %281, %277, %282 : vector<12x256xi1>, vector<12x256xf32>
    %284 = vector.extract_strided_slice %249 {offsets = [0, 1], sizes = [12, 255], strides = [1, 1]} : vector<12x256xf32> to vector<12x255xf32>
    %cst_126 = arith.constant 0.000000e+00 : f32
    %285 = vector.broadcast %cst_126 : f32 to vector<12x1xf32>
    %286 = tpu.concatenate %284, %285 in 1 : vector<12x255xf32>, vector<12x1xf32> -> vector<12x256xf32>
    %c15_i32_127 = arith.constant 15 : i32
    %287 = vector.broadcast %c15_i32_127 : i32 to vector<1x256xi32>
    %288 = arith.cmpi slt, %0, %287 : vector<1x256xi32>
    %cst_128 = arith.constant 0.000000e+00 : f32
    %289 = vector.shape_cast %288 : vector<1x256xi1> to vector<1x256xi1>
    %290 = vector.broadcast %289 : vector<1x256xi1> to vector<12x256xi1>
    %291 = vector.broadcast %cst_128 : f32 to vector<12x256xf32>
    %292 = arith.select %290, %286, %291 : vector<12x256xi1>, vector<12x256xf32>
    %293 = vector.extract_strided_slice %249 {offsets = [0, 15], sizes = [12, 241], strides = [1, 1]} : vector<12x256xf32> to vector<12x241xf32>
    %cst_129 = arith.constant 0.000000e+00 : f32
    %294 = vector.broadcast %cst_129 : f32 to vector<12x15xf32>
    %295 = tpu.concatenate %293, %294 in 1 : vector<12x241xf32>, vector<12x15xf32> -> vector<12x256xf32>
    %c1_i32_130 = arith.constant 1 : i32
    %296 = vector.broadcast %c1_i32_130 : i32 to vector<1x256xi32>
    %297 = arith.cmpi sge, %0, %296 : vector<1x256xi32>
    %cst_131 = arith.constant 0.000000e+00 : f32
    %298 = vector.shape_cast %297 : vector<1x256xi1> to vector<1x256xi1>
    %299 = vector.broadcast %298 : vector<1x256xi1> to vector<12x256xi1>
    %300 = vector.broadcast %cst_131 : f32 to vector<12x256xf32>
    %301 = arith.select %299, %295, %300 : vector<12x256xi1>, vector<12x256xf32>
    %302 = vector.extract_strided_slice %249 {offsets = [0, 16], sizes = [12, 240], strides = [1, 1]} : vector<12x256xf32> to vector<12x240xf32>
    %cst_132 = arith.constant 0.000000e+00 : f32
    %303 = vector.broadcast %cst_132 : f32 to vector<12x16xf32>
    %304 = tpu.concatenate %302, %303 in 1 : vector<12x240xf32>, vector<12x16xf32> -> vector<12x256xf32>
    %305 = vector.extract_strided_slice %249 {offsets = [0, 17], sizes = [12, 239], strides = [1, 1]} : vector<12x256xf32> to vector<12x239xf32>
    %cst_133 = arith.constant 0.000000e+00 : f32
    %306 = vector.broadcast %cst_133 : f32 to vector<12x17xf32>
    %307 = tpu.concatenate %305, %306 in 1 : vector<12x239xf32>, vector<12x17xf32> -> vector<12x256xf32>
    %c15_i32_134 = arith.constant 15 : i32
    %308 = vector.broadcast %c15_i32_134 : i32 to vector<1x256xi32>
    %309 = arith.cmpi slt, %0, %308 : vector<1x256xi32>
    %cst_135 = arith.constant 0.000000e+00 : f32
    %310 = vector.shape_cast %309 : vector<1x256xi1> to vector<1x256xi1>
    %311 = vector.broadcast %310 : vector<1x256xi1> to vector<12x256xi1>
    %312 = vector.broadcast %cst_135 : f32 to vector<12x256xf32>
    %313 = arith.select %311, %307, %312 : vector<12x256xi1>, vector<12x256xf32>
    %314 = tpu.concatenate %262, %265, %274, %283, %249, %292, %301, %304, %313 in 0 : vector<12x256xf32>, vector<12x256xf32>, vector<12x256xf32>, vector<12x256xf32>, vector<12x256xf32>, vector<12x256xf32>, vector<12x256xf32>, vector<12x256xf32>, vector<12x256xf32> -> vector<108x256xf32>
    %cst_136 = arith.constant dense<0.000000e+00> : vector<12x256xf32>
    %315 = tpu.matmul %251, %314, %cst_136 {dimension_numbers = #tpu.dot_dimension_numbers<[1], [0], [0], [1], [0, 0, 1, 1], [], []>} : vector<12x108xf32>, vector<108x256xf32>, vector<12x256xf32> -> vector<12x256xf32>
    %316 = vector.broadcast %253 : vector<12x1xf32> to vector<12x256xf32>
    %317 = arith.addf %315, %316 : vector<12x256xf32>
    %cst_137 = arith.constant dense<0.000000e+00> : vector<12xf32>
    %318 = vector.multi_reduction <add>, %317, %cst_137 [1] : vector<12x256xf32> to vector<12xf32>
    %319 = vector.shape_cast %318 : vector<12xf32> to vector<12x1xf32>
    %cst_138 = arith.constant 2.560000e+02 : f32
    %320 = vector.broadcast %cst_138 : f32 to vector<12x1xf32>
    %321 = arith.divf %319, %320 : vector<12x1xf32>
    %c0_139 = arith.constant 0 : index
    %c0_140 = arith.constant 0 : index
    %c0_141 = arith.constant 0 : index
    %c0_142 = arith.constant 0 : index
    %322 = vector.load %arg11[%c0_139, %c0_140, %c0_141, %c0_142] : memref<4x2x12x1xf32, #tpu.memory_space<vmem>>, vector<1x1x12x1xf32>
    %323 = vector.shape_cast %322 : vector<1x1x12x1xf32> to vector<12x1xf32>
    %324 = arith.mulf %321, %323 : vector<12x1xf32>
    %cst_143 = arith.constant dense<0.000000e+00> : vector<1xf32>
    %325 = vector.multi_reduction <add>, %324, %cst_143 [0] : vector<12x1xf32> to vector<1xf32>
    %326 = vector.shape_cast %325 : vector<1xf32> to vector<1x1xf32>
    %c0_144 = arith.constant 0 : index
    %c0_145 = arith.constant 0 : index
    %c0_146 = arith.constant 0 : index
    %327 = vector.load %arg12[%c0_144, %c0_145, %c0_146] : memref<4x1x1xf32, #tpu.memory_space<vmem>>, vector<1x1x1xf32>
    %328 = vector.shape_cast %327 : vector<1x1x1xf32> to vector<1x1xf32>
    %329 = arith.addf %326, %328 : vector<1x1xf32>
    %cst_147 = arith.constant 0.000000e+00 : f32
    %330 = vector.broadcast %cst_147 : f32 to vector<1x1xf32>
    %331 = arith.maximumf %329, %330 : vector<1x1xf32>
    %c0_148 = arith.constant 0 : index
    %c1_149 = arith.constant 1 : index
    %c0_150 = arith.constant 0 : index
    %c0_151 = arith.constant 0 : index
    %332 = vector.load %arg11[%c0_148, %c1_149, %c0_150, %c0_151] : memref<4x2x12x1xf32, #tpu.memory_space<vmem>>, vector<1x1x12x1xf32>
    %333 = vector.shape_cast %332 : vector<1x1x12x1xf32> to vector<12x1xf32>
    %334 = vector.broadcast %331 : vector<1x1xf32> to vector<12x1xf32>
    %335 = arith.mulf %334, %333 : vector<12x1xf32>
    %cst_152 = arith.constant dense<0.000000e+00> : vector<12xf32>
    %336 = vector.multi_reduction <add>, %335, %cst_152 [1] : vector<12x1xf32> to vector<12xf32>
    %337 = vector.shape_cast %336 : vector<12xf32> to vector<12x1xf32>
    %c0_153 = arith.constant 0 : index
    %c0_154 = arith.constant 0 : index
    %c0_155 = arith.constant 0 : index
    %338 = vector.load %arg13[%c0_153, %c0_154, %c0_155] : memref<4x12x1xf32, #tpu.memory_space<vmem>>, vector<1x12x1xf32>
    %339 = vector.shape_cast %338 : vector<1x12x1xf32> to vector<12x1xf32>
    %340 = arith.addf %337, %339 : vector<12x1xf32>
    %cst_156 = arith.constant 0.000000e+00 : f32
    %341 = vector.broadcast %cst_156 : f32 to vector<12x1xf32>
    %342 = arith.subf %341, %340 : vector<12x1xf32>
    %343 = math.exp %342 : vector<12x1xf32>
    %cst_157 = arith.constant 1.000000e+00 : f32
    %344 = vector.broadcast %cst_157 : f32 to vector<12x1xf32>
    %345 = arith.addf %344, %343 : vector<12x1xf32>
    %cst_158 = arith.constant 1.000000e+00 : f32
    %346 = vector.broadcast %cst_158 : f32 to vector<12x1xf32>
    %347 = arith.divf %346, %345 : vector<12x1xf32>
    %348 = vector.broadcast %347 : vector<12x1xf32> to vector<12x256xf32>
    %349 = arith.mulf %317, %348 : vector<12x256xf32>
    %350 = arith.addf %179, %349 : vector<12x256xf32>
    %c1_159 = arith.constant 1 : index
    %c0_160 = arith.constant 0 : index
    %c0_161 = arith.constant 0 : index
    %c0_162 = arith.constant 0 : index
    %351 = vector.load %arg9[%c1_159, %c0_160, %c0_161, %c0_162] : memref<4x2x12x108xf32, #tpu.memory_space<vmem>>, vector<1x1x12x108xf32>
    %352 = vector.shape_cast %351 : vector<1x1x12x108xf32> to vector<12x108xf32>
    %c1_163 = arith.constant 1 : index
    %c0_164 = arith.constant 0 : index
    %c0_165 = arith.constant 0 : index
    %c0_166 = arith.constant 0 : index
    %353 = vector.load %arg10[%c1_163, %c0_164, %c0_165, %c0_166] : memref<4x2x12x1xf32, #tpu.memory_space<vmem>>, vector<1x1x12x1xf32>
    %354 = vector.shape_cast %353 : vector<1x1x12x1xf32> to vector<12x1xf32>
    %cst_167 = arith.constant 0.000000e+00 : f32
    %355 = vector.broadcast %cst_167 : f32 to vector<12x17xf32>
    %356 = vector.extract_strided_slice %350 {offsets = [0, 0], sizes = [12, 239], strides = [1, 1]} : vector<12x256xf32> to vector<12x239xf32>
    %357 = tpu.concatenate %355, %356 in 1 : vector<12x17xf32>, vector<12x239xf32> -> vector<12x256xf32>
    %c1_i32_168 = arith.constant 1 : i32
    %358 = vector.broadcast %c1_i32_168 : i32 to vector<1x256xi32>
    %359 = arith.cmpi sge, %0, %358 : vector<1x256xi32>
    %cst_169 = arith.constant 0.000000e+00 : f32
    %360 = vector.shape_cast %359 : vector<1x256xi1> to vector<1x256xi1>
    %361 = vector.broadcast %360 : vector<1x256xi1> to vector<12x256xi1>
    %362 = vector.broadcast %cst_169 : f32 to vector<12x256xf32>
    %363 = arith.select %361, %357, %362 : vector<12x256xi1>, vector<12x256xf32>
    %cst_170 = arith.constant 0.000000e+00 : f32
    %364 = vector.broadcast %cst_170 : f32 to vector<12x16xf32>
    %365 = vector.extract_strided_slice %350 {offsets = [0, 0], sizes = [12, 240], strides = [1, 1]} : vector<12x256xf32> to vector<12x240xf32>
    %366 = tpu.concatenate %364, %365 in 1 : vector<12x16xf32>, vector<12x240xf32> -> vector<12x256xf32>
    %cst_171 = arith.constant 0.000000e+00 : f32
    %367 = vector.broadcast %cst_171 : f32 to vector<12x15xf32>
    %368 = vector.extract_strided_slice %350 {offsets = [0, 0], sizes = [12, 241], strides = [1, 1]} : vector<12x256xf32> to vector<12x241xf32>
    %369 = tpu.concatenate %367, %368 in 1 : vector<12x15xf32>, vector<12x241xf32> -> vector<12x256xf32>
    %c15_i32_172 = arith.constant 15 : i32
    %370 = vector.broadcast %c15_i32_172 : i32 to vector<1x256xi32>
    %371 = arith.cmpi slt, %0, %370 : vector<1x256xi32>
    %cst_173 = arith.constant 0.000000e+00 : f32
    %372 = vector.shape_cast %371 : vector<1x256xi1> to vector<1x256xi1>
    %373 = vector.broadcast %372 : vector<1x256xi1> to vector<12x256xi1>
    %374 = vector.broadcast %cst_173 : f32 to vector<12x256xf32>
    %375 = arith.select %373, %369, %374 : vector<12x256xi1>, vector<12x256xf32>
    %cst_174 = arith.constant 0.000000e+00 : f32
    %376 = vector.broadcast %cst_174 : f32 to vector<12x1xf32>
    %377 = vector.extract_strided_slice %350 {offsets = [0, 0], sizes = [12, 255], strides = [1, 1]} : vector<12x256xf32> to vector<12x255xf32>
    %378 = tpu.concatenate %376, %377 in 1 : vector<12x1xf32>, vector<12x255xf32> -> vector<12x256xf32>
    %c1_i32_175 = arith.constant 1 : i32
    %379 = vector.broadcast %c1_i32_175 : i32 to vector<1x256xi32>
    %380 = arith.cmpi sge, %0, %379 : vector<1x256xi32>
    %cst_176 = arith.constant 0.000000e+00 : f32
    %381 = vector.shape_cast %380 : vector<1x256xi1> to vector<1x256xi1>
    %382 = vector.broadcast %381 : vector<1x256xi1> to vector<12x256xi1>
    %383 = vector.broadcast %cst_176 : f32 to vector<12x256xf32>
    %384 = arith.select %382, %378, %383 : vector<12x256xi1>, vector<12x256xf32>
    %385 = vector.extract_strided_slice %350 {offsets = [0, 1], sizes = [12, 255], strides = [1, 1]} : vector<12x256xf32> to vector<12x255xf32>
    %cst_177 = arith.constant 0.000000e+00 : f32
    %386 = vector.broadcast %cst_177 : f32 to vector<12x1xf32>
    %387 = tpu.concatenate %385, %386 in 1 : vector<12x255xf32>, vector<12x1xf32> -> vector<12x256xf32>
    %c15_i32_178 = arith.constant 15 : i32
    %388 = vector.broadcast %c15_i32_178 : i32 to vector<1x256xi32>
    %389 = arith.cmpi slt, %0, %388 : vector<1x256xi32>
    %cst_179 = arith.constant 0.000000e+00 : f32
    %390 = vector.shape_cast %389 : vector<1x256xi1> to vector<1x256xi1>
    %391 = vector.broadcast %390 : vector<1x256xi1> to vector<12x256xi1>
    %392 = vector.broadcast %cst_179 : f32 to vector<12x256xf32>
    %393 = arith.select %391, %387, %392 : vector<12x256xi1>, vector<12x256xf32>
    %394 = vector.extract_strided_slice %350 {offsets = [0, 15], sizes = [12, 241], strides = [1, 1]} : vector<12x256xf32> to vector<12x241xf32>
    %cst_180 = arith.constant 0.000000e+00 : f32
    %395 = vector.broadcast %cst_180 : f32 to vector<12x15xf32>
    %396 = tpu.concatenate %394, %395 in 1 : vector<12x241xf32>, vector<12x15xf32> -> vector<12x256xf32>
    %c1_i32_181 = arith.constant 1 : i32
    %397 = vector.broadcast %c1_i32_181 : i32 to vector<1x256xi32>
    %398 = arith.cmpi sge, %0, %397 : vector<1x256xi32>
    %cst_182 = arith.constant 0.000000e+00 : f32
    %399 = vector.shape_cast %398 : vector<1x256xi1> to vector<1x256xi1>
    %400 = vector.broadcast %399 : vector<1x256xi1> to vector<12x256xi1>
    %401 = vector.broadcast %cst_182 : f32 to vector<12x256xf32>
    %402 = arith.select %400, %396, %401 : vector<12x256xi1>, vector<12x256xf32>
    %403 = vector.extract_strided_slice %350 {offsets = [0, 16], sizes = [12, 240], strides = [1, 1]} : vector<12x256xf32> to vector<12x240xf32>
    %cst_183 = arith.constant 0.000000e+00 : f32
    %404 = vector.broadcast %cst_183 : f32 to vector<12x16xf32>
    %405 = tpu.concatenate %403, %404 in 1 : vector<12x240xf32>, vector<12x16xf32> -> vector<12x256xf32>
    %406 = vector.extract_strided_slice %350 {offsets = [0, 17], sizes = [12, 239], strides = [1, 1]} : vector<12x256xf32> to vector<12x239xf32>
    %cst_184 = arith.constant 0.000000e+00 : f32
    %407 = vector.broadcast %cst_184 : f32 to vector<12x17xf32>
    %408 = tpu.concatenate %406, %407 in 1 : vector<12x239xf32>, vector<12x17xf32> -> vector<12x256xf32>
    %c15_i32_185 = arith.constant 15 : i32
    %409 = vector.broadcast %c15_i32_185 : i32 to vector<1x256xi32>
    %410 = arith.cmpi slt, %0, %409 : vector<1x256xi32>
    %cst_186 = arith.constant 0.000000e+00 : f32
    %411 = vector.shape_cast %410 : vector<1x256xi1> to vector<1x256xi1>
    %412 = vector.broadcast %411 : vector<1x256xi1> to vector<12x256xi1>
    %413 = vector.broadcast %cst_186 : f32 to vector<12x256xf32>
    %414 = arith.select %412, %408, %413 : vector<12x256xi1>, vector<12x256xf32>
    %415 = tpu.concatenate %363, %366, %375, %384, %350, %393, %402, %405, %414 in 0 : vector<12x256xf32>, vector<12x256xf32>, vector<12x256xf32>, vector<12x256xf32>, vector<12x256xf32>, vector<12x256xf32>, vector<12x256xf32>, vector<12x256xf32>, vector<12x256xf32> -> vector<108x256xf32>
    %cst_187 = arith.constant dense<0.000000e+00> : vector<12x256xf32>
    %416 = tpu.matmul %352, %415, %cst_187 {dimension_numbers = #tpu.dot_dimension_numbers<[1], [0], [0], [1], [0, 0, 1, 1], [], []>} : vector<12x108xf32>, vector<108x256xf32>, vector<12x256xf32> -> vector<12x256xf32>
    %417 = vector.broadcast %354 : vector<12x1xf32> to vector<12x256xf32>
    %418 = arith.addf %416, %417 : vector<12x256xf32>
    %cst_188 = arith.constant 0.000000e+00 : f32
    %419 = vector.broadcast %cst_188 : f32 to vector<12x256xf32>
    %420 = arith.maximumf %418, %419 : vector<12x256xf32>
    %c1_189 = arith.constant 1 : index
    %c1_190 = arith.constant 1 : index
    %c0_191 = arith.constant 0 : index
    %c0_192 = arith.constant 0 : index
    %421 = vector.load %arg9[%c1_189, %c1_190, %c0_191, %c0_192] : memref<4x2x12x108xf32, #tpu.memory_space<vmem>>, vector<1x1x12x108xf32>
    %422 = vector.shape_cast %421 : vector<1x1x12x108xf32> to vector<12x108xf32>
    %c1_193 = arith.constant 1 : index
    %c1_194 = arith.constant 1 : index
    %c0_195 = arith.constant 0 : index
    %c0_196 = arith.constant 0 : index
    %423 = vector.load %arg10[%c1_193, %c1_194, %c0_195, %c0_196] : memref<4x2x12x1xf32, #tpu.memory_space<vmem>>, vector<1x1x12x1xf32>
    %424 = vector.shape_cast %423 : vector<1x1x12x1xf32> to vector<12x1xf32>
    %cst_197 = arith.constant 0.000000e+00 : f32
    %425 = vector.broadcast %cst_197 : f32 to vector<12x17xf32>
    %426 = vector.extract_strided_slice %420 {offsets = [0, 0], sizes = [12, 239], strides = [1, 1]} : vector<12x256xf32> to vector<12x239xf32>
    %427 = tpu.concatenate %425, %426 in 1 : vector<12x17xf32>, vector<12x239xf32> -> vector<12x256xf32>
    %c1_i32_198 = arith.constant 1 : i32
    %428 = vector.broadcast %c1_i32_198 : i32 to vector<1x256xi32>
    %429 = arith.cmpi sge, %0, %428 : vector<1x256xi32>
    %cst_199 = arith.constant 0.000000e+00 : f32
    %430 = vector.shape_cast %429 : vector<1x256xi1> to vector<1x256xi1>
    %431 = vector.broadcast %430 : vector<1x256xi1> to vector<12x256xi1>
    %432 = vector.broadcast %cst_199 : f32 to vector<12x256xf32>
    %433 = arith.select %431, %427, %432 : vector<12x256xi1>, vector<12x256xf32>
    %cst_200 = arith.constant 0.000000e+00 : f32
    %434 = vector.broadcast %cst_200 : f32 to vector<12x16xf32>
    %435 = vector.extract_strided_slice %420 {offsets = [0, 0], sizes = [12, 240], strides = [1, 1]} : vector<12x256xf32> to vector<12x240xf32>
    %436 = tpu.concatenate %434, %435 in 1 : vector<12x16xf32>, vector<12x240xf32> -> vector<12x256xf32>
    %cst_201 = arith.constant 0.000000e+00 : f32
    %437 = vector.broadcast %cst_201 : f32 to vector<12x15xf32>
    %438 = vector.extract_strided_slice %420 {offsets = [0, 0], sizes = [12, 241], strides = [1, 1]} : vector<12x256xf32> to vector<12x241xf32>
    %439 = tpu.concatenate %437, %438 in 1 : vector<12x15xf32>, vector<12x241xf32> -> vector<12x256xf32>
    %c15_i32_202 = arith.constant 15 : i32
    %440 = vector.broadcast %c15_i32_202 : i32 to vector<1x256xi32>
    %441 = arith.cmpi slt, %0, %440 : vector<1x256xi32>
    %cst_203 = arith.constant 0.000000e+00 : f32
    %442 = vector.shape_cast %441 : vector<1x256xi1> to vector<1x256xi1>
    %443 = vector.broadcast %442 : vector<1x256xi1> to vector<12x256xi1>
    %444 = vector.broadcast %cst_203 : f32 to vector<12x256xf32>
    %445 = arith.select %443, %439, %444 : vector<12x256xi1>, vector<12x256xf32>
    %cst_204 = arith.constant 0.000000e+00 : f32
    %446 = vector.broadcast %cst_204 : f32 to vector<12x1xf32>
    %447 = vector.extract_strided_slice %420 {offsets = [0, 0], sizes = [12, 255], strides = [1, 1]} : vector<12x256xf32> to vector<12x255xf32>
    %448 = tpu.concatenate %446, %447 in 1 : vector<12x1xf32>, vector<12x255xf32> -> vector<12x256xf32>
    %c1_i32_205 = arith.constant 1 : i32
    %449 = vector.broadcast %c1_i32_205 : i32 to vector<1x256xi32>
    %450 = arith.cmpi sge, %0, %449 : vector<1x256xi32>
    %cst_206 = arith.constant 0.000000e+00 : f32
    %451 = vector.shape_cast %450 : vector<1x256xi1> to vector<1x256xi1>
    %452 = vector.broadcast %451 : vector<1x256xi1> to vector<12x256xi1>
    %453 = vector.broadcast %cst_206 : f32 to vector<12x256xf32>
    %454 = arith.select %452, %448, %453 : vector<12x256xi1>, vector<12x256xf32>
    %455 = vector.extract_strided_slice %420 {offsets = [0, 1], sizes = [12, 255], strides = [1, 1]} : vector<12x256xf32> to vector<12x255xf32>
    %cst_207 = arith.constant 0.000000e+00 : f32
    %456 = vector.broadcast %cst_207 : f32 to vector<12x1xf32>
    %457 = tpu.concatenate %455, %456 in 1 : vector<12x255xf32>, vector<12x1xf32> -> vector<12x256xf32>
    %c15_i32_208 = arith.constant 15 : i32
    %458 = vector.broadcast %c15_i32_208 : i32 to vector<1x256xi32>
    %459 = arith.cmpi slt, %0, %458 : vector<1x256xi32>
    %cst_209 = arith.constant 0.000000e+00 : f32
    %460 = vector.shape_cast %459 : vector<1x256xi1> to vector<1x256xi1>
    %461 = vector.broadcast %460 : vector<1x256xi1> to vector<12x256xi1>
    %462 = vector.broadcast %cst_209 : f32 to vector<12x256xf32>
    %463 = arith.select %461, %457, %462 : vector<12x256xi1>, vector<12x256xf32>
    %464 = vector.extract_strided_slice %420 {offsets = [0, 15], sizes = [12, 241], strides = [1, 1]} : vector<12x256xf32> to vector<12x241xf32>
    %cst_210 = arith.constant 0.000000e+00 : f32
    %465 = vector.broadcast %cst_210 : f32 to vector<12x15xf32>
    %466 = tpu.concatenate %464, %465 in 1 : vector<12x241xf32>, vector<12x15xf32> -> vector<12x256xf32>
    %c1_i32_211 = arith.constant 1 : i32
    %467 = vector.broadcast %c1_i32_211 : i32 to vector<1x256xi32>
    %468 = arith.cmpi sge, %0, %467 : vector<1x256xi32>
    %cst_212 = arith.constant 0.000000e+00 : f32
    %469 = vector.shape_cast %468 : vector<1x256xi1> to vector<1x256xi1>
    %470 = vector.broadcast %469 : vector<1x256xi1> to vector<12x256xi1>
    %471 = vector.broadcast %cst_212 : f32 to vector<12x256xf32>
    %472 = arith.select %470, %466, %471 : vector<12x256xi1>, vector<12x256xf32>
    %473 = vector.extract_strided_slice %420 {offsets = [0, 16], sizes = [12, 240], strides = [1, 1]} : vector<12x256xf32> to vector<12x240xf32>
    %cst_213 = arith.constant 0.000000e+00 : f32
    %474 = vector.broadcast %cst_213 : f32 to vector<12x16xf32>
    %475 = tpu.concatenate %473, %474 in 1 : vector<12x240xf32>, vector<12x16xf32> -> vector<12x256xf32>
    %476 = vector.extract_strided_slice %420 {offsets = [0, 17], sizes = [12, 239], strides = [1, 1]} : vector<12x256xf32> to vector<12x239xf32>
    %cst_214 = arith.constant 0.000000e+00 : f32
    %477 = vector.broadcast %cst_214 : f32 to vector<12x17xf32>
    %478 = tpu.concatenate %476, %477 in 1 : vector<12x239xf32>, vector<12x17xf32> -> vector<12x256xf32>
    %c15_i32_215 = arith.constant 15 : i32
    %479 = vector.broadcast %c15_i32_215 : i32 to vector<1x256xi32>
    %480 = arith.cmpi slt, %0, %479 : vector<1x256xi32>
    %cst_216 = arith.constant 0.000000e+00 : f32
    %481 = vector.shape_cast %480 : vector<1x256xi1> to vector<1x256xi1>
    %482 = vector.broadcast %481 : vector<1x256xi1> to vector<12x256xi1>
    %483 = vector.broadcast %cst_216 : f32 to vector<12x256xf32>
    %484 = arith.select %482, %478, %483 : vector<12x256xi1>, vector<12x256xf32>
    %485 = tpu.concatenate %433, %436, %445, %454, %420, %463, %472, %475, %484 in 0 : vector<12x256xf32>, vector<12x256xf32>, vector<12x256xf32>, vector<12x256xf32>, vector<12x256xf32>, vector<12x256xf32>, vector<12x256xf32>, vector<12x256xf32>, vector<12x256xf32> -> vector<108x256xf32>
    %cst_217 = arith.constant dense<0.000000e+00> : vector<12x256xf32>
    %486 = tpu.matmul %422, %485, %cst_217 {dimension_numbers = #tpu.dot_dimension_numbers<[1], [0], [0], [1], [0, 0, 1, 1], [], []>} : vector<12x108xf32>, vector<108x256xf32>, vector<12x256xf32> -> vector<12x256xf32>
    %487 = vector.broadcast %424 : vector<12x1xf32> to vector<12x256xf32>
    %488 = arith.addf %486, %487 : vector<12x256xf32>
    %cst_218 = arith.constant dense<0.000000e+00> : vector<12xf32>
    %489 = vector.multi_reduction <add>, %488, %cst_218 [1] : vector<12x256xf32> to vector<12xf32>
    %490 = vector.shape_cast %489 : vector<12xf32> to vector<12x1xf32>
    %cst_219 = arith.constant 2.560000e+02 : f32
    %491 = vector.broadcast %cst_219 : f32 to vector<12x1xf32>
    %492 = arith.divf %490, %491 : vector<12x1xf32>
    %c1_220 = arith.constant 1 : index
    %c0_221 = arith.constant 0 : index
    %c0_222 = arith.constant 0 : index
    %c0_223 = arith.constant 0 : index
    %493 = vector.load %arg11[%c1_220, %c0_221, %c0_222, %c0_223] : memref<4x2x12x1xf32, #tpu.memory_space<vmem>>, vector<1x1x12x1xf32>
    %494 = vector.shape_cast %493 : vector<1x1x12x1xf32> to vector<12x1xf32>
    %495 = arith.mulf %492, %494 : vector<12x1xf32>
    %cst_224 = arith.constant dense<0.000000e+00> : vector<1xf32>
    %496 = vector.multi_reduction <add>, %495, %cst_224 [0] : vector<12x1xf32> to vector<1xf32>
    %497 = vector.shape_cast %496 : vector<1xf32> to vector<1x1xf32>
    %c1_225 = arith.constant 1 : index
    %c0_226 = arith.constant 0 : index
    %c0_227 = arith.constant 0 : index
    %498 = vector.load %arg12[%c1_225, %c0_226, %c0_227] : memref<4x1x1xf32, #tpu.memory_space<vmem>>, vector<1x1x1xf32>
    %499 = vector.shape_cast %498 : vector<1x1x1xf32> to vector<1x1xf32>
    %500 = arith.addf %497, %499 : vector<1x1xf32>
    %cst_228 = arith.constant 0.000000e+00 : f32
    %501 = vector.broadcast %cst_228 : f32 to vector<1x1xf32>
    %502 = arith.maximumf %500, %501 : vector<1x1xf32>
    %c1_229 = arith.constant 1 : index
    %c1_230 = arith.constant 1 : index
    %c0_231 = arith.constant 0 : index
    %c0_232 = arith.constant 0 : index
    %503 = vector.load %arg11[%c1_229, %c1_230, %c0_231, %c0_232] : memref<4x2x12x1xf32, #tpu.memory_space<vmem>>, vector<1x1x12x1xf32>
    %504 = vector.shape_cast %503 : vector<1x1x12x1xf32> to vector<12x1xf32>
    %505 = vector.broadcast %502 : vector<1x1xf32> to vector<12x1xf32>
    %506 = arith.mulf %505, %504 : vector<12x1xf32>
    %cst_233 = arith.constant dense<0.000000e+00> : vector<12xf32>
    %507 = vector.multi_reduction <add>, %506, %cst_233 [1] : vector<12x1xf32> to vector<12xf32>
    %508 = vector.shape_cast %507 : vector<12xf32> to vector<12x1xf32>
    %c1_234 = arith.constant 1 : index
    %c0_235 = arith.constant 0 : index
    %c0_236 = arith.constant 0 : index
    %509 = vector.load %arg13[%c1_234, %c0_235, %c0_236] : memref<4x12x1xf32, #tpu.memory_space<vmem>>, vector<1x12x1xf32>
    %510 = vector.shape_cast %509 : vector<1x12x1xf32> to vector<12x1xf32>
    %511 = arith.addf %508, %510 : vector<12x1xf32>
    %cst_237 = arith.constant 0.000000e+00 : f32
    %512 = vector.broadcast %cst_237 : f32 to vector<12x1xf32>
    %513 = arith.subf %512, %511 : vector<12x1xf32>
    %514 = math.exp %513 : vector<12x1xf32>
    %cst_238 = arith.constant 1.000000e+00 : f32
    %515 = vector.broadcast %cst_238 : f32 to vector<12x1xf32>
    %516 = arith.addf %515, %514 : vector<12x1xf32>
    %cst_239 = arith.constant 1.000000e+00 : f32
    %517 = vector.broadcast %cst_239 : f32 to vector<12x1xf32>
    %518 = arith.divf %517, %516 : vector<12x1xf32>
    %519 = vector.broadcast %518 : vector<12x1xf32> to vector<12x256xf32>
    %520 = arith.mulf %488, %519 : vector<12x256xf32>
    %521 = arith.addf %350, %520 : vector<12x256xf32>
    %c2 = arith.constant 2 : index
    %c0_240 = arith.constant 0 : index
    %c0_241 = arith.constant 0 : index
    %c0_242 = arith.constant 0 : index
    %522 = vector.load %arg9[%c2, %c0_240, %c0_241, %c0_242] : memref<4x2x12x108xf32, #tpu.memory_space<vmem>>, vector<1x1x12x108xf32>
    %523 = vector.shape_cast %522 : vector<1x1x12x108xf32> to vector<12x108xf32>
    %c2_243 = arith.constant 2 : index
    %c0_244 = arith.constant 0 : index
    %c0_245 = arith.constant 0 : index
    %c0_246 = arith.constant 0 : index
    %524 = vector.load %arg10[%c2_243, %c0_244, %c0_245, %c0_246] : memref<4x2x12x1xf32, #tpu.memory_space<vmem>>, vector<1x1x12x1xf32>
    %525 = vector.shape_cast %524 : vector<1x1x12x1xf32> to vector<12x1xf32>
    %cst_247 = arith.constant 0.000000e+00 : f32
    %526 = vector.broadcast %cst_247 : f32 to vector<12x17xf32>
    %527 = vector.extract_strided_slice %521 {offsets = [0, 0], sizes = [12, 239], strides = [1, 1]} : vector<12x256xf32> to vector<12x239xf32>
    %528 = tpu.concatenate %526, %527 in 1 : vector<12x17xf32>, vector<12x239xf32> -> vector<12x256xf32>
    %c1_i32_248 = arith.constant 1 : i32
    %529 = vector.broadcast %c1_i32_248 : i32 to vector<1x256xi32>
    %530 = arith.cmpi sge, %0, %529 : vector<1x256xi32>
    %cst_249 = arith.constant 0.000000e+00 : f32
    %531 = vector.shape_cast %530 : vector<1x256xi1> to vector<1x256xi1>
    %532 = vector.broadcast %531 : vector<1x256xi1> to vector<12x256xi1>
    %533 = vector.broadcast %cst_249 : f32 to vector<12x256xf32>
    %534 = arith.select %532, %528, %533 : vector<12x256xi1>, vector<12x256xf32>
    %cst_250 = arith.constant 0.000000e+00 : f32
    %535 = vector.broadcast %cst_250 : f32 to vector<12x16xf32>
    %536 = vector.extract_strided_slice %521 {offsets = [0, 0], sizes = [12, 240], strides = [1, 1]} : vector<12x256xf32> to vector<12x240xf32>
    %537 = tpu.concatenate %535, %536 in 1 : vector<12x16xf32>, vector<12x240xf32> -> vector<12x256xf32>
    %cst_251 = arith.constant 0.000000e+00 : f32
    %538 = vector.broadcast %cst_251 : f32 to vector<12x15xf32>
    %539 = vector.extract_strided_slice %521 {offsets = [0, 0], sizes = [12, 241], strides = [1, 1]} : vector<12x256xf32> to vector<12x241xf32>
    %540 = tpu.concatenate %538, %539 in 1 : vector<12x15xf32>, vector<12x241xf32> -> vector<12x256xf32>
    %c15_i32_252 = arith.constant 15 : i32
    %541 = vector.broadcast %c15_i32_252 : i32 to vector<1x256xi32>
    %542 = arith.cmpi slt, %0, %541 : vector<1x256xi32>
    %cst_253 = arith.constant 0.000000e+00 : f32
    %543 = vector.shape_cast %542 : vector<1x256xi1> to vector<1x256xi1>
    %544 = vector.broadcast %543 : vector<1x256xi1> to vector<12x256xi1>
    %545 = vector.broadcast %cst_253 : f32 to vector<12x256xf32>
    %546 = arith.select %544, %540, %545 : vector<12x256xi1>, vector<12x256xf32>
    %cst_254 = arith.constant 0.000000e+00 : f32
    %547 = vector.broadcast %cst_254 : f32 to vector<12x1xf32>
    %548 = vector.extract_strided_slice %521 {offsets = [0, 0], sizes = [12, 255], strides = [1, 1]} : vector<12x256xf32> to vector<12x255xf32>
    %549 = tpu.concatenate %547, %548 in 1 : vector<12x1xf32>, vector<12x255xf32> -> vector<12x256xf32>
    %c1_i32_255 = arith.constant 1 : i32
    %550 = vector.broadcast %c1_i32_255 : i32 to vector<1x256xi32>
    %551 = arith.cmpi sge, %0, %550 : vector<1x256xi32>
    %cst_256 = arith.constant 0.000000e+00 : f32
    %552 = vector.shape_cast %551 : vector<1x256xi1> to vector<1x256xi1>
    %553 = vector.broadcast %552 : vector<1x256xi1> to vector<12x256xi1>
    %554 = vector.broadcast %cst_256 : f32 to vector<12x256xf32>
    %555 = arith.select %553, %549, %554 : vector<12x256xi1>, vector<12x256xf32>
    %556 = vector.extract_strided_slice %521 {offsets = [0, 1], sizes = [12, 255], strides = [1, 1]} : vector<12x256xf32> to vector<12x255xf32>
    %cst_257 = arith.constant 0.000000e+00 : f32
    %557 = vector.broadcast %cst_257 : f32 to vector<12x1xf32>
    %558 = tpu.concatenate %556, %557 in 1 : vector<12x255xf32>, vector<12x1xf32> -> vector<12x256xf32>
    %c15_i32_258 = arith.constant 15 : i32
    %559 = vector.broadcast %c15_i32_258 : i32 to vector<1x256xi32>
    %560 = arith.cmpi slt, %0, %559 : vector<1x256xi32>
    %cst_259 = arith.constant 0.000000e+00 : f32
    %561 = vector.shape_cast %560 : vector<1x256xi1> to vector<1x256xi1>
    %562 = vector.broadcast %561 : vector<1x256xi1> to vector<12x256xi1>
    %563 = vector.broadcast %cst_259 : f32 to vector<12x256xf32>
    %564 = arith.select %562, %558, %563 : vector<12x256xi1>, vector<12x256xf32>
    %565 = vector.extract_strided_slice %521 {offsets = [0, 15], sizes = [12, 241], strides = [1, 1]} : vector<12x256xf32> to vector<12x241xf32>
    %cst_260 = arith.constant 0.000000e+00 : f32
    %566 = vector.broadcast %cst_260 : f32 to vector<12x15xf32>
    %567 = tpu.concatenate %565, %566 in 1 : vector<12x241xf32>, vector<12x15xf32> -> vector<12x256xf32>
    %c1_i32_261 = arith.constant 1 : i32
    %568 = vector.broadcast %c1_i32_261 : i32 to vector<1x256xi32>
    %569 = arith.cmpi sge, %0, %568 : vector<1x256xi32>
    %cst_262 = arith.constant 0.000000e+00 : f32
    %570 = vector.shape_cast %569 : vector<1x256xi1> to vector<1x256xi1>
    %571 = vector.broadcast %570 : vector<1x256xi1> to vector<12x256xi1>
    %572 = vector.broadcast %cst_262 : f32 to vector<12x256xf32>
    %573 = arith.select %571, %567, %572 : vector<12x256xi1>, vector<12x256xf32>
    %574 = vector.extract_strided_slice %521 {offsets = [0, 16], sizes = [12, 240], strides = [1, 1]} : vector<12x256xf32> to vector<12x240xf32>
    %cst_263 = arith.constant 0.000000e+00 : f32
    %575 = vector.broadcast %cst_263 : f32 to vector<12x16xf32>
    %576 = tpu.concatenate %574, %575 in 1 : vector<12x240xf32>, vector<12x16xf32> -> vector<12x256xf32>
    %577 = vector.extract_strided_slice %521 {offsets = [0, 17], sizes = [12, 239], strides = [1, 1]} : vector<12x256xf32> to vector<12x239xf32>
    %cst_264 = arith.constant 0.000000e+00 : f32
    %578 = vector.broadcast %cst_264 : f32 to vector<12x17xf32>
    %579 = tpu.concatenate %577, %578 in 1 : vector<12x239xf32>, vector<12x17xf32> -> vector<12x256xf32>
    %c15_i32_265 = arith.constant 15 : i32
    %580 = vector.broadcast %c15_i32_265 : i32 to vector<1x256xi32>
    %581 = arith.cmpi slt, %0, %580 : vector<1x256xi32>
    %cst_266 = arith.constant 0.000000e+00 : f32
    %582 = vector.shape_cast %581 : vector<1x256xi1> to vector<1x256xi1>
    %583 = vector.broadcast %582 : vector<1x256xi1> to vector<12x256xi1>
    %584 = vector.broadcast %cst_266 : f32 to vector<12x256xf32>
    %585 = arith.select %583, %579, %584 : vector<12x256xi1>, vector<12x256xf32>
    %586 = tpu.concatenate %534, %537, %546, %555, %521, %564, %573, %576, %585 in 0 : vector<12x256xf32>, vector<12x256xf32>, vector<12x256xf32>, vector<12x256xf32>, vector<12x256xf32>, vector<12x256xf32>, vector<12x256xf32>, vector<12x256xf32>, vector<12x256xf32> -> vector<108x256xf32>
    %cst_267 = arith.constant dense<0.000000e+00> : vector<12x256xf32>
    %587 = tpu.matmul %523, %586, %cst_267 {dimension_numbers = #tpu.dot_dimension_numbers<[1], [0], [0], [1], [0, 0, 1, 1], [], []>} : vector<12x108xf32>, vector<108x256xf32>, vector<12x256xf32> -> vector<12x256xf32>
    %588 = vector.broadcast %525 : vector<12x1xf32> to vector<12x256xf32>
    %589 = arith.addf %587, %588 : vector<12x256xf32>
    %cst_268 = arith.constant 0.000000e+00 : f32
    %590 = vector.broadcast %cst_268 : f32 to vector<12x256xf32>
    %591 = arith.maximumf %589, %590 : vector<12x256xf32>
    %c2_269 = arith.constant 2 : index
    %c1_270 = arith.constant 1 : index
    %c0_271 = arith.constant 0 : index
    %c0_272 = arith.constant 0 : index
    %592 = vector.load %arg9[%c2_269, %c1_270, %c0_271, %c0_272] : memref<4x2x12x108xf32, #tpu.memory_space<vmem>>, vector<1x1x12x108xf32>
    %593 = vector.shape_cast %592 : vector<1x1x12x108xf32> to vector<12x108xf32>
    %c2_273 = arith.constant 2 : index
    %c1_274 = arith.constant 1 : index
    %c0_275 = arith.constant 0 : index
    %c0_276 = arith.constant 0 : index
    %594 = vector.load %arg10[%c2_273, %c1_274, %c0_275, %c0_276] : memref<4x2x12x1xf32, #tpu.memory_space<vmem>>, vector<1x1x12x1xf32>
    %595 = vector.shape_cast %594 : vector<1x1x12x1xf32> to vector<12x1xf32>
    %cst_277 = arith.constant 0.000000e+00 : f32
    %596 = vector.broadcast %cst_277 : f32 to vector<12x17xf32>
    %597 = vector.extract_strided_slice %591 {offsets = [0, 0], sizes = [12, 239], strides = [1, 1]} : vector<12x256xf32> to vector<12x239xf32>
    %598 = tpu.concatenate %596, %597 in 1 : vector<12x17xf32>, vector<12x239xf32> -> vector<12x256xf32>
    %c1_i32_278 = arith.constant 1 : i32
    %599 = vector.broadcast %c1_i32_278 : i32 to vector<1x256xi32>
    %600 = arith.cmpi sge, %0, %599 : vector<1x256xi32>
    %cst_279 = arith.constant 0.000000e+00 : f32
    %601 = vector.shape_cast %600 : vector<1x256xi1> to vector<1x256xi1>
    %602 = vector.broadcast %601 : vector<1x256xi1> to vector<12x256xi1>
    %603 = vector.broadcast %cst_279 : f32 to vector<12x256xf32>
    %604 = arith.select %602, %598, %603 : vector<12x256xi1>, vector<12x256xf32>
    %cst_280 = arith.constant 0.000000e+00 : f32
    %605 = vector.broadcast %cst_280 : f32 to vector<12x16xf32>
    %606 = vector.extract_strided_slice %591 {offsets = [0, 0], sizes = [12, 240], strides = [1, 1]} : vector<12x256xf32> to vector<12x240xf32>
    %607 = tpu.concatenate %605, %606 in 1 : vector<12x16xf32>, vector<12x240xf32> -> vector<12x256xf32>
    %cst_281 = arith.constant 0.000000e+00 : f32
    %608 = vector.broadcast %cst_281 : f32 to vector<12x15xf32>
    %609 = vector.extract_strided_slice %591 {offsets = [0, 0], sizes = [12, 241], strides = [1, 1]} : vector<12x256xf32> to vector<12x241xf32>
    %610 = tpu.concatenate %608, %609 in 1 : vector<12x15xf32>, vector<12x241xf32> -> vector<12x256xf32>
    %c15_i32_282 = arith.constant 15 : i32
    %611 = vector.broadcast %c15_i32_282 : i32 to vector<1x256xi32>
    %612 = arith.cmpi slt, %0, %611 : vector<1x256xi32>
    %cst_283 = arith.constant 0.000000e+00 : f32
    %613 = vector.shape_cast %612 : vector<1x256xi1> to vector<1x256xi1>
    %614 = vector.broadcast %613 : vector<1x256xi1> to vector<12x256xi1>
    %615 = vector.broadcast %cst_283 : f32 to vector<12x256xf32>
    %616 = arith.select %614, %610, %615 : vector<12x256xi1>, vector<12x256xf32>
    %cst_284 = arith.constant 0.000000e+00 : f32
    %617 = vector.broadcast %cst_284 : f32 to vector<12x1xf32>
    %618 = vector.extract_strided_slice %591 {offsets = [0, 0], sizes = [12, 255], strides = [1, 1]} : vector<12x256xf32> to vector<12x255xf32>
    %619 = tpu.concatenate %617, %618 in 1 : vector<12x1xf32>, vector<12x255xf32> -> vector<12x256xf32>
    %c1_i32_285 = arith.constant 1 : i32
    %620 = vector.broadcast %c1_i32_285 : i32 to vector<1x256xi32>
    %621 = arith.cmpi sge, %0, %620 : vector<1x256xi32>
    %cst_286 = arith.constant 0.000000e+00 : f32
    %622 = vector.shape_cast %621 : vector<1x256xi1> to vector<1x256xi1>
    %623 = vector.broadcast %622 : vector<1x256xi1> to vector<12x256xi1>
    %624 = vector.broadcast %cst_286 : f32 to vector<12x256xf32>
    %625 = arith.select %623, %619, %624 : vector<12x256xi1>, vector<12x256xf32>
    %626 = vector.extract_strided_slice %591 {offsets = [0, 1], sizes = [12, 255], strides = [1, 1]} : vector<12x256xf32> to vector<12x255xf32>
    %cst_287 = arith.constant 0.000000e+00 : f32
    %627 = vector.broadcast %cst_287 : f32 to vector<12x1xf32>
    %628 = tpu.concatenate %626, %627 in 1 : vector<12x255xf32>, vector<12x1xf32> -> vector<12x256xf32>
    %c15_i32_288 = arith.constant 15 : i32
    %629 = vector.broadcast %c15_i32_288 : i32 to vector<1x256xi32>
    %630 = arith.cmpi slt, %0, %629 : vector<1x256xi32>
    %cst_289 = arith.constant 0.000000e+00 : f32
    %631 = vector.shape_cast %630 : vector<1x256xi1> to vector<1x256xi1>
    %632 = vector.broadcast %631 : vector<1x256xi1> to vector<12x256xi1>
    %633 = vector.broadcast %cst_289 : f32 to vector<12x256xf32>
    %634 = arith.select %632, %628, %633 : vector<12x256xi1>, vector<12x256xf32>
    %635 = vector.extract_strided_slice %591 {offsets = [0, 15], sizes = [12, 241], strides = [1, 1]} : vector<12x256xf32> to vector<12x241xf32>
    %cst_290 = arith.constant 0.000000e+00 : f32
    %636 = vector.broadcast %cst_290 : f32 to vector<12x15xf32>
    %637 = tpu.concatenate %635, %636 in 1 : vector<12x241xf32>, vector<12x15xf32> -> vector<12x256xf32>
    %c1_i32_291 = arith.constant 1 : i32
    %638 = vector.broadcast %c1_i32_291 : i32 to vector<1x256xi32>
    %639 = arith.cmpi sge, %0, %638 : vector<1x256xi32>
    %cst_292 = arith.constant 0.000000e+00 : f32
    %640 = vector.shape_cast %639 : vector<1x256xi1> to vector<1x256xi1>
    %641 = vector.broadcast %640 : vector<1x256xi1> to vector<12x256xi1>
    %642 = vector.broadcast %cst_292 : f32 to vector<12x256xf32>
    %643 = arith.select %641, %637, %642 : vector<12x256xi1>, vector<12x256xf32>
    %644 = vector.extract_strided_slice %591 {offsets = [0, 16], sizes = [12, 240], strides = [1, 1]} : vector<12x256xf32> to vector<12x240xf32>
    %cst_293 = arith.constant 0.000000e+00 : f32
    %645 = vector.broadcast %cst_293 : f32 to vector<12x16xf32>
    %646 = tpu.concatenate %644, %645 in 1 : vector<12x240xf32>, vector<12x16xf32> -> vector<12x256xf32>
    %647 = vector.extract_strided_slice %591 {offsets = [0, 17], sizes = [12, 239], strides = [1, 1]} : vector<12x256xf32> to vector<12x239xf32>
    %cst_294 = arith.constant 0.000000e+00 : f32
    %648 = vector.broadcast %cst_294 : f32 to vector<12x17xf32>
    %649 = tpu.concatenate %647, %648 in 1 : vector<12x239xf32>, vector<12x17xf32> -> vector<12x256xf32>
    %c15_i32_295 = arith.constant 15 : i32
    %650 = vector.broadcast %c15_i32_295 : i32 to vector<1x256xi32>
    %651 = arith.cmpi slt, %0, %650 : vector<1x256xi32>
    %cst_296 = arith.constant 0.000000e+00 : f32
    %652 = vector.shape_cast %651 : vector<1x256xi1> to vector<1x256xi1>
    %653 = vector.broadcast %652 : vector<1x256xi1> to vector<12x256xi1>
    %654 = vector.broadcast %cst_296 : f32 to vector<12x256xf32>
    %655 = arith.select %653, %649, %654 : vector<12x256xi1>, vector<12x256xf32>
    %656 = tpu.concatenate %604, %607, %616, %625, %591, %634, %643, %646, %655 in 0 : vector<12x256xf32>, vector<12x256xf32>, vector<12x256xf32>, vector<12x256xf32>, vector<12x256xf32>, vector<12x256xf32>, vector<12x256xf32>, vector<12x256xf32>, vector<12x256xf32> -> vector<108x256xf32>
    %cst_297 = arith.constant dense<0.000000e+00> : vector<12x256xf32>
    %657 = tpu.matmul %593, %656, %cst_297 {dimension_numbers = #tpu.dot_dimension_numbers<[1], [0], [0], [1], [0, 0, 1, 1], [], []>} : vector<12x108xf32>, vector<108x256xf32>, vector<12x256xf32> -> vector<12x256xf32>
    %658 = vector.broadcast %595 : vector<12x1xf32> to vector<12x256xf32>
    %659 = arith.addf %657, %658 : vector<12x256xf32>
    %cst_298 = arith.constant dense<0.000000e+00> : vector<12xf32>
    %660 = vector.multi_reduction <add>, %659, %cst_298 [1] : vector<12x256xf32> to vector<12xf32>
    %661 = vector.shape_cast %660 : vector<12xf32> to vector<12x1xf32>
    %cst_299 = arith.constant 2.560000e+02 : f32
    %662 = vector.broadcast %cst_299 : f32 to vector<12x1xf32>
    %663 = arith.divf %661, %662 : vector<12x1xf32>
    %c2_300 = arith.constant 2 : index
    %c0_301 = arith.constant 0 : index
    %c0_302 = arith.constant 0 : index
    %c0_303 = arith.constant 0 : index
    %664 = vector.load %arg11[%c2_300, %c0_301, %c0_302, %c0_303] : memref<4x2x12x1xf32, #tpu.memory_space<vmem>>, vector<1x1x12x1xf32>
    %665 = vector.shape_cast %664 : vector<1x1x12x1xf32> to vector<12x1xf32>
    %666 = arith.mulf %663, %665 : vector<12x1xf32>
    %cst_304 = arith.constant dense<0.000000e+00> : vector<1xf32>
    %667 = vector.multi_reduction <add>, %666, %cst_304 [0] : vector<12x1xf32> to vector<1xf32>
    %668 = vector.shape_cast %667 : vector<1xf32> to vector<1x1xf32>
    %c2_305 = arith.constant 2 : index
    %c0_306 = arith.constant 0 : index
    %c0_307 = arith.constant 0 : index
    %669 = vector.load %arg12[%c2_305, %c0_306, %c0_307] : memref<4x1x1xf32, #tpu.memory_space<vmem>>, vector<1x1x1xf32>
    %670 = vector.shape_cast %669 : vector<1x1x1xf32> to vector<1x1xf32>
    %671 = arith.addf %668, %670 : vector<1x1xf32>
    %cst_308 = arith.constant 0.000000e+00 : f32
    %672 = vector.broadcast %cst_308 : f32 to vector<1x1xf32>
    %673 = arith.maximumf %671, %672 : vector<1x1xf32>
    %c2_309 = arith.constant 2 : index
    %c1_310 = arith.constant 1 : index
    %c0_311 = arith.constant 0 : index
    %c0_312 = arith.constant 0 : index
    %674 = vector.load %arg11[%c2_309, %c1_310, %c0_311, %c0_312] : memref<4x2x12x1xf32, #tpu.memory_space<vmem>>, vector<1x1x12x1xf32>
    %675 = vector.shape_cast %674 : vector<1x1x12x1xf32> to vector<12x1xf32>
    %676 = vector.broadcast %673 : vector<1x1xf32> to vector<12x1xf32>
    %677 = arith.mulf %676, %675 : vector<12x1xf32>
    %cst_313 = arith.constant dense<0.000000e+00> : vector<12xf32>
    %678 = vector.multi_reduction <add>, %677, %cst_313 [1] : vector<12x1xf32> to vector<12xf32>
    %679 = vector.shape_cast %678 : vector<12xf32> to vector<12x1xf32>
    %c2_314 = arith.constant 2 : index
    %c0_315 = arith.constant 0 : index
    %c0_316 = arith.constant 0 : index
    %680 = vector.load %arg13[%c2_314, %c0_315, %c0_316] : memref<4x12x1xf32, #tpu.memory_space<vmem>>, vector<1x12x1xf32>
    %681 = vector.shape_cast %680 : vector<1x12x1xf32> to vector<12x1xf32>
    %682 = arith.addf %679, %681 : vector<12x1xf32>
    %cst_317 = arith.constant 0.000000e+00 : f32
    %683 = vector.broadcast %cst_317 : f32 to vector<12x1xf32>
    %684 = arith.subf %683, %682 : vector<12x1xf32>
    %685 = math.exp %684 : vector<12x1xf32>
    %cst_318 = arith.constant 1.000000e+00 : f32
    %686 = vector.broadcast %cst_318 : f32 to vector<12x1xf32>
    %687 = arith.addf %686, %685 : vector<12x1xf32>
    %cst_319 = arith.constant 1.000000e+00 : f32
    %688 = vector.broadcast %cst_319 : f32 to vector<12x1xf32>
    %689 = arith.divf %688, %687 : vector<12x1xf32>
    %690 = vector.broadcast %689 : vector<12x1xf32> to vector<12x256xf32>
    %691 = arith.mulf %659, %690 : vector<12x256xf32>
    %692 = arith.addf %521, %691 : vector<12x256xf32>
    %c3 = arith.constant 3 : index
    %c0_320 = arith.constant 0 : index
    %c0_321 = arith.constant 0 : index
    %c0_322 = arith.constant 0 : index
    %693 = vector.load %arg9[%c3, %c0_320, %c0_321, %c0_322] : memref<4x2x12x108xf32, #tpu.memory_space<vmem>>, vector<1x1x12x108xf32>
    %694 = vector.shape_cast %693 : vector<1x1x12x108xf32> to vector<12x108xf32>
    %c3_323 = arith.constant 3 : index
    %c0_324 = arith.constant 0 : index
    %c0_325 = arith.constant 0 : index
    %c0_326 = arith.constant 0 : index
    %695 = vector.load %arg10[%c3_323, %c0_324, %c0_325, %c0_326] : memref<4x2x12x1xf32, #tpu.memory_space<vmem>>, vector<1x1x12x1xf32>
    %696 = vector.shape_cast %695 : vector<1x1x12x1xf32> to vector<12x1xf32>
    %cst_327 = arith.constant 0.000000e+00 : f32
    %697 = vector.broadcast %cst_327 : f32 to vector<12x17xf32>
    %698 = vector.extract_strided_slice %692 {offsets = [0, 0], sizes = [12, 239], strides = [1, 1]} : vector<12x256xf32> to vector<12x239xf32>
    %699 = tpu.concatenate %697, %698 in 1 : vector<12x17xf32>, vector<12x239xf32> -> vector<12x256xf32>
    %c1_i32_328 = arith.constant 1 : i32
    %700 = vector.broadcast %c1_i32_328 : i32 to vector<1x256xi32>
    %701 = arith.cmpi sge, %0, %700 : vector<1x256xi32>
    %cst_329 = arith.constant 0.000000e+00 : f32
    %702 = vector.shape_cast %701 : vector<1x256xi1> to vector<1x256xi1>
    %703 = vector.broadcast %702 : vector<1x256xi1> to vector<12x256xi1>
    %704 = vector.broadcast %cst_329 : f32 to vector<12x256xf32>
    %705 = arith.select %703, %699, %704 : vector<12x256xi1>, vector<12x256xf32>
    %cst_330 = arith.constant 0.000000e+00 : f32
    %706 = vector.broadcast %cst_330 : f32 to vector<12x16xf32>
    %707 = vector.extract_strided_slice %692 {offsets = [0, 0], sizes = [12, 240], strides = [1, 1]} : vector<12x256xf32> to vector<12x240xf32>
    %708 = tpu.concatenate %706, %707 in 1 : vector<12x16xf32>, vector<12x240xf32> -> vector<12x256xf32>
    %cst_331 = arith.constant 0.000000e+00 : f32
    %709 = vector.broadcast %cst_331 : f32 to vector<12x15xf32>
    %710 = vector.extract_strided_slice %692 {offsets = [0, 0], sizes = [12, 241], strides = [1, 1]} : vector<12x256xf32> to vector<12x241xf32>
    %711 = tpu.concatenate %709, %710 in 1 : vector<12x15xf32>, vector<12x241xf32> -> vector<12x256xf32>
    %c15_i32_332 = arith.constant 15 : i32
    %712 = vector.broadcast %c15_i32_332 : i32 to vector<1x256xi32>
    %713 = arith.cmpi slt, %0, %712 : vector<1x256xi32>
    %cst_333 = arith.constant 0.000000e+00 : f32
    %714 = vector.shape_cast %713 : vector<1x256xi1> to vector<1x256xi1>
    %715 = vector.broadcast %714 : vector<1x256xi1> to vector<12x256xi1>
    %716 = vector.broadcast %cst_333 : f32 to vector<12x256xf32>
    %717 = arith.select %715, %711, %716 : vector<12x256xi1>, vector<12x256xf32>
    %cst_334 = arith.constant 0.000000e+00 : f32
    %718 = vector.broadcast %cst_334 : f32 to vector<12x1xf32>
    %719 = vector.extract_strided_slice %692 {offsets = [0, 0], sizes = [12, 255], strides = [1, 1]} : vector<12x256xf32> to vector<12x255xf32>
    %720 = tpu.concatenate %718, %719 in 1 : vector<12x1xf32>, vector<12x255xf32> -> vector<12x256xf32>
    %c1_i32_335 = arith.constant 1 : i32
    %721 = vector.broadcast %c1_i32_335 : i32 to vector<1x256xi32>
    %722 = arith.cmpi sge, %0, %721 : vector<1x256xi32>
    %cst_336 = arith.constant 0.000000e+00 : f32
    %723 = vector.shape_cast %722 : vector<1x256xi1> to vector<1x256xi1>
    %724 = vector.broadcast %723 : vector<1x256xi1> to vector<12x256xi1>
    %725 = vector.broadcast %cst_336 : f32 to vector<12x256xf32>
    %726 = arith.select %724, %720, %725 : vector<12x256xi1>, vector<12x256xf32>
    %727 = vector.extract_strided_slice %692 {offsets = [0, 1], sizes = [12, 255], strides = [1, 1]} : vector<12x256xf32> to vector<12x255xf32>
    %cst_337 = arith.constant 0.000000e+00 : f32
    %728 = vector.broadcast %cst_337 : f32 to vector<12x1xf32>
    %729 = tpu.concatenate %727, %728 in 1 : vector<12x255xf32>, vector<12x1xf32> -> vector<12x256xf32>
    %c15_i32_338 = arith.constant 15 : i32
    %730 = vector.broadcast %c15_i32_338 : i32 to vector<1x256xi32>
    %731 = arith.cmpi slt, %0, %730 : vector<1x256xi32>
    %cst_339 = arith.constant 0.000000e+00 : f32
    %732 = vector.shape_cast %731 : vector<1x256xi1> to vector<1x256xi1>
    %733 = vector.broadcast %732 : vector<1x256xi1> to vector<12x256xi1>
    %734 = vector.broadcast %cst_339 : f32 to vector<12x256xf32>
    %735 = arith.select %733, %729, %734 : vector<12x256xi1>, vector<12x256xf32>
    %736 = vector.extract_strided_slice %692 {offsets = [0, 15], sizes = [12, 241], strides = [1, 1]} : vector<12x256xf32> to vector<12x241xf32>
    %cst_340 = arith.constant 0.000000e+00 : f32
    %737 = vector.broadcast %cst_340 : f32 to vector<12x15xf32>
    %738 = tpu.concatenate %736, %737 in 1 : vector<12x241xf32>, vector<12x15xf32> -> vector<12x256xf32>
    %c1_i32_341 = arith.constant 1 : i32
    %739 = vector.broadcast %c1_i32_341 : i32 to vector<1x256xi32>
    %740 = arith.cmpi sge, %0, %739 : vector<1x256xi32>
    %cst_342 = arith.constant 0.000000e+00 : f32
    %741 = vector.shape_cast %740 : vector<1x256xi1> to vector<1x256xi1>
    %742 = vector.broadcast %741 : vector<1x256xi1> to vector<12x256xi1>
    %743 = vector.broadcast %cst_342 : f32 to vector<12x256xf32>
    %744 = arith.select %742, %738, %743 : vector<12x256xi1>, vector<12x256xf32>
    %745 = vector.extract_strided_slice %692 {offsets = [0, 16], sizes = [12, 240], strides = [1, 1]} : vector<12x256xf32> to vector<12x240xf32>
    %cst_343 = arith.constant 0.000000e+00 : f32
    %746 = vector.broadcast %cst_343 : f32 to vector<12x16xf32>
    %747 = tpu.concatenate %745, %746 in 1 : vector<12x240xf32>, vector<12x16xf32> -> vector<12x256xf32>
    %748 = vector.extract_strided_slice %692 {offsets = [0, 17], sizes = [12, 239], strides = [1, 1]} : vector<12x256xf32> to vector<12x239xf32>
    %cst_344 = arith.constant 0.000000e+00 : f32
    %749 = vector.broadcast %cst_344 : f32 to vector<12x17xf32>
    %750 = tpu.concatenate %748, %749 in 1 : vector<12x239xf32>, vector<12x17xf32> -> vector<12x256xf32>
    %c15_i32_345 = arith.constant 15 : i32
    %751 = vector.broadcast %c15_i32_345 : i32 to vector<1x256xi32>
    %752 = arith.cmpi slt, %0, %751 : vector<1x256xi32>
    %cst_346 = arith.constant 0.000000e+00 : f32
    %753 = vector.shape_cast %752 : vector<1x256xi1> to vector<1x256xi1>
    %754 = vector.broadcast %753 : vector<1x256xi1> to vector<12x256xi1>
    %755 = vector.broadcast %cst_346 : f32 to vector<12x256xf32>
    %756 = arith.select %754, %750, %755 : vector<12x256xi1>, vector<12x256xf32>
    %757 = tpu.concatenate %705, %708, %717, %726, %692, %735, %744, %747, %756 in 0 : vector<12x256xf32>, vector<12x256xf32>, vector<12x256xf32>, vector<12x256xf32>, vector<12x256xf32>, vector<12x256xf32>, vector<12x256xf32>, vector<12x256xf32>, vector<12x256xf32> -> vector<108x256xf32>
    %cst_347 = arith.constant dense<0.000000e+00> : vector<12x256xf32>
    %758 = tpu.matmul %694, %757, %cst_347 {dimension_numbers = #tpu.dot_dimension_numbers<[1], [0], [0], [1], [0, 0, 1, 1], [], []>} : vector<12x108xf32>, vector<108x256xf32>, vector<12x256xf32> -> vector<12x256xf32>
    %759 = vector.broadcast %696 : vector<12x1xf32> to vector<12x256xf32>
    %760 = arith.addf %758, %759 : vector<12x256xf32>
    %cst_348 = arith.constant 0.000000e+00 : f32
    %761 = vector.broadcast %cst_348 : f32 to vector<12x256xf32>
    %762 = arith.maximumf %760, %761 : vector<12x256xf32>
    %c3_349 = arith.constant 3 : index
    %c1_350 = arith.constant 1 : index
    %c0_351 = arith.constant 0 : index
    %c0_352 = arith.constant 0 : index
    %763 = vector.load %arg9[%c3_349, %c1_350, %c0_351, %c0_352] : memref<4x2x12x108xf32, #tpu.memory_space<vmem>>, vector<1x1x12x108xf32>
    %764 = vector.shape_cast %763 : vector<1x1x12x108xf32> to vector<12x108xf32>
    %c3_353 = arith.constant 3 : index
    %c1_354 = arith.constant 1 : index
    %c0_355 = arith.constant 0 : index
    %c0_356 = arith.constant 0 : index
    %765 = vector.load %arg10[%c3_353, %c1_354, %c0_355, %c0_356] : memref<4x2x12x1xf32, #tpu.memory_space<vmem>>, vector<1x1x12x1xf32>
    %766 = vector.shape_cast %765 : vector<1x1x12x1xf32> to vector<12x1xf32>
    %cst_357 = arith.constant 0.000000e+00 : f32
    %767 = vector.broadcast %cst_357 : f32 to vector<12x17xf32>
    %768 = vector.extract_strided_slice %762 {offsets = [0, 0], sizes = [12, 239], strides = [1, 1]} : vector<12x256xf32> to vector<12x239xf32>
    %769 = tpu.concatenate %767, %768 in 1 : vector<12x17xf32>, vector<12x239xf32> -> vector<12x256xf32>
    %c1_i32_358 = arith.constant 1 : i32
    %770 = vector.broadcast %c1_i32_358 : i32 to vector<1x256xi32>
    %771 = arith.cmpi sge, %0, %770 : vector<1x256xi32>
    %cst_359 = arith.constant 0.000000e+00 : f32
    %772 = vector.shape_cast %771 : vector<1x256xi1> to vector<1x256xi1>
    %773 = vector.broadcast %772 : vector<1x256xi1> to vector<12x256xi1>
    %774 = vector.broadcast %cst_359 : f32 to vector<12x256xf32>
    %775 = arith.select %773, %769, %774 : vector<12x256xi1>, vector<12x256xf32>
    %cst_360 = arith.constant 0.000000e+00 : f32
    %776 = vector.broadcast %cst_360 : f32 to vector<12x16xf32>
    %777 = vector.extract_strided_slice %762 {offsets = [0, 0], sizes = [12, 240], strides = [1, 1]} : vector<12x256xf32> to vector<12x240xf32>
    %778 = tpu.concatenate %776, %777 in 1 : vector<12x16xf32>, vector<12x240xf32> -> vector<12x256xf32>
    %cst_361 = arith.constant 0.000000e+00 : f32
    %779 = vector.broadcast %cst_361 : f32 to vector<12x15xf32>
    %780 = vector.extract_strided_slice %762 {offsets = [0, 0], sizes = [12, 241], strides = [1, 1]} : vector<12x256xf32> to vector<12x241xf32>
    %781 = tpu.concatenate %779, %780 in 1 : vector<12x15xf32>, vector<12x241xf32> -> vector<12x256xf32>
    %c15_i32_362 = arith.constant 15 : i32
    %782 = vector.broadcast %c15_i32_362 : i32 to vector<1x256xi32>
    %783 = arith.cmpi slt, %0, %782 : vector<1x256xi32>
    %cst_363 = arith.constant 0.000000e+00 : f32
    %784 = vector.shape_cast %783 : vector<1x256xi1> to vector<1x256xi1>
    %785 = vector.broadcast %784 : vector<1x256xi1> to vector<12x256xi1>
    %786 = vector.broadcast %cst_363 : f32 to vector<12x256xf32>
    %787 = arith.select %785, %781, %786 : vector<12x256xi1>, vector<12x256xf32>
    %cst_364 = arith.constant 0.000000e+00 : f32
    %788 = vector.broadcast %cst_364 : f32 to vector<12x1xf32>
    %789 = vector.extract_strided_slice %762 {offsets = [0, 0], sizes = [12, 255], strides = [1, 1]} : vector<12x256xf32> to vector<12x255xf32>
    %790 = tpu.concatenate %788, %789 in 1 : vector<12x1xf32>, vector<12x255xf32> -> vector<12x256xf32>
    %c1_i32_365 = arith.constant 1 : i32
    %791 = vector.broadcast %c1_i32_365 : i32 to vector<1x256xi32>
    %792 = arith.cmpi sge, %0, %791 : vector<1x256xi32>
    %cst_366 = arith.constant 0.000000e+00 : f32
    %793 = vector.shape_cast %792 : vector<1x256xi1> to vector<1x256xi1>
    %794 = vector.broadcast %793 : vector<1x256xi1> to vector<12x256xi1>
    %795 = vector.broadcast %cst_366 : f32 to vector<12x256xf32>
    %796 = arith.select %794, %790, %795 : vector<12x256xi1>, vector<12x256xf32>
    %797 = vector.extract_strided_slice %762 {offsets = [0, 1], sizes = [12, 255], strides = [1, 1]} : vector<12x256xf32> to vector<12x255xf32>
    %cst_367 = arith.constant 0.000000e+00 : f32
    %798 = vector.broadcast %cst_367 : f32 to vector<12x1xf32>
    %799 = tpu.concatenate %797, %798 in 1 : vector<12x255xf32>, vector<12x1xf32> -> vector<12x256xf32>
    %c15_i32_368 = arith.constant 15 : i32
    %800 = vector.broadcast %c15_i32_368 : i32 to vector<1x256xi32>
    %801 = arith.cmpi slt, %0, %800 : vector<1x256xi32>
    %cst_369 = arith.constant 0.000000e+00 : f32
    %802 = vector.shape_cast %801 : vector<1x256xi1> to vector<1x256xi1>
    %803 = vector.broadcast %802 : vector<1x256xi1> to vector<12x256xi1>
    %804 = vector.broadcast %cst_369 : f32 to vector<12x256xf32>
    %805 = arith.select %803, %799, %804 : vector<12x256xi1>, vector<12x256xf32>
    %806 = vector.extract_strided_slice %762 {offsets = [0, 15], sizes = [12, 241], strides = [1, 1]} : vector<12x256xf32> to vector<12x241xf32>
    %cst_370 = arith.constant 0.000000e+00 : f32
    %807 = vector.broadcast %cst_370 : f32 to vector<12x15xf32>
    %808 = tpu.concatenate %806, %807 in 1 : vector<12x241xf32>, vector<12x15xf32> -> vector<12x256xf32>
    %c1_i32_371 = arith.constant 1 : i32
    %809 = vector.broadcast %c1_i32_371 : i32 to vector<1x256xi32>
    %810 = arith.cmpi sge, %0, %809 : vector<1x256xi32>
    %cst_372 = arith.constant 0.000000e+00 : f32
    %811 = vector.shape_cast %810 : vector<1x256xi1> to vector<1x256xi1>
    %812 = vector.broadcast %811 : vector<1x256xi1> to vector<12x256xi1>
    %813 = vector.broadcast %cst_372 : f32 to vector<12x256xf32>
    %814 = arith.select %812, %808, %813 : vector<12x256xi1>, vector<12x256xf32>
    %815 = vector.extract_strided_slice %762 {offsets = [0, 16], sizes = [12, 240], strides = [1, 1]} : vector<12x256xf32> to vector<12x240xf32>
    %cst_373 = arith.constant 0.000000e+00 : f32
    %816 = vector.broadcast %cst_373 : f32 to vector<12x16xf32>
    %817 = tpu.concatenate %815, %816 in 1 : vector<12x240xf32>, vector<12x16xf32> -> vector<12x256xf32>
    %818 = vector.extract_strided_slice %762 {offsets = [0, 17], sizes = [12, 239], strides = [1, 1]} : vector<12x256xf32> to vector<12x239xf32>
    %cst_374 = arith.constant 0.000000e+00 : f32
    %819 = vector.broadcast %cst_374 : f32 to vector<12x17xf32>
    %820 = tpu.concatenate %818, %819 in 1 : vector<12x239xf32>, vector<12x17xf32> -> vector<12x256xf32>
    %c15_i32_375 = arith.constant 15 : i32
    %821 = vector.broadcast %c15_i32_375 : i32 to vector<1x256xi32>
    %822 = arith.cmpi slt, %0, %821 : vector<1x256xi32>
    %cst_376 = arith.constant 0.000000e+00 : f32
    %823 = vector.shape_cast %822 : vector<1x256xi1> to vector<1x256xi1>
    %824 = vector.broadcast %823 : vector<1x256xi1> to vector<12x256xi1>
    %825 = vector.broadcast %cst_376 : f32 to vector<12x256xf32>
    %826 = arith.select %824, %820, %825 : vector<12x256xi1>, vector<12x256xf32>
    %827 = tpu.concatenate %775, %778, %787, %796, %762, %805, %814, %817, %826 in 0 : vector<12x256xf32>, vector<12x256xf32>, vector<12x256xf32>, vector<12x256xf32>, vector<12x256xf32>, vector<12x256xf32>, vector<12x256xf32>, vector<12x256xf32>, vector<12x256xf32> -> vector<108x256xf32>
    %cst_377 = arith.constant dense<0.000000e+00> : vector<12x256xf32>
    %828 = tpu.matmul %764, %827, %cst_377 {dimension_numbers = #tpu.dot_dimension_numbers<[1], [0], [0], [1], [0, 0, 1, 1], [], []>} : vector<12x108xf32>, vector<108x256xf32>, vector<12x256xf32> -> vector<12x256xf32>
    %829 = vector.broadcast %766 : vector<12x1xf32> to vector<12x256xf32>
    %830 = arith.addf %828, %829 : vector<12x256xf32>
    %cst_378 = arith.constant dense<0.000000e+00> : vector<12xf32>
    %831 = vector.multi_reduction <add>, %830, %cst_378 [1] : vector<12x256xf32> to vector<12xf32>
    %832 = vector.shape_cast %831 : vector<12xf32> to vector<12x1xf32>
    %cst_379 = arith.constant 2.560000e+02 : f32
    %833 = vector.broadcast %cst_379 : f32 to vector<12x1xf32>
    %834 = arith.divf %832, %833 : vector<12x1xf32>
    %c3_380 = arith.constant 3 : index
    %c0_381 = arith.constant 0 : index
    %c0_382 = arith.constant 0 : index
    %c0_383 = arith.constant 0 : index
    %835 = vector.load %arg11[%c3_380, %c0_381, %c0_382, %c0_383] : memref<4x2x12x1xf32, #tpu.memory_space<vmem>>, vector<1x1x12x1xf32>
    %836 = vector.shape_cast %835 : vector<1x1x12x1xf32> to vector<12x1xf32>
    %837 = arith.mulf %834, %836 : vector<12x1xf32>
    %cst_384 = arith.constant dense<0.000000e+00> : vector<1xf32>
    %838 = vector.multi_reduction <add>, %837, %cst_384 [0] : vector<12x1xf32> to vector<1xf32>
    %839 = vector.shape_cast %838 : vector<1xf32> to vector<1x1xf32>
    %c3_385 = arith.constant 3 : index
    %c0_386 = arith.constant 0 : index
    %c0_387 = arith.constant 0 : index
    %840 = vector.load %arg12[%c3_385, %c0_386, %c0_387] : memref<4x1x1xf32, #tpu.memory_space<vmem>>, vector<1x1x1xf32>
    %841 = vector.shape_cast %840 : vector<1x1x1xf32> to vector<1x1xf32>
    %842 = arith.addf %839, %841 : vector<1x1xf32>
    %cst_388 = arith.constant 0.000000e+00 : f32
    %843 = vector.broadcast %cst_388 : f32 to vector<1x1xf32>
    %844 = arith.maximumf %842, %843 : vector<1x1xf32>
    %c3_389 = arith.constant 3 : index
    %c1_390 = arith.constant 1 : index
    %c0_391 = arith.constant 0 : index
    %c0_392 = arith.constant 0 : index
    %845 = vector.load %arg11[%c3_389, %c1_390, %c0_391, %c0_392] : memref<4x2x12x1xf32, #tpu.memory_space<vmem>>, vector<1x1x12x1xf32>
    %846 = vector.shape_cast %845 : vector<1x1x12x1xf32> to vector<12x1xf32>
    %847 = vector.broadcast %844 : vector<1x1xf32> to vector<12x1xf32>
    %848 = arith.mulf %847, %846 : vector<12x1xf32>
    %cst_393 = arith.constant dense<0.000000e+00> : vector<12xf32>
    %849 = vector.multi_reduction <add>, %848, %cst_393 [1] : vector<12x1xf32> to vector<12xf32>
    %850 = vector.shape_cast %849 : vector<12xf32> to vector<12x1xf32>
    %c3_394 = arith.constant 3 : index
    %c0_395 = arith.constant 0 : index
    %c0_396 = arith.constant 0 : index
    %851 = vector.load %arg13[%c3_394, %c0_395, %c0_396] : memref<4x12x1xf32, #tpu.memory_space<vmem>>, vector<1x12x1xf32>
    %852 = vector.shape_cast %851 : vector<1x12x1xf32> to vector<12x1xf32>
    %853 = arith.addf %850, %852 : vector<12x1xf32>
    %cst_397 = arith.constant 0.000000e+00 : f32
    %854 = vector.broadcast %cst_397 : f32 to vector<12x1xf32>
    %855 = arith.subf %854, %853 : vector<12x1xf32>
    %856 = math.exp %855 : vector<12x1xf32>
    %cst_398 = arith.constant 1.000000e+00 : f32
    %857 = vector.broadcast %cst_398 : f32 to vector<12x1xf32>
    %858 = arith.addf %857, %856 : vector<12x1xf32>
    %cst_399 = arith.constant 1.000000e+00 : f32
    %859 = vector.broadcast %cst_399 : f32 to vector<12x1xf32>
    %860 = arith.divf %859, %858 : vector<12x1xf32>
    %861 = vector.broadcast %860 : vector<12x1xf32> to vector<12x256xf32>
    %862 = arith.mulf %830, %861 : vector<12x256xf32>
    %863 = arith.addf %692, %862 : vector<12x256xf32>
    %c0_400 = arith.constant 0 : index
    %c0_401 = arith.constant 0 : index
    %864 = vector.load %arg14[%c0_400, %c0_401] : memref<12x108xf32, #tpu.memory_space<vmem>>, vector<12x108xf32>
    %c0_402 = arith.constant 0 : index
    %c0_403 = arith.constant 0 : index
    %865 = vector.load %arg15[%c0_402, %c0_403] : memref<12x1xf32, #tpu.memory_space<vmem>>, vector<12x1xf32>
    %cst_404 = arith.constant 0.000000e+00 : f32
    %866 = vector.broadcast %cst_404 : f32 to vector<12x17xf32>
    %867 = vector.extract_strided_slice %863 {offsets = [0, 0], sizes = [12, 239], strides = [1, 1]} : vector<12x256xf32> to vector<12x239xf32>
    %868 = tpu.concatenate %866, %867 in 1 : vector<12x17xf32>, vector<12x239xf32> -> vector<12x256xf32>
    %c1_i32_405 = arith.constant 1 : i32
    %869 = vector.broadcast %c1_i32_405 : i32 to vector<1x256xi32>
    %870 = arith.cmpi sge, %0, %869 : vector<1x256xi32>
    %cst_406 = arith.constant 0.000000e+00 : f32
    %871 = vector.shape_cast %870 : vector<1x256xi1> to vector<1x256xi1>
    %872 = vector.broadcast %871 : vector<1x256xi1> to vector<12x256xi1>
    %873 = vector.broadcast %cst_406 : f32 to vector<12x256xf32>
    %874 = arith.select %872, %868, %873 : vector<12x256xi1>, vector<12x256xf32>
    %cst_407 = arith.constant 0.000000e+00 : f32
    %875 = vector.broadcast %cst_407 : f32 to vector<12x16xf32>
    %876 = vector.extract_strided_slice %863 {offsets = [0, 0], sizes = [12, 240], strides = [1, 1]} : vector<12x256xf32> to vector<12x240xf32>
    %877 = tpu.concatenate %875, %876 in 1 : vector<12x16xf32>, vector<12x240xf32> -> vector<12x256xf32>
    %cst_408 = arith.constant 0.000000e+00 : f32
    %878 = vector.broadcast %cst_408 : f32 to vector<12x15xf32>
    %879 = vector.extract_strided_slice %863 {offsets = [0, 0], sizes = [12, 241], strides = [1, 1]} : vector<12x256xf32> to vector<12x241xf32>
    %880 = tpu.concatenate %878, %879 in 1 : vector<12x15xf32>, vector<12x241xf32> -> vector<12x256xf32>
    %c15_i32_409 = arith.constant 15 : i32
    %881 = vector.broadcast %c15_i32_409 : i32 to vector<1x256xi32>
    %882 = arith.cmpi slt, %0, %881 : vector<1x256xi32>
    %cst_410 = arith.constant 0.000000e+00 : f32
    %883 = vector.shape_cast %882 : vector<1x256xi1> to vector<1x256xi1>
    %884 = vector.broadcast %883 : vector<1x256xi1> to vector<12x256xi1>
    %885 = vector.broadcast %cst_410 : f32 to vector<12x256xf32>
    %886 = arith.select %884, %880, %885 : vector<12x256xi1>, vector<12x256xf32>
    %cst_411 = arith.constant 0.000000e+00 : f32
    %887 = vector.broadcast %cst_411 : f32 to vector<12x1xf32>
    %888 = vector.extract_strided_slice %863 {offsets = [0, 0], sizes = [12, 255], strides = [1, 1]} : vector<12x256xf32> to vector<12x255xf32>
    %889 = tpu.concatenate %887, %888 in 1 : vector<12x1xf32>, vector<12x255xf32> -> vector<12x256xf32>
    %c1_i32_412 = arith.constant 1 : i32
    %890 = vector.broadcast %c1_i32_412 : i32 to vector<1x256xi32>
    %891 = arith.cmpi sge, %0, %890 : vector<1x256xi32>
    %cst_413 = arith.constant 0.000000e+00 : f32
    %892 = vector.shape_cast %891 : vector<1x256xi1> to vector<1x256xi1>
    %893 = vector.broadcast %892 : vector<1x256xi1> to vector<12x256xi1>
    %894 = vector.broadcast %cst_413 : f32 to vector<12x256xf32>
    %895 = arith.select %893, %889, %894 : vector<12x256xi1>, vector<12x256xf32>
    %896 = vector.extract_strided_slice %863 {offsets = [0, 1], sizes = [12, 255], strides = [1, 1]} : vector<12x256xf32> to vector<12x255xf32>
    %cst_414 = arith.constant 0.000000e+00 : f32
    %897 = vector.broadcast %cst_414 : f32 to vector<12x1xf32>
    %898 = tpu.concatenate %896, %897 in 1 : vector<12x255xf32>, vector<12x1xf32> -> vector<12x256xf32>
    %c15_i32_415 = arith.constant 15 : i32
    %899 = vector.broadcast %c15_i32_415 : i32 to vector<1x256xi32>
    %900 = arith.cmpi slt, %0, %899 : vector<1x256xi32>
    %cst_416 = arith.constant 0.000000e+00 : f32
    %901 = vector.shape_cast %900 : vector<1x256xi1> to vector<1x256xi1>
    %902 = vector.broadcast %901 : vector<1x256xi1> to vector<12x256xi1>
    %903 = vector.broadcast %cst_416 : f32 to vector<12x256xf32>
    %904 = arith.select %902, %898, %903 : vector<12x256xi1>, vector<12x256xf32>
    %905 = vector.extract_strided_slice %863 {offsets = [0, 15], sizes = [12, 241], strides = [1, 1]} : vector<12x256xf32> to vector<12x241xf32>
    %cst_417 = arith.constant 0.000000e+00 : f32
    %906 = vector.broadcast %cst_417 : f32 to vector<12x15xf32>
    %907 = tpu.concatenate %905, %906 in 1 : vector<12x241xf32>, vector<12x15xf32> -> vector<12x256xf32>
    %c1_i32_418 = arith.constant 1 : i32
    %908 = vector.broadcast %c1_i32_418 : i32 to vector<1x256xi32>
    %909 = arith.cmpi sge, %0, %908 : vector<1x256xi32>
    %cst_419 = arith.constant 0.000000e+00 : f32
    %910 = vector.shape_cast %909 : vector<1x256xi1> to vector<1x256xi1>
    %911 = vector.broadcast %910 : vector<1x256xi1> to vector<12x256xi1>
    %912 = vector.broadcast %cst_419 : f32 to vector<12x256xf32>
    %913 = arith.select %911, %907, %912 : vector<12x256xi1>, vector<12x256xf32>
    %914 = vector.extract_strided_slice %863 {offsets = [0, 16], sizes = [12, 240], strides = [1, 1]} : vector<12x256xf32> to vector<12x240xf32>
    %cst_420 = arith.constant 0.000000e+00 : f32
    %915 = vector.broadcast %cst_420 : f32 to vector<12x16xf32>
    %916 = tpu.concatenate %914, %915 in 1 : vector<12x240xf32>, vector<12x16xf32> -> vector<12x256xf32>
    %917 = vector.extract_strided_slice %863 {offsets = [0, 17], sizes = [12, 239], strides = [1, 1]} : vector<12x256xf32> to vector<12x239xf32>
    %cst_421 = arith.constant 0.000000e+00 : f32
    %918 = vector.broadcast %cst_421 : f32 to vector<12x17xf32>
    %919 = tpu.concatenate %917, %918 in 1 : vector<12x239xf32>, vector<12x17xf32> -> vector<12x256xf32>
    %c15_i32_422 = arith.constant 15 : i32
    %920 = vector.broadcast %c15_i32_422 : i32 to vector<1x256xi32>
    %921 = arith.cmpi slt, %0, %920 : vector<1x256xi32>
    %cst_423 = arith.constant 0.000000e+00 : f32
    %922 = vector.shape_cast %921 : vector<1x256xi1> to vector<1x256xi1>
    %923 = vector.broadcast %922 : vector<1x256xi1> to vector<12x256xi1>
    %924 = vector.broadcast %cst_423 : f32 to vector<12x256xf32>
    %925 = arith.select %923, %919, %924 : vector<12x256xi1>, vector<12x256xf32>
    %926 = tpu.concatenate %874, %877, %886, %895, %863, %904, %913, %916, %925 in 0 : vector<12x256xf32>, vector<12x256xf32>, vector<12x256xf32>, vector<12x256xf32>, vector<12x256xf32>, vector<12x256xf32>, vector<12x256xf32>, vector<12x256xf32>, vector<12x256xf32> -> vector<108x256xf32>
    %cst_424 = arith.constant dense<0.000000e+00> : vector<12x256xf32>
    %927 = tpu.matmul %864, %926, %cst_424 {dimension_numbers = #tpu.dot_dimension_numbers<[1], [0], [0], [1], [0, 0, 1, 1], [], []>} : vector<12x108xf32>, vector<108x256xf32>, vector<12x256xf32> -> vector<12x256xf32>
    %928 = vector.broadcast %865 : vector<12x1xf32> to vector<12x256xf32>
    %929 = arith.addf %927, %928 : vector<12x256xf32>
    %930 = arith.addf %179, %929 : vector<12x256xf32>
    %c0_425 = arith.constant 0 : index
    %c0_426 = arith.constant 0 : index
    %931 = vector.load %arg16[%c0_425, %c0_426] : memref<56x12xf32, #tpu.memory_space<vmem>>, vector<56x12xf32>
    %cst_427 = arith.constant dense<0.000000e+00> : vector<56x256xf32>
    %932 = tpu.matmul %931, %930, %cst_427 {dimension_numbers = #tpu.dot_dimension_numbers<[1], [0], [0], [1], [0, 0, 1, 1], [], []>} : vector<56x12xf32>, vector<12x256xf32>, vector<56x256xf32> -> vector<56x256xf32>
    %c0_428 = arith.constant 0 : index
    %c0_429 = arith.constant 0 : index
    %933 = vector.load %arg17[%c0_428, %c0_429] : memref<56x1xf32, #tpu.memory_space<vmem>>, vector<56x1xf32>
    %934 = vector.broadcast %933 : vector<56x1xf32> to vector<56x256xf32>
    %935 = arith.addf %932, %934 : vector<56x256xf32>
    %c0_430 = arith.constant 0 : index
    %c0_431 = arith.constant 0 : index
    %936 = vector.load %arg18[%c0_430, %c0_431] : memref<56x1xf32, #tpu.memory_space<vmem>>, vector<56x1xf32>
    %cst_432 = arith.constant 0.000000e+00 : f32
    %937 = vector.broadcast %cst_432 : f32 to vector<56x256xf32>
    %938 = arith.cmpf ogt, %935, %937 : vector<56x256xf32>
    %939 = vector.broadcast %936 : vector<56x1xf32> to vector<56x256xf32>
    %940 = arith.mulf %939, %935 : vector<56x256xf32>
    %941 = arith.select %938, %935, %940 : vector<56x256xi1>, vector<56x256xf32>
    %c0_433 = arith.constant 0 : index
    %c0_434 = arith.constant 0 : index
    %942 = vector.load %arg19[%c0_433, %c0_434] : memref<4x1400xf32, #tpu.memory_space<vmem>>, vector<4x1400xf32>
    %c0_435 = arith.constant 0 : index
    %c0_436 = arith.constant 0 : index
    %943 = vector.load %arg20[%c0_435, %c0_436] : memref<1x1xf32, #tpu.memory_space<vmem>>, vector<1x1xf32>
    %cst_437 = arith.constant 0.000000e+00 : f32
    %944 = vector.broadcast %cst_437 : f32 to vector<56x34xf32>
    %945 = vector.extract_strided_slice %941 {offsets = [0, 0], sizes = [56, 222], strides = [1, 1]} : vector<56x256xf32> to vector<56x222xf32>
    %946 = tpu.concatenate %944, %945 in 1 : vector<56x34xf32>, vector<56x222xf32> -> vector<56x256xf32>
    %c2_i32_438 = arith.constant 2 : i32
    %947 = vector.broadcast %c2_i32_438 : i32 to vector<1x256xi32>
    %948 = arith.cmpi sge, %0, %947 : vector<1x256xi32>
    %cst_439 = arith.constant 0.000000e+00 : f32
    %949 = vector.shape_cast %948 : vector<1x256xi1> to vector<1x256xi1>
    %950 = vector.broadcast %949 : vector<1x256xi1> to vector<56x256xi1>
    %951 = vector.broadcast %cst_439 : f32 to vector<56x256xf32>
    %952 = arith.select %950, %946, %951 : vector<56x256xi1>, vector<56x256xf32>
    %cst_440 = arith.constant 0.000000e+00 : f32
    %953 = vector.broadcast %cst_440 : f32 to vector<56x33xf32>
    %954 = vector.extract_strided_slice %941 {offsets = [0, 0], sizes = [56, 223], strides = [1, 1]} : vector<56x256xf32> to vector<56x223xf32>
    %955 = tpu.concatenate %953, %954 in 1 : vector<56x33xf32>, vector<56x223xf32> -> vector<56x256xf32>
    %c1_i32_441 = arith.constant 1 : i32
    %956 = vector.broadcast %c1_i32_441 : i32 to vector<1x256xi32>
    %957 = arith.cmpi sge, %0, %956 : vector<1x256xi32>
    %cst_442 = arith.constant 0.000000e+00 : f32
    %958 = vector.shape_cast %957 : vector<1x256xi1> to vector<1x256xi1>
    %959 = vector.broadcast %958 : vector<1x256xi1> to vector<56x256xi1>
    %960 = vector.broadcast %cst_442 : f32 to vector<56x256xf32>
    %961 = arith.select %959, %955, %960 : vector<56x256xi1>, vector<56x256xf32>
    %cst_443 = arith.constant 0.000000e+00 : f32
    %962 = vector.broadcast %cst_443 : f32 to vector<56x32xf32>
    %963 = vector.extract_strided_slice %941 {offsets = [0, 0], sizes = [56, 224], strides = [1, 1]} : vector<56x256xf32> to vector<56x224xf32>
    %964 = tpu.concatenate %962, %963 in 1 : vector<56x32xf32>, vector<56x224xf32> -> vector<56x256xf32>
    %cst_444 = arith.constant 0.000000e+00 : f32
    %965 = vector.broadcast %cst_444 : f32 to vector<56x31xf32>
    %966 = vector.extract_strided_slice %941 {offsets = [0, 0], sizes = [56, 225], strides = [1, 1]} : vector<56x256xf32> to vector<56x225xf32>
    %967 = tpu.concatenate %965, %966 in 1 : vector<56x31xf32>, vector<56x225xf32> -> vector<56x256xf32>
    %c15_i32_445 = arith.constant 15 : i32
    %968 = vector.broadcast %c15_i32_445 : i32 to vector<1x256xi32>
    %969 = arith.cmpi slt, %0, %968 : vector<1x256xi32>
    %cst_446 = arith.constant 0.000000e+00 : f32
    %970 = vector.shape_cast %969 : vector<1x256xi1> to vector<1x256xi1>
    %971 = vector.broadcast %970 : vector<1x256xi1> to vector<56x256xi1>
    %972 = vector.broadcast %cst_446 : f32 to vector<56x256xf32>
    %973 = arith.select %971, %967, %972 : vector<56x256xi1>, vector<56x256xf32>
    %cst_447 = arith.constant 0.000000e+00 : f32
    %974 = vector.broadcast %cst_447 : f32 to vector<56x30xf32>
    %975 = vector.extract_strided_slice %941 {offsets = [0, 0], sizes = [56, 226], strides = [1, 1]} : vector<56x256xf32> to vector<56x226xf32>
    %976 = tpu.concatenate %974, %975 in 1 : vector<56x30xf32>, vector<56x226xf32> -> vector<56x256xf32>
    %c14_i32_448 = arith.constant 14 : i32
    %977 = vector.broadcast %c14_i32_448 : i32 to vector<1x256xi32>
    %978 = arith.cmpi slt, %0, %977 : vector<1x256xi32>
    %cst_449 = arith.constant 0.000000e+00 : f32
    %979 = vector.shape_cast %978 : vector<1x256xi1> to vector<1x256xi1>
    %980 = vector.broadcast %979 : vector<1x256xi1> to vector<56x256xi1>
    %981 = vector.broadcast %cst_449 : f32 to vector<56x256xf32>
    %982 = arith.select %980, %976, %981 : vector<56x256xi1>, vector<56x256xf32>
    %cst_450 = arith.constant 0.000000e+00 : f32
    %983 = vector.broadcast %cst_450 : f32 to vector<56x18xf32>
    %984 = vector.extract_strided_slice %941 {offsets = [0, 0], sizes = [56, 238], strides = [1, 1]} : vector<56x256xf32> to vector<56x238xf32>
    %985 = tpu.concatenate %983, %984 in 1 : vector<56x18xf32>, vector<56x238xf32> -> vector<56x256xf32>
    %c2_i32_451 = arith.constant 2 : i32
    %986 = vector.broadcast %c2_i32_451 : i32 to vector<1x256xi32>
    %987 = arith.cmpi sge, %0, %986 : vector<1x256xi32>
    %cst_452 = arith.constant 0.000000e+00 : f32
    %988 = vector.shape_cast %987 : vector<1x256xi1> to vector<1x256xi1>
    %989 = vector.broadcast %988 : vector<1x256xi1> to vector<56x256xi1>
    %990 = vector.broadcast %cst_452 : f32 to vector<56x256xf32>
    %991 = arith.select %989, %985, %990 : vector<56x256xi1>, vector<56x256xf32>
    %cst_453 = arith.constant 0.000000e+00 : f32
    %992 = vector.broadcast %cst_453 : f32 to vector<56x17xf32>
    %993 = vector.extract_strided_slice %941 {offsets = [0, 0], sizes = [56, 239], strides = [1, 1]} : vector<56x256xf32> to vector<56x239xf32>
    %994 = tpu.concatenate %992, %993 in 1 : vector<56x17xf32>, vector<56x239xf32> -> vector<56x256xf32>
    %c1_i32_454 = arith.constant 1 : i32
    %995 = vector.broadcast %c1_i32_454 : i32 to vector<1x256xi32>
    %996 = arith.cmpi sge, %0, %995 : vector<1x256xi32>
    %cst_455 = arith.constant 0.000000e+00 : f32
    %997 = vector.shape_cast %996 : vector<1x256xi1> to vector<1x256xi1>
    %998 = vector.broadcast %997 : vector<1x256xi1> to vector<56x256xi1>
    %999 = vector.broadcast %cst_455 : f32 to vector<56x256xf32>
    %1000 = arith.select %998, %994, %999 : vector<56x256xi1>, vector<56x256xf32>
    %cst_456 = arith.constant 0.000000e+00 : f32
    %1001 = vector.broadcast %cst_456 : f32 to vector<56x16xf32>
    %1002 = vector.extract_strided_slice %941 {offsets = [0, 0], sizes = [56, 240], strides = [1, 1]} : vector<56x256xf32> to vector<56x240xf32>
    %1003 = tpu.concatenate %1001, %1002 in 1 : vector<56x16xf32>, vector<56x240xf32> -> vector<56x256xf32>
    %cst_457 = arith.constant 0.000000e+00 : f32
    %1004 = vector.broadcast %cst_457 : f32 to vector<56x15xf32>
    %1005 = vector.extract_strided_slice %941 {offsets = [0, 0], sizes = [56, 241], strides = [1, 1]} : vector<56x256xf32> to vector<56x241xf32>
    %1006 = tpu.concatenate %1004, %1005 in 1 : vector<56x15xf32>, vector<56x241xf32> -> vector<56x256xf32>
    %c15_i32_458 = arith.constant 15 : i32
    %1007 = vector.broadcast %c15_i32_458 : i32 to vector<1x256xi32>
    %1008 = arith.cmpi slt, %0, %1007 : vector<1x256xi32>
    %cst_459 = arith.constant 0.000000e+00 : f32
    %1009 = vector.shape_cast %1008 : vector<1x256xi1> to vector<1x256xi1>
    %1010 = vector.broadcast %1009 : vector<1x256xi1> to vector<56x256xi1>
    %1011 = vector.broadcast %cst_459 : f32 to vector<56x256xf32>
    %1012 = arith.select %1010, %1006, %1011 : vector<56x256xi1>, vector<56x256xf32>
    %cst_460 = arith.constant 0.000000e+00 : f32
    %1013 = vector.broadcast %cst_460 : f32 to vector<56x14xf32>
    %1014 = vector.extract_strided_slice %941 {offsets = [0, 0], sizes = [56, 242], strides = [1, 1]} : vector<56x256xf32> to vector<56x242xf32>
    %1015 = tpu.concatenate %1013, %1014 in 1 : vector<56x14xf32>, vector<56x242xf32> -> vector<56x256xf32>
    %c14_i32_461 = arith.constant 14 : i32
    %1016 = vector.broadcast %c14_i32_461 : i32 to vector<1x256xi32>
    %1017 = arith.cmpi slt, %0, %1016 : vector<1x256xi32>
    %cst_462 = arith.constant 0.000000e+00 : f32
    %1018 = vector.shape_cast %1017 : vector<1x256xi1> to vector<1x256xi1>
    %1019 = vector.broadcast %1018 : vector<1x256xi1> to vector<56x256xi1>
    %1020 = vector.broadcast %cst_462 : f32 to vector<56x256xf32>
    %1021 = arith.select %1019, %1015, %1020 : vector<56x256xi1>, vector<56x256xf32>
    %cst_463 = arith.constant 0.000000e+00 : f32
    %1022 = vector.broadcast %cst_463 : f32 to vector<56x2xf32>
    %1023 = vector.extract_strided_slice %941 {offsets = [0, 0], sizes = [56, 254], strides = [1, 1]} : vector<56x256xf32> to vector<56x254xf32>
    %1024 = tpu.concatenate %1022, %1023 in 1 : vector<56x2xf32>, vector<56x254xf32> -> vector<56x256xf32>
    %c2_i32_464 = arith.constant 2 : i32
    %1025 = vector.broadcast %c2_i32_464 : i32 to vector<1x256xi32>
    %1026 = arith.cmpi sge, %0, %1025 : vector<1x256xi32>
    %cst_465 = arith.constant 0.000000e+00 : f32
    %1027 = vector.shape_cast %1026 : vector<1x256xi1> to vector<1x256xi1>
    %1028 = vector.broadcast %1027 : vector<1x256xi1> to vector<56x256xi1>
    %1029 = vector.broadcast %cst_465 : f32 to vector<56x256xf32>
    %1030 = arith.select %1028, %1024, %1029 : vector<56x256xi1>, vector<56x256xf32>
    %cst_466 = arith.constant 0.000000e+00 : f32
    %1031 = vector.broadcast %cst_466 : f32 to vector<56x1xf32>
    %1032 = vector.extract_strided_slice %941 {offsets = [0, 0], sizes = [56, 255], strides = [1, 1]} : vector<56x256xf32> to vector<56x255xf32>
    %1033 = tpu.concatenate %1031, %1032 in 1 : vector<56x1xf32>, vector<56x255xf32> -> vector<56x256xf32>
    %c1_i32_467 = arith.constant 1 : i32
    %1034 = vector.broadcast %c1_i32_467 : i32 to vector<1x256xi32>
    %1035 = arith.cmpi sge, %0, %1034 : vector<1x256xi32>
    %cst_468 = arith.constant 0.000000e+00 : f32
    %1036 = vector.shape_cast %1035 : vector<1x256xi1> to vector<1x256xi1>
    %1037 = vector.broadcast %1036 : vector<1x256xi1> to vector<56x256xi1>
    %1038 = vector.broadcast %cst_468 : f32 to vector<56x256xf32>
    %1039 = arith.select %1037, %1033, %1038 : vector<56x256xi1>, vector<56x256xf32>
    %1040 = vector.extract_strided_slice %941 {offsets = [0, 1], sizes = [56, 255], strides = [1, 1]} : vector<56x256xf32> to vector<56x255xf32>
    %cst_469 = arith.constant 0.000000e+00 : f32
    %1041 = vector.broadcast %cst_469 : f32 to vector<56x1xf32>
    %1042 = tpu.concatenate %1040, %1041 in 1 : vector<56x255xf32>, vector<56x1xf32> -> vector<56x256xf32>
    %c15_i32_470 = arith.constant 15 : i32
    %1043 = vector.broadcast %c15_i32_470 : i32 to vector<1x256xi32>
    %1044 = arith.cmpi slt, %0, %1043 : vector<1x256xi32>
    %cst_471 = arith.constant 0.000000e+00 : f32
    %1045 = vector.shape_cast %1044 : vector<1x256xi1> to vector<1x256xi1>
    %1046 = vector.broadcast %1045 : vector<1x256xi1> to vector<56x256xi1>
    %1047 = vector.broadcast %cst_471 : f32 to vector<56x256xf32>
    %1048 = arith.select %1046, %1042, %1047 : vector<56x256xi1>, vector<56x256xf32>
    %1049 = vector.extract_strided_slice %941 {offsets = [0, 2], sizes = [56, 254], strides = [1, 1]} : vector<56x256xf32> to vector<56x254xf32>
    %cst_472 = arith.constant 0.000000e+00 : f32
    %1050 = vector.broadcast %cst_472 : f32 to vector<56x2xf32>
    %1051 = tpu.concatenate %1049, %1050 in 1 : vector<56x254xf32>, vector<56x2xf32> -> vector<56x256xf32>
    %c14_i32_473 = arith.constant 14 : i32
    %1052 = vector.broadcast %c14_i32_473 : i32 to vector<1x256xi32>
    %1053 = arith.cmpi slt, %0, %1052 : vector<1x256xi32>
    %cst_474 = arith.constant 0.000000e+00 : f32
    %1054 = vector.shape_cast %1053 : vector<1x256xi1> to vector<1x256xi1>
    %1055 = vector.broadcast %1054 : vector<1x256xi1> to vector<56x256xi1>
    %1056 = vector.broadcast %cst_474 : f32 to vector<56x256xf32>
    %1057 = arith.select %1055, %1051, %1056 : vector<56x256xi1>, vector<56x256xf32>
    %1058 = vector.extract_strided_slice %941 {offsets = [0, 14], sizes = [56, 242], strides = [1, 1]} : vector<56x256xf32> to vector<56x242xf32>
    %cst_475 = arith.constant 0.000000e+00 : f32
    %1059 = vector.broadcast %cst_475 : f32 to vector<56x14xf32>
    %1060 = tpu.concatenate %1058, %1059 in 1 : vector<56x242xf32>, vector<56x14xf32> -> vector<56x256xf32>
    %c2_i32_476 = arith.constant 2 : i32
    %1061 = vector.broadcast %c2_i32_476 : i32 to vector<1x256xi32>
    %1062 = arith.cmpi sge, %0, %1061 : vector<1x256xi32>
    %cst_477 = arith.constant 0.000000e+00 : f32
    %1063 = vector.shape_cast %1062 : vector<1x256xi1> to vector<1x256xi1>
    %1064 = vector.broadcast %1063 : vector<1x256xi1> to vector<56x256xi1>
    %1065 = vector.broadcast %cst_477 : f32 to vector<56x256xf32>
    %1066 = arith.select %1064, %1060, %1065 : vector<56x256xi1>, vector<56x256xf32>
    %1067 = vector.extract_strided_slice %941 {offsets = [0, 15], sizes = [56, 241], strides = [1, 1]} : vector<56x256xf32> to vector<56x241xf32>
    %cst_478 = arith.constant 0.000000e+00 : f32
    %1068 = vector.broadcast %cst_478 : f32 to vector<56x15xf32>
    %1069 = tpu.concatenate %1067, %1068 in 1 : vector<56x241xf32>, vector<56x15xf32> -> vector<56x256xf32>
    %c1_i32_479 = arith.constant 1 : i32
    %1070 = vector.broadcast %c1_i32_479 : i32 to vector<1x256xi32>
    %1071 = arith.cmpi sge, %0, %1070 : vector<1x256xi32>
    %cst_480 = arith.constant 0.000000e+00 : f32
    %1072 = vector.shape_cast %1071 : vector<1x256xi1> to vector<1x256xi1>
    %1073 = vector.broadcast %1072 : vector<1x256xi1> to vector<56x256xi1>
    %1074 = vector.broadcast %cst_480 : f32 to vector<56x256xf32>
    %1075 = arith.select %1073, %1069, %1074 : vector<56x256xi1>, vector<56x256xf32>
    %1076 = vector.extract_strided_slice %941 {offsets = [0, 16], sizes = [56, 240], strides = [1, 1]} : vector<56x256xf32> to vector<56x240xf32>
    %cst_481 = arith.constant 0.000000e+00 : f32
    %1077 = vector.broadcast %cst_481 : f32 to vector<56x16xf32>
    %1078 = tpu.concatenate %1076, %1077 in 1 : vector<56x240xf32>, vector<56x16xf32> -> vector<56x256xf32>
    %1079 = vector.extract_strided_slice %941 {offsets = [0, 17], sizes = [56, 239], strides = [1, 1]} : vector<56x256xf32> to vector<56x239xf32>
    %cst_482 = arith.constant 0.000000e+00 : f32
    %1080 = vector.broadcast %cst_482 : f32 to vector<56x17xf32>
    %1081 = tpu.concatenate %1079, %1080 in 1 : vector<56x239xf32>, vector<56x17xf32> -> vector<56x256xf32>
    %c15_i32_483 = arith.constant 15 : i32
    %1082 = vector.broadcast %c15_i32_483 : i32 to vector<1x256xi32>
    %1083 = arith.cmpi slt, %0, %1082 : vector<1x256xi32>
    %cst_484 = arith.constant 0.000000e+00 : f32
    %1084 = vector.shape_cast %1083 : vector<1x256xi1> to vector<1x256xi1>
    %1085 = vector.broadcast %1084 : vector<1x256xi1> to vector<56x256xi1>
    %1086 = vector.broadcast %cst_484 : f32 to vector<56x256xf32>
    %1087 = arith.select %1085, %1081, %1086 : vector<56x256xi1>, vector<56x256xf32>
    %1088 = vector.extract_strided_slice %941 {offsets = [0, 18], sizes = [56, 238], strides = [1, 1]} : vector<56x256xf32> to vector<56x238xf32>
    %cst_485 = arith.constant 0.000000e+00 : f32
    %1089 = vector.broadcast %cst_485 : f32 to vector<56x18xf32>
    %1090 = tpu.concatenate %1088, %1089 in 1 : vector<56x238xf32>, vector<56x18xf32> -> vector<56x256xf32>
    %c14_i32_486 = arith.constant 14 : i32
    %1091 = vector.broadcast %c14_i32_486 : i32 to vector<1x256xi32>
    %1092 = arith.cmpi slt, %0, %1091 : vector<1x256xi32>
    %cst_487 = arith.constant 0.000000e+00 : f32
    %1093 = vector.shape_cast %1092 : vector<1x256xi1> to vector<1x256xi1>
    %1094 = vector.broadcast %1093 : vector<1x256xi1> to vector<56x256xi1>
    %1095 = vector.broadcast %cst_487 : f32 to vector<56x256xf32>
    %1096 = arith.select %1094, %1090, %1095 : vector<56x256xi1>, vector<56x256xf32>
    %1097 = vector.extract_strided_slice %941 {offsets = [0, 30], sizes = [56, 226], strides = [1, 1]} : vector<56x256xf32> to vector<56x226xf32>
    %cst_488 = arith.constant 0.000000e+00 : f32
    %1098 = vector.broadcast %cst_488 : f32 to vector<56x30xf32>
    %1099 = tpu.concatenate %1097, %1098 in 1 : vector<56x226xf32>, vector<56x30xf32> -> vector<56x256xf32>
    %c2_i32_489 = arith.constant 2 : i32
    %1100 = vector.broadcast %c2_i32_489 : i32 to vector<1x256xi32>
    %1101 = arith.cmpi sge, %0, %1100 : vector<1x256xi32>
    %cst_490 = arith.constant 0.000000e+00 : f32
    %1102 = vector.shape_cast %1101 : vector<1x256xi1> to vector<1x256xi1>
    %1103 = vector.broadcast %1102 : vector<1x256xi1> to vector<56x256xi1>
    %1104 = vector.broadcast %cst_490 : f32 to vector<56x256xf32>
    %1105 = arith.select %1103, %1099, %1104 : vector<56x256xi1>, vector<56x256xf32>
    %1106 = vector.extract_strided_slice %941 {offsets = [0, 31], sizes = [56, 225], strides = [1, 1]} : vector<56x256xf32> to vector<56x225xf32>
    %cst_491 = arith.constant 0.000000e+00 : f32
    %1107 = vector.broadcast %cst_491 : f32 to vector<56x31xf32>
    %1108 = tpu.concatenate %1106, %1107 in 1 : vector<56x225xf32>, vector<56x31xf32> -> vector<56x256xf32>
    %c1_i32_492 = arith.constant 1 : i32
    %1109 = vector.broadcast %c1_i32_492 : i32 to vector<1x256xi32>
    %1110 = arith.cmpi sge, %0, %1109 : vector<1x256xi32>
    %cst_493 = arith.constant 0.000000e+00 : f32
    %1111 = vector.shape_cast %1110 : vector<1x256xi1> to vector<1x256xi1>
    %1112 = vector.broadcast %1111 : vector<1x256xi1> to vector<56x256xi1>
    %1113 = vector.broadcast %cst_493 : f32 to vector<56x256xf32>
    %1114 = arith.select %1112, %1108, %1113 : vector<56x256xi1>, vector<56x256xf32>
    %1115 = vector.extract_strided_slice %941 {offsets = [0, 32], sizes = [56, 224], strides = [1, 1]} : vector<56x256xf32> to vector<56x224xf32>
    %cst_494 = arith.constant 0.000000e+00 : f32
    %1116 = vector.broadcast %cst_494 : f32 to vector<56x32xf32>
    %1117 = tpu.concatenate %1115, %1116 in 1 : vector<56x224xf32>, vector<56x32xf32> -> vector<56x256xf32>
    %1118 = vector.extract_strided_slice %941 {offsets = [0, 33], sizes = [56, 223], strides = [1, 1]} : vector<56x256xf32> to vector<56x223xf32>
    %cst_495 = arith.constant 0.000000e+00 : f32
    %1119 = vector.broadcast %cst_495 : f32 to vector<56x33xf32>
    %1120 = tpu.concatenate %1118, %1119 in 1 : vector<56x223xf32>, vector<56x33xf32> -> vector<56x256xf32>
    %c15_i32_496 = arith.constant 15 : i32
    %1121 = vector.broadcast %c15_i32_496 : i32 to vector<1x256xi32>
    %1122 = arith.cmpi slt, %0, %1121 : vector<1x256xi32>
    %cst_497 = arith.constant 0.000000e+00 : f32
    %1123 = vector.shape_cast %1122 : vector<1x256xi1> to vector<1x256xi1>
    %1124 = vector.broadcast %1123 : vector<1x256xi1> to vector<56x256xi1>
    %1125 = vector.broadcast %cst_497 : f32 to vector<56x256xf32>
    %1126 = arith.select %1124, %1120, %1125 : vector<56x256xi1>, vector<56x256xf32>
    %1127 = vector.extract_strided_slice %941 {offsets = [0, 34], sizes = [56, 222], strides = [1, 1]} : vector<56x256xf32> to vector<56x222xf32>
    %cst_498 = arith.constant 0.000000e+00 : f32
    %1128 = vector.broadcast %cst_498 : f32 to vector<56x34xf32>
    %1129 = tpu.concatenate %1127, %1128 in 1 : vector<56x222xf32>, vector<56x34xf32> -> vector<56x256xf32>
    %c14_i32_499 = arith.constant 14 : i32
    %1130 = vector.broadcast %c14_i32_499 : i32 to vector<1x256xi32>
    %1131 = arith.cmpi slt, %0, %1130 : vector<1x256xi32>
    %cst_500 = arith.constant 0.000000e+00 : f32
    %1132 = vector.shape_cast %1131 : vector<1x256xi1> to vector<1x256xi1>
    %1133 = vector.broadcast %1132 : vector<1x256xi1> to vector<56x256xi1>
    %1134 = vector.broadcast %cst_500 : f32 to vector<56x256xf32>
    %1135 = arith.select %1133, %1129, %1134 : vector<56x256xi1>, vector<56x256xf32>
    %1136 = tpu.concatenate %952, %961, %964, %973, %982, %991, %1000, %1003, %1012, %1021, %1030, %1039, %941, %1048, %1057, %1066 in 0 : vector<56x256xf32>, vector<56x256xf32>, vector<56x256xf32>, vector<56x256xf32>, vector<56x256xf32>, vector<56x256xf32>, vector<56x256xf32>, vector<56x256xf32>, vector<56x256xf32>, vector<56x256xf32>, vector<56x256xf32>, vector<56x256xf32>, vector<56x256xf32>, vector<56x256xf32>, vector<56x256xf32>, vector<56x256xf32> -> vector<896x256xf32>
    %1137 = tpu.concatenate %1075, %1078, %1087, %1096, %1105, %1114, %1117, %1126, %1135 in 0 : vector<56x256xf32>, vector<56x256xf32>, vector<56x256xf32>, vector<56x256xf32>, vector<56x256xf32>, vector<56x256xf32>, vector<56x256xf32>, vector<56x256xf32>, vector<56x256xf32> -> vector<504x256xf32>
    %1138 = tpu.concatenate %1136, %1137 in 0 : vector<896x256xf32>, vector<504x256xf32> -> vector<1400x256xf32>
    %cst_501 = arith.constant dense<0.000000e+00> : vector<4x256xf32>
    %1139 = tpu.matmul %942, %1138, %cst_501 {dimension_numbers = #tpu.dot_dimension_numbers<[1], [0], [0], [1], [0, 0, 1, 1], [], []>} : vector<4x1400xf32>, vector<1400x256xf32>, vector<4x256xf32> -> vector<4x256xf32>
    %1140 = vector.broadcast %943 : vector<1x1xf32> to vector<4x256xf32>
    %1141 = arith.addf %1139, %1140 : vector<4x256xf32>
    %cst_502 = arith.constant 0.000000e+00 : f32
    %cst_503 = arith.constant 1.000000e+00 : f32
    %1142 = vector.broadcast %cst_502 : f32 to vector<4x256xf32>
    %1143 = arith.maximumf %1142, %1141 : vector<4x256xf32>
    %1144 = vector.broadcast %cst_503 : f32 to vector<4x256xf32>
    %1145 = arith.minimumf %1144, %1143 : vector<4x256xf32>
    %c0_504 = arith.constant 0 : index
    %c0_505 = arith.constant 0 : index
    %c0_506 = arith.constant 0 : index
    %1146 = vector.load %arg21[%c0_504, %c0_505, %c0_506] : memref<1x4x256xf32, #tpu.memory_space<vmem>>, vector<1x4x256xf32>
    %1147 = vector.shape_cast %1146 : vector<1x4x256xf32> to vector<4x256xf32>
    %1148 = vector.shape_cast %1145 : vector<4x256xf32> to vector<1x4x256xf32>
    tpu.vector_store %arg21[%c0_504, %c0_505, %c0_506], %1148 {strides = array<i32>} : memref<1x4x256xf32, #tpu.memory_space<vmem>>, vector<1x4x256xf32>,
    return
  }
  func.func @transform_0(%arg0: i32) -> (i32, i32, i32) {
    %c0_i32 = arith.constant 0 : i32
    %c0_i32_0 = arith.constant 0 : i32
    %c0_i32_1 = arith.constant 0 : i32
    return %arg0, %c0_i32, %c0_i32_0 : i32, i32, i32
  }
  func.func @transform_1(%arg0: i32) -> (i32, i32) {
    %c0_i32 = arith.constant 0 : i32
    %c0_i32_0 = arith.constant 0 : i32
    %c0_i32_1 = arith.constant 0 : i32
    return %c0_i32, %c0_i32_0 : i32, i32
  }
  func.func @transform_2(%arg0: i32) -> (i32, i32) {
    %c0_i32 = arith.constant 0 : i32
    %c0_i32_0 = arith.constant 0 : i32
    %c0_i32_1 = arith.constant 0 : i32
    return %c0_i32, %c0_i32_0 : i32, i32
  }
  func.func @transform_3(%arg0: i32) -> (i32, i32) {
    %c0_i32 = arith.constant 0 : i32
    %c0_i32_0 = arith.constant 0 : i32
    %c0_i32_1 = arith.constant 0 : i32
    return %c0_i32, %c0_i32_0 : i32, i32
  }
  func.func @transform_4(%arg0: i32) -> (i32, i32) {
    %c0_i32 = arith.constant 0 : i32
    %c0_i32_0 = arith.constant 0 : i32
    %c0_i32_1 = arith.constant 0 : i32
    return %c0_i32, %c0_i32_0 : i32, i32
  }
  func.func @transform_5(%arg0: i32) -> (i32, i32) {
    %c0_i32 = arith.constant 0 : i32
    %c0_i32_0 = arith.constant 0 : i32
    %c0_i32_1 = arith.constant 0 : i32
    return %c0_i32, %c0_i32_0 : i32, i32
  }
  func.func @transform_6(%arg0: i32) -> (i32, i32) {
    %c0_i32 = arith.constant 0 : i32
    %c0_i32_0 = arith.constant 0 : i32
    %c0_i32_1 = arith.constant 0 : i32
    return %c0_i32, %c0_i32_0 : i32, i32
  }
  func.func @transform_7(%arg0: i32) -> (i32, i32) {
    %c0_i32 = arith.constant 0 : i32
    %c0_i32_0 = arith.constant 0 : i32
    %c0_i32_1 = arith.constant 0 : i32
    return %c0_i32, %c0_i32_0 : i32, i32
  }
  func.func @transform_8(%arg0: i32) -> (i32, i32, i32, i32) {
    %c0_i32 = arith.constant 0 : i32
    %c0_i32_0 = arith.constant 0 : i32
    %c0_i32_1 = arith.constant 0 : i32
    %c0_i32_2 = arith.constant 0 : i32
    %c0_i32_3 = arith.constant 0 : i32
    return %c0_i32, %c0_i32_0, %c0_i32_1, %c0_i32_2 : i32, i32, i32, i32
  }
  func.func @transform_9(%arg0: i32) -> (i32, i32, i32, i32) {
    %c0_i32 = arith.constant 0 : i32
    %c0_i32_0 = arith.constant 0 : i32
    %c0_i32_1 = arith.constant 0 : i32
    %c0_i32_2 = arith.constant 0 : i32
    %c0_i32_3 = arith.constant 0 : i32
    return %c0_i32, %c0_i32_0, %c0_i32_1, %c0_i32_2 : i32, i32, i32, i32
  }
  func.func @transform_10(%arg0: i32) -> (i32, i32, i32, i32) {
    %c0_i32 = arith.constant 0 : i32
    %c0_i32_0 = arith.constant 0 : i32
    %c0_i32_1 = arith.constant 0 : i32
    %c0_i32_2 = arith.constant 0 : i32
    %c0_i32_3 = arith.constant 0 : i32
    return %c0_i32, %c0_i32_0, %c0_i32_1, %c0_i32_2 : i32, i32, i32, i32
  }
  func.func @transform_11(%arg0: i32) -> (i32, i32, i32) {
    %c0_i32 = arith.constant 0 : i32
    %c0_i32_0 = arith.constant 0 : i32
    %c0_i32_1 = arith.constant 0 : i32
    %c0_i32_2 = arith.constant 0 : i32
    return %c0_i32, %c0_i32_0, %c0_i32_1 : i32, i32, i32
  }
  func.func @transform_12(%arg0: i32) -> (i32, i32, i32) {
    %c0_i32 = arith.constant 0 : i32
    %c0_i32_0 = arith.constant 0 : i32
    %c0_i32_1 = arith.constant 0 : i32
    %c0_i32_2 = arith.constant 0 : i32
    return %c0_i32, %c0_i32_0, %c0_i32_1 : i32, i32, i32
  }
  func.func @transform_13(%arg0: i32) -> (i32, i32) {
    %c0_i32 = arith.constant 0 : i32
    %c0_i32_0 = arith.constant 0 : i32
    %c0_i32_1 = arith.constant 0 : i32
    return %c0_i32, %c0_i32_0 : i32, i32
  }
  func.func @transform_14(%arg0: i32) -> (i32, i32) {
    %c0_i32 = arith.constant 0 : i32
    %c0_i32_0 = arith.constant 0 : i32
    %c0_i32_1 = arith.constant 0 : i32
    return %c0_i32, %c0_i32_0 : i32, i32
  }
  func.func @transform_15(%arg0: i32) -> (i32, i32) {
    %c0_i32 = arith.constant 0 : i32
    %c0_i32_0 = arith.constant 0 : i32
    %c0_i32_1 = arith.constant 0 : i32
    return %c0_i32, %c0_i32_0 : i32, i32
  }
  func.func @transform_16(%arg0: i32) -> (i32, i32) {
    %c0_i32 = arith.constant 0 : i32
    %c0_i32_0 = arith.constant 0 : i32
    %c0_i32_1 = arith.constant 0 : i32
    return %c0_i32, %c0_i32_0 : i32, i32
  }
  func.func @transform_17(%arg0: i32) -> (i32, i32) {
    %c0_i32 = arith.constant 0 : i32
    %c0_i32_0 = arith.constant 0 : i32
    %c0_i32_1 = arith.constant 0 : i32
    return %c0_i32, %c0_i32_0 : i32, i32
  }
  func.func @transform_18(%arg0: i32) -> (i32, i32) {
    %c0_i32 = arith.constant 0 : i32
    %c0_i32_0 = arith.constant 0 : i32
    %c0_i32_1 = arith.constant 0 : i32
    return %c0_i32, %c0_i32_0 : i32, i32
  }
  func.func @transform_19(%arg0: i32) -> (i32, i32) {
    %c0_i32 = arith.constant 0 : i32
    %c0_i32_0 = arith.constant 0 : i32
    %c0_i32_1 = arith.constant 0 : i32
    return %c0_i32, %c0_i32_0 : i32, i32
  }
  func.func @transform_20(%arg0: i32) -> (i32, i32, i32) {
    %c0_i32 = arith.constant 0 : i32
    %c0_i32_0 = arith.constant 0 : i32
    %c0_i32_1 = arith.constant 0 : i32
    return %arg0, %c0_i32, %c0_i32_0 : i32, i32, i32
  }
}

</mosaic_0001>

<bundles_post_ra>
// kernel: fsrcnn_ca_forward.1
= control target key start
LH: loop header
LB: loop body
LE: loop exit
PB: predicated region body
PF: predicated region fallthrough
CT: control target
= control target key end

     0   :  { %s10691_s23 = smov 0   ;;  %s15136_s0 = inlined_call_operand.vmem [shape: f32[2,1,256], index: 0, kind: input, shape index: {}]   ;;  %s15137_s1 = inlined_call_operand.vmem [shape: s32[1,256], index: 1, kind: input, shape index: {}]   ;;  %s15138_s2 = inlined_call_operand.vmem [shape: f32[56,25], index: 2, kind: input, shape index: {}]   ;;  %s15139_s3 = inlined_call_operand.vmem [shape: f32[56,1], index: 3, kind: input, shape index: {}]   ;;  %s15140_s4 = inlined_call_operand.vmem [shape: f32[56,1], index: 4, kind: input, shape index: {}]   ;;  %s15141_s5 = inlined_call_operand.vmem [shape: f32[12,56], index: 5, kind: input, shape index: {}]   ;;  %s15142_s6 = inlined_call_operand.vmem [shape: f32[12,1], index: 6, kind: input, shape index: {}]   ;;  %s15143_s7 = inlined_call_operand.vmem [shape: f32[12,1], index: 7, kind: input, shape index: {}]   ;;  %s15144_s8 = inlined_call_operand.vmem [shape: f32[4,2,12,108], index: 8, kind: input, shape index: {}]   ;;  %s15145_s9 = inlined_call_operand.vmem [shape: f32[4,2,12,1], index: 9, kind: input, shape index: {}]   ;;  %s15146_s10 = inlined_call_operand.vmem [shape: f32[4,2,12,1], index: 10, kind: input, shape index: {}]   ;;  %s15147_s11 = inlined_call_operand.vmem [shape: f32[4,1,1], index: 11, kind: input, shape index: {}]   ;;  %s15148_s12 = inlined_call_operand.vmem [shape: f32[4,12,1], index: 12, kind: input, shape index: {}]   ;;  %s15149_s13 = inlined_call_operand.vmem [shape: f32[12,108], index: 13, kind: input, shape index: {}]   ;;  %s15150_s14 = inlined_call_operand.vmem [shape: f32[12,1], index: 14, kind: input, shape index: {}]   ;;  %s15151_s15 = inlined_call_operand.vmem [shape: f32[56,12], index: 15, kind: input, shape index: {}]   ;;  %s15152_s16 = inlined_call_operand.vmem [shape: f32[56,1], index: 16, kind: input, shape index: {}]   ;;  %s15153_s17 = inlined_call_operand.vmem [shape: f32[56,1], index: 17, kind: input, shape index: {}]   ;;  %s15154_s18 = inlined_call_operand.vmem [shape: f32[4,1400], index: 18, kind: input, shape index: {}]   ;;  %s15155_s19 = inlined_call_operand.<no memory space> [shape: f32[1,1], index: 19, kind: input, shape index: {}]   ;;  %s15156_s20 = inlined_call_operand.vmem [shape: f32[2,4,256], index: 20, kind: output, shape index: {}]  }
   0x1   :  { %15409 = sst [smem:[#allocation87_spill]] %s15136_s0  ;;  %v25_v0 = vstv %s15155_s19 }
   0x2   :  { %15410 = sst [smem:[#allocation88_spill]] %s15137_s1  ;;  %26 = vst [vmem:[#allocation2] sm:$0x1] %v25_v0 }
   0x3   :  { %15411 = sst [smem:[#allocation89_spill]] %s15138_s2 }
   0x4   :  { %15412 = sst [smem:[#allocation90_spill]] %s15139_s3 }
   0x5   :  { %15413 = sst [smem:[#allocation91_spill]] %s15140_s4 }
   0x6   :  { %15414 = sst [smem:[#allocation92_spill]] %s15141_s5 }
   0x7   :  { %15415 = sst [smem:[#allocation93_spill]] %s15142_s6 }
   0x8   :  { %15416 = sst [smem:[#allocation94_spill]] %s15143_s7 }
   0x9   :  { %15417 = sst [smem:[#allocation95_spill]] %s15144_s8 }
   0xa LB: > { %s7513_s24 = sadd.s32 4294967295, %s10553_s23   ;;  %p7517_p0 = scmp.ge.s32.totalorder %s10553_s23, 1  ;;  %s10553_s23 = sphi %s10691_s23, %s32_s23  }
   0xb   : > { %p563_p1 = scmp.lt.s32.totalorder %s10553_s23, 3 }
   0xd   : > { %p564_p2 = pnand %p7517_p0, %p563_p1 }
   0xf   : > { %567 = sbr.rel (%p564_p2) target bundleno = 6447 (0x192f), region = 100 }
  0x16   : > { %p620_p3 = scmp.lt.s32.totalorder %s7513_s24, 1  ;;  %v646_v1 = vlaneseq  ;;  %s15418_s3 = sld [smem:[#allocation87_spill]]  ;;  %v15257_v10 = vmov 0.0   ;;  %v15258_v15 = vmov 0   ;;  %v10581_v36 = vmov 1966171168  }
  0x17   : > { %s15186_s27 = smov 33   ;;  %s15184_s28 = smov 34   ;;  %1624 = vmatprep.mubr.f32.mxu0 %v15257_v10  ;;  %1836 = vmatprep.mubr.f32.mxu1 %v15257_v10  ;;  %v666_v37 = vunpack.c.l.s4 %v10581_v36  ;;  %vm15202_vm0 = vcmask 269312   ;;  %vm15204_vm1 = vcmask 277504   ;;  %vm15215_vm2 = vcmask 121856  }
  0x18   : > { %s16514_s24 = smov (!%p620_p3, %s7513_s24), 1  ;;  %v10701_v2 = vshrl.u32 %v646_v1, 7  ;;  %s15228_s4 = smov 15   ;;  %8952 = vset.pattern.permute.xlu1 %v15258_v15  ;;  %8951 = vset.pattern.permute.xlu0 %v15258_v15  ;;  %vm15203_vm3 = vcmask 113664   ;;  %vm15200_vm4 = vcmask 15360   ;;  %vm15205_vm5 = vcmask 7168  }
  0x19   : > { %s7518_s19 = sshll.u32 %s16514_s24, 1  ;;  %s15160_s29 = smov 14   ;;  %v667_v42 = vunpack.c.0.s8 %v666_v37  ;;  %vm15201_vm6 = vcmask 252928   ;;  %vm1365_vm9 = vcmask 1040384   ;;  %vm15206_vm12 = vcmask 244736  }
  0x1a   : > { %v10705_v3 = vsub.s32 0, %v10701_v2  ;;  %v10711_v4 = vsub.s32 1, %v10701_v2  ;;  %s15162_s30 = smov 2   ;;  %s15180_s0 = smov 31   ;;  %vm15207_vm13 = vcmask 146432   ;;  %vm15212_vm14 = vcmask 1039360  }
  0x1b   : > { %s15221_s21 = smov 1   ;;  %s15166_s1 = smov 30   ;;  %v10868_v51 = vsub.s32 %v667_v42, %v10701_v2  ;;  %vm15209_vm15 = vcmask 924672  }
  0x1c   : > { %s623_s26 = scalar_lea.vmem %s15418_s3, %s7518_s19  ;;  %s15170_s22 = smov 18  }
  0x1d   : > { %v630_v5 = vld [vmem:[%s623_s26] sm:$0x3]  ;;  %s15198_s19 = smov 127   ;;  %s15196_s2 = smov 113  }
  0x1e   : > { %v10714_v6 = vrot.slane %v630_v5, %v10705_v3  ;;  %v10721_v7 = vrot.slane %v630_v5, %v10711_v4  ;;  %s15237_s25 = smov 17   ;;  %s15164_s3 = smov 126  }
  0x1f   : > { %s15188_s26 = smov 111   ;;  %s15421_s6 = sld [smem:[#allocation93_spill]] }
  0x20   : > { %681 = vrot.lane.b32.xlu1 %v10714_v6, %s15186_s27  ;;  %654 = vrot.lane.b32.xlu0 %v10714_v6, %s15184_s28  ;;  %v8931_v8 = vpack.i.bf16 %v10721_v7, %v10714_v6  ;;  %v8936_v9 = vpack.i.bf16 %v10714_v6, %v10721_v7  ;;  %s15422_s7 = sld [smem:[#allocation94_spill]]  ;;  %s15425_s5 = sld [smem:[#allocation92_spill]] }
  0x21   : > { %s15480_s8 = sld [smem:[#allocation95_spill]] }
  0x24   : > { %683 = vrot.lane.b32.xlu1 %v10721_v7, %s15186_s27  ;;  %656 = vrot.lane.b32.xlu0 %v10721_v7, %s15184_s28  ;;  %s15419_s28 = sld [smem:[#allocation90_spill]]  ;;  %s15905_s27 = smov 31  }
  0x25   : > { %v1753_v46 = vld [vmem:[%s15421_s6] sm:$0xff]  ;;  %v1754_v47 = vld [vmem:[%s15421_s6 + $0x8] sm:$0xf]  ;;  %s15534_s6 = smov 17  }
  0x26   : > { %v1849_v58 = vld [vmem:[%s15422_s7] sm:$0xff]  ;;  %v1850_v59 = vld [vmem:[%s15422_s7 + $0x8] sm:$0xf]  ;;  %s15906_s7 = smov 32  }
  0x28   : > { %832 = vrot.lane.b32.xlu1 %v10721_v7, %s15228_s4  ;;  %830 = vrot.lane.b32.xlu0 %v10714_v6, %s15228_s4 }
  0x2a   : > { %v639_v11 = vld [vmem:[%s15419_s28 + $0x8] sm:$0xff]  ;;  %v638_v12 = vld [vmem:[%s15419_s28] sm:$0xff]  ;;  %v640_v20 = vld [vmem:[%s15419_s28 + $0x10] sm:$0xff] }
  0x2b   : > { %v641_v21 = vld [vmem:[%s15419_s28 + $0x18] sm:$0xff]  ;;  %v642_v28 = vld [vmem:[%s15419_s28 + $0x20] sm:$0xff]  ;;  %v643_v29 = vld [vmem:[%s15419_s28 + $0x28] sm:$0xff] }
  0x2c   : > { %858 = vrot.lane.b32.xlu1 %v10721_v7, %s15160_s29  ;;  %856 = vrot.lane.b32.xlu0 %v10714_v6, %s15160_s29  ;;  %s15168_s29 = smov 114   ;;  %v644_v38 = vld [vmem:[%s15419_s28 + $0x30] sm:$0xff]  ;;  %s15910_s28 = smov 18  }
  0x30   : > { %884 = vrot.lane.b32.xlu1 %v10721_v7, %s15162_s30  ;;  %882 = vrot.lane.b32.xlu0 %v10714_v6, %s15162_s30  ;;  %s15174_s30 = smov 110  }
  0x34   : > { %718 = vrot.lane.b32.xlu1 %v10721_v7, %s15180_s0  ;;  %716 = vrot.lane.b32.xlu0 %v10714_v6, %s15180_s0  ;;  %s15429_s0 = smov 111  }
  0x38   : > { %910 = vrot.lane.b32.xlu1 %v10721_v7, %s15221_s21  ;;  %908 = vrot.lane.b32.xlu0 %v10714_v6, %s15221_s21 }
  0x3c   : > { %745 = vrot.lane.b32.xlu1 %v10721_v7, %s15166_s1  ;;  %743 = vrot.lane.b32.xlu0 %v10714_v6, %s15166_s1  ;;  %s15178_s1 = smov 97  }
  0x40   : > { %772 = vrot.lane.b32.xlu1 %v10721_v7, %s15170_s22  ;;  %770 = vrot.lane.b32.xlu0 %v10714_v6, %s15170_s22  ;;  %s15182_s22 = smov 95  }
  0x44   : > { %936 = vrot.lane.b32.xlu1 %v10721_v7, %s15198_s19  ;;  %934 = vrot.lane.b32.xlu0 %v10714_v6, %s15198_s19  ;;  %s15917_s19 = smov 2  }
  0x48   : > { %1014 = vrot.lane.b32.xlu1 %v10721_v7, %s15196_s2  ;;  %1012 = vrot.lane.b32.xlu0 %v10714_v6, %s15196_s2  ;;  %s15423_s2 = sld [smem:[#allocation88_spill]] }
  0x4c   : > { %798 = vrot.lane.b32.xlu1 %v10721_v7, %s15237_s25  ;;  %796 = vrot.lane.b32.xlu0 %v10714_v6, %s15237_s25 }
  0x50   : > { %962 = vrot.lane.b32.xlu1 %v10721_v7, %s15164_s3  ;;  %960 = vrot.lane.b32.xlu0 %v10714_v6, %s15164_s3  ;;  %s15172_s3 = smov 98  }
  0x54   : > { %1048 = vrot.lane.b32.xlu1 %v10721_v7, %s15188_s26  ;;  %1046 = vrot.lane.b32.xlu0 %v10714_v6, %s15188_s26  ;;  %s15925_s26 = smov 126  }
  0x58   : > { %988 = vrot.lane.b32.xlu1 %v10721_v7, %s15168_s29  ;;  %986 = vrot.lane.b32.xlu0 %v10714_v6, %s15168_s29  ;;  %s15176_s29 = smov 32  }
  0x5c   : > { %1074 = vrot.lane.b32.xlu1 %v10721_v7, %s15174_s30  ;;  %1072 = vrot.lane.b32.xlu0 %v10714_v6, %s15174_s30  ;;  %s15192_s30 = smov 94  }
  0x60   : > { %1100 = vrot.lane.b32.xlu1 %v10721_v7, %s15172_s3  ;;  %1098 = vrot.lane.b32.xlu0 %v10714_v6, %s15172_s3  ;;  %s15194_s3 = smov 112  }
  0x64   : > { %1124 = vrot.lane.b32.xlu1 %v10714_v6, %s15178_s1  ;;  %8932 = vrot.lane.b32.xlu0 %v8931_v8, %s15176_s29  ;;  %s15190_s29 = smov 96  }
  0x68   : > { %1158 = vrot.lane.b32.xlu1 %v10714_v6, %s15182_s22  ;;  %1126 = vrot.lane.b32.xlu0 %v10721_v7, %s15178_s1  ;;  %s15239_s1 = smov 16  }
  0x6c   : > { %8937 = vrot.lane.b32.xlu1 %v8936_v9, %s15194_s3  ;;  %1160 = vrot.lane.b32.xlu0 %v10721_v7, %s15182_s22  ;;  %s15420_s3 = sld [smem:[#allocation91_spill]]  ;;  %s15424_s22 = sld [smem:[#allocation89_spill]] }
  0x70   : > { %1186 = vrot.lane.b32.xlu1 %v10721_v7, %s15192_s30  ;;  %1184 = vrot.lane.b32.xlu0 %v10714_v6, %s15192_s30  ;;  %s15427_s30 = smov 113  }
  0x72   : > { %v1667_v16 = vld [vmem:[%s15420_s3] sm:$0xff]  ;;  %v1668_v17 = vld [vmem:[%s15420_s3 + $0x8] sm:$0xff]  ;;  %v1669_v24 = vld [vmem:[%s15420_s3 + $0x10] sm:$0xff] }
  0x73   : > { %v1670_v25 = vld [vmem:[%s15420_s3 + $0x18] sm:$0xff]  ;;  %v1671_v32 = vld [vmem:[%s15420_s3 + $0x20] sm:$0xff]  ;;  %v1672_v33 = vld [vmem:[%s15420_s3 + $0x28] sm:$0xff] }
  0x74   : > { %8947 = vrot.lane.b32.xlu1 %v8936_v9, %s15190_s29  ;;  %8942 = vrot.lane.b32.xlu0 %v8931_v8, %s15239_s1  ;;  %v1673_v39 = vld [vmem:[%s15420_s3 + $0x30] sm:$0xff]  ;;  %v10887_v8 = vld [vmem:[%s15423_s2] sm:$0x3]  ;;  %s15426_s29 = smov 127   ;;  %s15428_s2 = smov 112  }
  0x75   : > { %vm689_vm7 = vcmp.ge.s32.totalorder %v10887_v8, 1  ;;  %vm15224_vm8 = vcmp.ge.s32.totalorder %v10887_v8, 2  ;;  %vm724_vm10 = vcmp.lt.s32.totalorder %v10887_v8, 15  ;;  %vm15223_vm11 = vcmp.lt.s32.totalorder %v10887_v8, 14  ;;  %s15902_s3 = smov 34  }
  0x78   : > { %1506 = vperm.xlu1 %8952, %v639_v11   ;;  %1501 = vperm.xlu0 %8951, %v638_v12  }
  0x7c   : > { %1690 = vperm.xlu1 %8952, %v1667_v16   ;;  %1695 = vperm.xlu0 %8951, %v1668_v17  }
  0x80   : > { %1511 = vperm.xlu1 %8952, %v640_v20   ;;  %1516 = vperm.xlu0 %8951, %v641_v21  }
  0x84   : > { %1700 = vperm.xlu1 %8952, %v1669_v24   ;;  %1705 = vperm.xlu0 %8951, %v1670_v25  }
  0x88   : > { %1521 = vperm.xlu1 %8952, %v642_v28   ;;  %1526 = vperm.xlu0 %8951, %v643_v29  }
  0x8c   : > { %1710 = vperm.xlu1 %8952, %v1671_v32   ;;  %1715 = vperm.xlu0 %8951, %v1672_v33  }
  0x90   : > { %1531 = vperm.xlu1 %8952, %v644_v38   ;;  %1720 = vperm.xlu0 %8951, %v1673_v39  }
  0x92   : > { %v682_v13 = vpop.permute.xlu1 %681  ;;  %v655_v14 = vpop.permute.xlu0 %654 }
  0x93   : > { %v688_v43 = vsel %vm15202_vm0, 0.0, %v682_v13  ;;  %v661_v48 = vsel %vm15204_vm1, 0.0, %v655_v14 }
  0x94   : > { %1757 = vperm.xlu1 %8952, %v1753_v46   ;;  %1762 = vperm.xlu0 %8951, %v1754_v47  }
  0x96   : > { %v684_v18 = vpop.permute.xlu1 %683  ;;  %v657_v19 = vpop.permute.xlu0 %656 }
  0x97   : > { %v686_v44 = vsel %vm15202_vm0, %v682_v13, %v684_v18  ;;  %v659_v45 = vsel %vm15204_vm1, %v655_v14, %v657_v19  ;;  %vm1368_vm0 = vcmask 1041408   ;;  %vm15210_vm1 = vcmask 932864  }
  0x98   : > { %v691_v52 = vcombine.low %v688_v43, %v686_v44  ;;  %v664_v53 = vcombine.low %v661_v48, %v659_v45  ;;  %1857 = vperm.xlu1 %8952, %v1849_v58   ;;  %1862 = vperm.xlu0 %8951, %v1850_v59  }
  0x9a   : > { %v833_v22 = vpop.permute.xlu1 %832  ;;  %v831_v23 = vpop.permute.xlu0 %830  ;;  %v698_v62 = vrot.slane %v691_v52, %v10868_v51  ;;  %v671_v1 = vrot.slane %v664_v53, %v10868_v51 }
  0x9b   : > { %v835_v54 = vsel %vm15215_vm2, %v831_v23, %v833_v22  ;;  %v837_v55 = vsel %vm15215_vm2, 0.0, %v831_v23  ;;  %vm15219_vm2 = vcmask 769024  }
  0x9c   : > { %v839_v63 = vcombine.low %v837_v55, %v835_v54  ;;  %v705_v14 = vrot.slane %v698_v62, %v10868_v51  ;;  %v678_v19 = vrot.slane %v671_v1, %v10868_v51 }
  0x9e   : > { %v859_v26 = vpop.permute.xlu1 %858  ;;  %v857_v27 = vpop.permute.xlu0 %856  ;;  %v846_v16 = vrot.slane %v839_v63, %v10868_v51  ;;  %v707_v25 = vsel %vm689_vm7, %v705_v14, 0.0  ;;  %v680_v29 = vsel %vm15224_vm8, %v678_v19, 0.0 }
  0x9f   : > { %v861_v56 = vsel %vm15203_vm3, %v857_v27, %v859_v26  ;;  %v863_v57 = vsel %vm15203_vm3, 0.0, %v857_v27  ;;  %v1229_v32 = vrot.slane %v707_v25, %v10711_v4  ;;  %v1225_v47 = vrot.slane %v707_v25, %v10705_v3 }
  0xa0   : > { %v865_v0 = vcombine.low %v863_v57, %v861_v56  ;;  %v853_v26 = vrot.slane %v846_v16, %v10868_v51  ;;  %v1214_v48 = vrot.slane %v680_v29, %v10705_v3  ;;  %vm15211_vm3 = vcmask 908288  }
  0xa2   : > { %v885_v30 = vpop.permute.xlu1 %884  ;;  %v883_v31 = vpop.permute.xlu0 %882  ;;  %v872_v17 = vrot.slane %v865_v0, %v10868_v51  ;;  %v855_v36 = vsel %vm724_vm10, %v853_v26, 0.0  ;;  %v10949_v14 = vsel %vm1365_vm9, %v1214_v48, %v1225_v47 }
  0xa3   : > { %v887_v2 = vsel %vm15200_vm4, %v883_v31, %v885_v30  ;;  %v889_v5 = vsel %vm15200_vm4, 0.0, %v883_v31  ;;  %vm15225_vm4 = vcmask 138240   ;;  %v1294_v54 = vrot.slane %v855_v36, %v10711_v4 }
  0xa4   : > { %v891_v18 = vcombine.low %v889_v5, %v887_v2  ;;  %v879_v27 = vrot.slane %v872_v17, %v10868_v51 }
  0xa6   : > { %v719_v34 = vpop.permute.xlu1 %718  ;;  %v717_v35 = vpop.permute.xlu0 %716  ;;  %v898_v28 = vrot.slane %v891_v18, %v10868_v51  ;;  %v881_v37 = vsel %vm15223_vm11, %v879_v27, 0.0 }
  0xa7   : > { %v721_v20 = vsel %vm15201_vm6, %v717_v35, %v719_v34  ;;  %v723_v21 = vsel %vm15201_vm6, 0.0, %v717_v35  ;;  %vm15208_vm6 = vcmask 1031168   ;;  %v1218_v35 = vrot.slane %v680_v29, %v10711_v4 }
  0xa8   : > { %v726_v30 = vcombine.low %v723_v21, %v721_v20  ;;  %v905_v38 = vrot.slane %v898_v28, %v10868_v51  ;;  %v1301_v56 = vrot.slane %v881_v37, %v10705_v3 }
  0xa9   : > { %v10930_v53 = vsel %vm1365_vm9, %v1218_v35, %v1229_v32 }
  0xaa   : > { %v911_v40 = vpop.permute.xlu1 %910  ;;  %v909_v41 = vpop.permute.xlu0 %908  ;;  %v733_v39 = vrot.slane %v726_v30, %v10868_v51  ;;  %v907_v57 = vsel %vm15224_vm8, %v905_v38, 0.0 }
  0xab   : > { %v913_v9 = vsel %vm15205_vm5, %v909_v41, %v911_v40  ;;  %v915_v11 = vsel %vm15205_vm5, 0.0, %v909_v41  ;;  %vm1371_vm5 = vcmask 1042432   ;;  %v1316_v17 = vrot.slane %v907_v57, %v10711_v4 }
  0xac   : > { %v917_v22 = vcombine.low %v915_v11, %v913_v9  ;;  %v1312_v25 = vrot.slane %v907_v57, %v10705_v3 }
  0xae   : > { %v10863_v49 = vpop.permute.xlu1 %745  ;;  %v10865_v50 = vpop.permute.xlu0 %743  ;;  %v924_v31 = vrot.slane %v917_v22, %v10868_v51 }
  0xaf   : > { %v748_v40 = vsel %vm15206_vm12, %v10865_v50, %v10863_v49  ;;  %v750_v44 = vsel %vm15206_vm12, 0.0, %v10865_v50  ;;  %v1305_v50 = vrot.slane %v881_v37, %v10711_v4  ;;  %vm15213_vm12 = vcmask 900096  }
  0xb0   : > { %v931_v43 = vrot.slane %v924_v31, %v10868_v51  ;;  %v753_v58 = vcombine.low %v750_v44, %v748_v40 }
  0xb1   : > { %v1387_v16 = vsel %vm1365_vm9, %v1294_v54, %v1305_v50 }
  0xb2   : > { %v773_v60 = vpop.permute.xlu1 %772  ;;  %v771_v61 = vpop.permute.xlu0 %770  ;;  %v760_v18 = vrot.slane %v753_v58, %v10868_v51  ;;  %v1389_v38 = vsel %vm1368_vm0, %v1387_v16, %v1316_v17 }
  0xb3   : > { %v775_v45 = vsel %vm15207_vm13, %v771_v61, %v773_v60  ;;  %v777_v46 = vsel %vm15207_vm13, 0.0, %v771_v61  ;;  %v740_v60 = vrot.slane %v733_v39, %v10868_v51  ;;  %v933_v61 = vsel %vm689_vm7, %v931_v43, 0.0 }
  0xb4   : > { %v779_v59 = vcombine.low %v777_v46, %v775_v45  ;;  %vm15231_vm13 = vcmask 1043456   ;;  %v1327_v21 = vrot.slane %v933_v61, %v10711_v4  ;;  %v1323_v31 = vrot.slane %v933_v61, %v10705_v3 }
  0xb5   : > { %v10960_v26 = vsel %vm724_vm10, %v740_v60, 0.0  ;;  %v767_v35 = vrot.slane %v760_v18, %v10868_v51 }
  0xb6   : > { %v937_v12 = vpop.permute.xlu1 %936  ;;  %v935_v13 = vpop.permute.xlu0 %934  ;;  %v786_v19 = vrot.slane %v779_v59, %v10868_v51  ;;  %v1241_v43 = vrot.slane %v10960_v26, %v10705_v3  ;;  %v1245_v44 = vrot.slane %v10960_v26, %v10711_v4 }
  0xb7   : > { %v941_v41 = vsel %vm15212_vm14, %v937_v12, 0.0  ;;  %v939_v42 = vsel %vm15212_vm14, %v935_v13, %v937_v12  ;;  %v1290_v12 = vrot.slane %v855_v36, %v10705_v3  ;;  %vm1380_vm14 = vcmask 1045504  }
  0xb8   : > { %v943_v55 = vcombine.low %v939_v42, %v941_v41  ;;  %v793_v36 = vrot.slane %v786_v19, %v10868_v51  ;;  %v1391_v42 = vsel %vm1371_vm5, %v1389_v38, %v1327_v21 }
  0xb9   : > { %v1393_v58 = vsel %vm15231_vm13, %v1391_v42, %v10721_v7 }
  0xba   : > { %v1015_v23 = vpop.permute.xlu1 %1014  ;;  %v1013_v24 = vpop.permute.xlu0 %1012  ;;  %v950_v13 = vrot.slane %v943_v55, %v10868_v51  ;;  %v10987_v55 = vsel %vm15223_vm11, %v767_v35, 0.0 }
  0xbb   : > { %v1019_v0 = vsel %vm15209_vm15, %v1015_v23, 0.0  ;;  %v1017_v1 = vsel %vm15209_vm15, %v1013_v24, %v1015_v23  ;;  %v1386_v24 = vsel %vm1365_vm9, %v1290_v12, %v1301_v56  ;;  %vm1377_vm15 = vcmask 1044480  }
  0xbc   : > { %v1021_v22 = vcombine.low %v1017_v1, %v1019_v0  ;;  %v957_v32 = vrot.slane %v950_v13, %v10868_v51  ;;  %v1388_v48 = vsel %vm1368_vm0, %v1386_v24, %v1312_v25  ;;  %v10991_v56 = vsel %vm15224_vm8, %v793_v36, 0.0 }
  0xbd   : > { %v1390_v50 = vsel %vm1371_vm5, %v1388_v48, %v1323_v31  ;;  %v1252_v7 = vrot.slane %v10987_v55, %v10705_v3  ;;  %v1267_v18 = vrot.slane %v10991_v56, %v10711_v4 }
  0xbe   : > { %v799_v33 = vpop.permute.xlu1 %798  ;;  %v797_v34 = vpop.permute.xlu0 %796  ;;  %v1028_v39 = vrot.slane %v1021_v22, %v10868_v51 }
  0xbf   : > { %v801_v2 = vsel %vm15225_vm4, %v797_v34, %v799_v33  ;;  %v803_v5 = vsel %vm15225_vm4, 0.0, %v797_v34 }
  0xc0   : > { %v805_v23 = vcombine.low %v803_v5, %v801_v2  ;;  %v1035_v59 = vrot.slane %v1028_v39, %v10868_v51 }
  0xc2   : > { %v963_v52 = vpop.permute.xlu1 %962  ;;  %v961_v49 = vpop.permute.xlu0 %960  ;;  %v812_v40 = vrot.slane %v805_v23, %v10868_v51  ;;  %v11018_v19 = vsel %vm689_vm7, %v1035_v59, 0.0 }
  0xc3   : > { %v967_v62 = vsel %vm15208_vm6, %v963_v52, 0.0  ;;  %v965_v63 = vsel %vm15208_vm6, %v961_v49, %v963_v52  ;;  %vm15214_vm6 = vcmask 801792   ;;  %v959_v52 = vsel %vm724_vm10, %v957_v32, 0.0 }
  0xc4   : > { %v969_v20 = vcombine.low %v965_v63, %v967_v62  ;;  %v819_v60 = vrot.slane %v812_v40, %v10868_v51  ;;  %v1336_v63 = vrot.slane %v959_v52, %v10705_v3  ;;  %v1340_v0 = vrot.slane %v959_v52, %v10711_v4 }
  0xc5   : > { %v1408_v35 = vrot.slane %v11018_v19, %v10711_v4 }
  0xc6   : > { %v1049_v9 = vpop.permute.xlu1 %1048  ;;  %v1047_v11 = vpop.permute.xlu0 %1046  ;;  %v976_v37 = vrot.slane %v969_v20, %v10868_v51  ;;  %v11024_v22 = vsel %vm689_vm7, %v819_v60, 0.0 }
  0xc7   : > { %v1053_v27 = vsel %vm15211_vm3, %v1049_v9, 0.0  ;;  %v1051_v28 = vsel %vm15211_vm3, %v1047_v11, %v1049_v9  ;;  %vm15216_vm3 = vcmask 793600   ;;  %v1392_v9 = vsel %vm15231_vm13, %v1390_v50, %v10714_v6 }
  0xc8   : > { %v1055_v41 = vcombine.low %v1051_v28, %v1053_v27  ;;  %v983_v57 = vrot.slane %v976_v37, %v10868_v51  ;;  %v1256_v11 = vrot.slane %v10987_v55, %v10711_v4  ;;  %v1263_v6 = vrot.slane %v10991_v56, %v10705_v3 }
  0xc9   : > { %v1395_v28 = vsel %vm1377_vm15, %v1393_v58, %v1340_v0  ;;  %v1278_v36 = vrot.slane %v11024_v22, %v10711_v4  ;;  %v1274_v37 = vrot.slane %v11024_v22, %v10705_v3 }
  0xca   : > { %v989_v29 = vpop.permute.xlu1 %988  ;;  %v987_v30 = vpop.permute.xlu0 %986  ;;  %v1062_v61 = vrot.slane %v1055_v41, %v10868_v51  ;;  %v985_v17 = vsel %vm15223_vm11, %v983_v57, 0.0 }
  0xcb   : > { %v993_v33 = vsel %vm15210_vm1, %v989_v29, 0.0  ;;  %v991_v34 = vsel %vm15210_vm1, %v987_v30, %v989_v29  ;;  %vm15217_vm1 = vcmask 261120   ;;  %v1394_v29 = vsel %vm1377_vm15, %v1392_v9, %v1336_v63 }
  0xcc   : > { %v995_v45 = vcombine.low %v991_v34, %v993_v33  ;;  %v1069_v20 = vrot.slane %v1062_v61, %v10868_v51  ;;  %v1351_v32 = vrot.slane %v985_v17, %v10711_v4  ;;  %v1347_v33 = vrot.slane %v985_v17, %v10705_v3 }
  0xcd   : > { %v1404_v34 = vrot.slane %v11018_v19, %v10705_v3 }
  0xce   : > { %v1075_v46 = vpop.permute.xlu1 %1074  ;;  %v1073_v47 = vpop.permute.xlu0 %1072  ;;  %v1002_v1 = vrot.slane %v995_v45, %v10868_v51  ;;  %v1071_v38 = vsel %vm724_vm10, %v1069_v20, 0.0  ;;  %v11053_v50 = vsel %vm1380_vm14, %v1395_v28, %v1351_v32  ;;  %v11056_v57 = vsel %vm1380_vm14, %v1394_v29, %v1347_v33 }
  0xcf   : > { %v1079_v49 = vsel %vm15213_vm12, %v1075_v46, 0.0  ;;  %v1077_v54 = vsel %vm15213_vm12, %v1073_v47, %v1075_v46  ;;  %vm15218_vm12 = vcmask 777216   ;;  %v1420_v58 = vrot.slane %v1071_v38, %v10705_v3 }
  0xd0   : > { %v1081_v62 = vcombine.low %v1077_v54, %v1079_v49  ;;  %v1009_v23 = vrot.slane %v1002_v1, %v10868_v51 }
  0xd2   : > { %v1101_v2 = vpop.permute.xlu1 %1100  ;;  %v1099_v5 = vpop.permute.xlu0 %1098  ;;  %v1088_v21 = vrot.slane %v1081_v62, %v10868_v51  ;;  %v11048_v52 = vsel %vm15224_vm8, %v1009_v23, 0.0  ;;  %v1424_v62 = vrot.slane %v1071_v38, %v10711_v4 }
  0xd3   : > { %v1105_v12 = vsel %vm15214_vm6, %v1101_v2, 0.0  ;;  %v1103_v13 = vsel %vm15214_vm6, %v1099_v5, %v1101_v2  ;;  %vm15227_vm6 = vcmask 916480   ;;  %v1362_v0 = vrot.slane %v11048_v52, %v10711_v4 }
  0xd4   : > { %v1107_v16 = vcombine.low %v1103_v13, %v1105_v12  ;;  %v1095_v39 = vrot.slane %v1088_v21, %v10868_v51  ;;  %v1358_v1 = vrot.slane %v11048_v52, %v10705_v3 }
  0xd6   : > { %v1114_v24 = vrot.slane %v1107_v16, %v10868_v51  ;;  %v1125_v25 = vpop.permute.xlu1 %1124  ;;  %v8933_v27 = vpop.permute.xlu0 %8932  ;;  %v1097_v63 = vsel %vm15223_vm11, %v1095_v39, 0.0 }
  0xd7   : > { %v8935_v30 = vunpack.i.h.bf16 %v8933_v27  ;;  %v8934_v31 = vunpack.i.l.bf16 %v8933_v27  ;;  %v1431_v20 = vrot.slane %v1097_v63, %v10705_v3  ;;  %v1435_v21 = vrot.slane %v1097_v63, %v10711_v4 }
  0xd8   : > { %v1121_v42 = vrot.slane %v1114_v24, %v10868_v51 }
  0xd9   : > { %v713_v40 = vsel %vm15217_vm1, %v8934_v31, %v8935_v30  ;;  %v715_v41 = vsel %vm15217_vm1, 0.0, %v8934_v31  ;;  %vm15232_vm1 = vcmask 130048  }
  0xda   : > { %v1233_v45 = vrot.slane %v715_v41, 6  ;;  %v1234_v46 = vrot.slane %v713_v40, 6  ;;  %v1159_v47 = vpop.permute.xlu1 %1158  ;;  %v1127_v48 = vpop.permute.xlu0 %1126  ;;  %v1123_v2 = vsel %vm15224_vm8, %v1121_v42, 0.0  ;;  %vm15461_vm8 = vcmask 1039360  }
  0xdb   : > { %v1129_v49 = vsel %vm15216_vm3, %v1125_v25, %v1127_v48  ;;  %v1131_v54 = vsel %vm15216_vm3, %v1127_v48, 0.0  ;;  %vm15220_vm3 = vcmask 785408   ;;  %v1446_v33 = vrot.slane %v1123_v2, %v10711_v4 }
  0xdc   : > { %v1369_v59 = vsel %vm1368_vm0, %v10949_v14, %v1233_v45  ;;  %v1133_v60 = vcombine.low %v1129_v49, %v1131_v54  ;;  %v1370_v61 = vsel %vm1368_vm0, %v10930_v53, %v1234_v46 }
  0xdd   : > { %v1373_v53 = vsel %vm1371_vm5, %v1370_v61, %v1245_v44  ;;  %v1372_v12 = vsel %vm1371_vm5, %v1369_v59, %v1241_v43  ;;  %v1442_v44 = vrot.slane %v1123_v2, %v10705_v3 }
  0xde   : > { %v1140_v14 = vrot.slane %v1133_v60, %v10868_v51  ;;  %v8938_v5 = vpop.permute.xlu1 %8937  ;;  %v1161_v9 = vpop.permute.xlu0 %1160  ;;  %v1376_v25 = vsel %vm15231_vm13, %v1373_v53, %v1256_v11  ;;  %v1375_v32 = vsel %vm15231_vm13, %v1372_v12, %v1252_v7 }
  0xdf   : > { %v8940_v13 = vunpack.i.h.bf16 %v8938_v5  ;;  %v8939_v16 = vunpack.i.l.bf16 %v8938_v5  ;;  %v1163_v17 = vsel %vm15218_vm12, %v1159_v47, %v1161_v9  ;;  %v1165_v19 = vsel %vm15218_vm12, %v1161_v9, 0.0 }
  0xe0   : > { %v1147_v23 = vrot.slane %v1140_v14, %v10868_v51  ;;  %v1167_v24 = vcombine.low %v1163_v17, %v1165_v19  ;;  %vm1383_vm12 = vcmask 1046528   ;;  %v1379_v46 = vsel %vm1377_vm15, %v1376_v25, %v1267_v18 }
  0xe1   : > { %v1043_v26 = vsel %vm15227_vm6, %v8940_v13, %v8939_v16  ;;  %v1045_v43 = vsel %vm15227_vm6, %v8939_v16, 0.0  ;;  %v1378_v47 = vsel %vm1377_vm15, %v1375_v32, %v1263_v6  ;;  %v633_v32 = vld [vmem:[%s15424_s22 + $0x10] sm:$0xff] }
  0xe2   : > { %v1412_v27 = vrot.slane %v1043_v26, 7  ;;  %v1413_v28 = vrot.slane %v1045_v43, 7  ;;  %v1174_v29 = vrot.slane %v1167_v24, %v10868_v51  ;;  %v1187_v30 = vpop.permute.xlu1 %1186  ;;  %v1185_v31 = vpop.permute.xlu0 %1184  ;;  %v1149_v38 = vsel %vm689_vm7, %v1147_v23, 0.0 }
  0xe3   : > { %v1191_v39 = vsel %vm15219_vm2, %v1187_v30, 0.0  ;;  %v1189_v11 = vsel %vm15219_vm2, %v1185_v31, %v1187_v30  ;;  %v1453_v59 = vrot.slane %v1149_v38, %v10705_v3  ;;  %v1457_v18 = vrot.slane %v1149_v38, %v10711_v4  ;;  %v635_v38 = vld [vmem:[%s15424_s22 + $0x20] sm:$0xff] }
  0xe4   : > { %v1485_v40 = vsel %vm1365_vm9, %v1404_v34, %v1412_v27  ;;  %v1486_v41 = vsel %vm1365_vm9, %v1408_v35, %v1413_v28  ;;  %v1181_v42 = vrot.slane %v1174_v29, %v10868_v51  ;;  %v1193_v45 = vcombine.low %v1189_v11, %v1191_v39  ;;  %v636_v39 = vld [vmem:[%s15424_s22 + $0x28] sm:$0xff]  ;;  %v637_v11 = vld [vmem:[%s15424_s22 + $0x30] sm:$0xff] }
  0xe5   : > { %v1487_v55 = vsel %vm1368_vm0, %v1485_v40, %v1420_v58  ;;  %v1488_v7 = vsel %vm1368_vm0, %v1486_v41, %v1424_v62  ;;  %v1381_v24 = vsel %vm1380_vm14, %v1378_v47, %v1274_v37  ;;  %v1382_v26 = vsel %vm1380_vm14, %v1379_v46, %v1278_v36 }
  0xe6   : > { %v1489_v34 = vsel %vm1371_vm5, %v1487_v55, %v1431_v20  ;;  %v1490_v35 = vsel %vm1371_vm5, %v1488_v7, %v1435_v21  ;;  %v1183_v48 = vsel %vm724_vm10, %v1181_v42, 0.0  ;;  %v1200_v49 = vrot.slane %v1193_v45, %v10868_v51  ;;  %v8948_v54 = vpop.permute.xlu1 %8947  ;;  %v8943_v58 = vpop.permute.xlu0 %8942 }
  0xe7   : > { %v8950_v60 = vunpack.i.h.bf16 %v8948_v54  ;;  %v8949_v61 = vunpack.i.l.bf16 %v8948_v54  ;;  %v1492_v6 = vsel %vm15231_vm13, %v1490_v35, %v1446_v33  ;;  %v8945_v62 = vunpack.i.h.bf16 %v8943_v58  ;;  %v634_v33 = vld [vmem:[%s15424_s22 + $0x18] sm:$0xff] }
  0xe8   : > { %v1207_v56 = vrot.slane %v1200_v49, %v10868_v51  ;;  %v8944_v63 = vunpack.i.l.bf16 %v8943_v58  ;;  %v1473_v2 = vrot.slane %v1183_v48, %v10711_v4  ;;  %v1491_v9 = vsel %vm15231_vm13, %v1489_v34, %v1442_v44 }
  0xe9   : > { %v1155_v14 = vsel %vm15220_vm3, %v8950_v60, %v8949_v61  ;;  %v1157_v5 = vsel %vm15220_vm3, %v8949_v61, 0.0  ;;  %v1494_v51 = vsel %vm1377_vm15, %v1492_v6, %v1457_v18  ;;  %v1398_v44 = vsel %vm1383_vm12, %v11056_v57, %v1358_v1 }
  0xea   : > { %v1209_v53 = vsel %vm15223_vm11, %v1207_v56, 0.0  ;;  %v1461_v12 = vrot.slane %v1155_v14, 2  ;;  %v1462_v13 = vrot.slane %v1157_v5, 2  ;;  %v829_v16 = vsel %vm15232_vm1, 0.0, %v8944_v63 }
  0xeb   : > { %v1282_v17 = vrot.slane %v829_v16, 1  ;;  %v827_v19 = vsel %vm15232_vm1, %v8944_v63, %v8945_v62  ;;  %v1484_v20 = vrot.slane %v1209_v53, %v10711_v4  ;;  %v1493_v27 = vsel %vm1377_vm15, %v1491_v9, %v1453_v59 }
  0xec   : > { %v1496_v21 = vsel %vm1380_vm14, %v1494_v51, %v1462_v13  ;;  %v1283_v23 = vrot.slane %v827_v19, 1  ;;  %v1399_v37 = vsel %vm1383_vm12, %v11053_v50, %v1362_v0  ;;  %v1495_v1 = vsel %vm1380_vm14, %v1493_v27, %v1461_v12  ;;  %v631_v50 = vld [vmem:[%s15424_s22] sm:$0xff]  ;;  %v632_v0 = vld [vmem:[%s15424_s22 + $0x8] sm:$0xff]  ;;  %s15911_s22 = smov 30  }
  0xed   : > { %v1384_v43 = vsel %vm1383_vm12, %v1381_v24, %v1282_v17  ;;  %v1498_v25 = vsel %vm1383_vm12, %v1496_v21, %v1473_v2  ;;  %v1469_v22 = vrot.slane %v1183_v48, %v10705_v3  ;;  %vm15226_vm0 = vmmov 1  }
  0xee   : > { %v1385_v28 = vsel %vm1383_vm12, %v1382_v26, %v1283_v23  ;;  %v8029_v57 = vpack.c.bf16 %v1398_v44, %v1384_v43  ;;  %v8031_v29 = vpack.c.bf16 %v1484_v20, %v1498_v25  ;;  %vm8032_vm5 = vmpackc.low %vm1365_vm9, %vm15226_vm0  ;;  %v1480_v30 = vrot.slane %v1209_v53, %v10705_v3 }
  0xef   : > { %v8027_v36 = vpack.c.bf16 %v1399_v37, %v1385_v28  ;;  %v1497_v31 = vsel %vm1383_vm12, %v1495_v1, %v1469_v22  ;;  %vm1534_vm14 = vcmask 203776  }
  0xf0   : > { %v8034_v52 = vpack.c.bf16 %v1480_v30, %v1497_v31 }
  0xf1   : > { %8028 = vmatprep.subr.bf16.mxu0 %v8027_v36 }
  0xf2   : > { %8030 = vmatpush1.bf16.msra.mxu0 %v8029_v57 }
  0xf3   : > { %8033 = vmatprep.subr.msk.bf16.mxu0 %vm8032_vm5, %v8031_v29 }
  0xf6   : > { %8036 = vmatpush1.bf16.msk.msra.mxu0 %vm8032_vm5, %v8034_v52 }
  0xf7   : > { %v1507_v40 = vpop.permute.xlu1 %1506  ;;  %v1502_v41 = vpop.permute.xlu0 %1501 }
  0xf9   : > { %7523 = vmatmul.mubr.msk.f32.vlgmr.msra.gmra.mrb[0].mxu0 %vm1534_vm14, %v631_v50 }
  0xfa   : > { %1630 = vmatprep.mubr.f32.mxu0 %v15257_v10 }
  0xfb   : > { %v1691_v42 = vpop.permute.xlu1 %1690  ;;  %v1696_v45 = vpop.permute.xlu0 %1695 }
  0xfd   : > { %7524 = vmatmul.mubr.msk.f32.gmra.mrb[2].mxu0 %vm1534_vm14, %v632_v0 }
  0xfe   : > { %1636 = vmatprep.mubr.f32.mxu0 %v15257_v10 }
  0xff   : > { %v1512_v55 = vpop.permute.xlu1 %1511  ;;  %v1517_v35 = vpop.permute.xlu0 %1516 }
 0x101   : > { %7525 = vmatmul.mubr.msk.f32.gmra.mrb[4].mxu0 %vm1534_vm14, %v633_v32 }
 0x102   : > { %1642 = vmatprep.mubr.f32.mxu0 %v15257_v10 }
 0x103   : > { %v1701_v59 = vpop.permute.xlu1 %1700  ;;  %v1706_v62 = vpop.permute.xlu0 %1705 }
 0x105   : > { %7526 = vmatmul.mubr.msk.f32.gmra.mrb[6].mxu0 %vm1534_vm14, %v634_v33 }
 0x106   : > { %1648 = vmatprep.mubr.f32.mxu0 %v15257_v10 }
 0x107   : > { %v1522_v51 = vpop.permute.xlu1 %1521  ;;  %v1527_v44 = vpop.permute.xlu0 %1526 }
 0x109   : > { %7527 = vmatmul.mubr.msk.f32.gmra.mrb[8].mxu0 %vm1534_vm14, %v635_v38 }
 0x10a   : > { %1654 = vmatprep.mubr.f32.mxu0 %v15257_v10 }
 0x10b   : > { %v1711_v1 = vpop.permute.xlu1 %1710  ;;  %v1716_v50 = vpop.permute.xlu0 %1715 }
 0x10d   : > { %7528 = vmatmul.mubr.msk.f32.gmra.mrb[10].mxu0 %vm1534_vm14, %v636_v39 }
 0x10e   : > { %1660 = vmatprep.mubr.f32.mxu0 %v15257_v10 }
 0x111   : > { %7529 = vmatmul.mubr.msk.f32.gmra.mrb[12].mxu0 %vm1534_vm14, %v637_v11 }
 0x112   : > { %2198 = vmatprep.mubr.f32.mxu0 %v15257_v10 }
 0x1cc   : > { %v1626_v7 = vpop.f32.mrb[0].mxu0 }
 0x1cd   : > { %v1627_v46 = vadd.f32 %v1626_v7, %v1502_v41  ;;  %v1628_v47 = vpop.f32.mrb[1].mxu0 }
 0x1ce   : > { %v1629_v34 = vadd.f32 %v1628_v47, %v1502_v41 }
 0x1cf   : > { %v1723_v49 = vmul.f32 %v1691_v42, %v1627_v46  ;;  %vm1674_vm9 = vcmp.gt.f32.partialorder %v1627_v46, 0.0 }
 0x1d0   : > { %v1632_v48 = vpop.f32.mrb[2].mxu0  ;;  %v1724_v18 = vmul.f32 %v1691_v42, %v1629_v34  ;;  %vm1675_vm12 = vcmp.gt.f32.partialorder %v1629_v34, 0.0 }
 0x1d1   : > { %v1633_v54 = vadd.f32 %v1632_v48, %v1507_v40  ;;  %v1634_v58 = vpop.f32.mrb[3].mxu0  ;;  %v1737_v14 = vsel %vm1674_vm9, %v1627_v46, %v1723_v49  ;;  %v1721_v49 = vpop.permute.xlu0 %1720 }
 0x1d2   : > { %v1635_v60 = vadd.f32 %v1634_v58, %v1507_v40  ;;  %v1738_v53 = vsel %vm1675_vm12, %v1629_v34, %v1724_v18  ;;  %v1532_v40 = vpop.permute.xlu1 %1531 }
 0x1d3   : > { %v1725_v61 = vmul.f32 %v1696_v45, %v1633_v54  ;;  %vm1676_vm15 = vcmp.gt.f32.partialorder %v1633_v54, 0.0 }
 0x1d4   : > { %v1726_v56 = vmul.f32 %v1696_v45, %v1635_v60  ;;  %v1638_v6 = vpop.f32.mrb[4].mxu0  ;;  %vm1677_vm5 = vcmp.gt.f32.partialorder %v1635_v60, 0.0 }
 0x1d5   : > { %v1639_v63 = vadd.f32 %v1638_v6, %v1512_v55  ;;  %v1640_v2 = vpop.f32.mrb[5].mxu0  ;;  %v1739_v5 = vsel %vm1676_vm15, %v1633_v54, %v1725_v61 }
 0x1d6   : > { %v1641_v9 = vadd.f32 %v1640_v2, %v1512_v55  ;;  %v1740_v12 = vsel %vm1677_vm5, %v1635_v60, %v1726_v56  ;;  %v8039_v13 = vpack.c.bf16 %v1739_v5, %v1737_v14  ;;  %v1751_v60 = vld [vmem:[%s15425_s5] sm:$0xff]  ;;  %v1752_v56 = vld [vmem:[%s15425_s5 + $0x8] sm:$0xf]  ;;  %v1758_v6 = vpop.permute.xlu1 %1757  ;;  %s15533_s5 = smov 16  }
 0x1d7   : > { %v8037_v16 = vpack.c.bf16 %v1740_v12, %v1738_v53  ;;  %v1727_v19 = vmul.f32 %v1701_v59, %v1639_v63  ;;  %vm1678_vm14 = vcmp.gt.f32.partialorder %v1639_v63, 0.0 }
 0x1d8   : > { %v1644_v17 = vpop.f32.mrb[6].mxu0  ;;  %v1728_v23 = vmul.f32 %v1701_v59, %v1641_v9  ;;  %vm1679_vm2 = vcmp.gt.f32.partialorder %v1641_v9, 0.0 }
 0x1d9   : > { %v1645_v20 = vadd.f32 %v1644_v17, %v1517_v35  ;;  %v1646_v21 = vpop.f32.mrb[7].mxu0  ;;  %8038 = vmatprep.subr.bf16.mxu1 %v8037_v16  ;;  %v1741_v37 = vsel %vm1678_vm14, %v1639_v63, %v1727_v19 }
 0x1da   : > { %v1647_v24 = vadd.f32 %v1646_v21, %v1517_v35  ;;  %8040 = vmatpush1.bf16.msra.mxu1 %v8039_v13  ;;  %v1742_v36 = vsel %vm1679_vm2, %v1641_v9, %v1728_v23  ;;  %v1858_v5 = vpop.permute.xlu1 %1857 }
 0x1db   : > { %vm1680_vm3 = vcmp.gt.f32.partialorder %v1645_v20, 0.0  ;;  %v1729_v26 = vmul.f32 %v1706_v62, %v1645_v20 }
 0x1dc   : > { %vm1681_vm9 = vcmp.gt.f32.partialorder %v1647_v24, 0.0  ;;  %v1730_v43 = vmul.f32 %v1706_v62, %v1647_v24  ;;  %v1650_v25 = vpop.f32.mrb[8].mxu0  ;;  %v1763_v62 = vpop.permute.xlu0 %1762 }
 0x1dd   : > { %v1651_v27 = vadd.f32 %v1650_v25, %v1522_v51  ;;  %v1652_v28 = vpop.f32.mrb[9].mxu0  ;;  %v1743_v57 = vsel %vm1680_vm3, %v1645_v20, %v1729_v26 }
 0x1de   : > { %v1653_v22 = vadd.f32 %v1652_v28, %v1522_v51  ;;  %v1744_v29 = vsel %vm1681_vm9, %v1647_v24, %v1730_v43  ;;  %v8043_v30 = vpack.c.bf16 %v1743_v57, %v1741_v37  ;;  %vm1765_vm9 = vcmask 457728  }
 0x1df   : > { %v8041_v31 = vpack.c.bf16 %v1744_v29, %v1742_v36  ;;  %v1731_v0 = vmul.f32 %v1711_v1, %v1651_v27  ;;  %vm1682_vm12 = vcmp.gt.f32.partialorder %v1651_v27, 0.0  ;;  %v1876_v29 = vld [vmem:[%s15145_s9 + $0x8] sm:$0xf] }
 0x1e0   : > { %v1656_v52 = vpop.f32.mrb[10].mxu0  ;;  %v1732_v38 = vmul.f32 %v1711_v1, %v1653_v22  ;;  %vm1683_vm15 = vcmp.gt.f32.partialorder %v1653_v22, 0.0  ;;  %v1863_v19 = vpop.permute.xlu0 %1862 }
 0x1e1   : > { %v1657_v32 = vadd.f32 %v1656_v52, %v1527_v44  ;;  %v1658_v33 = vpop.f32.mrb[11].mxu0  ;;  %8042 = vmatprep.subr.bf16.mxu1 %v8041_v31  ;;  %v1745_v7 = vsel %vm1682_vm12, %v1651_v27, %v1731_v0 }
 0x1e2   : > { %v1659_v39 = vadd.f32 %v1658_v33, %v1527_v44  ;;  %8044 = vmatpush1.bf16.msra.mxu1 %v8043_v30  ;;  %v1746_v34 = vsel %vm1683_vm15, %v1653_v22, %v1732_v38  ;;  %v1875_v22 = vld [vmem:[%s15145_s9] sm:$0xff]  ;;  %v1897_v30 = vsel %vm689_vm7, 1, %v15258_v15  ;;  %v15430_v33 = vmov 0 }
 0x1e3   : > { %vm1684_vm5 = vcmp.gt.f32.partialorder %v1657_v32, 0.0  ;;  %v1733_v11 = vmul.f32 %v1716_v50, %v1657_v32  ;;  %v1901_v31 = vrot.slane %v1897_v30, %v10705_v3  ;;  %v1905_v52 = vrot.slane %v1897_v30, %v10711_v4 }
 0x1e4   : > { %vm1685_vm3 = vcmp.gt.f32.partialorder %v1659_v39, 0.0  ;;  %v1734_v41 = vmul.f32 %v1716_v50, %v1659_v39  ;;  %v1662_v42 = vpop.f32.mrb[12].mxu0  ;;  %v15433_v38 = vmov 0 }
 0x1e5   : > { %v1663_v45 = vadd.f32 %v1662_v42, %v1532_v40  ;;  %v1664_v55 = vpop.f32.mrb[13].mxu0  ;;  %v1747_v46 = vsel %vm1684_vm5, %v1657_v32, %v1733_v11 }
 0x1e6   : > { %v1665_v47 = vadd.f32 %v1664_v55, %v1532_v40  ;;  %v1748_v35 = vsel %vm1685_vm3, %v1659_v39, %v1734_v41  ;;  %v8047_v48 = vpack.c.bf16 %v1747_v46, %v1745_v7  ;;  %v1942_v39 = vsel %vm724_vm10, 1, %v15258_v15 }
 0x1e7   : > { %v8045_v54 = vpack.c.bf16 %v1748_v35, %v1746_v34  ;;  %v1735_v59 = vmul.f32 %v1721_v49, %v1663_v45  ;;  %vm1686_vm14 = vcmp.gt.f32.partialorder %v1663_v45, 0.0 }
 0x1e8   : > { %v1736_v58 = vmul.f32 %v1721_v49, %v1665_v47  ;;  %vm1687_vm2 = vcmp.gt.f32.partialorder %v1665_v47, 0.0  ;;  %v1950_v49 = vrot.slane %v1942_v39, %v10711_v4 }
 0x1e9   : > { %8046 = vmatprep.subr.bf16.mxu1 %v8045_v54  ;;  %v1749_v61 = vsel %vm1686_vm14, %v1663_v45, %v1735_v59  ;;  %vm11262_vm14 = vcmp.eq.s32.totalorder %v1905_v52, 1 }
 0x1ea   : > { %8048 = vmatpush1.bf16.msra.mxu1 %v8047_v48  ;;  %v1750_v18 = vsel %vm1687_vm2, %v1665_v47, %v1736_v58  ;;  %vm11258_vm2 = vcmp.eq.s32.totalorder %v1901_v31, 1  ;;  %v15434_v38 = vsel %vm11262_vm14, 4294967295, %v15433_v38  ;;  %v1946_v47 = vrot.slane %v1942_v39, %v10705_v3  ;;  %vm11286_vm7 = vmpackc.low %vm15226_vm0, %vm11262_vm14 }
 0x1eb   : > { %1784 = vmatprep.subr.mxu1 %v1750_v18  ;;  %v15431_v33 = vsel %vm11258_vm2, 4294967295, %v15430_v33  ;;  %15435 = vst [vmem:[#allocation4_spill] sm:$0xff] %v15434_v38  ;;  %vm11295_vm10 = vmpackc.low %vm15226_vm0, %vm11258_vm2 }
 0x1ec   : > { %15432 = vst [vmem:[#allocation3_spill] sm:$0xff] %v15431_v33 }
 0x1ee   : > { %1785 = vmatpush1.msra.mxu1 %v1749_v61 }
 0x1ef   : > { %7530 = vmatmul.mubr.msk.f32.vlgmr.msra.gmra.mrb[0].mxu1 %vm1765_vm9, %v1751_v60 }
 0x1f0   : > { %1842 = vmatprep.mubr.f32.mxu1 %v15257_v10 }
 0x1f3   : > { %7531 = vmatmul.mubr.msk.f32.gmra.mrb[2].mxu1 %vm1765_vm9, %v1752_v56  ;;  %vm11301_vm9 = vcmp.eq.s32.totalorder %v1946_v47, 1 }
 0x1f4   : > { %2519 = vmatprep.mubr.f32.mxu1 %v15257_v10 }
 0x2c2   : > { %v1838_v63 = vpop.f32.mrb[0].mxu1 }
 0x2c3   : > { %v1839_v2 = vadd.f32 %v1838_v63, %v1758_v6  ;;  %v1840_v14 = vpop.f32.mrb[1].mxu1 }
 0x2c4   : > { %v1841_v9 = vadd.f32 %v1840_v14, %v1758_v6 }
 0x2c5   : > { %vm1851_vm12 = vcmp.gt.f32.partialorder %v1839_v2, 0.0  ;;  %v1865_v53 = vmul.f32 %v1858_v5, %v1839_v2 }
 0x2c6   : > { %vm1852_vm15 = vcmp.gt.f32.partialorder %v1841_v9, 0.0  ;;  %v1866_v12 = vmul.f32 %v1858_v5, %v1841_v9  ;;  %v1844_v13 = vpop.f32.mrb[2].mxu1 }
 0x2c7   : > { %v11207_v16 = vsel %vm1851_vm12, %v1839_v2, %v1865_v53  ;;  %v1845_v51 = vadd.f32 %v1844_v13, %v1763_v62  ;;  %v1846_v17 = vpop.f32.mrb[3].mxu1  ;;  %vm11305_vm12 = vcmp.eq.s32.totalorder %v1950_v49, 1 }
 0x2c8   : > { %v11209_v20 = vsel %vm1852_vm15, %v1841_v9, %v1866_v12  ;;  %v1847_v21 = vadd.f32 %v1846_v17, %v1763_v62  ;;  %v15436_v9 = vmov 0  ;;  %vm15448_vm15 = vcmask 121856  }
 0x2c9   : > { %vm1853_vm5 = vcmp.gt.f32.partialorder %v1845_v51, 0.0  ;;  %v1867_v23 = vmul.f32 %v1863_v19, %v1845_v51  ;;  %v8953_v24 = vpack.i.bf16 %v11209_v20, %v11207_v16  ;;  %v8988_v27 = vpack.i.bf16 %v11207_v16, %v11209_v20 }
 0x2ca   : > { %vm1854_vm3 = vcmp.gt.f32.partialorder %v1847_v21, 0.0  ;;  %v1868_v44 = vmul.f32 %v1863_v19, %v1847_v21  ;;  %v15437_v9 = vsel %vm11286_vm7, 4294967295, %v15436_v9 }
 0x2cb   : > { %v11213_v26 = vsel %vm1853_vm5, %v1845_v51, %v1867_v23  ;;  %8954 = vrot.lane.b32.xlu1 %v8953_v24, %s15239_s1  ;;  %15438 = vst [vmem:[#allocation5_spill] sm:$0xff] %v15437_v9  ;;  %v15439_v51 = vmov 0  ;;  %vm15449_vm5 = vcmask 7168  }
 0x2cc   : > { %v11216_v43 = vsel %vm1854_vm3, %v1847_v21, %v1868_v44  ;;  %v9018_v57 = vpack.i.bf16 %v11213_v26, %v11207_v16  ;;  %v9028_v36 = vpack.i.bf16 %v11207_v16, %v11213_v26  ;;  %v15440_v51 = vsel %vm11295_vm10, 4294967295, %v15439_v51  ;;  %vm15450_vm3 = vmmov %vm15449_vm5 }
 0x2cd   : > { %v8968_v25 = vpack.i.bf16 %v11216_v43, %v11213_v26  ;;  %v9003_v28 = vpack.i.bf16 %v11213_v26, %v11216_v43  ;;  %v9008_v37 = vpack.i.bf16 %v11216_v43, %v11209_v20  ;;  %v9023_v1 = vpack.i.bf16 %v11209_v20, %v11216_v43  ;;  %15441 = vst [vmem:[#allocation6_spill] sm:$0xff] %v15440_v51  ;;  %vm15451_vm11 = vmmov %vm15450_vm3 }
 0x2cf   : > { %8969 = vrot.lane.b32.xlu0 %v8968_v25, %s15237_s25  ;;  %8959 = vrot.lane.b32.xlu1 %v8953_v24, %s15237_s25 }
 0x2d3   : > { %8974 = vrot.lane.b32.xlu0 %v8968_v25, %s15239_s1  ;;  %8964 = vrot.lane.b32.xlu1 %v8953_v24, %s15228_s4 }
 0x2d7   : > { %8979 = vrot.lane.b32.xlu0 %v8953_v24, %s15221_s21  ;;  %8984 = vrot.lane.b32.xlu1 %v8968_v25, %s15221_s21  ;;  %s15481_s21 = smov 1  }
 0x2db   : > { %8999 = vrot.lane.b32.xlu0 %v8968_v25, %s15228_s4  ;;  %8989 = vrot.lane.b32.xlu1 %v8988_v27, %s15426_s29 }
 0x2df   : > { %9004 = vrot.lane.b32.xlu0 %v9003_v28, %s15426_s29  ;;  %8994 = vrot.lane.b32.xlu1 %v8988_v27, %s15427_s30 }
 0x2e3   : > { %9009 = vrot.lane.b32.xlu0 %v9008_v37, %s15428_s2  ;;  %9014 = vrot.lane.b32.xlu1 %v9003_v28, %s15427_s30  ;;  %v15442_v37 = vmov 0 }
 0x2e4   : > { %v15443_v37 = vsel %vm11301_vm9, 4294967295, %v15442_v37 }
 0x2e5   : > { %15444 = vst [vmem:[#allocation7_spill] sm:$0xff] %v15443_v37 }
 0x2e7   : > { %9019 = vrot.lane.b32.xlu0 %v9018_v57, %s15428_s2  ;;  %9024 = vrot.lane.b32.xlu1 %v9023_v1, %s15429_s0  ;;  %v15445_v57 = vmov 0 }
 0x2e8   : > { %v15446_v57 = vsel %vm11305_vm12, 4294967295, %v15445_v57 }
 0x2e9   : > { %15447 = vst [vmem:[#allocation8_spill] sm:$0xff] %v15446_v57 }
 0x2eb   : > { %9029 = vrot.lane.b32.xlu0 %v9028_v36, %s15429_s0  ;;  %2113 = vperm.xlu1 %8952, %v1875_v22  }
 0x2ef   : > { %2118 = vperm.xlu0 %8951, %v1876_v29  }
 0x33d   : > { %v8955_v50 = vpop.permute.xlu1 %8954 }
 0x33e   : > { %v8957_v0 = vunpack.i.h.bf16 %v8955_v50  ;;  %v8956_v32 = vunpack.i.l.bf16 %v8955_v50 }
 0x340   : > { %v1924_v11 = vsel %vm15232_vm1, 0.0, %v8956_v32  ;;  %v1920_v42 = vsel %vm15232_vm1, %v8956_v32, %v8957_v0 }
 0x341   : > { %v8970_v40 = vpop.permute.xlu0 %8969  ;;  %v8960_v41 = vpop.permute.xlu1 %8959  ;;  %v2053_v34 = vrot.slane %v1924_v11, 4  ;;  %v2054_v54 = vrot.slane %v1920_v42, 4 }
 0x342   : > { %v8972_v45 = vunpack.i.h.bf16 %v8970_v40  ;;  %v8971_v55 = vunpack.i.l.bf16 %v8970_v40  ;;  %v8961_v7 = vunpack.i.l.bf16 %v8960_v41  ;;  %v8962_v46 = vunpack.i.h.bf16 %v8960_v41 }
 0x344   : > { %v1890_v35 = vsel %vm15225_vm4, %v8971_v55, %v8972_v45  ;;  %v1896_v48 = vsel %vm15225_vm4, 0.0, %v8971_v55  ;;  %v1895_v61 = vsel %vm15225_vm4, 0.0, %v8961_v7  ;;  %v1889_v63 = vsel %vm15225_vm4, %v8961_v7, %v8962_v46  ;;  %vm15462_vm4 = vmmov %vm15461_vm8 }
 0x345   : > { %v1910_v58 = vsel %vm11258_vm2, %v1896_v48, 0.0  ;;  %v1911_v59 = vsel %vm11262_vm14, %v1890_v35, 0.0  ;;  %v8975_v18 = vpop.permute.xlu0 %8974  ;;  %v8965_v60 = vpop.permute.xlu1 %8964 }
 0x346   : > { %v2103_v56 = vsel %vm15231_vm13, %v1910_v58, %v2053_v34  ;;  %v8977_v6 = vunpack.i.h.bf16 %v8975_v18  ;;  %v8976_v62 = vunpack.i.l.bf16 %v8975_v18  ;;  %v8966_v14 = vunpack.i.l.bf16 %v8965_v60 }
 0x347   : > { %v8052_v2 = vpack.c.bf16 %v2103_v56, %v1895_v61  ;;  %v2104_v5 = vsel %vm15231_vm13, %v1911_v59, %v2054_v54  ;;  %v8967_v21 = vunpack.i.h.bf16 %v8965_v60  ;;  %v15457_v58 = vmov 0 }
 0x348   : > { %v1921_v53 = vsel %vm15232_vm1, %v8976_v62, %v8977_v6  ;;  %v1925_v12 = vsel %vm15232_vm1, 0.0, %v8976_v62  ;;  %v8049_v13 = vpack.c.bf16 %v2104_v5, %v1889_v63  ;;  %v1940_v1 = vsel %vm15448_vm15, 0.0, %v8966_v14  ;;  %vm15452_vm15 = vmmov %vm15450_vm3 }
 0x349   : > { %v2055_v17 = vrot.slane %v1925_v12, 4  ;;  %v2057_v19 = vrot.slane %v1921_v53, 4  ;;  %v8980_v23 = vpop.permute.xlu0 %8979  ;;  %v8985_v24 = vpop.permute.xlu1 %8984 }
 0x34a   : > { %v8982_v44 = vunpack.i.h.bf16 %v8980_v23  ;;  %v8981_v25 = vunpack.i.l.bf16 %v8980_v23  ;;  %v8987_v27 = vunpack.i.h.bf16 %v8985_v24  ;;  %v8986_v28 = vunpack.i.l.bf16 %v8985_v24  ;;  %8051 = vmatprep.subr.msk.bf16.mxu0 %vm11286_vm7, %v8049_v13 }
 0x34b   : > { %v2056_v22 = vsel %vm15231_vm13, %v2053_v34, %v2055_v17  ;;  %8054 = vmatpush1.bf16.msk.msra.mxu0 %vm11295_vm10, %v8052_v2  ;;  %v2058_v31 = vsel %vm15231_vm13, %v2054_v54, %v2057_v19  ;;  %v15454_v34 = vmov 0 }
 0x34c   : > { %v1965_v36 = vsel %vm15449_vm5, %v8981_v25, %v8982_v44  ;;  %v1971_v29 = vsel %vm15450_vm3, 0.0, %v8981_v25  ;;  %v1966_v30 = vsel %vm15451_vm11, %v8986_v28, %v8987_v27  ;;  %v1972_v0 = vsel %vm15452_vm15, 0.0, %v8986_v28  ;;  %vm11330_vm11 = vmpackc.low %vm11305_vm12, %vm15226_vm0 }
 0x34d   : > { %v1973_v52 = vsel %vm11258_vm2, %v1971_v29, 0.0  ;;  %v1974_v50 = vsel %vm11262_vm14, %v1965_v36, 0.0  ;;  %v1976_v32 = vsel %vm11262_vm14, %v1966_v30, 0.0  ;;  %v9000_v39 = vpop.permute.xlu0 %8999  ;;  %v8990_v11 = vpop.permute.xlu1 %8989  ;;  %vm15453_vm5 = vcmask 121856   ;;  %vm11337_vm3 = vmpackc.low %vm11301_vm9, %vm15226_vm0 }
 0x34e   : > { %v1934_v40 = vsel %vm15453_vm5, %v8966_v14, %v8967_v21  ;;  %v8058_v41 = vpack.c.bf16 %v1940_v1, %v2056_v22  ;;  %v2067_v42 = vrot.slane %v1973_v52, 4  ;;  %v1975_v45 = vsel %vm11258_vm2, %v1972_v0, 0.0  ;;  %vm15460_vm15 = vmmov %vm15453_vm5 }
 0x34f   : > { %v2068_v55 = vrot.slane %v1974_v50, 4  ;;  %v9002_v7 = vunpack.i.h.bf16 %v9000_v39  ;;  %v9001_v46 = vunpack.i.l.bf16 %v9000_v39  ;;  %v8992_v47 = vunpack.i.h.bf16 %v8990_v11 }
 0x350   : > { %v15455_v34 = vsel %vm11330_vm11, 4294967295, %v15454_v34  ;;  %v2069_v35 = vrot.slane %v1975_v45, 4  ;;  %v2071_v48 = vrot.slane %v1976_v32, 4  ;;  %v8991_v49 = vunpack.i.l.bf16 %v8990_v11 }
 0x351   : > { %15456 = vst [vmem:[#allocation9_spill] sm:$0xff] %v15455_v34  ;;  %v8055_v54 = vpack.c.bf16 %v1934_v40, %v2058_v31  ;;  %v15458_v58 = vsel %vm11337_vm3, 4294967295, %v15457_v58  ;;  %v1935_v59 = vsel %vm15460_vm15, %v9001_v46, %v9002_v7  ;;  %v1941_v18 = vsel %vm15453_vm5, 0.0, %v9001_v46  ;;  %v9005_v60 = vpop.permute.xlu0 %9004  ;;  %v8995_v61 = vpop.permute.xlu1 %8994  ;;  %vm15464_vm15 = vmmov %vm15462_vm4 }
 0x352   : > { %15459 = vst [vmem:[#allocation10_spill] sm:$0xff] %v15458_v58  ;;  %v1955_v56 = vsel %vm11301_vm9, %v1941_v18, 0.0  ;;  %v1991_v6 = vsel %vm15461_vm8, %v8991_v49, 0.0  ;;  %v9007_v62 = vunpack.i.h.bf16 %v9005_v60  ;;  %v1985_v63 = vsel %vm15462_vm4, %v8992_v47, %v8991_v49  ;;  %vm15463_vm8 = vmmov %vm15462_vm4 }
 0x353   : > { %8057 = vmatprep.subr.msk.bf16.mxu0 %vm11330_vm11, %v8055_v54  ;;  %v1994_v2 = vsel %vm11305_vm12, %v1991_v6, 0.0  ;;  %v9006_v14 = vunpack.i.l.bf16 %v9005_v60  ;;  %v1956_v5 = vsel %vm11305_vm12, %v1935_v59, 0.0  ;;  %v2072_v53 = vsel %vm15231_vm13, %v2068_v55, %v2071_v48 }
 0x354   : > { %8060 = vmatpush1.bf16.msk.msra.mxu0 %vm11337_vm3, %v8058_v41  ;;  %v2070_v12 = vsel %vm15231_vm13, %v2067_v42, %v2069_v35  ;;  %v2106_v23 = vsel %vm15231_vm13, %v1956_v5, %v2068_v55  ;;  %v2105_v24 = vsel %vm15231_vm13, %v1955_v56, %v2067_v42  ;;  %v1993_v44 = vsel %vm11301_vm9, %v1985_v63, 0.0 }
 0x355   : > { %v1986_v13 = vsel %vm15463_vm8, %v9007_v62, %v9006_v14  ;;  %v1992_v17 = vsel %vm15464_vm15, %v9006_v14, 0.0  ;;  %v9010_v19 = vpop.permute.xlu0 %9009  ;;  %v9015_v21 = vpop.permute.xlu1 %9014  ;;  %v2082_v25 = vrot.slane %v1994_v2, 4  ;;  %v8996_v28 = vunpack.i.l.bf16 %v8995_v61  ;;  %vm11386_vm15 = vmpackc.low %vm11262_vm14, %vm15226_vm0 }
 0x356   : > { %v1996_v27 = vsel %vm11305_vm12, %v1992_v17, 0.0  ;;  %v1995_v1 = vsel %vm11301_vm9, %v1986_v13, 0.0  ;;  %v9012_v36 = vunpack.i.h.bf16 %v9010_v19  ;;  %v9011_v29 = vunpack.i.l.bf16 %v9010_v19 }
 0x357   : > { %v2085_v22 = vrot.slane %v1996_v27, 4  ;;  %v9016_v30 = vunpack.i.l.bf16 %v9015_v21  ;;  %v8061_v31 = vpack.c.bf16 %v2072_v53, %v2106_v23  ;;  %v8063_v52 = vpack.c.bf16 %v2070_v12, %v2105_v24 }
 0x358   : > { %v2081_v50 = vrot.slane %v1993_v44, 4  ;;  %v2030_v32 = vsel %vm15227_vm6, %v9012_v36, 0.0  ;;  %v2029_v39 = vsel %vm15227_vm6, %v9011_v29, 0.0  ;;  %v2083_v40 = vrot.slane %v1995_v1, 4 }
 0x359   : > { %v2086_v0 = vsel %vm15231_vm13, %v2082_v25, %v2085_v22  ;;  %v9020_v11 = vpop.permute.xlu0 %9019  ;;  %v8997_v41 = vunpack.i.h.bf16 %v8995_v61  ;;  %vm15465_vm4 = vcmask 924672   ;;  %v9017_v45 = vunpack.i.h.bf16 %v9015_v21  ;;  %8062 = vmatprep.subr.bf16.mxu0 %v8061_v31  ;;  %v9025_v55 = vpop.permute.xlu1 %9024 }
 0x35a   : > { %v2011_v42 = vsel %vm15465_vm4, %v8996_v28, 0.0  ;;  %vm15466_vm5 = vmmov %vm15465_vm4  ;;  %8064 = vmatpush1.bf16.msra.mxu0 %v8063_v52  ;;  %v2108_v47 = vsel %vm15231_vm13, %v11216_v43, %v2082_v25  ;;  %v9022_v35 = vunpack.i.h.bf16 %v9020_v11  ;;  %v2097_v48 = vrot.slane %v2030_v32, 4  ;;  %v4741_v25 = vld [vmem:[%s15149_s13] sm:$0xff] }
 0x35b   : > { %v8069_v7 = vpack.c.bf16 %v2011_v42, %v2086_v0  ;;  %v2012_v46 = vsel %vm15466_vm5, %v9016_v30, 0.0  ;;  %v2094_v49 = vrot.slane %v2029_v39, 4  ;;  %v8065_v54 = vpack.c.bf16 %v2108_v47, %v11209_v20  ;;  %vm15467_vm8 = vmmov %vm15465_vm4  ;;  %v1874_v42 = vld [vmem:[%s15480_s8 + $0x8] sm:$0xf] }
 0x35c   : > { %v9021_v59 = vunpack.i.l.bf16 %v9020_v11  ;;  %v2016_v18 = vsel %vm11262_vm14, %v2012_v46, 0.0  ;;  %v2026_v60 = vsel %vm15227_vm6, %v9022_v35, %v9012_v36  ;;  %v9026_v61 = vunpack.i.l.bf16 %v9025_v55 }
 0x35d   : > { %v2107_v56 = vsel %vm15231_vm13, %v11213_v26, %v2081_v50  ;;  %v9030_v6 = vpop.permute.xlu0 %9029  ;;  %v2006_v62 = vsel %vm15467_vm8, %v9017_v45, %v9016_v30  ;;  %8066 = vmatprep.subr.bf16.mxu0 %v8065_v54  ;;  %v2095_v2 = vrot.slane %v2026_v60, 4  ;;  %v2005_v53 = vsel %vm15465_vm4, %v8997_v41, %v8996_v28  ;;  %vm11402_vm8 = vmpackc.low %vm11258_vm2, %vm15226_vm0  ;;  %v1873_v41 = vld [vmem:[%s15480_s8] sm:$0xff] }
 0x35e   : > { %v2025_v63 = vsel %vm15227_vm6, %v9021_v59, %v9011_v29  ;;  %v8067_v14 = vpack.c.bf16 %v2107_v56, %v11207_v16  ;;  %v2084_v12 = vsel %vm15231_vm13, %v2081_v50, %v2083_v40  ;;  %v9027_v17 = vunpack.i.h.bf16 %v9025_v55  ;;  %vm11417_vm0 = vmpackc.low %vm15231_vm13, %vm11305_vm12 }
 0x35f   : > { %v2093_v13 = vrot.slane %v2025_v63, 4  ;;  %v9031_v19 = vunpack.i.l.bf16 %v9030_v6  ;;  %v2098_v21 = vsel %vm15231_vm13, %v2094_v49, %v2097_v48  ;;  %v2110_v23 = vsel %vm15231_vm13, %v2016_v18, %v2094_v49 }
 0x360   : > { %8068 = vmatpush1.bf16.msra.mxu0 %v8067_v14  ;;  %v2015_v24 = vsel %vm11258_vm2, %v2006_v62, 0.0  ;;  %vm15470_vm5 = vcmask 908288   ;;  %v8075_v27 = vpack.c.bf16 %v2098_v21, %v2110_v23  ;;  %v8072_v1 = vpack.c.bf16 %v2005_v53, %v2084_v12 }
 0x361   : > { %v2046_v44 = vsel %vm15470_vm5, %v9026_v61, 0.0  ;;  %8071 = vmatprep.subr.msk.bf16.mxu0 %vm11386_vm15, %v8069_v7  ;;  %v2096_v28 = vsel %vm15231_vm13, %v2093_v13, %v2095_v2  ;;  %v2109_v22 = vsel %vm15231_vm13, %v2015_v24, %v2093_v13  ;;  %v9032_v36 = vunpack.i.h.bf16 %v9030_v6  ;;  %vm15473_vm4 = vmmov %vm15470_vm5  ;;  %v7547_v13 = vld [vmem:[%s15145_s9 + $0x18] sm:$0xf] }
 0x362   : > { %v2045_v29 = vsel %vm15473_vm4, %v9027_v17, 0.0  ;;  %v2050_v30 = vsel %vm11305_vm12, %v2046_v44, 0.0  ;;  %vm15474_vm5 = vmmov %vm15473_vm4  ;;  %v8077_v52 = vpack.c.bf16 %v2096_v28, %v2109_v22  ;;  %v15475_v50 = vmov 0 }
 0x363   : > { %v2040_v31 = vsel %vm15474_vm5, %v9031_v19, %v9026_v61  ;;  %v15476_v50 = vsel %vm11417_vm0, 4294967295, %v15475_v50  ;;  %v8079_v0 = vpack.c.bf16 %v2050_v30, %v2045_v29  ;;  %vm15477_vm6 = vmmov %vm15473_vm4  ;;  %v15478_v11 = vmov 0  ;;  %v7546_v19 = vld [vmem:[%s15145_s9 + $0x10] sm:$0xff] }
 0x364   : > { %8074 = vmatpush1.bf16.msk.msra.mxu0 %vm11402_vm8, %v8072_v1  ;;  %v2039_v32 = vsel %vm15477_vm6, %v9032_v36, %v9027_v17  ;;  %v2049_v39 = vsel %vm11301_vm9, %v2040_v31, 0.0  ;;  %vm11429_vm4 = vmpackc.low %vm15231_vm13, %vm11301_vm9  ;;  %vm15230_vm6 = vcmask 883712   ;;  %vm15482_vm5 = vcmask 138240  }
 0x365   : > { %8076 = vmatprep.subr.bf16.mxu0 %v8075_v27  ;;  %v15479_v11 = vsel %vm11429_vm4, 4294967295, %v15478_v11  ;;  %v8082_v40 = vpack.c.bf16 %v2049_v39, %v2039_v32  ;;  %vm15484_vm13 = vmmov %vm15482_vm5 }
 0x368   : > { %8078 = vmatpush1.bf16.msra.mxu0 %v8077_v52 }
 0x369   : > { %8081 = vmatprep.subr.msk.bf16.mxu0 %vm11417_vm0, %v8079_v0 }
 0x36a   : > { %v2114_v45 = vpop.permute.xlu1 %2113 }
 0x36c   : > { %8084 = vmatpush1.bf16.msk.msra.mxu0 %vm11429_vm4, %v8082_v40  ;;  %vm15486_vm4 = vmmov %vm15482_vm5 }
 0x36e   : > { %v2119_v48 = vpop.permute.xlu0 %2118 }
 0x36f   : > { %7542 = vmatmul.mubr.msk.f32.vlgmr.msra.gmra.mrb[14].mxu0 %vm15230_vm6, %v1873_v41 }
 0x370   : > { %2204 = vmatprep.mubr.f32.mxu0 %v15257_v10 }
 0x373   : > { %7543 = vmatmul.mubr.msk.f32.gmra.mrb[16].mxu0 %vm15230_vm6, %v1874_v42  ;;  %vm15483_vm6 = vmmov %vm15482_vm5 }
 0x374   : > { %2909 = vmatprep.mubr.f32.mxu0 %v15257_v10 }
 0x442   : > { %v2200_v55 = vpop.f32.mrb[14].mxu0 }
 0x443   : > { %v2201_v7 = vadd.f32 %v2200_v55, %v2114_v45  ;;  %v2202_v46 = vpop.f32.mrb[15].mxu0 }
 0x444   : > { %v2203_v47 = vadd.f32 %v2202_v46, %v2114_v45 }
 0x445   : > { %v11445_v35 = vmax.f32 %v2201_v7, 0.0 }
 0x446   : > { %v11447_v49 = vmax.f32 %v2203_v47, 0.0  ;;  %v2206_v54 = vpop.f32.mrb[16].mxu0 }
 0x447   : > { %v2207_v59 = vadd.f32 %v2206_v54, %v2119_v48  ;;  %v2208_v18 = vpop.f32.mrb[17].mxu0 }
 0x448   : > { %v2209_v60 = vadd.f32 %v2208_v18, %v2119_v48  ;;  %v9033_v61 = vpack.i.bf16 %v11447_v49, %v11445_v35  ;;  %v9068_v63 = vpack.i.bf16 %v11445_v35, %v11447_v49 }
 0x449   : > { %v11451_v56 = vmax.f32 %v2207_v59, 0.0 }
 0x44a   : > { %v11453_v6 = vmax.f32 %v2209_v60, 0.0  ;;  %9034 = vrot.lane.b32.xlu1 %v9033_v61, %s15239_s1 }
 0x44b   : > { %v9098_v53 = vpack.i.bf16 %v11451_v56, %v11445_v35  ;;  %v9108_v17 = vpack.i.bf16 %v11445_v35, %v11451_v56 }
 0x44c   : > { %v9048_v62 = vpack.i.bf16 %v11453_v6, %v11451_v56  ;;  %v9083_v2 = vpack.i.bf16 %v11451_v56, %v11453_v6  ;;  %v9088_v14 = vpack.i.bf16 %v11453_v6, %v11447_v49  ;;  %v9103_v12 = vpack.i.bf16 %v11447_v49, %v11453_v6 }
 0x44e   : > { %9049 = vrot.lane.b32.xlu0 %v9048_v62, %s15237_s25  ;;  %9039 = vrot.lane.b32.xlu1 %v9033_v61, %s15237_s25  ;;  %s15901_s25 = smov 33  }
 0x452   : > { %9054 = vrot.lane.b32.xlu0 %v9048_v62, %s15239_s1  ;;  %9044 = vrot.lane.b32.xlu1 %v9033_v61, %s15228_s4  ;;  %s15535_s1 = smov 15  }
 0x456   : > { %9059 = vrot.lane.b32.xlu0 %v9033_v61, %s15481_s21  ;;  %9064 = vrot.lane.b32.xlu1 %v9048_v62, %s15481_s21 }
 0x45a   : > { %9079 = vrot.lane.b32.xlu0 %v9048_v62, %s15228_s4  ;;  %9069 = vrot.lane.b32.xlu1 %v9068_v63, %s15426_s29  ;;  %s15955_s4 = smov 114  }
 0x45e   : > { %9084 = vrot.lane.b32.xlu0 %v9083_v2, %s15426_s29  ;;  %9074 = vrot.lane.b32.xlu1 %v9068_v63, %s15427_s30 }
 0x462   : > { %9089 = vrot.lane.b32.xlu0 %v9088_v14, %s15428_s2  ;;  %9094 = vrot.lane.b32.xlu1 %v9083_v2, %s15427_s30 }
 0x466   : > { %9099 = vrot.lane.b32.xlu0 %v9098_v53, %s15428_s2  ;;  %9104 = vrot.lane.b32.xlu1 %v9103_v12, %s15429_s0 }
 0x46a   : > { %9109 = vrot.lane.b32.xlu0 %v9108_v17, %s15429_s0  ;;  %2440 = vperm.xlu1 %8952, %v7547_v13  }
 0x46e   : > { %2435 = vperm.xlu0 %8951, %v7546_v19  }
 0x4bc   : > { %v9035_v21 = vpop.permute.xlu1 %9034 }
 0x4bd   : > { %v9037_v23 = vunpack.i.h.bf16 %v9035_v21  ;;  %v9036_v24 = vunpack.i.l.bf16 %v9035_v21 }
 0x4bf   : > { %v2257_v44 = vsel %vm15232_vm1, 0.0, %v9036_v24  ;;  %v2253_v1 = vsel %vm15232_vm1, %v9036_v24, %v9037_v23  ;;  %vm15485_vm1 = vcmask 1043456  }
 0x4c0   : > { %v9050_v27 = vpop.permute.xlu0 %9049  ;;  %v9040_v28 = vpop.permute.xlu1 %9039  ;;  %v2375_v31 = vrot.slane %v2257_v44, 4  ;;  %v2376_v32 = vrot.slane %v2253_v1, 4 }
 0x4c1   : > { %v9052_v22 = vunpack.i.h.bf16 %v9050_v27  ;;  %v9051_v36 = vunpack.i.l.bf16 %v9050_v27  ;;  %v9041_v29 = vunpack.i.l.bf16 %v9040_v28  ;;  %v9042_v30 = vunpack.i.h.bf16 %v9040_v28 }
 0x4c3   : > { %v2234_v52 = vsel %vm15482_vm5, %v9051_v36, %v9052_v22  ;;  %v2240_v0 = vsel %vm15483_vm6, 0.0, %v9051_v36  ;;  %v2239_v45 = vsel %vm15484_vm13, 0.0, %v9041_v29  ;;  %v2233_v47 = vsel %vm15486_vm4, %v9041_v29, %v9042_v30  ;;  %vm15487_vm6 = vmmov %vm15485_vm1 }
 0x4c4   : > { %v2243_v39 = vsel %vm11258_vm2, %v2240_v0, 0.0  ;;  %v2244_v40 = vsel %vm11262_vm14, %v2234_v52, 0.0  ;;  %v9055_v41 = vpop.permute.xlu0 %9054  ;;  %v9045_v42 = vpop.permute.xlu1 %9044  ;;  %vm15488_vm5 = vcmask 130048   ;;  %vm15491_vm13 = vmmov %vm15487_vm6 }
 0x4c5   : > { %v2425_v55 = vsel %vm15485_vm1, %v2243_v39, %v2375_v31  ;;  %v9057_v7 = vunpack.i.h.bf16 %v9055_v41  ;;  %v9056_v46 = vunpack.i.l.bf16 %v9055_v41  ;;  %v9046_v54 = vunpack.i.l.bf16 %v9045_v42  ;;  %vm15489_vm0 = vmmov %vm15488_vm5 }
 0x4c6   : > { %v8088_v48 = vpack.c.bf16 %v2425_v55, %v2239_v45  ;;  %v2426_v59 = vsel %vm15487_vm6, %v2244_v40, %v2376_v32  ;;  %v9047_v2 = vunpack.i.h.bf16 %v9045_v42  ;;  %vm15490_vm1 = vcmask 121856  }
 0x4c7   : > { %v2254_v18 = vsel %vm15488_vm5, %v9056_v46, %v9057_v7  ;;  %v2258_v60 = vsel %vm15489_vm0, 0.0, %v9056_v46  ;;  %v8085_v61 = vpack.c.bf16 %v2426_v59, %v2233_v47  ;;  %v2273_v21 = vsel %vm15490_vm1, 0.0, %v9046_v54  ;;  %vm15495_vm5 = vmmov %vm15491_vm13 }
 0x4c8   : > { %v2377_v62 = vrot.slane %v2258_v60, 4  ;;  %v2379_v63 = vrot.slane %v2254_v18, 4  ;;  %v9060_v14 = vpop.permute.xlu0 %9059  ;;  %v9065_v53 = vpop.permute.xlu1 %9064  ;;  %vm15492_vm0 = vcmask 7168  }
 0x4c9   : > { %v9062_v12 = vunpack.i.h.bf16 %v9060_v14  ;;  %v9061_v13 = vunpack.i.l.bf16 %v9060_v14  ;;  %v9067_v17 = vunpack.i.h.bf16 %v9065_v53  ;;  %v9066_v19 = vunpack.i.l.bf16 %v9065_v53  ;;  %8087 = vmatprep.subr.msk.bf16.mxu1 %vm11286_vm7, %v8085_v61  ;;  %vm15493_vm4 = vmmov %vm15492_vm0 }
 0x4ca   : > { %v2378_v23 = vsel %vm15491_vm13, %v2375_v31, %v2377_v62  ;;  %8090 = vmatpush1.bf16.msk.msra.mxu1 %vm11295_vm10, %v8088_v48  ;;  %vm15494_vm6 = vmmov %vm15492_vm0  ;;  %v2380_v28 = vsel %vm15495_vm5, %v2376_v32, %v2379_v63  ;;  %vm15497_vm13 = vcmask 121856  }
 0x4cb   : > { %v2287_v24 = vsel %vm15492_vm0, %v9061_v13, %v9062_v12  ;;  %v2293_v44 = vsel %vm15493_vm4, 0.0, %v9061_v13  ;;  %v2288_v27 = vsel %vm15494_vm6, %v9066_v19, %v9067_v17  ;;  %vm15496_vm1 = vmmov %vm15492_vm0  ;;  %v2267_v52 = vsel %vm15497_vm13, %v9046_v54, %v9047_v2 }
 0x4cc   : > { %v2295_v1 = vsel %vm11258_vm2, %v2293_v44, 0.0  ;;  %v2296_v22 = vsel %vm11262_vm14, %v2287_v24, 0.0  ;;  %v2294_v36 = vsel %vm15496_vm1, 0.0, %v9066_v19  ;;  %v2298_v29 = vsel %vm11262_vm14, %v2288_v27, 0.0  ;;  %v9080_v30 = vpop.permute.xlu0 %9079  ;;  %v9070_v31 = vpop.permute.xlu1 %9069  ;;  %vm15498_vm0 = vmmov %vm15497_vm13 }
 0x4cd   : > { %v8094_v0 = vpack.c.bf16 %v2273_v21, %v2378_v23  ;;  %v2389_v39 = vrot.slane %v2295_v1, 4  ;;  %v2297_v32 = vsel %vm11258_vm2, %v2294_v36, 0.0  ;;  %v2390_v40 = vrot.slane %v2296_v22, 4  ;;  %vm15499_vm4 = vmmov %vm15498_vm0 }
 0x4ce   : > { %v9082_v41 = vunpack.i.h.bf16 %v9080_v30  ;;  %v9081_v42 = vunpack.i.l.bf16 %v9080_v30  ;;  %v9072_v45 = vunpack.i.h.bf16 %v9070_v31  ;;  %v2391_v55 = vrot.slane %v2297_v32, 4 }
 0x4cf   : > { %v2393_v7 = vrot.slane %v2298_v29, 4  ;;  %v9071_v46 = vunpack.i.l.bf16 %v9070_v31  ;;  %v8091_v47 = vpack.c.bf16 %v2267_v52, %v2380_v28  ;;  %vm15500_vm6 = vcmask 1039360  }
 0x4d0   : > { %v2268_v48 = vsel %vm15498_vm0, %v9081_v42, %v9082_v41  ;;  %v2274_v59 = vsel %vm15499_vm4, 0.0, %v9081_v42  ;;  %v9085_v18 = vpop.permute.xlu0 %9084  ;;  %v9075_v60 = vpop.permute.xlu1 %9074  ;;  %vm15501_vm5 = vmmov %vm15500_vm6  ;;  %vm15502_vm1 = vcmask 1043456  }
 0x4d1   : > { %v2277_v54 = vsel %vm11301_vm9, %v2274_v59, 0.0  ;;  %v2313_v61 = vsel %vm15500_vm6, %v9071_v46, 0.0  ;;  %8093 = vmatprep.subr.msk.bf16.mxu1 %vm11330_vm11, %v8091_v47  ;;  %v9087_v62 = vunpack.i.h.bf16 %v9085_v18  ;;  %v2307_v63 = vsel %vm15501_vm5, %v9072_v45, %v9071_v46  ;;  %vm15503_vm13 = vmmov %vm15502_vm1 }
 0x4d2   : > { %v2316_v2 = vsel %vm11305_vm12, %v2313_v61, 0.0  ;;  %8096 = vmatpush1.bf16.msk.msra.mxu1 %vm11337_vm3, %v8094_v0  ;;  %v9086_v14 = vunpack.i.l.bf16 %v9085_v18  ;;  %v2278_v53 = vsel %vm11305_vm12, %v2268_v48, 0.0  ;;  %v2394_v12 = vsel %vm15502_vm1, %v2390_v40, %v2393_v7  ;;  %vm15504_vm0 = vmmov %vm15501_vm5 }
 0x4d3   : > { %v2392_v13 = vsel %vm15503_vm13, %v2389_v39, %v2391_v55  ;;  %vm15505_vm4 = vmmov %vm15504_vm0  ;;  %v2315_v27 = vsel %vm11301_vm9, %v2307_v63, 0.0  ;;  %v2404_v28 = vrot.slane %v2316_v2, 4  ;;  %v9076_v22 = vunpack.i.l.bf16 %v9075_v60 }
 0x4d4   : > { %v2308_v17 = vsel %vm15504_vm0, %v9087_v62, %v9086_v14  ;;  %v2314_v19 = vsel %vm15505_vm4, %v9086_v14, 0.0  ;;  %v9090_v21 = vpop.permute.xlu0 %9089  ;;  %v9095_v23 = vpop.permute.xlu1 %9094  ;;  %vm15506_vm6 = vmmov %vm15502_vm1  ;;  %vm15508_vm13 = vcmask 916480   ;;  %v9077_v7 = vunpack.i.h.bf16 %v9075_v60 }
 0x4d5   : > { %v2428_v24 = vsel %vm15506_vm6, %v2278_v53, %v2390_v40  ;;  %vm15507_vm5 = vmmov %vm15502_vm1  ;;  %v2318_v1 = vsel %vm11305_vm12, %v2314_v19, 0.0  ;;  %v2317_v36 = vsel %vm11301_vm9, %v2308_v17, 0.0  ;;  %v9092_v30 = vunpack.i.h.bf16 %v9090_v21 }
 0x4d6   : > { %v2427_v44 = vsel %vm15507_vm5, %v2277_v54, %v2389_v39  ;;  %v2407_v29 = vrot.slane %v2318_v1, 4  ;;  %v9091_v31 = vunpack.i.l.bf16 %v9090_v21  ;;  %v9096_v52 = vunpack.i.l.bf16 %v9095_v23  ;;  %vm15509_vm0 = vmmov %vm15508_vm13 }
 0x4d7   : > { %v8097_v0 = vpack.c.bf16 %v2394_v12, %v2428_v24  ;;  %v8099_v32 = vpack.c.bf16 %v2392_v13, %v2427_v44  ;;  %v2403_v40 = vrot.slane %v2315_v27, 4  ;;  %v2352_v41 = vsel %vm15508_vm13, %v9092_v30, 0.0  ;;  %vm15512_vm5 = vmmov %vm15502_vm1 }
 0x4d8   : > { %v2408_v39 = vsel %vm15502_vm1, %v2404_v28, %v2407_v29  ;;  %v2351_v42 = vsel %vm15509_vm0, %v9091_v31, 0.0  ;;  %v9100_v45 = vpop.permute.xlu0 %9099  ;;  %v2405_v55 = vrot.slane %v2317_v36, 4  ;;  %vm15510_vm4 = vcmask 924672   ;;  %v9105_v48 = vpop.permute.xlu1 %9104  ;;  %vm15513_vm1 = vmmov %vm15509_vm0 }
 0x4d9   : > { %v2333_v46 = vsel %vm15510_vm4, %v9076_v22, 0.0  ;;  %v9097_v47 = vunpack.i.h.bf16 %v9095_v23  ;;  %8098 = vmatprep.subr.bf16.mxu1 %v8097_v0  ;;  %vm15511_vm6 = vmmov %vm15510_vm4  ;;  %v2430_v54 = vsel %vm15512_vm5, %v11453_v6, %v2404_v28  ;;  %v9102_v61 = vunpack.i.h.bf16 %v9100_v45 }
 0x4da   : > { %v8105_v59 = vpack.c.bf16 %v2333_v46, %v2408_v39  ;;  %v2334_v18 = vsel %vm15511_vm6, %v9096_v52, 0.0  ;;  %8100 = vmatpush1.bf16.msra.mxu1 %v8099_v32  ;;  %v2419_v62 = vrot.slane %v2352_v41, 4  ;;  %v2416_v63 = vrot.slane %v2351_v42, 4  ;;  %vm15514_vm13 = vmmov %vm15512_vm5  ;;  %v7545_v46 = vld [vmem:[%s15480_s8 + $0x18] sm:$0xf] }
 0x4db   : > { %v8101_v2 = vpack.c.bf16 %v2430_v54, %v11447_v49  ;;  %v9101_v14 = vunpack.i.l.bf16 %v9100_v45  ;;  %v2338_v60 = vsel %vm11262_vm14, %v2334_v18, 0.0  ;;  %v2348_v53 = vsel %vm15513_vm1, %v9102_v61, %v9092_v30  ;;  %vm15515_vm0 = vmmov %vm15510_vm4 }
 0x4dc   : > { %v9106_v12 = vunpack.i.l.bf16 %v9105_v48  ;;  %v2429_v13 = vsel %vm15514_vm13, %v11451_v56, %v2403_v40  ;;  %v9110_v17 = vpop.permute.xlu0 %9109  ;;  %v2328_v19 = vsel %vm15515_vm0, %v9097_v47, %v9096_v52  ;;  %vm15516_vm4 = vmmov %vm15513_vm1  ;;  %v2417_v21 = vrot.slane %v2348_v53, 4 }
 0x4dd   : > { %8102 = vmatprep.subr.bf16.mxu1 %v8101_v2  ;;  %v2347_v6 = vsel %vm15516_vm4, %v9101_v14, %v9091_v31  ;;  %v8103_v23 = vpack.c.bf16 %v2429_v13, %v11445_v35  ;;  %vm15517_vm6 = vmmov %vm15515_vm0  ;;  %v2406_v24 = vsel %vm15512_vm5, %v2403_v40, %v2405_v55  ;;  %v9107_v27 = vunpack.i.h.bf16 %v9105_v48 }
 0x4de   : > { %v2327_v49 = vsel %vm15517_vm6, %v9077_v7, %v9076_v22  ;;  %v2415_v44 = vrot.slane %v2347_v6, 4  ;;  %v9111_v28 = vunpack.i.l.bf16 %v9110_v17  ;;  %vm15518_vm1 = vmmov %vm15512_vm5  ;;  %v2337_v36 = vsel %vm11258_vm2, %v2328_v19, 0.0  ;;  %v7544_v7 = vld [vmem:[%s15480_s8 + $0x10] sm:$0xff]  ;;  %v2543_v6 = vld [vmem:[%s15146_s10] sm:$0xff] }
 0x4df   : > { %8104 = vmatpush1.bf16.msra.mxu1 %v8103_v23  ;;  %v2420_v1 = vsel %vm15518_vm1, %v2416_v63, %v2419_v62  ;;  %vm15519_vm13 = vmmov %vm15518_vm1  ;;  %vm15520_vm0 = vcmask 908288   ;;  %v8108_v30 = vpack.c.bf16 %v2327_v49, %v2406_v24  ;;  %v9112_v52 = vunpack.i.h.bf16 %v9110_v17 }
 0x4e0   : > { %v2432_v56 = vsel %vm15519_vm13, %v2338_v60, %v2416_v63  ;;  %v2368_v29 = vsel %vm15520_vm0, %v9106_v12, 0.0  ;;  %8107 = vmatprep.subr.msk.bf16.mxu1 %vm11386_vm15, %v8105_v59  ;;  %vm15521_vm4 = vmmov %vm15518_vm1 }
 0x4e1   : > { %v8111_v35 = vpack.c.bf16 %v2420_v1, %v2432_v56  ;;  %v2418_v22 = vsel %vm15521_vm4, %v2415_v44, %v2417_v21  ;;  %vm15522_vm6 = vmmov %vm15518_vm1  ;;  %v2372_v32 = vsel %vm11305_vm12, %v2368_v29, 0.0  ;;  %vm15527_vm4 = vnez %v15479_v11  ;;  %v2544_v21 = vld [vmem:[%s15146_s10 + $0x8] sm:$0xf] }
 0x4e2   : > { %v2431_v31 = vsel %vm15522_vm6, %v2337_v36, %v2415_v44  ;;  %vm15523_vm5 = vmmov %vm15520_vm0  ;;  %vm15528_vm6 = vcmask 883712  }
 0x4e3   : > { %v2367_v0 = vsel %vm15523_vm5, %v9107_v27, 0.0  ;;  %vm15524_vm1 = vmmov %vm15520_vm0  ;;  %8110 = vmatpush1.bf16.msk.msra.mxu1 %vm11402_vm8, %v8108_v30  ;;  %v8113_v39 = vpack.c.bf16 %v2418_v22, %v2431_v31  ;;  %v2557_v30 = vld [vmem:[%s15147_s11] sm:$0x1] }
 0x4e4   : > { %v2362_v40 = vsel %vm15524_vm1, %v9111_v28, %v9106_v12  ;;  %8112 = vmatprep.subr.bf16.mxu1 %v8111_v35  ;;  %v8115_v41 = vpack.c.bf16 %v2372_v32, %v2367_v0  ;;  %vm15525_vm13 = vmmov %vm15520_vm0  ;;  %vm15526_vm0 = vnez %v15476_v50  ;;  %vm15530_vm1 = vcmask 1043456   ;;  %v7560_v32 = vld [vmem:[%s15146_s10 + $0x10] sm:$0xff] }
 0x4e5   : > { %v2361_v42 = vsel %vm15525_vm13, %v9112_v52, %v9107_v27  ;;  %v2371_v45 = vsel %vm11301_vm9, %v2362_v40, 0.0  ;;  %vm15529_vm5 = vmmov %vm15528_vm6  ;;  %v7561_v40 = vld [vmem:[%s15146_s10 + $0x18] sm:$0xf] }
 0x4e6   : > { %v8118_v55 = vpack.c.bf16 %v2371_v45, %v2361_v42  ;;  %vm15531_vm13 = vmmov %vm15530_vm1  ;;  %v2572_v42 = vld [vmem:[%s15148_s12 + $0x8] sm:$0xf] }
 0x4e7   : > { %8114 = vmatpush1.bf16.msra.mxu1 %v8113_v39 }
 0x4e8   : > { %8117 = vmatprep.subr.msk.bf16.mxu1 %vm15526_vm0, %v8115_v41  ;;  %v2571_v41 = vld [vmem:[%s15148_s12] sm:$0xff] }
 0x4e9   : > { %v2441_v61 = vpop.permute.xlu1 %2440 }
 0x4eb   : > { %8120 = vmatpush1.bf16.msk.msra.mxu1 %vm15527_vm4, %v8118_v55  ;;  %vm15540_vm4 = vcmask 1043456  }
 0x4ed   : > { %v2436_v47 = vpop.permute.xlu0 %2435 }
 0x4ee   : > { %7558 = vmatmul.mubr.msk.f32.vlgmr.msra.gmra.mrb[4].mxu1 %vm15528_vm6, %v7544_v7  ;;  %vm15242_vm6 = vcmask 3072  }
 0x4ef   : > { %2525 = vmatprep.mubr.f32.mxu1 %v15257_v10 }
 0x4f2   : > { %7559 = vmatmul.mubr.msk.f32.gmra.mrb[6].mxu1 %vm15529_vm5, %v7545_v46  ;;  %vm15532_vm5 = vcmask 7168  }
 0x4f3   : > { %3230 = vmatprep.mubr.f32.mxu1 %v15257_v10 }
 0x5c1   : > { %v2521_v48 = vpop.f32.mrb[4].mxu1 }
 0x5c2   : > { %v2522_v59 = vadd.f32 %v2521_v48, %v2436_v47  ;;  %v2523_v18 = vpop.f32.mrb[5].mxu1 }
 0x5c3   : > { %v2524_v54 = vadd.f32 %v2523_v18, %v2436_v47 }
 0x5c5   : > { %v2532_v62 = vadd.f32 %v2524_v54, %v2522_v59  ;;  %v2527_v63 = vpop.f32.mrb[6].mxu1 }
 0x5c6   : > { %v2528_v2 = vadd.f32 %v2527_v63, %v2441_v61  ;;  %v2529_v14 = vpop.f32.mrb[7].mxu1 }
 0x5c7   : > { %v2530_v60 = vadd.f32 %v2529_v14, %v2441_v61  ;;  %2533 = vadd.xlane.f32.xlu1 %v2532_v62 }
 0x5c8   : > { %v2535_v53 = vsel %vm15530_vm1, %v2528_v2, 0.0  ;;  %vm15536_vm1 = vcmask 130048  }
 0x5c9   : > { %v2536_v12 = vsel %vm15531_vm13, %v2530_v60, 0.0  ;;  %vm15537_vm13 = vmmov %vm15536_vm1 }
 0x5ca   : > { %v2537_v13 = vadd.f32 %v2536_v12, %v2535_v53 }
 0x5cc   : > { %2538 = vadd.xlane.f32.xlu0 %v2537_v13 }
 0x654   : > { %v2534_v17 = vpop.xlane.xlu1 %2533 }
 0x655   : > { %v2541_v19 = vmul.f32 0.00390625, %v2534_v17 }
 0x657   : > { %v2545_v49 = vmul.f32 %v2543_v6, %v2541_v19 }
 0x659   : > { %v2539_v23 = vpop.xlane.xlu0 %2538  ;;  %v2547_v27 = vsel %vm15532_vm5, %v2545_v49, 0.0  ;;  %vm15538_vm5 = vcmask 138240  }
 0x65a   : > { %v2542_v24 = vmul.f32 0.00390625, %v2539_v23 }
 0x65c   : > { %v2546_v44 = vmul.f32 %v2544_v21, %v2542_v24 }
 0x65e   : > { %v2549_v28 = vsel %vm15242_vm6, %v2546_v44, 0.0  ;;  %vm15539_vm6 = vmmov %vm15538_vm5 }
 0x65f   : > { %v2550_v1 = vadd.f32 %v2549_v28, %v2547_v27 }
 0x661   : > { %v2551_v56 = vrot.slane %v2550_v1, 4 }
 0x663   : > { %v2552_v36 = vadd.f32 %v2551_v56, %v2550_v1 }
 0x665   : > { %v2553_v29 = vrot.slane %v2552_v36, 2 }
 0x667   : > { %v2554_v35 = vadd.f32 %v2553_v29, %v2552_v36 }
 0x669   : > { %v2555_v22 = vrot.slane %v2554_v35, 1 }
 0x66b   : > { %v2556_v31 = vadd.f32 %v2555_v22, %v2554_v35  ;;  %v7564_v35 = vld [vmem:[%s15145_s9 + $0x20] sm:$0xff]  ;;  %v7565_v22 = vld [vmem:[%s15145_s9 + $0x28] sm:$0xf] }
 0x66d   : > { %v2558_v52 = vadd.f32 %v2557_v30, %v2556_v31 }
 0x66f   : > { %v2559_v0 = vmax.f32 %v2558_v52, 0.0 }
 0x671   : > { %v2566_v39 = vrot.slane %v2559_v0, %v10705_v3 }
 0x673   : > { %v2567_v45 = vmul.f32 %v7560_v32, %v2566_v39  ;;  %v2568_v55 = vmul.f32 %v7561_v40, %v2566_v39 }
 0x675   : > { %v2573_v7 = vadd.f32 %v2571_v41, %v2567_v45  ;;  %v2574_v46 = vadd.f32 %v2572_v42, %v2568_v55 }
 0x677   : > { %v2575_v47 = vsub.f32 0.0, %v2573_v7  ;;  %v2576_v48 = vsub.f32 0.0, %v2574_v46 }
 0x679   : > { %v2577_v18 = vmul.f32 1.442695, %v2575_v47  ;;  %v2579_v61 = vmul.f32 1.442695, %v2576_v48 }
 0x67b   : > { %10513 = vpow2.f32 %v2577_v18 }
 0x67c   : > { %10515 = vpow2.f32 %v2579_v61 }
 0x685   : > { %v10514_v62 = vpop.eup %10513 }
 0x686   : > { %v10516_v63 = vpop.eup %10515  ;;  %v2581_v14 = vadd.f32 1.0, %v10514_v62 }
 0x687   : > { %v2582_v53 = vadd.f32 1.0, %v10516_v63 }
 0x688   : > { %10517 = vrcp.f32 %v2581_v14 }
 0x689   : > { %10519 = vrcp.f32 %v2582_v53 }
 0x692   : > { %v10518_v12 = vpop.eup %10517 }
 0x693   : > { %v10520_v13 = vpop.eup %10519  ;;  %2589 = vperm.xlu0 %8951, %v10518_v12  }
 0x694   : > { %2594 = vperm.xlu1 %8952, %v10520_v13  }
 0x712   : > { %v2590_v17 = vpop.permute.xlu0 %2589 }
 0x713   : > { %v2595_v19 = vpop.permute.xlu1 %2594  ;;  %v2597_v6 = vmul.f32 %v2590_v17, %v2522_v59  ;;  %v2598_v21 = vmul.f32 %v2590_v17, %v2524_v54 }
 0x714   : > { %v2599_v23 = vmul.f32 %v2595_v19, %v2528_v2  ;;  %v2600_v49 = vmul.f32 %v2595_v19, %v2530_v60 }
 0x715   : > { %v11628_v24 = vadd.f32 %v2597_v6, %v11207_v16  ;;  %v11631_v44 = vadd.f32 %v2598_v21, %v11209_v20 }
 0x716   : > { %v11634_v27 = vadd.f32 %v2599_v23, %v11213_v26  ;;  %v11637_v28 = vadd.f32 %v2600_v49, %v11216_v43 }
 0x717   : > { %v9113_v1 = vpack.i.bf16 %v11631_v44, %v11628_v24  ;;  %v9153_v54 = vpack.i.bf16 %v11628_v24, %v11631_v44 }
 0x718   : > { %v9118_v59 = vpack.i.bf16 %v11637_v28, %v11634_v27  ;;  %v9158_v2 = vpack.i.bf16 %v11634_v27, %v11637_v28  ;;  %v9168_v60 = vpack.i.bf16 %v11637_v28, %v11631_v44  ;;  %v9178_v56 = vpack.i.bf16 %v11634_v27, %v11628_v24 }
 0x719   : > { %9114 = vrot.lane.b32.xlu1 %v9113_v1, %s15533_s5  ;;  %v9183_v36 = vpack.i.bf16 %v11631_v44, %v11637_v28  ;;  %v9188_v29 = vpack.i.bf16 %v11628_v24, %v11634_v27 }
 0x71a   : > { %9119 = vrot.lane.b32.xlu0 %v9118_v59, %s15534_s6 }
 0x71d   : > { %9124 = vrot.lane.b32.xlu1 %v9113_v1, %s15534_s6 }
 0x71e   : > { %9129 = vrot.lane.b32.xlu0 %v9118_v59, %s15533_s5 }
 0x721   : > { %9134 = vrot.lane.b32.xlu1 %v9113_v1, %s15535_s1 }
 0x722   : > { %9139 = vrot.lane.b32.xlu0 %v9113_v1, %s15481_s21 }
 0x725   : > { %9144 = vrot.lane.b32.xlu1 %v9118_v59, %s15481_s21 }
 0x726   : > { %9149 = vrot.lane.b32.xlu0 %v9118_v59, %s15535_s1 }
 0x729   : > { %9154 = vrot.lane.b32.xlu1 %v9153_v54, %s15426_s29 }
 0x72a   : > { %9159 = vrot.lane.b32.xlu0 %v9158_v2, %s15426_s29 }
 0x72d   : > { %9164 = vrot.lane.b32.xlu1 %v9153_v54, %s15427_s30 }
 0x72e   : > { %9169 = vrot.lane.b32.xlu0 %v9168_v60, %s15428_s2 }
 0x731   : > { %9174 = vrot.lane.b32.xlu1 %v9158_v2, %s15427_s30 }
 0x732   : > { %9179 = vrot.lane.b32.xlu0 %v9178_v56, %s15428_s2 }
 0x735   : > { %9184 = vrot.lane.b32.xlu1 %v9183_v36, %s15429_s0 }
 0x736   : > { %9189 = vrot.lane.b32.xlu0 %v9188_v29, %s15429_s0 }
 0x739   : > { %2825 = vperm.xlu1 %8952, %v7564_v35  }
 0x73a   : > { %2830 = vperm.xlu0 %8951, %v7565_v22  }
 0x78b   : > { %v9115_v30 = vpop.permute.xlu1 %9114 }
 0x78c   : > { %v9117_v31 = vunpack.i.h.bf16 %v9115_v30  ;;  %v9116_v52 = vunpack.i.l.bf16 %v9115_v30  ;;  %v9120_v0 = vpop.permute.xlu0 %9119 }
 0x78d   : > { %v9122_v32 = vunpack.i.h.bf16 %v9120_v0  ;;  %v9121_v40 = vunpack.i.l.bf16 %v9120_v0 }
 0x78e   : > { %v2643_v39 = vsel %vm15536_vm1, %v9116_v52, %v9117_v31  ;;  %v2647_v41 = vsel %vm15537_vm13, 0.0, %v9116_v52  ;;  %vm15541_vm1 = vmmov %vm15540_vm4 }
 0x78f   : > { %v2765_v42 = vrot.slane %v2647_v41, 4  ;;  %v2766_v45 = vrot.slane %v2643_v39, 4  ;;  %v2624_v55 = vsel %vm15538_vm5, %v9121_v40, %v9122_v32  ;;  %v2630_v7 = vsel %vm15539_vm6, 0.0, %v9121_v40  ;;  %v9125_v46 = vpop.permute.xlu1 %9124  ;;  %vm15542_vm13 = vmmov %vm15538_vm5 }
 0x790   : > { %v2633_v47 = vsel %vm11258_vm2, %v2630_v7, 0.0  ;;  %v2634_v48 = vsel %vm11262_vm14, %v2624_v55, 0.0  ;;  %v9127_v18 = vunpack.i.h.bf16 %v9125_v46  ;;  %v9126_v61 = vunpack.i.l.bf16 %v9125_v46  ;;  %v9130_v62 = vpop.permute.xlu0 %9129 }
 0x791   : > { %v2815_v63 = vsel %vm15540_vm4, %v2633_v47, %v2765_v42  ;;  %v9132_v14 = vunpack.i.h.bf16 %v9130_v62  ;;  %v9131_v53 = vunpack.i.l.bf16 %v9130_v62  ;;  %v2816_v12 = vsel %vm15541_vm1, %v2634_v48, %v2766_v45 }
 0x792   : > { %v2623_v13 = vsel %vm15542_vm13, %v9126_v61, %v9127_v18  ;;  %v2629_v17 = vsel %vm15538_vm5, 0.0, %v9126_v61  ;;  %vm15543_vm6 = vcmask 130048   ;;  %vm15545_vm4 = vcmask 121856  }
 0x793   : > { %v8124_v19 = vpack.c.bf16 %v2815_v63, %v2629_v17  ;;  %v2644_v6 = vsel %vm15543_vm6, %v9131_v53, %v9132_v14  ;;  %vm15544_vm0 = vmmov %vm15543_vm6  ;;  %v9135_v23 = vpop.permute.xlu1 %9134  ;;  %v8121_v49 = vpack.c.bf16 %v2816_v12, %v2623_v13  ;;  %vm15547_vm13 = vcmask 1043456  }
 0x794   : > { %v2648_v21 = vsel %vm15544_vm0, 0.0, %v9131_v53  ;;  %v2769_v59 = vrot.slane %v2644_v6, 4  ;;  %v9137_v54 = vunpack.i.h.bf16 %v9135_v23  ;;  %v9136_v2 = vunpack.i.l.bf16 %v9135_v23  ;;  %v9140_v60 = vpop.permute.xlu0 %9139  ;;  %vm15546_vm1 = vmmov %vm15545_vm4 }
 0x795   : > { %v2767_v1 = vrot.slane %v2648_v21, 4  ;;  %v9142_v56 = vunpack.i.h.bf16 %v9140_v60  ;;  %v9141_v36 = vunpack.i.l.bf16 %v9140_v60  ;;  %8123 = vmatprep.subr.msk.bf16.mxu0 %vm11286_vm7, %v8121_v49  ;;  %vm15548_vm0 = vmmov %vm15547_vm13  ;;  %vm15549_vm5 = vcmask 7168  }
 0x796   : > { %v2657_v29 = vsel %vm15545_vm4, %v9136_v2, %v9137_v54  ;;  %v2663_v35 = vsel %vm15546_vm1, 0.0, %v9136_v2  ;;  %8126 = vmatpush1.bf16.msk.msra.mxu0 %vm11295_vm10, %v8124_v19  ;;  %v2770_v30 = vsel %vm15548_vm0, %v2766_v45, %v2769_v59  ;;  %vm15550_vm6 = vmmov %vm15549_vm5 }
 0x797   : > { %v2768_v22 = vsel %vm15547_vm13, %v2765_v42, %v2767_v1  ;;  %v2683_v52 = vsel %vm15549_vm5, 0.0, %v9141_v36  ;;  %v9145_v0 = vpop.permute.xlu1 %9144  ;;  %v8127_v32 = vpack.c.bf16 %v2657_v29, %v2770_v30  ;;  %v2677_v40 = vsel %vm15550_vm6, %v9141_v36, %v9142_v56  ;;  %vm15551_vm4 = vmmov %vm15549_vm5 }
 0x798   : > { %v8130_v31 = vpack.c.bf16 %v2663_v35, %v2768_v22  ;;  %v9147_v39 = vunpack.i.h.bf16 %v9145_v0  ;;  %v9146_v41 = vunpack.i.l.bf16 %v9145_v0  ;;  %v9150_v55 = vpop.permute.xlu0 %9149  ;;  %v2685_v42 = vsel %vm11258_vm2, %v2683_v52, 0.0  ;;  %vm15552_vm1 = vmmov %vm15551_vm4 }
 0x799   : > { %v9152_v7 = vunpack.i.h.bf16 %v9150_v55  ;;  %v9151_v46 = vunpack.i.l.bf16 %v9150_v55  ;;  %8129 = vmatprep.subr.msk.bf16.mxu0 %vm11330_vm11, %v8127_v32  ;;  %v2686_v48 = vsel %vm11262_vm14, %v2677_v40, 0.0  ;;  %vm15553_vm13 = vcmask 121856  }
 0x79a   : > { %v2678_v45 = vsel %vm15551_vm4, %v9146_v41, %v9147_v39  ;;  %v2684_v47 = vsel %vm15552_vm1, 0.0, %v9146_v41  ;;  %8132 = vmatpush1.bf16.msk.msra.mxu0 %vm11337_vm3, %v8130_v31  ;;  %vm15554_vm0 = vmmov %vm15553_vm13  ;;  %v2779_v23 = vrot.slane %v2685_v42, 4  ;;  %v2780_v49 = vrot.slane %v2686_v48, 4 }
 0x79b   : > { %v2687_v18 = vsel %vm11258_vm2, %v2684_v47, 0.0  ;;  %v2688_v61 = vsel %vm11262_vm14, %v2678_v45, 0.0  ;;  %v2664_v62 = vsel %vm15553_vm13, 0.0, %v9151_v46  ;;  %v9155_v63 = vpop.permute.xlu1 %9154  ;;  %v2658_v12 = vsel %vm15554_vm0, %v9151_v46, %v9152_v7 }
 0x79c   : > { %v2781_v14 = vrot.slane %v2687_v18, 4  ;;  %v2783_v53 = vrot.slane %v2688_v61, 4  ;;  %v9157_v13 = vunpack.i.h.bf16 %v9155_v63  ;;  %v9160_v17 = vpop.permute.xlu0 %9159  ;;  %v9156_v19 = vunpack.i.l.bf16 %v9155_v63 }
 0x79d   : > { %v9162_v6 = vunpack.i.h.bf16 %v9160_v17  ;;  %v9161_v21 = vunpack.i.l.bf16 %v9160_v17  ;;  %v2667_v1 = vsel %vm11301_vm9, %v2664_v62, 0.0  ;;  %vm15555_vm5 = vcmask 1039360  }
 0x79e   : > { %v2697_v59 = vsel %vm15555_vm5, %v9157_v13, %v9156_v19  ;;  %vm15556_vm6 = vmmov %vm15555_vm5  ;;  %v2668_v56 = vsel %vm11305_vm12, %v2658_v12, 0.0  ;;  %vm15558_vm1 = vcmask 1043456  }
 0x79f   : > { %v2703_v54 = vsel %vm15556_vm6, %v9156_v19, 0.0  ;;  %vm15557_vm4 = vmmov %vm15555_vm5  ;;  %v9165_v60 = vpop.permute.xlu1 %9164  ;;  %v2705_v36 = vsel %vm11301_vm9, %v2697_v59, 0.0  ;;  %v2784_v22 = vsel %vm15558_vm1, %v2780_v49, %v2783_v53 }
 0x7a0   : > { %v2704_v2 = vsel %vm15557_vm4, %v9161_v21, 0.0  ;;  %v2706_v29 = vsel %vm11305_vm12, %v2703_v54, 0.0  ;;  %v9170_v35 = vpop.permute.xlu0 %9169  ;;  %vm15559_vm13 = vmmov %vm15558_vm1  ;;  %v2793_v41 = vrot.slane %v2705_v36, 4  ;;  %v9166_v48 = vunpack.i.l.bf16 %v9165_v60 }
 0x7a1   : > { %v2782_v30 = vsel %vm15559_vm13, %v2779_v23, %v2781_v14  ;;  %vm15560_vm0 = vmmov %vm15557_vm4  ;;  %v2708_v52 = vsel %vm11305_vm12, %v2704_v2, 0.0  ;;  %v9172_v0 = vunpack.i.h.bf16 %v9170_v35  ;;  %v9171_v32 = vunpack.i.l.bf16 %v9170_v35 }
 0x7a2   : > { %v2698_v31 = vsel %vm15560_vm0, %v9162_v6, %v9161_v21  ;;  %vm15561_vm5 = vmmov %vm15558_vm1  ;;  %v2794_v55 = vrot.slane %v2706_v29, 4  ;;  %v2797_v47 = vrot.slane %v2708_v52, 4  ;;  %vm15563_vm4 = vcmask 916480  }
 0x7a3   : > { %v2818_v40 = vsel %vm15561_vm5, %v2668_v56, %v2780_v49  ;;  %vm15562_vm6 = vmmov %vm15558_vm1  ;;  %v9175_v42 = vpop.permute.xlu1 %9174  ;;  %v2707_v45 = vsel %vm11301_vm9, %v2698_v31, 0.0  ;;  %v2742_v61 = vsel %vm15563_vm4, %v9172_v0, 0.0  ;;  %v9167_v17 = vunpack.i.h.bf16 %v9165_v60 }
 0x7a4   : > { %v2817_v39 = vsel %vm15562_vm6, %v2667_v1, %v2779_v23  ;;  %v8133_v7 = vpack.c.bf16 %v2784_v22, %v2818_v40  ;;  %v9180_v18 = vpop.permute.xlu0 %9179  ;;  %vm15564_vm1 = vmmov %vm15563_vm4  ;;  %v9177_v63 = vunpack.i.h.bf16 %v9175_v42  ;;  %v9176_v14 = vunpack.i.l.bf16 %v9175_v42 }
 0x7a5   : > { %v8135_v46 = vpack.c.bf16 %v2782_v30, %v2817_v39  ;;  %v2741_v62 = vsel %vm15564_vm1, %v9171_v32, 0.0  ;;  %v9182_v53 = vunpack.i.h.bf16 %v9180_v18  ;;  %v9181_v12 = vunpack.i.l.bf16 %v9180_v18  ;;  %vm15565_vm13 = vmmov %vm15561_vm5 }
 0x7a6   : > { %8134 = vmatprep.subr.bf16.mxu0 %v8133_v7  ;;  %v2795_v13 = vrot.slane %v2707_v45, 4  ;;  %v2820_v19 = vsel %vm15565_vm13, %v11637_v28, %v2794_v55  ;;  %vm15566_vm0 = vmmov %vm15561_vm5  ;;  %vm15567_vm5 = vcmask 924672   ;;  %v2809_v1 = vrot.slane %v2742_v61, 4 }
 0x7a7   : > { %8136 = vmatpush1.bf16.msra.mxu0 %v8135_v46  ;;  %v2819_v6 = vsel %vm15566_vm0, %v11634_v27, %v2793_v41  ;;  %v9185_v21 = vpop.permute.xlu1 %9184  ;;  %v2723_v23 = vsel %vm15567_vm5, %v9166_v48, 0.0  ;;  %vm15568_vm6 = vmmov %vm15566_vm0  ;;  %v2806_v54 = vrot.slane %v2741_v62, 4  ;;  %v2737_v60 = vsel %vm15564_vm1, %v9181_v12, %v9171_v32 }
 0x7a8   : > { %v2798_v49 = vsel %vm15568_vm6, %v2794_v55, %v2797_v47  ;;  %vm15569_vm4 = vmmov %vm15567_vm5  ;;  %v8137_v29 = vpack.c.bf16 %v2820_v19, %v11631_v44  ;;  %v8139_v35 = vpack.c.bf16 %v2819_v6, %v11628_v24  ;;  %v9186_v22 = vunpack.i.l.bf16 %v9185_v21  ;;  %v9190_v30 = vpop.permute.xlu0 %9189  ;;  %v7562_v6 = vld [vmem:[%s15480_s8 + $0x20] sm:$0xff] }
 0x7a9   : > { %v2724_v59 = vsel %vm15569_vm4, %v9176_v14, 0.0  ;;  %vm15570_vm3 = vmmov %vm15564_vm1  ;;  %v9187_v40 = vunpack.i.h.bf16 %v9185_v21  ;;  %v8141_v55 = vpack.c.bf16 %v2723_v23, %v2798_v49  ;;  %v2805_v7 = vrot.slane %v2737_v60, 4  ;;  %v7563_v21 = vld [vmem:[%s15480_s8 + $0x28] sm:$0xf] }
 0x7aa   : > { %v2728_v2 = vsel %vm11262_vm14, %v2724_v59, 0.0  ;;  %v2738_v56 = vsel %vm15570_vm3, %v9182_v53, %v9172_v0  ;;  %vm15571_vm13 = vmmov %vm15569_vm4  ;;  %8138 = vmatprep.subr.bf16.mxu0 %v8137_v29  ;;  %vm15575_vm3 = vcmask 908288   ;;  %v9191_v42 = vunpack.i.l.bf16 %v9190_v30 }
 0x7ab   : > { %v2718_v36 = vsel %vm15571_vm13, %v9177_v63, %v9176_v14  ;;  %vm15572_vm0 = vmmov %vm15569_vm4  ;;  %v2807_v32 = vrot.slane %v2738_v56, 4  ;;  %v2758_v0 = vsel %vm15575_vm3, %v9186_v22, 0.0  ;;  %8140 = vmatpush1.bf16.msra.mxu0 %v8139_v35  ;;  %v9192_v61 = vunpack.i.h.bf16 %v9190_v30 }
 0x7ac   : > { %v2717_v31 = vsel %vm15572_vm0, %v9167_v17, %v9166_v48  ;;  %vm15573_vm5 = vmmov %vm15568_vm6  ;;  %v2727_v46 = vsel %vm11258_vm2, %v2718_v36, 0.0  ;;  %8143 = vmatprep.subr.msk.bf16.mxu0 %vm11386_vm15, %v8141_v55  ;;  %v2762_v18 = vsel %vm11305_vm12, %v2758_v0, 0.0 }
 0x7ad   : > { %v2796_v52 = vsel %vm15573_vm5, %v2793_v41, %v2795_v13  ;;  %vm15574_vm6 = vmmov %vm15573_vm5 }
 0x7ae   : > { %v2822_v39 = vsel %vm15574_vm6, %v2728_v2, %v2806_v54  ;;  %vm15576_vm4 = vmmov %vm15573_vm5  ;;  %v8144_v47 = vpack.c.bf16 %v2717_v31, %v2796_v52 }
 0x7af   : > { %v2810_v45 = vsel %vm15576_vm4, %v2806_v54, %v2809_v1  ;;  %vm15577_vm1 = vmmov %vm15575_vm3  ;;  %vm15582_vm3 = vnez %v15476_v50 }
 0x7b0   : > { %v8147_v41 = vpack.c.bf16 %v2810_v45, %v2822_v39  ;;  %v2757_v48 = vsel %vm15577_vm1, %v9187_v40, 0.0  ;;  %vm15578_vm13 = vmmov %vm15576_vm4  ;;  %8146 = vmatpush1.bf16.msk.msra.mxu0 %vm11402_vm8, %v8144_v47  ;;  %v7580_v45 = vld [vmem:[%s15145_s9 + $0x30] sm:$0xff] }
 0x7b1   : > { %v2808_v62 = vsel %vm15578_vm13, %v2805_v7, %v2807_v32  ;;  %vm15579_vm0 = vmmov %vm15576_vm4  ;;  %v8151_v53 = vpack.c.bf16 %v2762_v18, %v2757_v48  ;;  %vm15583_vm4 = vnez %v15479_v11 }
 0x7b2   : > { %v2821_v63 = vsel %vm15579_vm0, %v2727_v46, %v2805_v7  ;;  %vm15580_vm5 = vmmov %vm15577_vm1  ;;  %8148 = vmatprep.subr.bf16.mxu0 %v8147_v41  ;;  %v7581_v46 = vld [vmem:[%s15145_s9 + $0x38] sm:$0xf]  ;;  %vm15586_vm0 = vcmask 130048  }
 0x7b3   : > { %v2752_v14 = vsel %vm15580_vm5, %v9191_v42, %v9186_v22  ;;  %v8149_v12 = vpack.c.bf16 %v2808_v62, %v2821_v63  ;;  %vm15581_vm6 = vmmov %vm15577_vm1  ;;  %vm15584_vm1 = vcmask 883712  }
 0x7b4   : > { %v2751_v13 = vsel %vm15581_vm6, %v9192_v61, %v9187_v40  ;;  %v2761_v17 = vsel %vm11301_vm9, %v2752_v14, 0.0  ;;  %vm15585_vm13 = vmmov %vm15584_vm1  ;;  %vm15588_vm6 = vcmask 138240  }
 0x7b5   : > { %8150 = vmatpush1.bf16.msra.mxu0 %v8149_v12  ;;  %v8154_v19 = vpack.c.bf16 %v2761_v17, %v2751_v13  ;;  %vm15587_vm5 = vmmov %vm15586_vm0 }
 0x7b6   : > { %8153 = vmatprep.subr.msk.bf16.mxu0 %vm15582_vm3, %v8151_v53 }
 0x7b8   : > { %v2826_v23 = vpop.permute.xlu1 %2825 }
 0x7b9   : > { %8156 = vmatpush1.bf16.msk.msra.mxu0 %vm15583_vm4, %v8154_v19  ;;  %v2831_v60 = vpop.permute.xlu0 %2830 }
 0x7bc   : > { %7576 = vmatmul.mubr.msk.f32.vlgmr.msra.gmra.mrb[18].mxu0 %vm15584_vm1, %v7562_v6  ;;  %vm15589_vm1 = vmmov %vm15588_vm6 }
 0x7bd   : > { %2915 = vmatprep.mubr.f32.mxu0 %v15257_v10 }
 0x7c0   : > { %7577 = vmatmul.mubr.msk.f32.gmra.mrb[20].mxu0 %vm15585_vm13, %v7563_v21  ;;  %vm15590_vm13 = vmmov %vm15589_vm1 }
 0x7c1   : > { %3621 = vmatprep.mubr.f32.mxu0 %v15257_v10 }
 0x88f   : > { %v2911_v49 = vpop.f32.mrb[18].mxu0 }
 0x890   : > { %v2912_v1 = vadd.f32 %v2911_v49, %v2826_v23  ;;  %v2913_v59 = vpop.f32.mrb[19].mxu0 }
 0x891   : > { %v2914_v54 = vadd.f32 %v2913_v59, %v2826_v23 }
 0x892   : > { %v11787_v2 = vmax.f32 %v2912_v1, 0.0 }
 0x893   : > { %v11789_v56 = vmax.f32 %v2914_v54, 0.0  ;;  %v2917_v36 = vpop.f32.mrb[20].mxu0 }
 0x894   : > { %v2918_v29 = vadd.f32 %v2917_v36, %v2831_v60  ;;  %v2919_v35 = vpop.f32.mrb[21].mxu0 }
 0x895   : > { %v2920_v22 = vadd.f32 %v2919_v35, %v2831_v60  ;;  %v9193_v30 = vpack.i.bf16 %v11789_v56, %v11787_v2  ;;  %v9228_v39 = vpack.i.bf16 %v11787_v2, %v11789_v56 }
 0x896   : > { %v11793_v31 = vmax.f32 %v2918_v29, 0.0 }
 0x897   : > { %v11795_v52 = vmax.f32 %v2920_v22, 0.0  ;;  %9194 = vrot.lane.b32.xlu1 %v9193_v30, %s15533_s5 }
 0x898   : > { %v9258_v32 = vpack.i.bf16 %v11793_v31, %v11787_v2  ;;  %v9268_v42 = vpack.i.bf16 %v11787_v2, %v11793_v31 }
 0x899   : > { %v9208_v40 = vpack.i.bf16 %v11795_v52, %v11793_v31  ;;  %v9243_v55 = vpack.i.bf16 %v11793_v31, %v11795_v52  ;;  %v9248_v7 = vpack.i.bf16 %v11795_v52, %v11789_v56  ;;  %v9263_v0 = vpack.i.bf16 %v11789_v56, %v11795_v52 }
 0x89b   : > { %9209 = vrot.lane.b32.xlu0 %v9208_v40, %s15534_s6  ;;  %9199 = vrot.lane.b32.xlu1 %v9193_v30, %s15534_s6 }
 0x89f   : > { %9214 = vrot.lane.b32.xlu0 %v9208_v40, %s15533_s5  ;;  %9204 = vrot.lane.b32.xlu1 %v9193_v30, %s15535_s1 }
 0x8a3   : > { %9219 = vrot.lane.b32.xlu0 %v9193_v30, %s15481_s21  ;;  %9224 = vrot.lane.b32.xlu1 %v9208_v40, %s15481_s21 }
 0x8a7   : > { %9239 = vrot.lane.b32.xlu0 %v9208_v40, %s15535_s1  ;;  %9229 = vrot.lane.b32.xlu1 %v9228_v39, %s15426_s29 }
 0x8ab   : > { %9244 = vrot.lane.b32.xlu0 %v9243_v55, %s15426_s29  ;;  %9234 = vrot.lane.b32.xlu1 %v9228_v39, %s15427_s30 }
 0x8af   : > { %9249 = vrot.lane.b32.xlu0 %v9248_v7, %s15428_s2  ;;  %9254 = vrot.lane.b32.xlu1 %v9243_v55, %s15427_s30 }
 0x8b3   : > { %9259 = vrot.lane.b32.xlu0 %v9258_v32, %s15428_s2  ;;  %9264 = vrot.lane.b32.xlu1 %v9263_v0, %s15429_s0 }
 0x8b7   : > { %9269 = vrot.lane.b32.xlu0 %v9268_v42, %s15429_s0  ;;  %3151 = vperm.xlu1 %8952, %v7581_v46  }
 0x8bb   : > { %3146 = vperm.xlu0 %8951, %v7580_v45  }
 0x909   : > { %v9195_v41 = vpop.permute.xlu1 %9194 }
 0x90a   : > { %v9197_v47 = vunpack.i.h.bf16 %v9195_v41  ;;  %v9196_v48 = vunpack.i.l.bf16 %v9195_v41 }
 0x90c   : > { %v2968_v18 = vsel %vm15586_vm0, 0.0, %v9196_v48  ;;  %v2964_v63 = vsel %vm15587_vm5, %v9196_v48, %v9197_v47  ;;  %vm15591_vm0 = vcmask 1043456   ;;  %vm15592_vm5 = vmmov %vm15589_vm1 }
 0x90d   : > { %v9210_v61 = vpop.permute.xlu0 %9209  ;;  %v9200_v62 = vpop.permute.xlu1 %9199  ;;  %v3086_v17 = vrot.slane %v2968_v18, 4  ;;  %v3087_v21 = vrot.slane %v2964_v63, 4 }
 0x90e   : > { %v9212_v14 = vunpack.i.h.bf16 %v9210_v61  ;;  %v9211_v53 = vunpack.i.l.bf16 %v9210_v61  ;;  %v9201_v12 = vunpack.i.l.bf16 %v9200_v62  ;;  %v9202_v13 = vunpack.i.h.bf16 %v9200_v62 }
 0x910   : > { %v2945_v19 = vsel %vm15588_vm6, %v9211_v53, %v9212_v14  ;;  %v2951_v6 = vsel %vm15589_vm1, 0.0, %v9211_v53  ;;  %v2950_v54 = vsel %vm15590_vm13, 0.0, %v9201_v12  ;;  %v2944_v35 = vsel %vm15592_vm5, %v9201_v12, %v9202_v13  ;;  %vm15593_vm6 = vmmov %vm15591_vm0 }
 0x911   : > { %v2954_v23 = vsel %vm11258_vm2, %v2951_v6, 0.0  ;;  %v2955_v49 = vsel %vm11262_vm14, %v2945_v19, 0.0  ;;  %v9215_v1 = vpop.permute.xlu0 %9214  ;;  %v9205_v59 = vpop.permute.xlu1 %9204  ;;  %vm15594_vm1 = vcmask 130048   ;;  %vm15596_vm13 = vcmask 121856  }
 0x912   : > { %v3136_v60 = vsel %vm15591_vm0, %v2954_v23, %v3086_v17  ;;  %v9217_v36 = vunpack.i.h.bf16 %v9215_v1  ;;  %v9216_v29 = vunpack.i.l.bf16 %v9215_v1  ;;  %v9206_v30 = vunpack.i.l.bf16 %v9205_v59  ;;  %vm15595_vm4 = vmmov %vm15594_vm1 }
 0x913   : > { %v8160_v22 = vpack.c.bf16 %v3136_v60, %v2950_v54  ;;  %v3137_v40 = vsel %vm15593_vm6, %v2955_v49, %v3087_v21  ;;  %v9207_v46 = vunpack.i.h.bf16 %v9205_v59 }
 0x914   : > { %v2965_v39 = vsel %vm15594_vm1, %v9216_v29, %v9217_v36  ;;  %v2969_v55 = vsel %vm15595_vm4, 0.0, %v9216_v29  ;;  %v8157_v7 = vpack.c.bf16 %v3137_v40, %v2944_v35  ;;  %v2984_v61 = vsel %vm15596_vm13, 0.0, %v9206_v30  ;;  %vm15600_vm1 = vmmov %vm15591_vm0 }
 0x915   : > { %v3088_v32 = vrot.slane %v2969_v55, 4  ;;  %v3090_v0 = vrot.slane %v2965_v39, 4  ;;  %v9220_v42 = vpop.permute.xlu0 %9219  ;;  %v9225_v45 = vpop.permute.xlu1 %9224  ;;  %vm15597_vm4 = vcmask 7168  }
 0x916   : > { %v9222_v41 = vunpack.i.h.bf16 %v9220_v42  ;;  %v9221_v47 = vunpack.i.l.bf16 %v9220_v42  ;;  %v9227_v48 = vunpack.i.h.bf16 %v9225_v45  ;;  %v9226_v18 = vunpack.i.l.bf16 %v9225_v45  ;;  %8159 = vmatprep.subr.msk.bf16.mxu1 %vm11286_vm7, %v8157_v7  ;;  %vm15598_vm5 = vmmov %vm15597_vm4 }
 0x917   : > { %v3089_v62 = vsel %vm15591_vm0, %v3086_v17, %v3088_v32  ;;  %8162 = vmatpush1.bf16.msk.msra.mxu1 %vm11295_vm10, %v8160_v22  ;;  %vm15599_vm6 = vmmov %vm15597_vm4  ;;  %v3091_v12 = vsel %vm15600_vm1, %v3087_v21, %v3090_v0  ;;  %vm15602_vm0 = vcmask 121856  }
 0x918   : > { %v2998_v63 = vsel %vm15597_vm4, %v9221_v47, %v9222_v41  ;;  %v3004_v14 = vsel %vm15598_vm5, 0.0, %v9221_v47  ;;  %v2999_v53 = vsel %vm15599_vm6, %v9226_v18, %v9227_v48  ;;  %vm15601_vm13 = vmmov %vm15597_vm4  ;;  %v2978_v1 = vsel %vm15602_vm0, %v9206_v30, %v9207_v46 }
 0x919   : > { %v3006_v13 = vsel %vm11258_vm2, %v3004_v14, 0.0  ;;  %v3007_v19 = vsel %vm11262_vm14, %v2998_v63, 0.0  ;;  %v3005_v6 = vsel %vm15601_vm13, 0.0, %v9226_v18  ;;  %v3009_v17 = vsel %vm11262_vm14, %v2999_v53, 0.0  ;;  %v9240_v23 = vpop.permute.xlu0 %9239  ;;  %v9230_v49 = vpop.permute.xlu1 %9229  ;;  %vm15603_vm4 = vmmov %vm15602_vm0 }
 0x91a   : > { %v8166_v59 = vpack.c.bf16 %v2984_v61, %v3089_v62  ;;  %v3100_v54 = vrot.slane %v3006_v13, 4  ;;  %v3008_v21 = vsel %vm11258_vm2, %v3005_v6, 0.0  ;;  %v3101_v60 = vrot.slane %v3007_v19, 4  ;;  %vm15604_vm5 = vmmov %vm15602_vm0 }
 0x91b   : > { %v9242_v36 = vunpack.i.h.bf16 %v9240_v23  ;;  %v9241_v29 = vunpack.i.l.bf16 %v9240_v23  ;;  %v9232_v35 = vunpack.i.h.bf16 %v9230_v49  ;;  %v3102_v22 = vrot.slane %v3008_v21, 4 }
 0x91c   : > { %v3104_v40 = vrot.slane %v3009_v17, 4  ;;  %v9231_v39 = vunpack.i.l.bf16 %v9230_v49  ;;  %v8163_v55 = vpack.c.bf16 %v2978_v1, %v3091_v12  ;;  %vm15605_vm6 = vcmask 1039360  }
 0x91d   : > { %v2979_v7 = vsel %vm15603_vm4, %v9241_v29, %v9242_v36  ;;  %v2985_v32 = vsel %vm15604_vm5, 0.0, %v9241_v29  ;;  %v9245_v0 = vpop.permute.xlu0 %9244  ;;  %v9235_v42 = vpop.permute.xlu1 %9234  ;;  %vm15606_vm1 = vmmov %vm15605_vm6  ;;  %vm15607_vm13 = vnez %v15458_v58  ;;  %vm15608_vm0 = vcmask 1043456  }
 0x91e   : > { %v2988_v30 = vsel %vm11301_vm9, %v2985_v32, 0.0  ;;  %v3024_v46 = vsel %vm15605_vm6, %v9231_v39, 0.0  ;;  %8165 = vmatprep.subr.msk.bf16.mxu1 %vm11330_vm11, %v8163_v55  ;;  %v9247_v45 = vunpack.i.h.bf16 %v9245_v0  ;;  %v3018_v41 = vsel %vm15606_vm1, %v9232_v35, %v9231_v39  ;;  %vm15609_vm4 = vmmov %vm15608_vm0 }
 0x91f   : > { %v3027_v47 = vsel %vm11305_vm12, %v3024_v46, 0.0  ;;  %8168 = vmatpush1.bf16.msk.msra.mxu1 %vm15607_vm13, %v8166_v59  ;;  %v9246_v48 = vunpack.i.l.bf16 %v9245_v0  ;;  %v2989_v18 = vsel %vm11305_vm12, %v2979_v7, 0.0  ;;  %v3105_v61 = vsel %vm15608_vm0, %v3101_v60, %v3104_v40  ;;  %vm15610_vm5 = vmmov %vm15606_vm1 }
 0x920   : > { %v3103_v62 = vsel %vm15609_vm4, %v3100_v54, %v3102_v22  ;;  %vm15611_vm6 = vmmov %vm15606_vm1  ;;  %v3026_v6 = vsel %vm11301_vm9, %v3018_v41, 0.0  ;;  %v3115_v17 = vrot.slane %v3027_v47, 4  ;;  %v9236_v49 = vunpack.i.l.bf16 %v9235_v42 }
 0x921   : > { %v3019_v63 = vsel %vm15610_vm5, %v9247_v45, %v9246_v48  ;;  %v3025_v14 = vsel %vm15611_vm6, %v9246_v48, 0.0  ;;  %v9250_v53 = vpop.permute.xlu0 %9249  ;;  %v9255_v12 = vpop.permute.xlu1 %9254  ;;  %vm15612_vm1 = vmmov %vm15608_vm0  ;;  %v9237_v32 = vunpack.i.h.bf16 %v9235_v42  ;;  %vm15616_vm5 = vcmask 924672  }
 0x922   : > { %v3139_v13 = vsel %vm15612_vm1, %v2989_v18, %v3101_v60  ;;  %vm15613_vm11 = vmmov %vm15608_vm0  ;;  %v3029_v23 = vsel %vm11305_vm12, %v3025_v14, 0.0  ;;  %v3028_v1 = vsel %vm11301_vm9, %v3019_v63, 0.0  ;;  %v9252_v21 = vunpack.i.h.bf16 %v9250_v53 }
 0x923   : > { %v3138_v19 = vsel %vm15613_vm11, %v2988_v30, %v3100_v54  ;;  %v3118_v59 = vrot.slane %v3029_v23, 4  ;;  %v9251_v36 = vunpack.i.l.bf16 %v9250_v53  ;;  %v9256_v29 = vunpack.i.l.bf16 %v9255_v12  ;;  %vm15617_vm6 = vmmov %vm15616_vm5 }
 0x924   : > { %v8169_v35 = vpack.c.bf16 %v3105_v61, %v3139_v13  ;;  %v8171_v22 = vpack.c.bf16 %v3103_v62, %v3138_v19  ;;  %v3114_v60 = vrot.slane %v3026_v6, 4  ;;  %vm15614_vm11 = vcmask 916480   ;;  %vm15618_vm1 = vmmov %vm15608_vm0 }
 0x925   : > { %v3119_v54 = vsel %vm15608_vm0, %v3115_v17, %v3118_v59  ;;  %v3063_v40 = vsel %vm15614_vm11, %v9252_v21, 0.0  ;;  %vm15615_vm4 = vmmov %vm15614_vm11  ;;  %v9260_v55 = vpop.permute.xlu0 %9259  ;;  %v3116_v7 = vrot.slane %v3028_v1, 4  ;;  %v3044_v0 = vsel %vm15616_vm5, %v9236_v49, 0.0  ;;  %v9265_v46 = vpop.permute.xlu1 %9264 }
 0x926   : > { %v3062_v39 = vsel %vm15615_vm4, %v9251_v36, 0.0  ;;  %v9257_v30 = vunpack.i.h.bf16 %v9255_v12  ;;  %8170 = vmatprep.subr.bf16.mxu1 %v8169_v35  ;;  %v8177_v45 = vpack.c.bf16 %v3044_v0, %v3119_v54  ;;  %v3045_v41 = vsel %vm15617_vm6, %v9256_v29, 0.0  ;;  %vm15619_vm0 = vmmov %vm15615_vm4 }
 0x927   : > { %8172 = vmatpush1.bf16.msra.mxu1 %v8171_v22  ;;  %v3141_v47 = vsel %vm15618_vm1, %v11795_v52, %v3115_v17  ;;  %v9262_v48 = vunpack.i.h.bf16 %v9260_v55  ;;  %v3130_v18 = vrot.slane %v3063_v40, 4  ;;  %v3127_v61 = vrot.slane %v3062_v39, 4  ;;  %vm15620_vm11 = vmmov %vm15618_vm1 }
 0x928   : > { %v8173_v62 = vpack.c.bf16 %v3141_v47, %v11789_v56  ;;  %v9261_v63 = vunpack.i.l.bf16 %v9260_v55  ;;  %v3049_v42 = vsel %vm11262_vm14, %v3045_v41, 0.0  ;;  %v9266_v53 = vunpack.i.l.bf16 %v9265_v46  ;;  %vm15621_vm4 = vmmov %vm15616_vm5  ;;  %v7579_v41 = vld [vmem:[%s15480_s8 + $0x38] sm:$0xf] }
 0x929   : > { %v3059_v14 = vsel %vm15619_vm0, %v9262_v48, %v9252_v21  ;;  %v3140_v12 = vsel %vm15620_vm11, %v11793_v31, %v3114_v60  ;;  %v9270_v13 = vpop.permute.xlu0 %9269  ;;  %v3039_v19 = vsel %vm15621_vm4, %v9257_v30, %v9256_v29  ;;  %vm15622_vm5 = vmmov %vm15619_vm0  ;;  %v3117_v23 = vsel %vm15618_vm1, %v3114_v60, %v3116_v7 }
 0x92a   : > { %8174 = vmatprep.subr.bf16.mxu1 %v8173_v62  ;;  %v3058_v52 = vsel %vm15622_vm5, %v9261_v63, %v9251_v36  ;;  %v3128_v6 = vrot.slane %v3059_v14, 4  ;;  %v8175_v17 = vpack.c.bf16 %v3140_v12, %v11787_v2  ;;  %vm15623_vm6 = vmmov %vm15621_vm4  ;;  %v9267_v59 = vunpack.i.h.bf16 %v9265_v46 }
 0x92b   : > { %v3038_v56 = vsel %vm15623_vm6, %v9237_v32, %v9236_v49  ;;  %v3126_v1 = vrot.slane %v3058_v52, 4  ;;  %v9271_v21 = vunpack.i.l.bf16 %v9270_v13  ;;  %vm15624_vm0 = vmmov %vm15618_vm1  ;;  %v3048_v29 = vsel %vm11258_vm2, %v3039_v19, 0.0 }
 0x92c   : > { %8176 = vmatpush1.bf16.msra.mxu1 %v8175_v17  ;;  %v3131_v35 = vsel %vm15624_vm0, %v3127_v61, %v3130_v18  ;;  %vm15625_vm11 = vmmov %vm15624_vm0  ;;  %vm15626_vm4 = vcmask 908288   ;;  %v8180_v22 = vpack.c.bf16 %v3038_v56, %v3117_v23  ;;  %v9272_v54 = vunpack.i.h.bf16 %v9270_v13  ;;  %v7594_v23 = vld [vmem:[%s15146_s10 + $0x20] sm:$0xff] }
 0x92d   : > { %v3143_v31 = vsel %vm15625_vm11, %v3049_v42, %v3127_v61  ;;  %v3079_v36 = vsel %vm15626_vm4, %v9266_v53, 0.0  ;;  %8179 = vmatprep.subr.msk.bf16.mxu1 %vm11386_vm15, %v8177_v45  ;;  %vm15627_vm5 = vmmov %vm15624_vm0  ;;  %v7578_v45 = vld [vmem:[%s15480_s8 + $0x30] sm:$0xff] }
 0x92e   : > { %v8183_v2 = vpack.c.bf16 %v3131_v35, %v3143_v31  ;;  %v3129_v49 = vsel %vm15627_vm5, %v3126_v1, %v3128_v6  ;;  %vm15628_vm6 = vmmov %vm15624_vm0  ;;  %v3083_v39 = vsel %vm11305_vm12, %v3079_v36, 0.0  ;;  %vm15633_vm5 = vcmask 883712  }
 0x92f   : > { %v3142_v60 = vsel %vm15628_vm6, %v3048_v29, %v3126_v1  ;;  %vm15629_vm1 = vmmov %vm15626_vm4  ;;  %vm15632_vm4 = vnez %v15479_v11  ;;  %v7595_v1 = vld [vmem:[%s15146_s10 + $0x28] sm:$0xf] }
 0x930   : > { %v3078_v40 = vsel %vm15629_vm1, %v9267_v59, 0.0  ;;  %vm15630_vm0 = vmmov %vm15629_vm1  ;;  %8182 = vmatpush1.bf16.msk.msra.mxu1 %vm11402_vm8, %v8180_v22  ;;  %v8185_v7 = vpack.c.bf16 %v3129_v49, %v3142_v60  ;;  %vm15635_vm1 = vcmask 1043456  }
 0x931   : > { %v3073_v55 = vsel %vm15630_vm0, %v9271_v21, %v9266_v53  ;;  %8184 = vmatprep.subr.bf16.mxu1 %v8183_v2  ;;  %v8187_v32 = vpack.c.bf16 %v3083_v39, %v3078_v40  ;;  %vm15631_vm11 = vmmov %vm15630_vm0  ;;  %v7596_v39 = vld [vmem:[%s15147_s11 + $0x1] sm:$0x1] }
 0x932   : > { %v3072_v0 = vsel %vm15631_vm11, %v9272_v54, %v9267_v59  ;;  %v3082_v30 = vsel %vm11301_vm9, %v3073_v55, 0.0  ;;  %vm15634_vm6 = vmmov %vm15633_vm5  ;;  %vm15637_vm11 = vcmask 7168  }
 0x933   : > { %v8190_v46 = vpack.c.bf16 %v3082_v30, %v3072_v0  ;;  %vm15636_vm0 = vmmov %vm15635_vm1  ;;  %v7597_v0 = vld [vmem:[%s15146_s10 + $0x30] sm:$0xff]  ;;  %v7598_v30 = vld [vmem:[%s15146_s10 + $0x38] sm:$0xf] }
 0x934   : > { %8186 = vmatpush1.bf16.msra.mxu1 %v8185_v7 }
 0x935   : > { %8189 = vmatprep.subr.msk.bf16.mxu1 %vm15582_vm3, %v8187_v32 }
 0x936   : > { %v3152_v63 = vpop.permute.xlu1 %3151 }
 0x938   : > { %8192 = vmatpush1.bf16.msk.msra.mxu1 %vm15632_vm4, %v8190_v46 }
 0x93a   : > { %v3147_v47 = vpop.permute.xlu0 %3146 }
 0x93b   : > { %7592 = vmatmul.mubr.msk.f32.vlgmr.msra.gmra.mrb[8].mxu1 %vm15633_vm5, %v7578_v45  ;;  %vm15638_vm5 = vcmask 3072   ;;  %v7599_v45 = vld [vmem:[%s15148_s12 + $0x10] sm:$0xff] }
 0x93c   : > { %3236 = vmatprep.mubr.f32.mxu1 %v15257_v10 }
 0x93f   : > { %7593 = vmatmul.mubr.msk.f32.gmra.mrb[10].mxu1 %vm15634_vm6, %v7579_v41  ;;  %v7600_v41 = vld [vmem:[%s15148_s12 + $0x18] sm:$0xf]  ;;  %vm15639_vm6 = vcmask 130048  }
 0x940   : > { %3942 = vmatprep.mubr.f32.mxu1 %v15257_v10 }
 0xa0e   : > { %v3232_v48 = vpop.f32.mrb[8].mxu1 }
 0xa0f   : > { %v3233_v18 = vadd.f32 %v3232_v48, %v3147_v47  ;;  %v3234_v61 = vpop.f32.mrb[9].mxu1 }
 0xa10   : > { %v3235_v62 = vadd.f32 %v3234_v61, %v3147_v47 }
 0xa12   : > { %v3243_v42 = vadd.f32 %v3235_v62, %v3233_v18  ;;  %v3238_v14 = vpop.f32.mrb[10].mxu1 }
 0xa13   : > { %v3239_v53 = vadd.f32 %v3238_v14, %v3152_v63  ;;  %v3240_v12 = vpop.f32.mrb[11].mxu1 }
 0xa14   : > { %v3241_v13 = vadd.f32 %v3240_v12, %v3152_v63  ;;  %3244 = vadd.xlane.f32.xlu1 %v3243_v42 }
 0xa15   : > { %v3246_v19 = vsel %vm15635_vm1, %v3239_v53, 0.0  ;;  %vm15640_vm1 = vmmov %vm15639_vm6 }
 0xa16   : > { %v3247_v52 = vsel %vm15636_vm0, %v3241_v13, 0.0  ;;  %vm15641_vm0 = vcmask 138240  }
 0xa17   : > { %v3248_v6 = vadd.f32 %v3247_v52, %v3246_v19 }
 0xa19   : > { %3249 = vadd.xlane.f32.xlu0 %v3248_v6 }
 0xaa1   : > { %v3245_v17 = vpop.xlane.xlu1 %3244 }
 0xaa2   : > { %v3251_v56 = vmul.f32 0.00390625, %v3245_v17 }
 0xaa4   : > { %v3256_v21 = vmul.f32 %v7594_v23, %v3251_v56 }
 0xaa6   : > { %v3250_v59 = vpop.xlane.xlu0 %3249  ;;  %v3258_v29 = vsel %vm15637_vm11, %v3256_v21, 0.0  ;;  %vm15642_vm11 = vmmov %vm15641_vm0 }
 0xaa7   : > { %v3252_v35 = vmul.f32 0.00390625, %v3250_v59 }
 0xaa9   : > { %v3257_v31 = vmul.f32 %v7595_v1, %v3252_v35 }
 0xaab   : > { %v3259_v36 = vsel %vm15638_vm5, %v3257_v31, 0.0  ;;  %vm15643_vm5 = vcmask 1043456  }
 0xaac   : > { %v3260_v2 = vadd.f32 %v3259_v36, %v3258_v29 }
 0xaae   : > { %v3261_v49 = vrot.slane %v3260_v2, 4 }
 0xab0   : > { %v3262_v22 = vadd.f32 %v3261_v49, %v3260_v2 }
 0xab2   : > { %v3263_v60 = vrot.slane %v3262_v22, 2 }
 0xab4   : > { %v3264_v54 = vadd.f32 %v3263_v60, %v3262_v22 }
 0xab6   : > { %v3265_v40 = vrot.slane %v3264_v54, 1 }
 0xab8   : > { %v3266_v55 = vadd.f32 %v3265_v40, %v3264_v54  ;;  %v7604_v40 = vld [vmem:[%s15145_s9 + $0x48] sm:$0xf] }
 0xaba   : > { %v3269_v7 = vadd.f32 %v7596_v39, %v3266_v55 }
 0xabc   : > { %v3270_v32 = vmax.f32 %v3269_v7, 0.0 }
 0xabe   : > { %v3277_v46 = vrot.slane %v3270_v32, %v10705_v3 }
 0xac0   : > { %v3278_v47 = vmul.f32 %v7597_v0, %v3277_v46  ;;  %v3279_v48 = vmul.f32 %v7598_v30, %v3277_v46 }
 0xac2   : > { %v3285_v61 = vadd.f32 %v7599_v45, %v3278_v47  ;;  %v3286_v63 = vadd.f32 %v7600_v41, %v3279_v48 }
 0xac4   : > { %v3287_v42 = vsub.f32 0.0, %v3285_v61  ;;  %v3288_v14 = vsub.f32 0.0, %v3286_v63 }
 0xac6   : > { %v3289_v12 = vmul.f32 1.442695, %v3287_v42  ;;  %v3291_v19 = vmul.f32 1.442695, %v3288_v14 }
 0xac8   : > { %10521 = vpow2.f32 %v3289_v12 }
 0xac9   : > { %10523 = vpow2.f32 %v3291_v19 }
 0xad2   : > { %v10522_v52 = vpop.eup %10521 }
 0xad3   : > { %v10524_v6 = vpop.eup %10523  ;;  %v3293_v17 = vadd.f32 1.0, %v10522_v52 }
 0xad4   : > { %v3294_v56 = vadd.f32 1.0, %v10524_v6 }
 0xad5   : > { %10525 = vrcp.f32 %v3293_v17 }
 0xad6   : > { %10527 = vrcp.f32 %v3294_v56 }
 0xadf   : > { %v10526_v23 = vpop.eup %10525 }
 0xae0   : > { %v10528_v1 = vpop.eup %10527  ;;  %3301 = vperm.xlu0 %8951, %v10526_v23  }
 0xae1   : > { %3306 = vperm.xlu1 %8952, %v10528_v1  }
 0xb5f   : > { %v3302_v59 = vpop.permute.xlu0 %3301 }
 0xb60   : > { %v3307_v21 = vpop.permute.xlu1 %3306  ;;  %v3309_v35 = vmul.f32 %v3302_v59, %v3233_v18  ;;  %v3310_v31 = vmul.f32 %v3302_v59, %v3235_v62 }
 0xb61   : > { %v3311_v29 = vmul.f32 %v3307_v21, %v3239_v53  ;;  %v3312_v36 = vmul.f32 %v3307_v21, %v3241_v13  ;;  %v7603_v13 = vld [vmem:[%s15145_s9 + $0x40] sm:$0xff] }
 0xb62   : > { %v11970_v2 = vadd.f32 %v3309_v35, %v11628_v24  ;;  %v11973_v49 = vadd.f32 %v3310_v31, %v11631_v44 }
 0xb63   : > { %v11976_v22 = vadd.f32 %v3311_v29, %v11634_v27  ;;  %v11979_v60 = vadd.f32 %v3312_v36, %v11637_v28 }
 0xb64   : > { %v9273_v54 = vpack.i.bf16 %v11973_v49, %v11970_v2  ;;  %v9313_v24 = vpack.i.bf16 %v11970_v2, %v11973_v49 }
 0xb65   : > { %v9278_v18 = vpack.i.bf16 %v11979_v60, %v11976_v22  ;;  %v9318_v44 = vpack.i.bf16 %v11976_v22, %v11979_v60  ;;  %v9328_v27 = vpack.i.bf16 %v11979_v60, %v11973_v49  ;;  %v9338_v28 = vpack.i.bf16 %v11976_v22, %v11970_v2 }
 0xb66   : > { %9274 = vrot.lane.b32.xlu1 %v9273_v54, %s15533_s5  ;;  %v9343_v62 = vpack.i.bf16 %v11973_v49, %v11979_v60  ;;  %v9348_v53 = vpack.i.bf16 %v11970_v2, %v11976_v22 }
 0xb67   : > { %9279 = vrot.lane.b32.xlu0 %v9278_v18, %s15534_s6 }
 0xb6a   : > { %9284 = vrot.lane.b32.xlu1 %v9273_v54, %s15534_s6 }
 0xb6b   : > { %9289 = vrot.lane.b32.xlu0 %v9278_v18, %s15533_s5 }
 0xb6e   : > { %9294 = vrot.lane.b32.xlu1 %v9273_v54, %s15535_s1 }
 0xb6f   : > { %9299 = vrot.lane.b32.xlu0 %v9273_v54, %s15481_s21 }
 0xb72   : > { %9304 = vrot.lane.b32.xlu1 %v9278_v18, %s15481_s21 }
 0xb73   : > { %9309 = vrot.lane.b32.xlu0 %v9278_v18, %s15535_s1 }
 0xb76   : > { %9314 = vrot.lane.b32.xlu1 %v9313_v24, %s15426_s29 }
 0xb77   : > { %9319 = vrot.lane.b32.xlu0 %v9318_v44, %s15426_s29 }
 0xb7a   : > { %9324 = vrot.lane.b32.xlu1 %v9313_v24, %s15427_s30 }
 0xb7b   : > { %9329 = vrot.lane.b32.xlu0 %v9328_v27, %s15428_s2 }
 0xb7e   : > { %9334 = vrot.lane.b32.xlu1 %v9318_v44, %s15427_s30 }
 0xb7f   : > { %9339 = vrot.lane.b32.xlu0 %v9338_v28, %s15428_s2 }
 0xb82   : > { %9344 = vrot.lane.b32.xlu1 %v9343_v62, %s15429_s0 }
 0xb83   : > { %9349 = vrot.lane.b32.xlu0 %v9348_v53, %s15429_s0 }
 0xb86   : > { %3537 = vperm.xlu1 %8952, %v7603_v13  }
 0xb87   : > { %3542 = vperm.xlu0 %8951, %v7604_v40  }
 0xbd8   : > { %v9275_v39 = vpop.permute.xlu1 %9274 }
 0xbd9   : > { %v9277_v55 = vunpack.i.h.bf16 %v9275_v39  ;;  %v9276_v7 = vunpack.i.l.bf16 %v9275_v39  ;;  %v9280_v32 = vpop.permute.xlu0 %9279 }
 0xbda   : > { %v9282_v0 = vunpack.i.h.bf16 %v9280_v32  ;;  %v9281_v30 = vunpack.i.l.bf16 %v9280_v32 }
 0xbdb   : > { %v3355_v46 = vsel %vm15639_vm6, %v9276_v7, %v9277_v55  ;;  %v3359_v45 = vsel %vm15640_vm1, 0.0, %v9276_v7  ;;  %vm15644_vm6 = vmmov %vm15643_vm5 }
 0xbdc   : > { %v3477_v41 = vrot.slane %v3359_v45, 4  ;;  %v3478_v47 = vrot.slane %v3355_v46, 4  ;;  %v3336_v48 = vsel %vm15641_vm0, %v9281_v30, %v9282_v0  ;;  %v3342_v61 = vsel %vm15642_vm11, 0.0, %v9281_v30  ;;  %v9285_v63 = vpop.permute.xlu1 %9284  ;;  %vm15645_vm1 = vmmov %vm15641_vm0 }
 0xbdd   : > { %v3345_v42 = vsel %vm11258_vm2, %v3342_v61, 0.0  ;;  %v3346_v14 = vsel %vm11262_vm14, %v3336_v48, 0.0  ;;  %v9287_v12 = vunpack.i.h.bf16 %v9285_v63  ;;  %v9286_v19 = vunpack.i.l.bf16 %v9285_v63  ;;  %v9290_v52 = vpop.permute.xlu0 %9289 }
 0xbde   : > { %v3527_v6 = vsel %vm15643_vm5, %v3345_v42, %v3477_v41  ;;  %v9292_v17 = vunpack.i.h.bf16 %v9290_v52  ;;  %v9291_v56 = vunpack.i.l.bf16 %v9290_v52  ;;  %v3528_v23 = vsel %vm15644_vm6, %v3346_v14, %v3478_v47 }
 0xbdf   : > { %v3335_v1 = vsel %vm15645_vm1, %v9286_v19, %v9287_v12  ;;  %v3341_v59 = vsel %vm15641_vm0, 0.0, %v9286_v19  ;;  %vm15646_vm11 = vcmask 130048   ;;  %vm15648_vm5 = vcmask 121856  }
 0xbe0   : > { %v8196_v21 = vpack.c.bf16 %v3527_v6, %v3341_v59  ;;  %v3356_v35 = vsel %vm15646_vm11, %v9291_v56, %v9292_v17  ;;  %vm15647_vm4 = vmmov %vm15646_vm11  ;;  %v9295_v29 = vpop.permute.xlu1 %9294  ;;  %v8193_v36 = vpack.c.bf16 %v3528_v23, %v3335_v1  ;;  %vm15650_vm1 = vcmask 1043456  }
 0xbe1   : > { %v3360_v31 = vsel %vm15647_vm4, 0.0, %v9291_v56  ;;  %v3481_v18 = vrot.slane %v3356_v35, 4  ;;  %v9297_v24 = vunpack.i.h.bf16 %v9295_v29  ;;  %v9296_v44 = vunpack.i.l.bf16 %v9295_v29  ;;  %v9300_v27 = vpop.permute.xlu0 %9299  ;;  %vm15649_vm6 = vmmov %vm15648_vm5 }
 0xbe2   : > { %v3479_v54 = vrot.slane %v3360_v31, 4  ;;  %v9302_v28 = vunpack.i.h.bf16 %v9300_v27  ;;  %v9301_v62 = vunpack.i.l.bf16 %v9300_v27  ;;  %8195 = vmatprep.subr.msk.bf16.mxu0 %vm11286_vm7, %v8193_v36  ;;  %vm15651_vm4 = vmmov %vm15650_vm1  ;;  %vm15652_vm0 = vcmask 7168  }
 0xbe3   : > { %v3369_v53 = vsel %vm15648_vm5, %v9296_v44, %v9297_v24  ;;  %v3375_v13 = vsel %vm15649_vm6, 0.0, %v9296_v44  ;;  %8198 = vmatpush1.bf16.msk.msra.mxu0 %vm11295_vm10, %v8196_v21  ;;  %v3482_v39 = vsel %vm15651_vm4, %v3478_v47, %v3481_v18  ;;  %vm15653_vm11 = vmmov %vm15652_vm0  ;;  %vm15654_vm5 = vnez %v15455_v34 }
 0xbe4   : > { %v3480_v40 = vsel %vm15650_vm1, %v3477_v41, %v3479_v54  ;;  %v3395_v7 = vsel %vm15652_vm0, 0.0, %v9301_v62  ;;  %v9305_v32 = vpop.permute.xlu1 %9304  ;;  %v8199_v0 = vpack.c.bf16 %v3369_v53, %v3482_v39  ;;  %v3389_v30 = vsel %vm15653_vm11, %v9301_v62, %v9302_v28  ;;  %vm15655_vm6 = vmmov %vm15652_vm0 }
 0xbe5   : > { %v8202_v55 = vpack.c.bf16 %v3375_v13, %v3480_v40  ;;  %v9307_v46 = vunpack.i.h.bf16 %v9305_v32  ;;  %v9306_v45 = vunpack.i.l.bf16 %v9305_v32  ;;  %v9310_v48 = vpop.permute.xlu0 %9309  ;;  %v3397_v41 = vsel %vm11258_vm2, %v3395_v7, 0.0  ;;  %vm15656_vm1 = vmmov %vm15652_vm0 }
 0xbe6   : > { %v9312_v61 = vunpack.i.h.bf16 %v9310_v48  ;;  %v9311_v63 = vunpack.i.l.bf16 %v9310_v48  ;;  %8201 = vmatprep.subr.msk.bf16.mxu0 %vm15654_vm5, %v8199_v0  ;;  %v3398_v14 = vsel %vm11262_vm14, %v3389_v30, 0.0  ;;  %vm15657_vm4 = vcmask 121856  }
 0xbe7   : > { %v3390_v47 = vsel %vm15655_vm6, %v9306_v45, %v9307_v46  ;;  %v3396_v42 = vsel %vm15656_vm1, 0.0, %v9306_v45  ;;  %8204 = vmatpush1.bf16.msk.msra.mxu0 %vm15607_vm13, %v8202_v55  ;;  %vm15658_vm0 = vmmov %vm15657_vm4  ;;  %v3491_v29 = vrot.slane %v3397_v41, 4  ;;  %v3492_v36 = vrot.slane %v3398_v14, 4 }
 0xbe8   : > { %v3399_v12 = vsel %vm11258_vm2, %v3396_v42, 0.0  ;;  %v3400_v19 = vsel %vm11262_vm14, %v3390_v47, 0.0  ;;  %v3376_v52 = vsel %vm15657_vm4, 0.0, %v9311_v63  ;;  %v9315_v6 = vpop.permute.xlu1 %9314  ;;  %v3370_v23 = vsel %vm15658_vm0, %v9311_v63, %v9312_v61 }
 0xbe9   : > { %v3493_v17 = vrot.slane %v3399_v12, 4  ;;  %v3495_v56 = vrot.slane %v3400_v19, 4  ;;  %v9317_v1 = vunpack.i.h.bf16 %v9315_v6  ;;  %v9320_v59 = vpop.permute.xlu0 %9319  ;;  %v9316_v21 = vunpack.i.l.bf16 %v9315_v6 }
 0xbea   : > { %v9322_v35 = vunpack.i.h.bf16 %v9320_v59  ;;  %v9321_v31 = vunpack.i.l.bf16 %v9320_v59  ;;  %v3379_v54 = vsel %vm11301_vm9, %v3376_v52, 0.0  ;;  %vm15659_vm11 = vcmask 1039360  }
 0xbeb   : > { %v3409_v18 = vsel %vm15659_vm11, %v9317_v1, %v9316_v21  ;;  %vm15660_vm6 = vmmov %vm15659_vm11  ;;  %v3380_v28 = vsel %vm11305_vm12, %v3370_v23, 0.0  ;;  %vm15662_vm4 = vcmask 1043456   ;;  %vm15674_vm13 = vcmask 916480  }
 0xbec   : > { %v3415_v24 = vsel %vm15660_vm6, %v9316_v21, 0.0  ;;  %vm15661_vm1 = vmmov %vm15660_vm6  ;;  %v9325_v27 = vpop.permute.xlu1 %9324  ;;  %v3417_v62 = vsel %vm11301_vm9, %v3409_v18, 0.0  ;;  %v3496_v40 = vsel %vm15662_vm4, %v3492_v36, %v3495_v56 }
 0xbed   : > { %v3416_v44 = vsel %vm15661_vm1, %v9321_v31, 0.0  ;;  %v3418_v53 = vsel %vm11305_vm12, %v3415_v24, 0.0  ;;  %v9330_v13 = vpop.permute.xlu0 %9329  ;;  %vm15663_vm0 = vmmov %vm15662_vm4  ;;  %v3505_v45 = vrot.slane %v3417_v62, 4  ;;  %v9326_v14 = vunpack.i.l.bf16 %v9325_v27 }
 0xbee   : > { %v3494_v39 = vsel %vm15663_vm0, %v3491_v29, %v3493_v17  ;;  %vm15664_vm11 = vmmov %vm15661_vm1  ;;  %v3420_v7 = vsel %vm11305_vm12, %v3416_v44, 0.0  ;;  %v9332_v32 = vunpack.i.h.bf16 %v9330_v13  ;;  %v9331_v0 = vunpack.i.l.bf16 %v9330_v13 }
 0xbef   : > { %v3410_v55 = vsel %vm15664_vm11, %v9322_v35, %v9321_v31  ;;  %vm15665_vm6 = vmmov %vm15663_vm0  ;;  %v3506_v48 = vrot.slane %v3418_v53, 4  ;;  %v3509_v42 = vrot.slane %v3420_v7, 4  ;;  %vm15667_vm4 = vcmask 916480  }
 0xbf0   : > { %v3530_v30 = vsel %vm15665_vm6, %v3380_v28, %v3492_v36  ;;  %vm15666_vm1 = vmmov %vm15663_vm0  ;;  %v9335_v41 = vpop.permute.xlu1 %9334  ;;  %v3419_v47 = vsel %vm11301_vm9, %v3410_v55, 0.0  ;;  %v3454_v19 = vsel %vm15667_vm4, %v9332_v32, 0.0  ;;  %v9327_v59 = vunpack.i.h.bf16 %v9325_v27 }
 0xbf1   : > { %v3529_v46 = vsel %vm15666_vm1, %v3379_v54, %v3491_v29  ;;  %v8205_v61 = vpack.c.bf16 %v3496_v40, %v3530_v30  ;;  %v9340_v12 = vpop.permute.xlu0 %9339  ;;  %vm15668_vm0 = vmmov %vm15667_vm4  ;;  %v9337_v6 = vunpack.i.h.bf16 %v9335_v41  ;;  %v9336_v17 = vunpack.i.l.bf16 %v9335_v41 }
 0xbf2   : > { %v8207_v63 = vpack.c.bf16 %v3494_v39, %v3529_v46  ;;  %v3453_v52 = vsel %vm15668_vm0, %v9331_v0, 0.0  ;;  %v9342_v56 = vunpack.i.h.bf16 %v9340_v12  ;;  %v9341_v23 = vunpack.i.l.bf16 %v9340_v12  ;;  %vm15669_vm11 = vmmov %vm15666_vm1 }
 0xbf3   : > { %8206 = vmatprep.subr.bf16.mxu0 %v8205_v61  ;;  %v3507_v1 = vrot.slane %v3419_v47, 4  ;;  %v3532_v21 = vsel %vm15669_vm11, %v11979_v60, %v3506_v48  ;;  %vm15670_vm6 = vmmov %vm15666_vm1  ;;  %vm15671_vm1 = vcmask 924672   ;;  %v3521_v54 = vrot.slane %v3454_v19, 4 }
 0xbf4   : > { %8208 = vmatpush1.bf16.msra.mxu0 %v8207_v63  ;;  %v3531_v35 = vsel %vm15670_vm6, %v11976_v22, %v3505_v45  ;;  %v9345_v31 = vpop.permute.xlu1 %9344  ;;  %v3435_v29 = vsel %vm15671_vm1, %v9326_v14, 0.0  ;;  %vm15672_vm4 = vmmov %vm15670_vm6  ;;  %v3518_v24 = vrot.slane %v3453_v52, 4  ;;  %v3449_v27 = vsel %vm15674_vm13, %v9341_v23, %v9331_v0 }
 0xbf5   : > { %v3510_v36 = vsel %vm15672_vm4, %v3506_v48, %v3509_v42  ;;  %vm15673_vm0 = vmmov %vm15671_vm1  ;;  %v8209_v53 = vpack.c.bf16 %v3532_v21, %v11973_v49  ;;  %v8211_v13 = vpack.c.bf16 %v3531_v35, %v11970_v2  ;;  %v9346_v40 = vunpack.i.l.bf16 %v9345_v31  ;;  %v9350_v39 = vpop.permute.xlu0 %9349  ;;  %v7601_v35 = vld [vmem:[%s15480_s8 + $0x40] sm:$0xff] }
 0xbf6   : > { %v3436_v18 = vsel %vm15673_vm0, %v9336_v17, 0.0  ;;  %vm15675_vm5 = vmmov %vm15674_vm13  ;;  %v9347_v30 = vunpack.i.h.bf16 %v9345_v31  ;;  %v8213_v48 = vpack.c.bf16 %v3435_v29, %v3510_v36  ;;  %v3517_v61 = vrot.slane %v3449_v27, 4  ;;  %v7602_v31 = vld [vmem:[%s15480_s8 + $0x48] sm:$0xf] }
 0xbf7   : > { %v3440_v44 = vsel %vm11262_vm14, %v3436_v18, 0.0  ;;  %v3450_v28 = vsel %vm15675_vm5, %v9342_v56, %v9332_v32  ;;  %vm15676_vm11 = vmmov %vm15673_vm0  ;;  %8210 = vmatprep.subr.bf16.mxu0 %v8209_v53  ;;  %vm15680_vm13 = vcmask 908288   ;;  %v9351_v41 = vunpack.i.l.bf16 %v9350_v39 }
 0xbf8   : > { %v3430_v62 = vsel %vm15676_vm11, %v9337_v6, %v9336_v17  ;;  %vm15677_vm6 = vmmov %vm15673_vm0  ;;  %v3519_v0 = vrot.slane %v3450_v28, 4  ;;  %v3470_v32 = vsel %vm15680_vm13, %v9346_v40, 0.0  ;;  %8212 = vmatpush1.bf16.msra.mxu0 %v8211_v13  ;;  %v9352_v19 = vunpack.i.h.bf16 %v9350_v39 }
 0xbf9   : > { %v3429_v55 = vsel %vm15677_vm6, %v9327_v59, %v9326_v14  ;;  %vm15678_vm1 = vmmov %vm15672_vm4  ;;  %v3439_v63 = vsel %vm11258_vm2, %v3430_v62, 0.0  ;;  %8215 = vmatprep.subr.msk.bf16.mxu0 %vm11386_vm15, %v8213_v48  ;;  %v3474_v12 = vsel %vm11305_vm12, %v3470_v32, 0.0 }
 0xbfa   : > { %v3508_v7 = vsel %vm15678_vm1, %v3505_v45, %v3507_v1  ;;  %vm15679_vm4 = vmmov %vm15678_vm1 }
 0xbfb   : > { %v3534_v46 = vsel %vm15679_vm4, %v3440_v44, %v3518_v24  ;;  %vm15681_vm5 = vmmov %vm15678_vm1  ;;  %v8216_v42 = vpack.c.bf16 %v3429_v55, %v3508_v7 }
 0xbfc   : > { %v3522_v47 = vsel %vm15681_vm5, %v3518_v24, %v3521_v54  ;;  %vm15682_vm0 = vmmov %vm15680_vm13  ;;  %vm15687_vm13 = vnez %v15479_v11  ;;  %vm15688_vm5 = vcmask 883712  }
 0xbfd   : > { %v8219_v45 = vpack.c.bf16 %v3522_v47, %v3534_v46  ;;  %v3469_v14 = vsel %vm15682_vm0, %v9347_v30, 0.0  ;;  %vm15683_vm11 = vmmov %vm15678_vm1  ;;  %8218 = vmatpush1.bf16.msk.msra.mxu0 %vm11402_vm8, %v8216_v42  ;;  %v7619_v47 = vld [vmem:[%s15145_s9 + $0x50] sm:$0xff] }
 0xbfe   : > { %v3520_v52 = vsel %vm15683_vm11, %v3517_v61, %v3519_v0  ;;  %vm15684_vm6 = vmmov %vm15678_vm1  ;;  %v8223_v56 = vpack.c.bf16 %v3474_v12, %v3469_v14  ;;  %vm15690_vm11 = vcmask 130048  }
 0xbff   : > { %v3533_v6 = vsel %vm15684_vm6, %v3439_v63, %v3517_v61  ;;  %vm15685_vm1 = vmmov %vm15682_vm0  ;;  %8220 = vmatprep.subr.bf16.mxu0 %v8219_v45  ;;  %v7620_v63 = vld [vmem:[%s15145_s9 + $0x58] sm:$0xf] }
 0xc00   : > { %v3464_v17 = vsel %vm15685_vm1, %v9351_v41, %v9346_v40  ;;  %v8221_v23 = vpack.c.bf16 %v3520_v52, %v3533_v6  ;;  %vm15686_vm4 = vmmov %vm15682_vm0  ;;  %vm15692_vm1 = vcmask 138240  }
 0xc01   : > { %v3463_v1 = vsel %vm15686_vm4, %v9352_v19, %v9347_v30  ;;  %v3473_v59 = vsel %vm11301_vm9, %v3464_v17, 0.0  ;;  %vm15689_vm0 = vmmov %vm15688_vm5 }
 0xc02   : > { %8222 = vmatpush1.bf16.msra.mxu0 %v8221_v23  ;;  %v8226_v21 = vpack.c.bf16 %v3473_v59, %v3463_v1  ;;  %vm15691_vm6 = vmmov %vm15690_vm11 }
 0xc03   : > { %8225 = vmatprep.subr.msk.bf16.mxu0 %vm15582_vm3, %v8223_v56  ;;  %vm15693_vm4 = vmmov %vm15692_vm1 }
 0xc05   : > { %v3538_v29 = vpop.permute.xlu1 %3537 }
 0xc06   : > { %8228 = vmatpush1.bf16.msk.msra.mxu0 %vm15687_vm13, %v8226_v21  ;;  %v3543_v27 = vpop.permute.xlu0 %3542 }
 0xc09   : > { %7615 = vmatmul.mubr.msk.f32.vlgmr.msra.gmra.mrb[22].mxu0 %vm15688_vm5, %v7601_v35  ;;  %vm15694_vm5 = vmmov %vm15692_vm1 }
 0xc0a   : > { %3627 = vmatprep.mubr.f32.mxu0 %v15257_v10 }
 0xc0d   : > { %7616 = vmatmul.mubr.msk.f32.gmra.mrb[24].mxu0 %vm15689_vm0, %v7602_v31  ;;  %vm15695_vm0 = vcmask 1043456  }
 0xc0e   : > { %4333 = vmatprep.mubr.f32.mxu0 %v15257_v10 }
 0xcdc   : > { %v3623_v36 = vpop.f32.mrb[22].mxu0 }
 0xcdd   : > { %v3624_v54 = vadd.f32 %v3623_v36, %v3538_v29  ;;  %v3625_v18 = vpop.f32.mrb[23].mxu0 }
 0xcde   : > { %v3626_v24 = vadd.f32 %v3625_v18, %v3538_v29 }
 0xcdf   : > { %v12129_v44 = vmax.f32 %v3624_v54, 0.0 }
 0xce0   : > { %v12131_v28 = vmax.f32 %v3626_v24, 0.0  ;;  %v3629_v62 = vpop.f32.mrb[24].mxu0 }
 0xce1   : > { %v3630_v53 = vadd.f32 %v3629_v62, %v3543_v27  ;;  %v3631_v13 = vpop.f32.mrb[25].mxu0 }
 0xce2   : > { %v3632_v40 = vadd.f32 %v3631_v13, %v3543_v27  ;;  %v9353_v39 = vpack.i.bf16 %v12131_v28, %v12129_v44  ;;  %v9388_v46 = vpack.i.bf16 %v12129_v44, %v12131_v28 }
 0xce3   : > { %v12135_v55 = vmax.f32 %v3630_v53, 0.0 }
 0xce4   : > { %v12137_v7 = vmax.f32 %v3632_v40, 0.0  ;;  %9354 = vrot.lane.b32.xlu1 %v9353_v39, %s15533_s5 }
 0xce5   : > { %v9418_v0 = vpack.i.bf16 %v12135_v55, %v12129_v44  ;;  %v9428_v41 = vpack.i.bf16 %v12129_v44, %v12135_v55 }
 0xce6   : > { %v9368_v30 = vpack.i.bf16 %v12137_v7, %v12135_v55  ;;  %v9403_v48 = vpack.i.bf16 %v12135_v55, %v12137_v7  ;;  %v9408_v61 = vpack.i.bf16 %v12137_v7, %v12131_v28  ;;  %v9423_v32 = vpack.i.bf16 %v12131_v28, %v12137_v7 }
 0xce8   : > { %9369 = vrot.lane.b32.xlu0 %v9368_v30, %s15534_s6  ;;  %9359 = vrot.lane.b32.xlu1 %v9353_v39, %s15534_s6 }
 0xcec   : > { %9374 = vrot.lane.b32.xlu0 %v9368_v30, %s15533_s5  ;;  %9364 = vrot.lane.b32.xlu1 %v9353_v39, %s15535_s1 }
 0xcf0   : > { %9379 = vrot.lane.b32.xlu0 %v9353_v39, %s15481_s21  ;;  %9384 = vrot.lane.b32.xlu1 %v9368_v30, %s15481_s21 }
 0xcf4   : > { %9399 = vrot.lane.b32.xlu0 %v9368_v30, %s15535_s1  ;;  %9389 = vrot.lane.b32.xlu1 %v9388_v46, %s15426_s29 }
 0xcf8   : > { %9404 = vrot.lane.b32.xlu0 %v9403_v48, %s15426_s29  ;;  %9394 = vrot.lane.b32.xlu1 %v9388_v46, %s15427_s30 }
 0xcfc   : > { %9409 = vrot.lane.b32.xlu0 %v9408_v61, %s15428_s2  ;;  %9414 = vrot.lane.b32.xlu1 %v9403_v48, %s15427_s30 }
 0xd00   : > { %9419 = vrot.lane.b32.xlu0 %v9418_v0, %s15428_s2  ;;  %9424 = vrot.lane.b32.xlu1 %v9423_v32, %s15429_s0 }
 0xd04   : > { %9429 = vrot.lane.b32.xlu0 %v9428_v41, %s15429_s0  ;;  %3863 = vperm.xlu1 %8952, %v7620_v63  }
 0xd08   : > { %3858 = vperm.xlu0 %8951, %v7619_v47  }
 0xd56   : > { %v9355_v45 = vpop.permute.xlu1 %9354 }
 0xd57   : > { %v9357_v42 = vunpack.i.h.bf16 %v9355_v45  ;;  %v9356_v14 = vunpack.i.l.bf16 %v9355_v45 }
 0xd59   : > { %v3680_v12 = vsel %vm15690_vm11, 0.0, %v9356_v14  ;;  %v3676_v6 = vsel %vm15691_vm6, %v9356_v14, %v9357_v42  ;;  %vm15696_vm11 = vmmov %vm15692_vm1 }
 0xd5a   : > { %v9370_v19 = vpop.permute.xlu0 %9369  ;;  %v9360_v52 = vpop.permute.xlu1 %9359  ;;  %v3798_v59 = vrot.slane %v3680_v12, 4  ;;  %v3799_v31 = vrot.slane %v3676_v6, 4  ;;  %vm15697_vm6 = vmmov %vm15695_vm0 }
 0xd5b   : > { %v9372_v17 = vunpack.i.h.bf16 %v9370_v19  ;;  %v9371_v56 = vunpack.i.l.bf16 %v9370_v19  ;;  %v9361_v23 = vunpack.i.l.bf16 %v9360_v52  ;;  %v9362_v1 = vunpack.i.h.bf16 %v9360_v52 }
 0xd5d   : > { %v3657_v21 = vsel %vm15692_vm1, %v9371_v56, %v9372_v17  ;;  %v3663_v35 = vsel %vm15693_vm4, 0.0, %v9371_v56  ;;  %v3662_v24 = vsel %vm15694_vm5, 0.0, %v9361_v23  ;;  %v3656_v13 = vsel %vm15696_vm11, %v9361_v23, %v9362_v1 }
 0xd5e   : > { %v3666_v29 = vsel %vm11258_vm2, %v3663_v35, 0.0  ;;  %v3667_v36 = vsel %vm11262_vm14, %v3657_v21, 0.0  ;;  %v9375_v54 = vpop.permute.xlu0 %9374  ;;  %v9365_v18 = vpop.permute.xlu1 %9364  ;;  %vm15698_vm1 = vcmask 130048   ;;  %vm15700_vm5 = vcmask 121856  }
 0xd5f   : > { %v3848_v27 = vsel %vm15695_vm0, %v3666_v29, %v3798_v59  ;;  %v9377_v62 = vunpack.i.h.bf16 %v9375_v54  ;;  %v9376_v53 = vunpack.i.l.bf16 %v9375_v54  ;;  %v9366_v39 = vunpack.i.l.bf16 %v9365_v18  ;;  %vm15699_vm4 = vmmov %vm15698_vm1 }
 0xd60   : > { %v8232_v40 = vpack.c.bf16 %v3848_v27, %v3662_v24  ;;  %v3849_v30 = vsel %vm15697_vm6, %v3667_v36, %v3799_v31  ;;  %v9367_v63 = vunpack.i.h.bf16 %v9365_v18  ;;  %vm15701_vm11 = vcmask 7168  }
 0xd61   : > { %v3677_v46 = vsel %vm15698_vm1, %v9376_v53, %v9377_v62  ;;  %v3681_v48 = vsel %vm15699_vm4, 0.0, %v9376_v53  ;;  %v8229_v61 = vpack.c.bf16 %v3849_v30, %v3656_v13  ;;  %v3696_v19 = vsel %vm15700_vm5, 0.0, %v9366_v39  ;;  %vm15702_vm6 = vmmov %vm15701_vm11 }
 0xd62   : > { %v3800_v0 = vrot.slane %v3681_v48, 4  ;;  %v3802_v32 = vrot.slane %v3677_v46, 4  ;;  %v9380_v41 = vpop.permute.xlu0 %9379  ;;  %v9385_v47 = vpop.permute.xlu1 %9384  ;;  %vm15703_vm1 = vmmov %vm15702_vm6 }
 0xd63   : > { %v9382_v45 = vunpack.i.h.bf16 %v9380_v41  ;;  %v9381_v42 = vunpack.i.l.bf16 %v9380_v41  ;;  %v9387_v14 = vunpack.i.h.bf16 %v9385_v47  ;;  %v9386_v12 = vunpack.i.l.bf16 %v9385_v47  ;;  %8231 = vmatprep.subr.msk.bf16.mxu1 %vm11286_vm7, %v8229_v61  ;;  %vm15704_vm4 = vmmov %vm15695_vm0 }
 0xd64   : > { %v3801_v52 = vsel %vm15695_vm0, %v3798_v59, %v3800_v0  ;;  %8234 = vmatpush1.bf16.msk.msra.mxu1 %vm11295_vm10, %v8232_v40  ;;  %v3803_v23 = vsel %vm15704_vm4, %v3799_v31, %v3802_v32  ;;  %vm15705_vm5 = vmmov %vm15703_vm1  ;;  %vm15706_vm0 = vcmask 121856   ;;  %vm15710_vm4 = vnez %v15455_v34 }
 0xd65   : > { %v3710_v6 = vsel %vm15701_vm11, %v9381_v42, %v9382_v45  ;;  %v3716_v17 = vsel %vm15702_vm6, 0.0, %v9381_v42  ;;  %v3711_v56 = vsel %vm15703_vm1, %v9386_v12, %v9387_v14  ;;  %v3717_v35 = vsel %vm15705_vm5, 0.0, %v9386_v12  ;;  %vm15707_vm11 = vmmov %vm15706_vm0 }
 0xd66   : > { %v3718_v1 = vsel %vm11258_vm2, %v3716_v17, 0.0  ;;  %v3719_v21 = vsel %vm11262_vm14, %v3710_v6, 0.0  ;;  %v3721_v59 = vsel %vm11262_vm14, %v3711_v56, 0.0  ;;  %v9400_v29 = vpop.permute.xlu0 %9399  ;;  %v9390_v36 = vpop.permute.xlu1 %9389  ;;  %v3690_v54 = vsel %vm15706_vm0, %v9366_v39, %v9367_v63  ;;  %vm15708_vm6 = vmmov %vm15706_vm0 }
 0xd67   : > { %v8238_v18 = vpack.c.bf16 %v3696_v19, %v3801_v52  ;;  %v3812_v24 = vrot.slane %v3718_v1, 4  ;;  %v3720_v31 = vsel %vm11258_vm2, %v3717_v35, 0.0  ;;  %v3813_v27 = vrot.slane %v3719_v21, 4 }
 0xd68   : > { %v9402_v62 = vunpack.i.h.bf16 %v9400_v29  ;;  %v9401_v53 = vunpack.i.l.bf16 %v9400_v29  ;;  %v9392_v13 = vunpack.i.h.bf16 %v9390_v36  ;;  %v3814_v40 = vrot.slane %v3720_v31, 4 }
 0xd69   : > { %v3816_v30 = vrot.slane %v3721_v59, 4  ;;  %v9391_v46 = vunpack.i.l.bf16 %v9390_v36  ;;  %v8235_v48 = vpack.c.bf16 %v3690_v54, %v3803_v23  ;;  %vm15709_vm1 = vcmask 1039360  }
 0xd6a   : > { %v3691_v61 = vsel %vm15707_vm11, %v9401_v53, %v9402_v62  ;;  %v3697_v0 = vsel %vm15708_vm6, 0.0, %v9401_v53  ;;  %v9405_v32 = vpop.permute.xlu0 %9404  ;;  %v9395_v41 = vpop.permute.xlu1 %9394  ;;  %vm15711_vm5 = vmmov %vm15709_vm1  ;;  %vm15712_vm0 = vnez %v15458_v58  ;;  %vm15713_vm11 = vcmask 1043456  }
 0xd6b   : > { %v3700_v39 = vsel %vm11301_vm9, %v3697_v0, 0.0  ;;  %v3736_v63 = vsel %vm15709_vm1, %v9391_v46, 0.0  ;;  %8237 = vmatprep.subr.msk.bf16.mxu1 %vm15710_vm4, %v8235_v48  ;;  %v9407_v47 = vunpack.i.h.bf16 %v9405_v32  ;;  %v3730_v45 = vsel %vm15711_vm5, %v9392_v13, %v9391_v46  ;;  %vm15714_vm6 = vmmov %vm15713_vm11 }
 0xd6c   : > { %v3739_v42 = vsel %vm11305_vm12, %v3736_v63, 0.0  ;;  %8240 = vmatpush1.bf16.msk.msra.mxu1 %vm15712_vm0, %v8238_v18  ;;  %v9406_v14 = vunpack.i.l.bf16 %v9405_v32  ;;  %v3701_v12 = vsel %vm11305_vm12, %v3691_v61, 0.0  ;;  %v3817_v19 = vsel %vm15713_vm11, %v3813_v27, %v3816_v30  ;;  %vm15715_vm4 = vmmov %vm15709_vm1 }
 0xd6d   : > { %v3815_v52 = vsel %vm15714_vm6, %v3812_v24, %v3814_v40  ;;  %vm15716_vm5 = vmmov %vm15714_vm6  ;;  %v3738_v35 = vsel %vm11301_vm9, %v3730_v45, 0.0  ;;  %v3827_v59 = vrot.slane %v3739_v42, 4  ;;  %v9396_v36 = vunpack.i.l.bf16 %v9395_v41 }
 0xd6e   : > { %v3731_v6 = vsel %vm15709_vm1, %v9407_v47, %v9406_v14  ;;  %v3737_v17 = vsel %vm15715_vm4, %v9406_v14, 0.0  ;;  %v9410_v56 = vpop.permute.xlu0 %9409  ;;  %v9415_v23 = vpop.permute.xlu1 %9414  ;;  %v3851_v1 = vsel %vm15716_vm5, %v3701_v12, %v3813_v27  ;;  %vm15717_vm10 = vmmov %vm15716_vm5  ;;  %v3826_v27 = vrot.slane %v3738_v35, 4 }
 0xd6f   : > { %v3850_v21 = vsel %vm15717_vm10, %v3700_v39, %v3812_v24  ;;  %v3741_v29 = vsel %vm11305_vm12, %v3737_v17, 0.0  ;;  %v3740_v54 = vsel %vm11301_vm9, %v3731_v6, 0.0  ;;  %v9412_v31 = vunpack.i.h.bf16 %v9410_v56  ;;  %vm15718_vm4 = vmmov %vm15716_vm5 }
 0xd70   : > { %v3830_v18 = vrot.slane %v3741_v29, 4  ;;  %v9411_v62 = vunpack.i.l.bf16 %v9410_v56  ;;  %v9416_v53 = vunpack.i.l.bf16 %v9415_v23  ;;  %v8241_v13 = vpack.c.bf16 %v3817_v19, %v3851_v1  ;;  %vm15723_vm5 = vmmov %vm15718_vm4 }
 0xd71   : > { %v8243_v40 = vpack.c.bf16 %v3815_v52, %v3850_v21  ;;  %vm15719_vm10 = vcmask 916480   ;;  %v3828_v61 = vrot.slane %v3740_v54, 4  ;;  %v9397_v0 = vunpack.i.h.bf16 %v9395_v41 }
 0xd72   : > { %v3831_v24 = vsel %vm15718_vm4, %v3827_v59, %v3830_v18  ;;  %v3775_v30 = vsel %vm15719_vm10, %v9412_v31, 0.0  ;;  %vm15720_vm11 = vmmov %vm15719_vm10  ;;  %v9420_v48 = vpop.permute.xlu0 %9419  ;;  %vm15721_vm6 = vcmask 924672   ;;  %v9417_v39 = vunpack.i.h.bf16 %v9415_v23  ;;  %8242 = vmatprep.subr.bf16.mxu1 %v8241_v13  ;;  %v9425_v63 = vpop.permute.xlu1 %9424 }
 0xd73   : > { %v3774_v46 = vsel %vm15720_vm11, %v9411_v62, 0.0  ;;  %v3756_v32 = vsel %vm15721_vm6, %v9396_v36, 0.0  ;;  %vm15722_vm1 = vmmov %vm15721_vm6  ;;  %8244 = vmatpush1.bf16.msra.mxu1 %v8243_v40  ;;  %v3853_v42 = vsel %vm15723_vm5, %v12137_v7, %v3827_v59  ;;  %v9422_v14 = vunpack.i.h.bf16 %v9420_v48 }
 0xd74   : > { %v8249_v47 = vpack.c.bf16 %v3756_v32, %v3831_v24  ;;  %v3757_v45 = vsel %vm15722_vm1, %v9416_v53, 0.0  ;;  %v3842_v12 = vrot.slane %v3775_v30, 4  ;;  %v3839_v19 = vrot.slane %v3774_v46, 4  ;;  %vm15724_vm4 = vmmov %vm15719_vm10 }
 0xd75   : > { %v8245_v52 = vpack.c.bf16 %v3853_v42, %v12131_v28  ;;  %v9421_v6 = vunpack.i.l.bf16 %v9420_v48  ;;  %v3761_v41 = vsel %vm11262_vm14, %v3757_v45, 0.0  ;;  %v3771_v17 = vsel %vm15724_vm4, %v9422_v14, %v9412_v31  ;;  %vm15725_vm10 = vmmov %vm15723_vm5  ;;  %v7618_v45 = vld [vmem:[%s15480_s8 + $0x58] sm:$0xf] }
 0xd76   : > { %v9426_v56 = vunpack.i.l.bf16 %v9425_v63  ;;  %v3852_v23 = vsel %vm15725_vm10, %v12135_v55, %v3826_v27  ;;  %v9430_v1 = vpop.permute.xlu0 %9429  ;;  %vm15726_vm11 = vmmov %vm15722_vm1  ;;  %v3840_v35 = vrot.slane %v3771_v17, 4  ;;  %v3750_v28 = vsel %vm15722_vm1, %v9397_v0, %v9396_v36 }
 0xd77   : > { %v3751_v21 = vsel %vm15726_vm11, %v9417_v39, %v9416_v53  ;;  %8246 = vmatprep.subr.bf16.mxu1 %v8245_v52  ;;  %vm15727_vm6 = vmmov %vm15724_vm4  ;;  %v8247_v59 = vpack.c.bf16 %v3852_v23, %v12129_v44  ;;  %v3829_v29 = vsel %vm15723_vm5, %v3826_v27, %v3828_v61  ;;  %v9427_v18 = vunpack.i.h.bf16 %v9425_v63 }
 0xd78   : > { %v3770_v7 = vsel %vm15727_vm6, %v9421_v6, %v9411_v62  ;;  %v9431_v31 = vunpack.i.l.bf16 %v9430_v1  ;;  %vm15728_vm4 = vmmov %vm15723_vm5  ;;  %v3760_v53 = vsel %vm11258_vm2, %v3751_v21, 0.0  ;;  %vm15730_vm11 = vcmask 908288  }
 0xd79   : > { %v3838_v54 = vrot.slane %v3770_v7, 4  ;;  %8248 = vmatpush1.bf16.msra.mxu1 %v8247_v59  ;;  %v3843_v13 = vsel %vm15728_vm4, %v3839_v19, %v3842_v12  ;;  %vm15729_vm10 = vmmov %vm15728_vm4  ;;  %v3791_v62 = vsel %vm15730_vm11, %v9426_v56, 0.0  ;;  %v8252_v40 = vpack.c.bf16 %v3750_v28, %v3829_v29  ;;  %v7633_v29 = vld [vmem:[%s15146_s10 + $0x40] sm:$0xff] }
 0xd7a   : > { %v3855_v55 = vsel %vm15729_vm10, %v3761_v41, %v3839_v19  ;;  %8251 = vmatprep.subr.msk.bf16.mxu1 %vm11386_vm15, %v8249_v47  ;;  %vm15731_vm6 = vmmov %vm15728_vm4  ;;  %v9432_v24 = vunpack.i.h.bf16 %v9430_v1  ;;  %v3795_v46 = vsel %vm11305_vm12, %v3791_v62, 0.0  ;;  %v7617_v47 = vld [vmem:[%s15480_s8 + $0x50] sm:$0xff] }
 0xd7b   : > { %v8255_v44 = vpack.c.bf16 %v3843_v13, %v3855_v55  ;;  %v3841_v36 = vsel %vm15731_vm6, %v3838_v54, %v3840_v35  ;;  %vm15732_vm1 = vmmov %vm15728_vm4 }
 0xd7c   : > { %v3854_v27 = vsel %vm15732_vm1, %v3760_v53, %v3838_v54  ;;  %vm15733_vm5 = vmmov %vm15730_vm11  ;;  %vm15736_vm11 = vcmask 883712   ;;  %v7634_v54 = vld [vmem:[%s15146_s10 + $0x48] sm:$0xf] }
 0xd7d   : > { %v3790_v30 = vsel %vm15733_vm5, %v9427_v18, 0.0  ;;  %vm15734_vm4 = vmmov %vm15733_vm5  ;;  %8254 = vmatpush1.bf16.msk.msra.mxu1 %vm11402_vm8, %v8252_v40  ;;  %v8257_v61 = vpack.c.bf16 %v3841_v36, %v3854_v27 }
 0xd7e   : > { %v3785_v48 = vsel %vm15734_vm4, %v9431_v31, %v9426_v56  ;;  %8256 = vmatprep.subr.bf16.mxu1 %v8255_v44  ;;  %v8259_v0 = vpack.c.bf16 %v3795_v46, %v3790_v30  ;;  %vm15735_vm10 = vmmov %vm15734_vm4  ;;  %vm15739_vm4 = vcmask 7168   ;;  %v7635_v46 = vld [vmem:[%s15147_s11 + $0x2] sm:$0x1] }
 0xd7f   : > { %v3784_v32 = vsel %vm15735_vm10, %v9432_v24, %v9427_v18  ;;  %v3794_v39 = vsel %vm11301_vm9, %v3785_v48, 0.0  ;;  %vm15737_vm6 = vmmov %vm15736_vm11  ;;  %vm15740_vm10 = vcmask 3072  }
 0xd80   : > { %v8262_v63 = vpack.c.bf16 %v3794_v39, %v3784_v32  ;;  %vm15738_vm5 = vmmov %vm15732_vm1  ;;  %v7636_v32 = vld [vmem:[%s15146_s10 + $0x50] sm:$0xff]  ;;  %v7637_v39 = vld [vmem:[%s15146_s10 + $0x58] sm:$0xf] }
 0xd81   : > { %8258 = vmatpush1.bf16.msra.mxu1 %v8257_v61 }
 0xd82   : > { %8261 = vmatprep.subr.msk.bf16.mxu1 %vm15582_vm3, %v8259_v0 }
 0xd83   : > { %v3864_v6 = vpop.permute.xlu1 %3863 }
 0xd85   : > { %8264 = vmatpush1.bf16.msk.msra.mxu1 %vm15687_vm13, %v8262_v63 }
 0xd87   : > { %v3859_v42 = vpop.permute.xlu0 %3858 }
 0xd88   : > { %7631 = vmatmul.mubr.msk.f32.vlgmr.msra.gmra.mrb[12].mxu1 %vm15736_vm11, %v7617_v47  ;;  %v7638_v47 = vld [vmem:[%s15148_s12 + $0x20] sm:$0xff]  ;;  %vm15741_vm11 = vcmask 130048  }
 0xd89   : > { %3948 = vmatprep.mubr.f32.mxu1 %v15257_v10 }
 0xd8c   : > { %7632 = vmatmul.mubr.msk.f32.gmra.mrb[14].mxu1 %vm15737_vm6, %v7618_v45  ;;  %v7639_v45 = vld [vmem:[%s15148_s12 + $0x28] sm:$0xf]  ;;  %vm15742_vm6 = vmmov %vm15741_vm11 }
 0xd8d   : > { %4654 = vmatprep.mubr.f32.mxu1 %v15257_v10 }
 0xe5b   : > { %v3944_v14 = vpop.f32.mrb[12].mxu1 }
 0xe5c   : > { %v3945_v12 = vadd.f32 %v3944_v14, %v3859_v42  ;;  %v3946_v19 = vpop.f32.mrb[13].mxu1 }
 0xe5d   : > { %v3947_v52 = vadd.f32 %v3946_v19, %v3859_v42 }
 0xe5f   : > { %v3955_v41 = vadd.f32 %v3947_v52, %v3945_v12  ;;  %v3950_v17 = vpop.f32.mrb[14].mxu1 }
 0xe60   : > { %v3951_v56 = vadd.f32 %v3950_v17, %v3864_v6  ;;  %v3952_v23 = vpop.f32.mrb[15].mxu1 }
 0xe61   : > { %v3953_v1 = vadd.f32 %v3952_v23, %v3864_v6  ;;  %3956 = vadd.xlane.f32.xlu1 %v3955_v41 }
 0xe62   : > { %v3958_v21 = vsel %vm15732_vm1, %v3951_v56, 0.0  ;;  %vm15743_vm1 = vcmask 138240  }
 0xe63   : > { %v3959_v7 = vsel %vm15738_vm5, %v3953_v1, 0.0  ;;  %vm15744_vm5 = vmmov %vm15743_vm1 }
 0xe64   : > { %v3960_v35 = vadd.f32 %v3959_v7, %v3958_v21 }
 0xe66   : > { %3961 = vadd.xlane.f32.xlu0 %v3960_v35 }
 0xeee   : > { %v3957_v59 = vpop.xlane.xlu1 %3956 }
 0xeef   : > { %v3963_v28 = vmul.f32 0.00390625, %v3957_v59 }
 0xef1   : > { %v3968_v31 = vmul.f32 %v7633_v29, %v3963_v28 }
 0xef3   : > { %v3962_v18 = vpop.xlane.xlu0 %3961  ;;  %v3970_v53 = vsel %vm15739_vm4, %v3968_v31, 0.0  ;;  %vm15745_vm4 = vcmask 1043456  }
 0xef4   : > { %v3964_v13 = vmul.f32 0.00390625, %v3962_v18 }
 0xef6   : > { %v3969_v55 = vmul.f32 %v7634_v54, %v3964_v13 }
 0xef8   : > { %v3971_v62 = vsel %vm15740_vm10, %v3969_v55, 0.0  ;;  %vm15746_vm10 = vmmov %vm15745_vm4 }
 0xef9   : > { %v3972_v44 = vadd.f32 %v3971_v62, %v3970_v53 }
 0xefb   : > { %v3973_v36 = vrot.slane %v3972_v44, 4 }
 0xefd   : > { %v3974_v40 = vadd.f32 %v3973_v36, %v3972_v44 }
 0xeff   : > { %v3975_v27 = vrot.slane %v3974_v40, 2 }
 0xf01   : > { %v3976_v24 = vadd.f32 %v3975_v27, %v3974_v40 }
 0xf03   : > { %v3977_v30 = vrot.slane %v3976_v24, 1 }
 0xf05   : > { %v3978_v48 = vadd.f32 %v3977_v30, %v3976_v24  ;;  %v7643_v30 = vld [vmem:[%s15145_s9 + $0x68] sm:$0xf] }
 0xf07   : > { %v3981_v61 = vadd.f32 %v7635_v46, %v3978_v48 }
 0xf09   : > { %v3982_v0 = vmax.f32 %v3981_v61, 0.0 }
 0xf0b   : > { %v3989_v63 = vrot.slane %v3982_v0, %v10705_v3 }
 0xf0d   : > { %v3990_v42 = vmul.f32 %v7636_v32, %v3989_v63  ;;  %v3991_v14 = vmul.f32 %v7637_v39, %v3989_v63 }
 0xf0f   : > { %v3997_v19 = vadd.f32 %v7638_v47, %v3990_v42  ;;  %v3998_v6 = vadd.f32 %v7639_v45, %v3991_v14 }
 0xf11   : > { %v3999_v41 = vsub.f32 0.0, %v3997_v19  ;;  %v4000_v17 = vsub.f32 0.0, %v3998_v6 }
 0xf13   : > { %v4001_v23 = vmul.f32 1.442695, %v3999_v41  ;;  %v4003_v21 = vmul.f32 1.442695, %v4000_v17 }
 0xf15   : > { %10529 = vpow2.f32 %v4001_v23 }
 0xf16   : > { %10531 = vpow2.f32 %v4003_v21 }
 0xf1f   : > { %v10530_v7 = vpop.eup %10529 }
 0xf20   : > { %v10532_v35 = vpop.eup %10531  ;;  %v4005_v59 = vadd.f32 1.0, %v10530_v7 }
 0xf21   : > { %v4006_v28 = vadd.f32 1.0, %v10532_v35 }
 0xf22   : > { %10533 = vrcp.f32 %v4005_v59 }
 0xf23   : > { %10535 = vrcp.f32 %v4006_v28 }
 0xf2c   : > { %v10534_v29 = vpop.eup %10533 }
 0xf2d   : > { %v10536_v54 = vpop.eup %10535  ;;  %4013 = vperm.xlu0 %8951, %v10534_v29  }
 0xf2e   : > { %4018 = vperm.xlu1 %8952, %v10536_v54  }
 0xfac   : > { %v4014_v18 = vpop.permute.xlu0 %4013 }
 0xfad   : > { %v4019_v31 = vpop.permute.xlu1 %4018  ;;  %v4021_v13 = vmul.f32 %v4014_v18, %v3945_v12  ;;  %v4022_v55 = vmul.f32 %v4014_v18, %v3947_v52 }
 0xfae   : > { %v4023_v53 = vmul.f32 %v4019_v31, %v3951_v56  ;;  %v4024_v62 = vmul.f32 %v4019_v31, %v3953_v1  ;;  %v7642_v1 = vld [vmem:[%s15145_s9 + $0x60] sm:$0xff] }
 0xfaf   : > { %v12312_v44 = vadd.f32 %v4021_v13, %v11970_v2  ;;  %v12315_v36 = vadd.f32 %v4022_v55, %v11973_v49 }
 0xfb0   : > { %v12318_v40 = vadd.f32 %v4023_v53, %v11976_v22  ;;  %v12321_v27 = vadd.f32 %v4024_v62, %v11979_v60 }
 0xfb1   : > { %v9433_v24 = vpack.i.bf16 %v12315_v36, %v12312_v44  ;;  %v9473_v2 = vpack.i.bf16 %v12312_v44, %v12315_v36 }
 0xfb2   : > { %v9438_v12 = vpack.i.bf16 %v12321_v27, %v12318_v40  ;;  %v9478_v49 = vpack.i.bf16 %v12318_v40, %v12321_v27  ;;  %v9488_v22 = vpack.i.bf16 %v12321_v27, %v12315_v36  ;;  %v9498_v60 = vpack.i.bf16 %v12318_v40, %v12312_v44 }
 0xfb3   : > { %9434 = vrot.lane.b32.xlu1 %v9433_v24, %s15533_s5  ;;  %v9503_v52 = vpack.i.bf16 %v12315_v36, %v12321_v27  ;;  %v9508_v56 = vpack.i.bf16 %v12312_v44, %v12318_v40 }
 0xfb4   : > { %9439 = vrot.lane.b32.xlu0 %v9438_v12, %s15534_s6 }
 0xfb7   : > { %9444 = vrot.lane.b32.xlu1 %v9433_v24, %s15534_s6 }
 0xfb8   : > { %9449 = vrot.lane.b32.xlu0 %v9438_v12, %s15533_s5 }
 0xfbb   : > { %9454 = vrot.lane.b32.xlu1 %v9433_v24, %s15535_s1 }
 0xfbc   : > { %9459 = vrot.lane.b32.xlu0 %v9433_v24, %s15481_s21 }
 0xfbf   : > { %9464 = vrot.lane.b32.xlu1 %v9438_v12, %s15481_s21 }
 0xfc0   : > { %9469 = vrot.lane.b32.xlu0 %v9438_v12, %s15535_s1 }
 0xfc3   : > { %9474 = vrot.lane.b32.xlu1 %v9473_v2, %s15426_s29 }
 0xfc4   : > { %9479 = vrot.lane.b32.xlu0 %v9478_v49, %s15426_s29 }
 0xfc7   : > { %9484 = vrot.lane.b32.xlu1 %v9473_v2, %s15427_s30 }
 0xfc8   : > { %9489 = vrot.lane.b32.xlu0 %v9488_v22, %s15428_s2 }
 0xfcb   : > { %9494 = vrot.lane.b32.xlu1 %v9478_v49, %s15427_s30 }
 0xfcc   : > { %9499 = vrot.lane.b32.xlu0 %v9498_v60, %s15428_s2 }
 0xfcf   : > { %9504 = vrot.lane.b32.xlu1 %v9503_v52, %s15429_s0 }
 0xfd0   : > { %9509 = vrot.lane.b32.xlu0 %v9508_v56, %s15429_s0 }
 0xfd3   : > { %4249 = vperm.xlu1 %8952, %v7642_v1  }
 0xfd4   : > { %4254 = vperm.xlu0 %8951, %v7643_v30  }
0x1025   : > { %v9435_v46 = vpop.permute.xlu1 %9434 }
0x1026   : > { %v9437_v48 = vunpack.i.h.bf16 %v9435_v46  ;;  %v9436_v61 = vunpack.i.l.bf16 %v9435_v46  ;;  %v9440_v0 = vpop.permute.xlu0 %9439 }
0x1027   : > { %v9442_v32 = vunpack.i.h.bf16 %v9440_v0  ;;  %v9441_v39 = vunpack.i.l.bf16 %v9440_v0 }
0x1028   : > { %v4067_v63 = vsel %vm15741_vm11, %v9436_v61, %v9437_v48  ;;  %v4071_v47 = vsel %vm15742_vm6, 0.0, %v9436_v61  ;;  %vm15747_vm11 = vmmov %vm15743_vm1 }
0x1029   : > { %v4189_v45 = vrot.slane %v4071_v47, 4  ;;  %v4190_v42 = vrot.slane %v4067_v63, 4  ;;  %v4048_v14 = vsel %vm15743_vm1, %v9441_v39, %v9442_v32  ;;  %v4054_v19 = vsel %vm15744_vm5, 0.0, %v9441_v39  ;;  %v9445_v6 = vpop.permute.xlu1 %9444  ;;  %vm15748_vm6 = vmmov %vm15743_vm1 }
0x102a   : > { %v4057_v41 = vsel %vm11258_vm2, %v4054_v19, 0.0  ;;  %v4058_v17 = vsel %vm11262_vm14, %v4048_v14, 0.0  ;;  %v9447_v23 = vunpack.i.h.bf16 %v9445_v6  ;;  %v9446_v21 = vunpack.i.l.bf16 %v9445_v6  ;;  %v9450_v7 = vpop.permute.xlu0 %9449 }
0x102b   : > { %v4239_v35 = vsel %vm15745_vm4, %v4057_v41, %v4189_v45  ;;  %v9452_v59 = vunpack.i.h.bf16 %v9450_v7  ;;  %v9451_v28 = vunpack.i.l.bf16 %v9450_v7  ;;  %v4240_v29 = vsel %vm15746_vm10, %v4058_v17, %v4190_v42 }
0x102c   : > { %v4047_v54 = vsel %vm15747_vm11, %v9446_v21, %v9447_v23  ;;  %v4053_v18 = vsel %vm15748_vm6, 0.0, %v9446_v21  ;;  %vm15749_vm1 = vcmask 130048   ;;  %vm15751_vm4 = vcmask 121856  }
0x102d   : > { %v8268_v31 = vpack.c.bf16 %v4239_v35, %v4053_v18  ;;  %v4068_v13 = vsel %vm15749_vm1, %v9451_v28, %v9452_v59  ;;  %vm15750_vm5 = vmmov %vm15749_vm1  ;;  %v9455_v53 = vpop.permute.xlu1 %9454  ;;  %v8265_v62 = vpack.c.bf16 %v4240_v29, %v4047_v54  ;;  %vm15753_vm11 = vcmask 1043456  }
0x102e   : > { %v4072_v55 = vsel %vm15750_vm5, 0.0, %v9451_v28  ;;  %v4193_v12 = vrot.slane %v4068_v13, 4  ;;  %v9457_v2 = vunpack.i.h.bf16 %v9455_v53  ;;  %v9456_v49 = vunpack.i.l.bf16 %v9455_v53  ;;  %v9460_v22 = vpop.permute.xlu0 %9459  ;;  %vm15752_vm10 = vmmov %vm15751_vm4 }
0x102f   : > { %v4191_v24 = vrot.slane %v4072_v55, 4  ;;  %v9462_v60 = vunpack.i.h.bf16 %v9460_v22  ;;  %v9461_v52 = vunpack.i.l.bf16 %v9460_v22  ;;  %8267 = vmatprep.subr.msk.bf16.mxu0 %vm11286_vm7, %v8265_v62  ;;  %vm15754_vm6 = vnez %v15440_v51  ;;  %vm15755_vm1 = vmmov %vm15753_vm11 }
0x1030   : > { %v4081_v56 = vsel %vm15751_vm4, %v9456_v49, %v9457_v2  ;;  %v4087_v1 = vsel %vm15752_vm10, 0.0, %v9456_v49  ;;  %8270 = vmatpush1.bf16.msk.msra.mxu0 %vm15754_vm6, %v8268_v31  ;;  %v4194_v46 = vsel %vm15755_vm1, %v4190_v42, %v4193_v12  ;;  %vm15756_vm5 = vcmask 7168  }
0x1031   : > { %v4192_v30 = vsel %vm15753_vm11, %v4189_v45, %v4191_v24  ;;  %v4107_v61 = vsel %vm15756_vm5, 0.0, %v9461_v52  ;;  %v9465_v0 = vpop.permute.xlu1 %9464  ;;  %v8271_v32 = vpack.c.bf16 %v4081_v56, %v4194_v46  ;;  %vm15757_vm13 = vmmov %vm15756_vm5  ;;  %vm15758_vm4 = vnez %v15455_v34 }
0x1032   : > { %v8274_v48 = vpack.c.bf16 %v4087_v1, %v4192_v30  ;;  %v4101_v39 = vsel %vm15757_vm13, %v9461_v52, %v9462_v60  ;;  %v9467_v63 = vunpack.i.h.bf16 %v9465_v0  ;;  %v9466_v47 = vunpack.i.l.bf16 %v9465_v0  ;;  %v9470_v14 = vpop.permute.xlu0 %9469  ;;  %vm15759_vm10 = vmmov %vm15756_vm5 }
0x1033   : > { %v9472_v19 = vunpack.i.h.bf16 %v9470_v14  ;;  %v9471_v6 = vunpack.i.l.bf16 %v9470_v14  ;;  %8273 = vmatprep.subr.msk.bf16.mxu0 %vm15758_vm4, %v8271_v32  ;;  %v4109_v45 = vsel %vm11258_vm2, %v4107_v61, 0.0  ;;  %vm15760_vm11 = vmmov %vm15756_vm5  ;;  %v4110_v17 = vsel %vm11262_vm14, %v4101_v39, 0.0 }
0x1034   : > { %v4102_v42 = vsel %vm15759_vm10, %v9466_v47, %v9467_v63  ;;  %v4108_v41 = vsel %vm15760_vm11, 0.0, %v9466_v47  ;;  %8276 = vmatpush1.bf16.msk.msra.mxu0 %vm15712_vm0, %v8274_v48  ;;  %vm15761_vm13 = vcmask 121856   ;;  %v4203_v53 = vrot.slane %v4109_v45, 4 }
0x1035   : > { %v4111_v23 = vsel %vm11258_vm2, %v4108_v41, 0.0  ;;  %v4112_v21 = vsel %vm11262_vm14, %v4102_v42, 0.0  ;;  %v4088_v7 = vsel %vm15761_vm13, 0.0, %v9471_v6  ;;  %v9475_v35 = vpop.permute.xlu1 %9474  ;;  %vm15762_vm1 = vmmov %vm15761_vm13  ;;  %v4204_v62 = vrot.slane %v4110_v17, 4 }
0x1036   : > { %v4205_v59 = vrot.slane %v4111_v23, 4  ;;  %v4207_v28 = vrot.slane %v4112_v21, 4  ;;  %v4082_v29 = vsel %vm15762_vm1, %v9471_v6, %v9472_v19  ;;  %v9477_v54 = vunpack.i.h.bf16 %v9475_v35  ;;  %v9480_v18 = vpop.permute.xlu0 %9479 }
0x1037   : > { %v9476_v31 = vunpack.i.l.bf16 %v9475_v35  ;;  %v9482_v13 = vunpack.i.h.bf16 %v9480_v18  ;;  %v9481_v55 = vunpack.i.l.bf16 %v9480_v18  ;;  %v4091_v24 = vsel %vm11301_vm9, %v4088_v7, 0.0 }
0x1038   : > { %vm15763_vm5 = vcmask 1039360   ;;  %v4092_v60 = vsel %vm11305_vm12, %v4082_v29, 0.0  ;;  %vm15766_vm13 = vcmask 1043456   ;;  %vm15777_vm0 = vcmask 916480  }
0x1039   : > { %v4121_v12 = vsel %vm15763_vm5, %v9477_v54, %v9476_v31  ;;  %vm15764_vm10 = vmmov %vm15763_vm5  ;;  %v9485_v22 = vpop.permute.xlu1 %9484  ;;  %v4208_v30 = vsel %vm15766_vm13, %v4204_v62, %v4207_v28  ;;  %v4122_v48 = vsel %vm15763_vm5, %v9482_v13, %v9481_v55 }
0x103a   : > { %v4127_v2 = vsel %vm15764_vm10, %v9476_v31, 0.0  ;;  %vm15765_vm11 = vmmov %vm15763_vm5  ;;  %v4129_v52 = vsel %vm11301_vm9, %v4121_v12, 0.0  ;;  %v9490_v1 = vpop.permute.xlu0 %9489  ;;  %v4131_v42 = vsel %vm11301_vm9, %v4122_v48, 0.0  ;;  %v9486_v17 = vunpack.i.l.bf16 %v9485_v22 }
0x103b   : > { %v4128_v49 = vsel %vm15765_vm11, %v9481_v55, 0.0  ;;  %v4130_v56 = vsel %vm11305_vm12, %v4127_v2, 0.0  ;;  %vm15767_vm1 = vmmov %vm15766_vm13  ;;  %v9492_v0 = vunpack.i.h.bf16 %v9490_v1  ;;  %v9491_v32 = vunpack.i.l.bf16 %v9490_v1 }
0x103c   : > { %v4206_v46 = vsel %vm15767_vm1, %v4203_v53, %v4205_v59  ;;  %v4132_v61 = vsel %vm11305_vm12, %v4128_v49, 0.0  ;;  %vm15768_vm10 = vmmov %vm15767_vm1  ;;  %v4217_v47 = vrot.slane %v4129_v52, 4  ;;  %v4218_v14 = vrot.slane %v4130_v56, 4 }
0x103d   : > { %v4242_v39 = vsel %vm15768_vm10, %v4092_v60, %v4204_v62  ;;  %vm15769_vm11 = vmmov %vm15767_vm1  ;;  %v9495_v45 = vpop.permute.xlu1 %9494  ;;  %v4221_v41 = vrot.slane %v4132_v61, 4  ;;  %vm15770_vm13 = vcmask 916480   ;;  %v4219_v54 = vrot.slane %v4131_v42, 4 }
0x103e   : > { %v4241_v63 = vsel %vm15769_vm11, %v4091_v24, %v4203_v53  ;;  %v8277_v19 = vpack.c.bf16 %v4208_v30, %v4242_v39  ;;  %v9500_v23 = vpop.permute.xlu0 %9499  ;;  %v4166_v21 = vsel %vm15770_vm13, %v9492_v0, 0.0  ;;  %vm15771_vm1 = vmmov %vm15770_vm13  ;;  %v9497_v35 = vunpack.i.h.bf16 %v9495_v45 }
0x103f   : > { %v8279_v6 = vpack.c.bf16 %v4206_v46, %v4241_v63  ;;  %v4165_v7 = vsel %vm15771_vm1, %v9491_v32, 0.0  ;;  %v9496_v59 = vunpack.i.l.bf16 %v9495_v45  ;;  %v9502_v28 = vunpack.i.h.bf16 %v9500_v23  ;;  %vm15772_vm5 = vmmov %vm15768_vm10 }
0x1040   : > { %8278 = vmatprep.subr.bf16.mxu0 %v8277_v19  ;;  %v9501_v29 = vunpack.i.l.bf16 %v9500_v23  ;;  %v9487_v18 = vunpack.i.h.bf16 %v9485_v22  ;;  %v4244_v31 = vsel %vm15772_vm5, %v12321_v27, %v4218_v14  ;;  %vm15773_vm10 = vmmov %vm15772_vm5  ;;  %vm15774_vm11 = vcmask 924672  }
0x1041   : > { %8280 = vmatpush1.bf16.msra.mxu0 %v8279_v6  ;;  %v4243_v13 = vsel %vm15773_vm10, %v12318_v40, %v4217_v47  ;;  %v9505_v55 = vpop.permute.xlu1 %9504  ;;  %v4147_v53 = vsel %vm15774_vm11, %v9486_v17, 0.0  ;;  %vm15775_vm13 = vmmov %vm15772_vm5  ;;  %v4233_v24 = vrot.slane %v4166_v21, 4  ;;  %v4230_v2 = vrot.slane %v4165_v7, 4 }
0x1042   : > { %v4222_v62 = vsel %vm15775_vm13, %v4218_v14, %v4221_v41  ;;  %vm15776_vm1 = vmmov %vm15774_vm11  ;;  %v4161_v22 = vsel %vm15777_vm0, %v9501_v29, %v9491_v32  ;;  %v8281_v56 = vpack.c.bf16 %v4244_v31, %v12315_v36  ;;  %v8283_v1 = vpack.c.bf16 %v4243_v13, %v12312_v44  ;;  %v9510_v46 = vpop.permute.xlu0 %9509  ;;  %v7640_v13 = vld [vmem:[%s15480_s8 + $0x60] sm:$0xff] }
0x1043   : > { %v4148_v12 = vsel %vm15776_vm1, %v9496_v59, 0.0  ;;  %vm15778_vm4 = vmmov %vm15777_vm0  ;;  %v9506_v30 = vunpack.i.l.bf16 %v9505_v55  ;;  %v9507_v39 = vunpack.i.h.bf16 %v9505_v55  ;;  %v8285_v14 = vpack.c.bf16 %v4147_v53, %v4222_v62  ;;  %v7641_v55 = vld [vmem:[%s15480_s8 + $0x68] sm:$0xf] }
0x1044   : > { %v4152_v49 = vsel %vm11262_vm14, %v4148_v12, 0.0  ;;  %v4162_v60 = vsel %vm15778_vm4, %v9502_v28, %v9492_v0  ;;  %vm15779_vm5 = vmmov %vm15776_vm1  ;;  %v4229_v19 = vrot.slane %v4161_v22, 4  ;;  %8282 = vmatprep.subr.bf16.mxu0 %v8281_v56  ;;  %vm15783_vm0 = vcmask 908288  }
0x1045   : > { %v4142_v52 = vsel %vm15779_vm5, %v9497_v35, %v9496_v59  ;;  %vm15780_vm10 = vmmov %vm15776_vm1  ;;  %v4231_v32 = vrot.slane %v4162_v60, 4  ;;  %v4182_v0 = vsel %vm15783_vm0, %v9506_v30, 0.0  ;;  %8284 = vmatpush1.bf16.msra.mxu0 %v8283_v1  ;;  %v9511_v45 = vunpack.i.l.bf16 %v9510_v46 }
0x1046   : > { %v4141_v48 = vsel %vm15780_vm10, %v9487_v18, %v9486_v17  ;;  %vm15781_vm11 = vmmov %vm15775_vm13  ;;  %v4151_v6 = vsel %vm11258_vm2, %v4142_v52, 0.0  ;;  %8287 = vmatprep.subr.msk.bf16.mxu0 %vm11386_vm15, %v8285_v14  ;;  %v4186_v23 = vsel %vm11305_vm12, %v4182_v0, 0.0  ;;  %v9512_v21 = vunpack.i.h.bf16 %v9510_v46 }
0x1047   : > { %v4220_v61 = vsel %vm15781_vm11, %v4217_v47, %v4219_v54  ;;  %vm15782_vm13 = vmmov %vm15781_vm11 }
0x1048   : > { %v4246_v63 = vsel %vm15782_vm13, %v4152_v49, %v4230_v2  ;;  %vm15784_vm4 = vmmov %vm15781_vm11  ;;  %v8288_v41 = vpack.c.bf16 %v4141_v48, %v4220_v61 }
0x1049   : > { %v4234_v42 = vsel %vm15784_vm4, %v4230_v2, %v4233_v24  ;;  %vm15785_vm1 = vmmov %vm15783_vm0 }
0x104a   : > { %v8291_v47 = vpack.c.bf16 %v4234_v42, %v4246_v63  ;;  %v4181_v17 = vsel %vm15785_vm1, %v9507_v39, 0.0  ;;  %vm15786_vm5 = vmmov %vm15784_vm4  ;;  %8290 = vmatpush1.bf16.msk.msra.mxu0 %vm11402_vm8, %v8288_v41  ;;  %v7658_v42 = vld [vmem:[%s15145_s9 + $0x70] sm:$0xff] }
0x104b   : > { %v4232_v7 = vsel %vm15786_vm5, %v4229_v19, %v4231_v32  ;;  %vm15787_vm10 = vmmov %vm15784_vm4  ;;  %v8295_v28 = vpack.c.bf16 %v4186_v23, %v4181_v17  ;;  %vm15791_vm4 = vcmask 883712   ;;  %vm15793_vm5 = vcmask 130048  }
0x104c   : > { %v4245_v35 = vsel %vm15787_vm10, %v4151_v6, %v4229_v19  ;;  %vm15788_vm11 = vmmov %vm15783_vm0  ;;  %8292 = vmatprep.subr.bf16.mxu0 %v8291_v47  ;;  %v7659_v6 = vld [vmem:[%s15145_s9 + $0x78] sm:$0xf] }
0x104d   : > { %v4176_v59 = vsel %vm15788_vm11, %v9511_v45, %v9506_v30  ;;  %v8293_v29 = vpack.c.bf16 %v4232_v7, %v4245_v35  ;;  %vm15789_vm13 = vmmov %vm15783_vm0  ;;  %vm15790_vm0 = vnez %v15479_v11  ;;  %vm15795_vm11 = vcmask 138240  }
0x104e   : > { %v4175_v54 = vsel %vm15789_vm13, %v9512_v21, %v9507_v39  ;;  %v4185_v18 = vsel %vm11301_vm9, %v4176_v59, 0.0  ;;  %vm15792_vm1 = vmmov %vm15791_vm4 }
0x104f   : > { %8294 = vmatpush1.bf16.msra.mxu0 %v8293_v29  ;;  %v8298_v31 = vpack.c.bf16 %v4185_v18, %v4175_v54  ;;  %vm15794_vm10 = vmmov %vm15793_vm5 }
0x1050   : > { %8297 = vmatprep.subr.msk.bf16.mxu0 %vm15582_vm3, %v8295_v28  ;;  %vm15796_vm13 = vmmov %vm15795_vm11 }
0x1052   : > { %v4250_v53 = vpop.permute.xlu1 %4249 }
0x1053   : > { %8300 = vmatpush1.bf16.msk.msra.mxu0 %vm15790_vm0, %v8298_v31  ;;  %v4255_v22 = vpop.permute.xlu0 %4254 }
0x1056   : > { %7654 = vmatmul.mubr.msk.f32.vlgmr.msra.gmra.mrb[26].mxu0 %vm15791_vm4, %v7640_v13  ;;  %vm15797_vm4 = vmmov %vm15795_vm11 }
0x1057   : > { %4339 = vmatprep.mubr.f32.mxu0 %v15257_v10 }
0x105a   : > { %7655 = vmatmul.mubr.msk.f32.gmra.mrb[28].mxu0 %vm15792_vm1, %v7641_v55  ;;  %vm15798_vm1 = vcmask 1043456  }
0x105b   : > { %5043 = vmatprep.mubr.f32.mxu0 %v15257_v10 }
0x1129   : > { %v4335_v62 = vpop.f32.mrb[26].mxu0 }
0x112a   : > { %v4336_v24 = vadd.f32 %v4335_v62, %v4250_v53  ;;  %v4337_v12 = vpop.f32.mrb[27].mxu0 }
0x112b   : > { %v4338_v2 = vadd.f32 %v4337_v12, %v4250_v53 }
0x112c   : > { %v12471_v49 = vmax.f32 %v4336_v24, 0.0 }
0x112d   : > { %v12473_v60 = vmax.f32 %v4338_v2, 0.0  ;;  %v4341_v52 = vpop.f32.mrb[28].mxu0 }
0x112e   : > { %v4342_v56 = vadd.f32 %v4341_v52, %v4255_v22  ;;  %v4343_v1 = vpop.f32.mrb[29].mxu0 }
0x112f   : > { %v4344_v30 = vadd.f32 %v4343_v1, %v4255_v22  ;;  %v9513_v46 = vpack.i.bf16 %v12473_v60, %v12471_v49  ;;  %v9548_v63 = vpack.i.bf16 %v12471_v49, %v12473_v60 }
0x1130   : > { %v12477_v48 = vmax.f32 %v4342_v56, 0.0 }
0x1131   : > { %v12479_v61 = vmax.f32 %v4344_v30, 0.0  ;;  %9514 = vrot.lane.b32.xlu1 %v9513_v46, %s15533_s5 }
0x1132   : > { %v9578_v32 = vpack.i.bf16 %v12477_v48, %v12471_v49  ;;  %v9588_v45 = vpack.i.bf16 %v12471_v49, %v12477_v48 }
0x1133   : > { %v9528_v39 = vpack.i.bf16 %v12479_v61, %v12477_v48  ;;  %v9563_v14 = vpack.i.bf16 %v12477_v48, %v12479_v61  ;;  %v9568_v19 = vpack.i.bf16 %v12479_v61, %v12473_v60  ;;  %v9583_v0 = vpack.i.bf16 %v12473_v60, %v12479_v61 }
0x1135   : > { %9529 = vrot.lane.b32.xlu0 %v9528_v39, %s15534_s6  ;;  %9519 = vrot.lane.b32.xlu1 %v9513_v46, %s15534_s6 }
0x1139   : > { %9534 = vrot.lane.b32.xlu0 %v9528_v39, %s15533_s5  ;;  %9524 = vrot.lane.b32.xlu1 %v9513_v46, %s15535_s1 }
0x113d   : > { %9539 = vrot.lane.b32.xlu0 %v9513_v46, %s15481_s21  ;;  %9544 = vrot.lane.b32.xlu1 %v9528_v39, %s15481_s21 }
0x1141   : > { %9559 = vrot.lane.b32.xlu0 %v9528_v39, %s15535_s1  ;;  %9549 = vrot.lane.b32.xlu1 %v9548_v63, %s15426_s29 }
0x1145   : > { %9564 = vrot.lane.b32.xlu0 %v9563_v14, %s15426_s29  ;;  %9554 = vrot.lane.b32.xlu1 %v9548_v63, %s15427_s30 }
0x1149   : > { %9569 = vrot.lane.b32.xlu0 %v9568_v19, %s15428_s2  ;;  %9574 = vrot.lane.b32.xlu1 %v9563_v14, %s15427_s30 }
0x114d   : > { %9579 = vrot.lane.b32.xlu0 %v9578_v32, %s15428_s2  ;;  %9584 = vrot.lane.b32.xlu1 %v9583_v0, %s15429_s0 }
0x1151   : > { %9589 = vrot.lane.b32.xlu0 %v9588_v45, %s15429_s0  ;;  %4575 = vperm.xlu1 %8952, %v7659_v6  }
0x1155   : > { %4570 = vperm.xlu0 %8951, %v7658_v42  }
0x11a3   : > { %v9515_v47 = vpop.permute.xlu1 %9514 }
0x11a4   : > { %v9517_v41 = vunpack.i.h.bf16 %v9515_v47  ;;  %v9516_v17 = vunpack.i.l.bf16 %v9515_v47 }
0x11a6   : > { %v4392_v23 = vsel %vm15793_vm5, 0.0, %v9516_v17  ;;  %v4388_v35 = vsel %vm15794_vm10, %v9516_v17, %v9517_v41  ;;  %vm15799_vm5 = vmmov %vm15797_vm4 }
0x11a7   : > { %v9530_v21 = vpop.permute.xlu0 %9529  ;;  %v9520_v7 = vpop.permute.xlu1 %9519  ;;  %v4510_v18 = vrot.slane %v4392_v23, 4  ;;  %v4511_v55 = vrot.slane %v4388_v35, 4  ;;  %vm15800_vm10 = vmmov %vm15798_vm1 }
0x11a8   : > { %v9532_v59 = vunpack.i.h.bf16 %v9530_v21  ;;  %v9531_v28 = vunpack.i.l.bf16 %v9530_v21  ;;  %v9521_v29 = vunpack.i.l.bf16 %v9520_v7  ;;  %v9522_v54 = vunpack.i.h.bf16 %v9520_v7 }
0x11aa   : > { %v4369_v31 = vsel %vm15795_vm11, %v9531_v28, %v9532_v59  ;;  %v4375_v13 = vsel %vm15796_vm13, 0.0, %v9531_v28  ;;  %v4374_v2 = vsel %vm15797_vm4, 0.0, %v9521_v29  ;;  %v4368_v1 = vsel %vm15799_vm5, %v9521_v29, %v9522_v54 }
0x11ab   : > { %v4378_v53 = vsel %vm11258_vm2, %v4375_v13, 0.0  ;;  %v4379_v62 = vsel %vm11262_vm14, %v4369_v31, 0.0  ;;  %v9535_v24 = vpop.permute.xlu0 %9534  ;;  %v9525_v12 = vpop.permute.xlu1 %9524  ;;  %vm15801_vm11 = vcmask 130048   ;;  %vm15803_vm4 = vcmask 121856  }
0x11ac   : > { %v4560_v22 = vsel %vm15798_vm1, %v4378_v53, %v4510_v18  ;;  %v9537_v52 = vunpack.i.h.bf16 %v9535_v24  ;;  %v9536_v56 = vunpack.i.l.bf16 %v9535_v24  ;;  %v9526_v46 = vunpack.i.l.bf16 %v9525_v12  ;;  %vm15802_vm13 = vmmov %vm15801_vm11 }
0x11ad   : > { %v8304_v30 = vpack.c.bf16 %v4560_v22, %v4374_v2  ;;  %v4561_v39 = vsel %vm15800_vm10, %v4379_v62, %v4511_v55  ;;  %v9527_v6 = vunpack.i.h.bf16 %v9525_v12  ;;  %vm15804_vm5 = vcmask 7168  }
0x11ae   : > { %v4389_v63 = vsel %vm15801_vm11, %v9536_v56, %v9537_v52  ;;  %v4393_v14 = vsel %vm15802_vm13, 0.0, %v9536_v56  ;;  %v8301_v19 = vpack.c.bf16 %v4561_v39, %v4368_v1  ;;  %v4408_v21 = vsel %vm15803_vm4, 0.0, %v9526_v46  ;;  %vm15805_vm10 = vmmov %vm15804_vm5 }
0x11af   : > { %v4512_v32 = vrot.slane %v4393_v14, 4  ;;  %v4514_v0 = vrot.slane %v4389_v63, 4  ;;  %v9540_v45 = vpop.permute.xlu0 %9539  ;;  %v9545_v42 = vpop.permute.xlu1 %9544  ;;  %vm15806_vm11 = vmmov %vm15804_vm5 }
0x11b0   : > { %v9542_v47 = vunpack.i.h.bf16 %v9540_v45  ;;  %v9541_v41 = vunpack.i.l.bf16 %v9540_v45  ;;  %v9547_v17 = vunpack.i.h.bf16 %v9545_v42  ;;  %v9546_v23 = vunpack.i.l.bf16 %v9545_v42  ;;  %8303 = vmatprep.subr.msk.bf16.mxu1 %vm11286_vm7, %v8301_v19  ;;  %vm15807_vm13 = vmmov %vm15798_vm1 }
0x11b1   : > { %v4513_v7 = vsel %vm15798_vm1, %v4510_v18, %v4512_v32  ;;  %8306 = vmatpush1.bf16.msk.msra.mxu1 %vm15754_vm6, %v8304_v30  ;;  %v4515_v29 = vsel %vm15807_vm13, %v4511_v55, %v4514_v0  ;;  %vm15808_vm4 = vmmov %vm15804_vm5  ;;  %vm15809_vm1 = vcmask 121856   ;;  %vm15813_vm13 = vnez %v15455_v34 }
0x11b2   : > { %v4422_v35 = vsel %vm15804_vm5, %v9541_v41, %v9542_v47  ;;  %v4428_v59 = vsel %vm15805_vm10, 0.0, %v9541_v41  ;;  %v4423_v28 = vsel %vm15806_vm11, %v9546_v23, %v9547_v17  ;;  %v4429_v13 = vsel %vm15808_vm4, 0.0, %v9546_v23  ;;  %vm15810_vm5 = vmmov %vm15809_vm1 }
0x11b3   : > { %v4430_v54 = vsel %vm11258_vm2, %v4428_v59, 0.0  ;;  %v4431_v31 = vsel %vm11262_vm14, %v4422_v35, 0.0  ;;  %v4433_v18 = vsel %vm11262_vm14, %v4423_v28, 0.0  ;;  %v9560_v53 = vpop.permute.xlu0 %9559  ;;  %v9550_v62 = vpop.permute.xlu1 %9549  ;;  %v4402_v24 = vsel %vm15809_vm1, %v9526_v46, %v9527_v6  ;;  %vm15811_vm10 = vmmov %vm15809_vm1 }
0x11b4   : > { %v8310_v12 = vpack.c.bf16 %v4408_v21, %v4513_v7  ;;  %v4524_v2 = vrot.slane %v4430_v54, 4  ;;  %v4432_v55 = vsel %vm11258_vm2, %v4429_v13, 0.0  ;;  %v4525_v22 = vrot.slane %v4431_v31, 4 }
0x11b5   : > { %v9562_v52 = vunpack.i.h.bf16 %v9560_v53  ;;  %v9561_v56 = vunpack.i.l.bf16 %v9560_v53  ;;  %v9552_v1 = vunpack.i.h.bf16 %v9550_v62  ;;  %v4526_v30 = vrot.slane %v4432_v55, 4 }
0x11b6   : > { %v4528_v39 = vrot.slane %v4433_v18, 4  ;;  %v9551_v63 = vunpack.i.l.bf16 %v9550_v62  ;;  %v8307_v14 = vpack.c.bf16 %v4402_v24, %v4515_v29  ;;  %vm15812_vm11 = vcmask 1039360  }
0x11b7   : > { %v4403_v19 = vsel %vm15810_vm5, %v9561_v56, %v9562_v52  ;;  %v4409_v32 = vsel %vm15811_vm10, 0.0, %v9561_v56  ;;  %v9565_v0 = vpop.permute.xlu0 %9564  ;;  %v9555_v45 = vpop.permute.xlu1 %9554  ;;  %vm15814_vm4 = vmmov %vm15812_vm11  ;;  %vm15815_vm1 = vnez %v15458_v58  ;;  %vm15816_vm5 = vcmask 1043456  }
0x11b8   : > { %v4412_v46 = vsel %vm11301_vm9, %v4409_v32, 0.0  ;;  %v4448_v6 = vsel %vm15812_vm11, %v9551_v63, 0.0  ;;  %8309 = vmatprep.subr.msk.bf16.mxu1 %vm15813_vm13, %v8307_v14  ;;  %v9567_v42 = vunpack.i.h.bf16 %v9565_v0  ;;  %v4442_v47 = vsel %vm15814_vm4, %v9552_v1, %v9551_v63  ;;  %vm15817_vm10 = vmmov %vm15816_vm5 }
0x11b9   : > { %v4451_v41 = vsel %vm11305_vm12, %v4448_v6, 0.0  ;;  %8312 = vmatpush1.bf16.msk.msra.mxu1 %vm15815_vm1, %v8310_v12  ;;  %v9566_v17 = vunpack.i.l.bf16 %v9565_v0  ;;  %v4413_v23 = vsel %vm11305_vm12, %v4403_v19, 0.0  ;;  %v4529_v21 = vsel %vm15816_vm5, %v4525_v22, %v4528_v39  ;;  %vm15818_vm11 = vmmov %vm15814_vm4 }
0x11ba   : > { %v4527_v7 = vsel %vm15817_vm10, %v4524_v2, %v4526_v30  ;;  %vm15819_vm13 = vmmov %vm15814_vm4  ;;  %v4450_v13 = vsel %vm11301_vm9, %v4442_v47, 0.0  ;;  %v4539_v18 = vrot.slane %v4451_v41, 4  ;;  %v9556_v62 = vunpack.i.l.bf16 %v9555_v45 }
0x11bb   : > { %v4443_v35 = vsel %vm15818_vm11, %v9567_v42, %v9566_v17  ;;  %v4449_v59 = vsel %vm15819_vm13, %v9566_v17, 0.0  ;;  %v9570_v28 = vpop.permute.xlu0 %9569  ;;  %v9575_v29 = vpop.permute.xlu1 %9574  ;;  %vm15820_vm4 = vmmov %vm15816_vm5  ;;  %v9557_v32 = vunpack.i.h.bf16 %v9555_v45  ;;  %vm15825_vm10 = vcmask 924672  }
0x11bc   : > { %v4563_v54 = vsel %vm15820_vm4, %v4413_v23, %v4525_v22  ;;  %vm15821_vm6 = vmmov %vm15820_vm4  ;;  %v4453_v53 = vsel %vm11305_vm12, %v4449_v59, 0.0  ;;  %v4452_v24 = vsel %vm11301_vm9, %v4443_v35, 0.0  ;;  %v9572_v55 = vunpack.i.h.bf16 %v9570_v28 }
0x11bd   : > { %v4562_v31 = vsel %vm15821_vm6, %v4412_v46, %v4524_v2  ;;  %v4542_v12 = vrot.slane %v4453_v53, 4  ;;  %v9571_v52 = vunpack.i.l.bf16 %v9570_v28  ;;  %v9576_v56 = vunpack.i.l.bf16 %v9575_v29  ;;  %vm15822_vm13 = vmmov %vm15820_vm4 }
0x11be   : > { %v8313_v1 = vpack.c.bf16 %v4529_v21, %v4563_v54  ;;  %v8315_v30 = vpack.c.bf16 %v4527_v7, %v4562_v31  ;;  %v4538_v22 = vrot.slane %v4450_v13, 4  ;;  %vm15823_vm6 = vcmask 916480   ;;  %vm15826_vm11 = vmmov %vm15825_vm10 }
0x11bf   : > { %v4543_v2 = vsel %vm15822_vm13, %v4539_v18, %v4542_v12  ;;  %v4487_v39 = vsel %vm15823_vm6, %v9572_v55, 0.0  ;;  %vm15824_vm5 = vmmov %vm15823_vm6  ;;  %v9580_v14 = vpop.permute.xlu0 %9579  ;;  %v4540_v19 = vrot.slane %v4452_v24, 4  ;;  %v4468_v0 = vsel %vm15825_vm10, %v9556_v62, 0.0  ;;  %v9585_v6 = vpop.permute.xlu1 %9584 }
0x11c0   : > { %v4486_v63 = vsel %vm15824_vm5, %v9571_v52, 0.0  ;;  %v9577_v46 = vunpack.i.h.bf16 %v9575_v29  ;;  %8314 = vmatprep.subr.bf16.mxu1 %v8313_v1  ;;  %v8321_v42 = vpack.c.bf16 %v4468_v0, %v4543_v2  ;;  %v4469_v47 = vsel %vm15826_vm11, %v9576_v56, 0.0  ;;  %vm15827_vm13 = vmmov %vm15824_vm5 }
0x11c1   : > { %8316 = vmatpush1.bf16.msra.mxu1 %v8315_v30  ;;  %v4565_v41 = vsel %vm15820_vm4, %v12479_v61, %v4539_v18  ;;  %v9582_v17 = vunpack.i.h.bf16 %v9580_v14  ;;  %v4554_v23 = vrot.slane %v4487_v39, 4  ;;  %v4551_v21 = vrot.slane %v4486_v63, 4  ;;  %vm15828_vm6 = vmmov %vm15820_vm4 }
0x11c2   : > { %v8317_v7 = vpack.c.bf16 %v4565_v41, %v12473_v60  ;;  %v9581_v35 = vunpack.i.l.bf16 %v9580_v14  ;;  %v4473_v45 = vsel %vm11262_vm14, %v4469_v47, 0.0  ;;  %v9586_v28 = vunpack.i.l.bf16 %v9585_v6  ;;  %vm15829_vm5 = vmmov %vm15825_vm10  ;;  %v7657_v47 = vld [vmem:[%s15480_s8 + $0x78] sm:$0xf] }
0x11c3   : > { %v4483_v59 = vsel %vm15827_vm13, %v9582_v17, %v9572_v55  ;;  %v4564_v29 = vsel %vm15828_vm6, %v12477_v48, %v4538_v22  ;;  %v9590_v54 = vpop.permute.xlu0 %9589  ;;  %v4463_v31 = vsel %vm15829_vm5, %v9577_v46, %v9576_v56  ;;  %vm15830_vm10 = vmmov %vm15827_vm13  ;;  %v4541_v53 = vsel %vm15820_vm4, %v4538_v22, %v4540_v19 }
0x11c4   : > { %8318 = vmatprep.subr.bf16.mxu1 %v8317_v7  ;;  %v4482_v61 = vsel %vm15830_vm10, %v9581_v35, %v9571_v52  ;;  %v4552_v13 = vrot.slane %v4483_v59, 4  ;;  %v8319_v18 = vpack.c.bf16 %v4564_v29, %v12471_v49  ;;  %vm15831_vm11 = vmmov %vm15829_vm5  ;;  %v9587_v12 = vunpack.i.h.bf16 %v9585_v6 }
0x11c5   : > { %v4462_v60 = vsel %vm15831_vm11, %v9557_v32, %v9556_v62  ;;  %v4550_v24 = vrot.slane %v4482_v61, 4  ;;  %v9591_v55 = vunpack.i.l.bf16 %v9590_v54  ;;  %vm15832_vm13 = vmmov %vm15820_vm4  ;;  %v4472_v56 = vsel %vm11258_vm2, %v4463_v31, 0.0 }
0x11c6   : > { %8320 = vmatpush1.bf16.msra.mxu1 %v8319_v18  ;;  %v4555_v1 = vsel %vm15832_vm13, %v4551_v21, %v4554_v23  ;;  %vm15833_vm6 = vmmov %vm15820_vm4  ;;  %vm15834_vm5 = vcmask 908288   ;;  %v8324_v30 = vpack.c.bf16 %v4462_v60, %v4541_v53  ;;  %v9592_v2 = vunpack.i.h.bf16 %v9590_v54  ;;  %v7672_v53 = vld [vmem:[%s15146_s10 + $0x60] sm:$0xff] }
0x11c7   : > { %v4567_v48 = vsel %vm15833_vm6, %v4473_v45, %v4551_v21  ;;  %v4503_v52 = vsel %vm15834_vm5, %v9586_v28, 0.0  ;;  %8323 = vmatprep.subr.msk.bf16.mxu1 %vm11386_vm15, %v8321_v42  ;;  %vm15835_vm10 = vmmov %vm15820_vm4  ;;  %v7656_v42 = vld [vmem:[%s15480_s8 + $0x70] sm:$0xff]  ;;  %s15931_s8 = smov 14  }
0x11c8   : > { %v8327_v49 = vpack.c.bf16 %v4555_v1, %v4567_v48  ;;  %v4553_v62 = vsel %vm15835_vm10, %v4550_v24, %v4552_v13  ;;  %vm15836_vm11 = vmmov %vm15820_vm4  ;;  %v4507_v63 = vsel %vm11305_vm12, %v4503_v52, 0.0 }
0x11c9   : > { %v4566_v22 = vsel %vm15836_vm11, %v4472_v56, %v4550_v24  ;;  %vm15837_vm4 = vmmov %vm15834_vm5  ;;  %vm15840_vm5 = vcmask 883712   ;;  %v7673_v24 = vld [vmem:[%s15146_s10 + $0x68] sm:$0xf] }
0x11ca   : > { %v4502_v39 = vsel %vm15837_vm4, %v9587_v12, 0.0  ;;  %vm15838_vm13 = vmmov %vm15837_vm4  ;;  %8326 = vmatpush1.bf16.msk.msra.mxu1 %vm11402_vm8, %v8324_v30  ;;  %v8329_v19 = vpack.c.bf16 %v4553_v62, %v4566_v22 }
0x11cb   : > { %v4497_v14 = vsel %vm15838_vm13, %v9591_v55, %v9586_v28  ;;  %8328 = vmatprep.subr.bf16.mxu1 %v8327_v49  ;;  %v8331_v32 = vpack.c.bf16 %v4507_v63, %v4502_v39  ;;  %vm15839_vm6 = vmmov %vm15837_vm4  ;;  %vm15843_vm13 = vcmask 7168   ;;  %v7674_v63 = vld [vmem:[%s15147_s11 + $0x3] sm:$0x1] }
0x11cc   : > { %v4496_v0 = vsel %vm15839_vm6, %v9592_v2, %v9587_v12  ;;  %v4506_v46 = vsel %vm11301_vm9, %v4497_v14, 0.0  ;;  %vm15841_vm10 = vmmov %vm15840_vm5  ;;  %vm15844_vm6 = vcmask 3072  }
0x11cd   : > { %v8334_v6 = vpack.c.bf16 %v4506_v46, %v4496_v0  ;;  %vm15842_vm4 = vmmov %vm15836_vm11  ;;  %v7675_v0 = vld [vmem:[%s15146_s10 + $0x70] sm:$0xff]  ;;  %v7676_v46 = vld [vmem:[%s15146_s10 + $0x78] sm:$0xf] }
0x11ce   : > { %8330 = vmatpush1.bf16.msra.mxu1 %v8329_v19 }
0x11cf   : > { %8333 = vmatprep.subr.msk.bf16.mxu1 %vm15582_vm3, %v8331_v32 }
0x11d0   : > { %v4576_v35 = vpop.permute.xlu1 %4575 }
0x11d2   : > { %8336 = vmatpush1.bf16.msk.msra.mxu1 %vm15790_vm0, %v8334_v6 }
0x11d4   : > { %v4571_v41 = vpop.permute.xlu0 %4570 }
0x11d5   : > { %7670 = vmatmul.mubr.msk.f32.vlgmr.msra.gmra.mrb[16].mxu1 %vm15840_vm5, %v7656_v42  ;;  %v7677_v42 = vld [vmem:[%s15148_s12 + $0x30] sm:$0xff]  ;;  %vm15845_vm5 = vcmask 130048  }
0x11d6   : > { %4660 = vmatprep.mubr.f32.mxu1 %v15257_v10 }
0x11d9   : > { %7671 = vmatmul.mubr.msk.f32.gmra.mrb[18].mxu1 %vm15841_vm10, %v7657_v47  ;;  %v7678_v47 = vld [vmem:[%s15148_s12 + $0x38] sm:$0xf]  ;;  %vm15846_vm10 = vmmov %vm15845_vm5 }
0x12a8   : > { %v4656_v17 = vpop.f32.mrb[16].mxu1 }
0x12a9   : > { %v4657_v23 = vadd.f32 %v4656_v17, %v4571_v41  ;;  %v4658_v21 = vpop.f32.mrb[17].mxu1 }
0x12aa   : > { %v4659_v7 = vadd.f32 %v4658_v21, %v4571_v41 }
0x12ac   : > { %v4667_v45 = vadd.f32 %v4659_v7, %v4657_v23  ;;  %v4662_v59 = vpop.f32.mrb[18].mxu1 }
0x12ad   : > { %v4663_v28 = vadd.f32 %v4662_v59, %v4576_v35  ;;  %v4664_v29 = vpop.f32.mrb[19].mxu1 }
0x12ae   : > { %v4665_v54 = vadd.f32 %v4664_v29, %v4576_v35  ;;  %4668 = vadd.xlane.f32.xlu1 %v4667_v45 }
0x12af   : > { %v4670_v31 = vsel %vm15836_vm11, %v4663_v28, 0.0  ;;  %vm15847_vm11 = vcmask 138240  }
0x12b0   : > { %v4671_v61 = vsel %vm15842_vm4, %v4665_v54, 0.0  ;;  %vm15848_vm4 = vmmov %vm15847_vm11 }
0x12b1   : > { %v4672_v13 = vadd.f32 %v4671_v61, %v4670_v31 }
0x12b3   : > { %4673 = vadd.xlane.f32.xlu0 %v4672_v13 }
0x133b   : > { %v4669_v18 = vpop.xlane.xlu1 %4668 }
0x133c   : > { %v4675_v60 = vmul.f32 0.00390625, %v4669_v18 }
0x133e   : > { %v4680_v55 = vmul.f32 %v7672_v53, %v4675_v60 }
0x1340   : > { %v4674_v12 = vpop.xlane.xlu0 %4673  ;;  %v4682_v56 = vsel %vm15843_vm13, %v4680_v55, 0.0  ;;  %vm15849_vm13 = vcmask 1043456  }
0x1341   : > { %v4676_v1 = vmul.f32 0.00390625, %v4674_v12 }
0x1343   : > { %v4681_v48 = vmul.f32 %v7673_v24, %v4676_v1 }
0x1345   : > { %v4683_v52 = vsel %vm15844_vm6, %v4681_v48, 0.0  ;;  %vm15850_vm6 = vmmov %vm15849_vm13 }
0x1346   : > { %v4684_v49 = vadd.f32 %v4683_v52, %v4682_v56 }
0x1348   : > { %v4685_v62 = vrot.slane %v4684_v49, 4 }
0x134a   : > { %v4686_v30 = vadd.f32 %v4685_v62, %v4684_v49 }
0x134c   : > { %v4687_v22 = vrot.slane %v4686_v30, 2 }
0x134e   : > { %v4688_v2 = vadd.f32 %v4687_v22, %v4686_v30 }
0x1350   : > { %v4689_v39 = vrot.slane %v4688_v2, 1 }
0x1352   : > { %v4690_v14 = vadd.f32 %v4689_v39, %v4688_v2  ;;  %v4744_v39 = vld [vmem:[%s15150_s14 + $0x8] sm:$0xf] }
0x1354   : > { %v4693_v19 = vadd.f32 %v7674_v63, %v4690_v14  ;;  %v5067_v63 = vld [vmem:[%s15152_s16] sm:$0xff]  ;;  %v5068_v14 = vld [vmem:[%s15152_s16 + $0x8] sm:$0xff] }
0x1356   : > { %v4694_v32 = vmax.f32 %v4693_v19, 0.0  ;;  %v5069_v19 = vld [vmem:[%s15152_s16 + $0x10] sm:$0xff] }
0x1358   : > { %v4701_v6 = vrot.slane %v4694_v32, %v10705_v3  ;;  %v5070_v32 = vld [vmem:[%s15152_s16 + $0x18] sm:$0xff] }
0x135a   : > { %v4702_v41 = vmul.f32 %v7675_v0, %v4701_v6  ;;  %v4703_v17 = vmul.f32 %v7676_v46, %v4701_v6  ;;  %v5071_v0 = vld [vmem:[%s15152_s16 + $0x20] sm:$0xff]  ;;  %v5072_v46 = vld [vmem:[%s15152_s16 + $0x28] sm:$0xff]  ;;  %v5073_v6 = vld [vmem:[%s15152_s16 + $0x30] sm:$0xff] }
0x135c   : > { %v4709_v21 = vadd.f32 %v7677_v42, %v4702_v41  ;;  %v4710_v35 = vadd.f32 %v7678_v47, %v4703_v17  ;;  %v5244_v42 = vld [vmem:[%s15153_s17] sm:$0xff]  ;;  %v5245_v47 = vld [vmem:[%s15153_s17 + $0x8] sm:$0xff]  ;;  %v5246_v41 = vld [vmem:[%s15153_s17 + $0x10] sm:$0xff] }
0x135d   : > { %v5247_v17 = vld [vmem:[%s15153_s17 + $0x18] sm:$0xff] }
0x135e   : > { %v4711_v45 = vsub.f32 0.0, %v4709_v21  ;;  %v4712_v59 = vsub.f32 0.0, %v4710_v35  ;;  %v5248_v21 = vld [vmem:[%s15153_s17 + $0x20] sm:$0xff]  ;;  %v5249_v35 = vld [vmem:[%s15153_s17 + $0x28] sm:$0xff] }
0x1360   : > { %v4713_v29 = vmul.f32 1.442695, %v4711_v45  ;;  %v4715_v31 = vmul.f32 1.442695, %v4712_v59  ;;  %v5250_v45 = vld [vmem:[%s15153_s17 + $0x30] sm:$0xff] }
0x1362   : > { %10537 = vpow2.f32 %v4713_v29 }
0x1363   : > { %10539 = vpow2.f32 %v4715_v31 }
0x136c   : > { %v10538_v61 = vpop.eup %10537 }
0x136d   : > { %v10540_v13 = vpop.eup %10539  ;;  %v4717_v18 = vadd.f32 1.0, %v10538_v61 }
0x136e   : > { %v4718_v60 = vadd.f32 1.0, %v10540_v13 }
0x136f   : > { %10541 = vrcp.f32 %v4717_v18 }
0x1370   : > { %10543 = vrcp.f32 %v4718_v60 }
0x1379   : > { %v10542_v53 = vpop.eup %10541 }
0x137a   : > { %v10544_v24 = vpop.eup %10543  ;;  %4725 = vperm.xlu0 %8951, %v10542_v53  }
0x137b   : > { %4730 = vperm.xlu1 %8952, %v10544_v24  }
0x13f9   : > { %v4726_v12 = vpop.permute.xlu0 %4725 }
0x13fa   : > { %v4731_v55 = vpop.permute.xlu1 %4730  ;;  %v4733_v1 = vmul.f32 %v4726_v12, %v4657_v23  ;;  %v4734_v48 = vmul.f32 %v4726_v12, %v4659_v7 }
0x13fb   : > { %v4735_v56 = vmul.f32 %v4731_v55, %v4663_v28  ;;  %v4736_v52 = vmul.f32 %v4731_v55, %v4665_v54  ;;  %v4743_v54 = vld [vmem:[%s15150_s14] sm:$0xff] }
0x13fc   : > { %v12653_v49 = vadd.f32 %v4733_v1, %v12312_v44  ;;  %v12656_v62 = vadd.f32 %v4734_v48, %v12315_v36 }
0x13fd   : > { %v12659_v30 = vadd.f32 %v4735_v56, %v12318_v40  ;;  %v12662_v22 = vadd.f32 %v4736_v52, %v12321_v27 }
0x13fe   : > { %v9593_v2 = vpack.i.bf16 %v12656_v62, %v12653_v49  ;;  %v9633_v44 = vpack.i.bf16 %v12653_v49, %v12656_v62 }
0x13ff   : > { %v9598_v23 = vpack.i.bf16 %v12662_v22, %v12659_v30  ;;  %v9638_v36 = vpack.i.bf16 %v12659_v30, %v12662_v22  ;;  %v9648_v40 = vpack.i.bf16 %v12662_v22, %v12656_v62  ;;  %v9658_v27 = vpack.i.bf16 %v12659_v30, %v12653_v49 }
0x1400   : > { %9594 = vrot.lane.b32.xlu1 %v9593_v2, %s15533_s5  ;;  %v9663_v7 = vpack.i.bf16 %v12656_v62, %v12662_v22  ;;  %v9668_v28 = vpack.i.bf16 %v12653_v49, %v12659_v30 }
0x1401   : > { %9599 = vrot.lane.b32.xlu0 %v9598_v23, %s15534_s6 }
0x1404   : > { %9604 = vrot.lane.b32.xlu1 %v9593_v2, %s15534_s6 }
0x1405   : > { %9609 = vrot.lane.b32.xlu0 %v9598_v23, %s15533_s5 }
0x1408   : > { %9614 = vrot.lane.b32.xlu1 %v9593_v2, %s15535_s1 }
0x1409   : > { %9619 = vrot.lane.b32.xlu0 %v9593_v2, %s15481_s21 }
0x140c   : > { %9624 = vrot.lane.b32.xlu1 %v9598_v23, %s15481_s21 }
0x140d   : > { %9629 = vrot.lane.b32.xlu0 %v9598_v23, %s15535_s1 }
0x1410   : > { %9634 = vrot.lane.b32.xlu1 %v9633_v44, %s15426_s29 }
0x1411   : > { %9639 = vrot.lane.b32.xlu0 %v9638_v36, %s15426_s29 }
0x1414   : > { %9644 = vrot.lane.b32.xlu1 %v9633_v44, %s15427_s30 }
0x1415   : > { %9649 = vrot.lane.b32.xlu0 %v9648_v40, %s15428_s2 }
0x1418   : > { %9654 = vrot.lane.b32.xlu1 %v9638_v36, %s15427_s30 }
0x1419   : > { %9659 = vrot.lane.b32.xlu0 %v9658_v27, %s15428_s2 }
0x141c   : > { %9664 = vrot.lane.b32.xlu1 %v9663_v7, %s15429_s0 }
0x141d   : > { %9669 = vrot.lane.b32.xlu0 %v9668_v28, %s15429_s0 }
0x1420   : > { %4959 = vperm.xlu1 %8952, %v4743_v54  }
0x1421   : > { %4964 = vperm.xlu0 %8951, %v4744_v39  }
0x1424   : > { %5076 = vperm.xlu1 %8952, %v5067_v63  }
0x1425   : > { %5081 = vperm.xlu0 %8951, %v5068_v14  }
0x1428   : > { %5086 = vperm.xlu1 %8952, %v5069_v19  }
0x1429   : > { %5091 = vperm.xlu0 %8951, %v5070_v32  }
0x142c   : > { %5096 = vperm.xlu1 %8952, %v5071_v0  }
0x142d   : > { %5101 = vperm.xlu0 %8951, %v5072_v46  }
0x1430   : > { %5106 = vperm.xlu1 %8952, %v5073_v6  }
0x1431   : > { %5267 = vperm.xlu0 %8951, %v5244_v42  }
0x1434   : > { %5272 = vperm.xlu1 %8952, %v5245_v47  }
0x1435   : > { %5277 = vperm.xlu0 %8951, %v5246_v41  }
0x1438   : > { %5282 = vperm.xlu1 %8952, %v5247_v17  }
0x1439   : > { %5287 = vperm.xlu0 %8951, %v5248_v21  }
0x143c   : > { %5292 = vperm.xlu1 %8952, %v5249_v35  }
0x143d   : > { %5297 = vperm.xlu0 %8951, %v5250_v45  }
0x1472   : > { %v9595_v59 = vpop.permute.xlu1 %9594 }
0x1473   : > { %v9597_v29 = vunpack.i.h.bf16 %v9595_v59  ;;  %v9596_v31 = vunpack.i.l.bf16 %v9595_v59  ;;  %v9600_v61 = vpop.permute.xlu0 %9599 }
0x1474   : > { %v9602_v13 = vunpack.i.h.bf16 %v9600_v61  ;;  %v9601_v18 = vunpack.i.l.bf16 %v9600_v61 }
0x1475   : > { %v4777_v60 = vsel %vm15845_vm5, %v9596_v31, %v9597_v29  ;;  %v4781_v53 = vsel %vm15846_vm10, 0.0, %v9596_v31  ;;  %vm15851_vm5 = vmmov %vm15848_vm4 }
0x1476   : > { %v4899_v24 = vrot.slane %v4781_v53, 4  ;;  %v4900_v12 = vrot.slane %v4777_v60, 4  ;;  %v4758_v55 = vsel %vm15847_vm11, %v9601_v18, %v9602_v13  ;;  %v4764_v1 = vsel %vm15848_vm4, 0.0, %v9601_v18  ;;  %v9605_v48 = vpop.permute.xlu1 %9604  ;;  %vm15852_vm10 = vmmov %vm15848_vm4 }
0x1477   : > { %v4767_v56 = vsel %vm11258_vm2, %v4764_v1, 0.0  ;;  %v4768_v52 = vsel %vm11262_vm14, %v4758_v55, 0.0  ;;  %v9607_v2 = vunpack.i.h.bf16 %v9605_v48  ;;  %v9606_v23 = vunpack.i.l.bf16 %v9605_v48  ;;  %v9610_v44 = vpop.permute.xlu0 %9609 }
0x1478   : > { %v4949_v36 = vsel %vm15849_vm13, %v4767_v56, %v4899_v24  ;;  %v9612_v40 = vunpack.i.h.bf16 %v9610_v44  ;;  %v9611_v27 = vunpack.i.l.bf16 %v9610_v44  ;;  %v4950_v7 = vsel %vm15850_vm6, %v4768_v52, %v4900_v12 }
0x1479   : > { %v4757_v28 = vsel %vm15851_vm5, %v9606_v23, %v9607_v2  ;;  %v4763_v54 = vsel %vm15852_vm10, 0.0, %v9606_v23  ;;  %vm15853_vm11 = vcmask 130048   ;;  %vm15855_vm13 = vcmask 121856  }
0x147a   : > { %v8340_v39 = vpack.c.bf16 %v4949_v36, %v4763_v54  ;;  %v4778_v63 = vsel %vm15853_vm11, %v9611_v27, %v9612_v40  ;;  %vm15854_vm4 = vmmov %vm15853_vm11  ;;  %v9615_v19 = vpop.permute.xlu1 %9614  ;;  %v8337_v32 = vpack.c.bf16 %v4950_v7, %v4757_v28  ;;  %vm15857_vm5 = vcmask 1043456  }
0x147b   : > { %v4782_v14 = vsel %vm15854_vm4, 0.0, %v9611_v27  ;;  %v4903_v46 = vrot.slane %v4778_v63, 4  ;;  %v9617_v6 = vunpack.i.h.bf16 %v9615_v19  ;;  %v9616_v42 = vunpack.i.l.bf16 %v9615_v19  ;;  %v9620_v47 = vpop.permute.xlu0 %9619  ;;  %vm15856_vm6 = vmmov %vm15855_vm13 }
0x147c   : > { %v4901_v0 = vrot.slane %v4782_v14, 4  ;;  %v9622_v41 = vunpack.i.h.bf16 %v9620_v47  ;;  %v9621_v17 = vunpack.i.l.bf16 %v9620_v47  ;;  %8339 = vmatprep.subr.msk.bf16.mxu0 %vm11286_vm7, %v8337_v32  ;;  %vm15858_vm10 = vnez %v15440_v51  ;;  %vm15859_vm11 = vmmov %vm15857_vm5 }
0x147d   : > { %v4791_v21 = vsel %vm15855_vm13, %v9616_v42, %v9617_v6  ;;  %v4797_v35 = vsel %vm15856_vm6, 0.0, %v9616_v42  ;;  %8342 = vmatpush1.bf16.msk.msra.mxu0 %vm15858_vm10, %v8340_v39  ;;  %v4904_v59 = vsel %vm15859_vm11, %v4900_v12, %v4903_v46  ;;  %vm15860_vm4 = vcmask 7168  }
0x147e   : > { %v4902_v45 = vsel %vm15857_vm5, %v4899_v24, %v4901_v0  ;;  %v4817_v31 = vsel %vm15860_vm4, 0.0, %v9621_v17  ;;  %v9625_v61 = vpop.permute.xlu1 %9624  ;;  %v8343_v13 = vpack.c.bf16 %v4791_v21, %v4904_v59  ;;  %vm15861_vm0 = vmmov %vm15860_vm4  ;;  %vm15862_vm13 = vnez %v15455_v34 }
0x147f   : > { %v8346_v29 = vpack.c.bf16 %v4797_v35, %v4902_v45  ;;  %v4811_v18 = vsel %vm15861_vm0, %v9621_v17, %v9622_v41  ;;  %v9627_v60 = vunpack.i.h.bf16 %v9625_v61  ;;  %v9626_v53 = vunpack.i.l.bf16 %v9625_v61  ;;  %v9630_v55 = vpop.permute.xlu0 %9629  ;;  %vm15863_vm6 = vmmov %vm15861_vm0 }
0x1480   : > { %v9632_v1 = vunpack.i.h.bf16 %v9630_v55  ;;  %v9631_v48 = vunpack.i.l.bf16 %v9630_v55  ;;  %8345 = vmatprep.subr.msk.bf16.mxu0 %vm15862_vm13, %v8343_v13  ;;  %v4819_v24 = vsel %vm11258_vm2, %v4817_v31, 0.0  ;;  %vm15864_vm5 = vmmov %vm15861_vm0  ;;  %v4820_v52 = vsel %vm11262_vm14, %v4811_v18, 0.0 }
0x1481   : > { %v4812_v12 = vsel %vm15863_vm6, %v9626_v53, %v9627_v60  ;;  %v4818_v56 = vsel %vm15864_vm5, 0.0, %v9626_v53  ;;  %8348 = vmatpush1.bf16.msk.msra.mxu0 %vm15815_vm1, %v8346_v29  ;;  %vm15865_vm0 = vcmask 121856   ;;  %v4913_v19 = vrot.slane %v4819_v24, 4 }
0x1482   : > { %v4821_v2 = vsel %vm11258_vm2, %v4818_v56, 0.0  ;;  %v4822_v23 = vsel %vm11262_vm14, %v4812_v12, 0.0  ;;  %v4798_v44 = vsel %vm15865_vm0, 0.0, %v9631_v48  ;;  %v9635_v36 = vpop.permute.xlu1 %9634  ;;  %vm15866_vm11 = vmmov %vm15865_vm0  ;;  %v4914_v32 = vrot.slane %v4820_v52, 4 }
0x1483   : > { %v4915_v40 = vrot.slane %v4821_v2, 4  ;;  %v4917_v27 = vrot.slane %v4822_v23, 4  ;;  %v4792_v7 = vsel %vm15866_vm11, %v9631_v48, %v9632_v1  ;;  %v9637_v28 = vunpack.i.h.bf16 %v9635_v36  ;;  %v9640_v54 = vpop.permute.xlu0 %9639 }
0x1484   : > { %v9636_v39 = vunpack.i.l.bf16 %v9635_v36  ;;  %v9642_v63 = vunpack.i.h.bf16 %v9640_v54  ;;  %v9641_v14 = vunpack.i.l.bf16 %v9640_v54  ;;  %v4801_v0 = vsel %vm11301_vm9, %v4798_v44, 0.0 }
0x1485   : > { %vm15867_vm4 = vcmask 1039360   ;;  %v4802_v41 = vsel %vm11305_vm12, %v4792_v7, 0.0  ;;  %vm15870_vm0 = vcmask 1043456   ;;  %vm15881_vm10 = vcmask 916480  }
0x1486   : > { %v4831_v46 = vsel %vm15867_vm4, %v9637_v28, %v9636_v39  ;;  %vm15868_vm6 = vmmov %vm15867_vm4  ;;  %v9645_v47 = vpop.permute.xlu1 %9644  ;;  %v4918_v45 = vsel %vm15870_vm0, %v4914_v32, %v4917_v27  ;;  %v4832_v29 = vsel %vm15867_vm4, %v9642_v63, %v9641_v14 }
0x1487   : > { %v4837_v6 = vsel %vm15868_vm6, %v9636_v39, 0.0  ;;  %vm15869_vm5 = vmmov %vm15867_vm4  ;;  %v4839_v17 = vsel %vm11301_vm9, %v4831_v46, 0.0  ;;  %v9650_v35 = vpop.permute.xlu0 %9649  ;;  %v4841_v12 = vsel %vm11301_vm9, %v4832_v29, 0.0  ;;  %v9646_v52 = vunpack.i.l.bf16 %v9645_v47 }
0x1488   : > { %v4838_v42 = vsel %vm15869_vm5, %v9641_v14, 0.0  ;;  %v4840_v21 = vsel %vm11305_vm12, %v4837_v6, 0.0  ;;  %vm15871_vm11 = vmmov %vm15870_vm0  ;;  %v9652_v61 = vunpack.i.h.bf16 %v9650_v35  ;;  %v9651_v13 = vunpack.i.l.bf16 %v9650_v35 }
0x1489   : > { %v4916_v59 = vsel %vm15871_vm11, %v4913_v19, %v4915_v40  ;;  %v4842_v31 = vsel %vm11305_vm12, %v4838_v42, 0.0  ;;  %vm15872_vm6 = vmmov %vm15870_vm0  ;;  %v4927_v53 = vrot.slane %v4839_v17, 4  ;;  %v4928_v55 = vrot.slane %v4840_v21, 4 }
0x148a   : > { %v4952_v18 = vsel %vm15872_vm6, %v4802_v41, %v4914_v32  ;;  %vm15873_vm5 = vmmov %vm15870_vm0  ;;  %v9655_v24 = vpop.permute.xlu1 %9654  ;;  %v4931_v56 = vrot.slane %v4842_v31, 4  ;;  %vm15874_vm0 = vcmask 916480   ;;  %v4929_v28 = vrot.slane %v4841_v12, 4 }
0x148b   : > { %v4951_v60 = vsel %vm15873_vm5, %v4801_v0, %v4913_v19  ;;  %v8349_v1 = vpack.c.bf16 %v4918_v45, %v4952_v18  ;;  %v9660_v2 = vpop.permute.xlu0 %9659  ;;  %v4876_v23 = vsel %vm15874_vm0, %v9652_v61, 0.0  ;;  %vm15875_vm11 = vmmov %vm15874_vm0  ;;  %v9657_v36 = vunpack.i.h.bf16 %v9655_v24 }
0x148c   : > { %v8351_v48 = vpack.c.bf16 %v4916_v59, %v4951_v60  ;;  %v4875_v44 = vsel %vm15875_vm11, %v9651_v13, 0.0  ;;  %v9656_v40 = vunpack.i.l.bf16 %v9655_v24  ;;  %v9662_v27 = vunpack.i.h.bf16 %v9660_v2  ;;  %vm15876_vm4 = vmmov %vm15873_vm5 }
0x148d   : > { %8350 = vmatprep.subr.bf16.mxu0 %v8349_v1  ;;  %v9661_v7 = vunpack.i.l.bf16 %v9660_v2  ;;  %v9647_v54 = vunpack.i.h.bf16 %v9645_v47  ;;  %v4954_v39 = vsel %vm15876_vm4, %v12662_v22, %v4928_v55  ;;  %vm15877_vm6 = vmmov %vm15876_vm4  ;;  %vm15878_vm5 = vcmask 924672  }
0x148e   : > { %8352 = vmatpush1.bf16.msra.mxu0 %v8351_v48  ;;  %v4953_v63 = vsel %vm15877_vm6, %v12659_v30, %v4927_v53  ;;  %v9665_v14 = vpop.permute.xlu1 %9664  ;;  %v4857_v19 = vsel %vm15878_vm5, %v9646_v52, 0.0  ;;  %vm15879_vm0 = vmmov %vm15876_vm4  ;;  %v4943_v0 = vrot.slane %v4876_v23, 4  ;;  %v4940_v6 = vrot.slane %v4875_v44, 4 }
0x148f   : > { %v4932_v32 = vsel %vm15879_vm0, %v4928_v55, %v4931_v56  ;;  %vm15880_vm11 = vmmov %vm15878_vm5  ;;  %v4871_v47 = vsel %vm15881_vm10, %v9661_v7, %v9651_v13  ;;  %v8353_v30 = vpack.c.bf16 %v4954_v39, %v12656_v62  ;;  %v8355_v17 = vpack.c.bf16 %v4953_v63, %v12653_v49  ;;  %v9670_v35 = vpop.permute.xlu0 %9669 }
0x1490   : > { %v4858_v46 = vsel %vm15880_vm11, %v9656_v40, 0.0  ;;  %vm15882_vm7 = vmmov %vm15881_vm10  ;;  %v9666_v21 = vunpack.i.l.bf16 %v9665_v14  ;;  %v9667_v29 = vunpack.i.h.bf16 %v9665_v14  ;;  %v8357_v18 = vpack.c.bf16 %v4857_v19, %v4932_v32 }
0x1491   : > { %v4862_v42 = vsel %vm11262_vm14, %v4858_v46, 0.0  ;;  %v4872_v41 = vsel %vm15882_vm7, %v9662_v27, %v9652_v61  ;;  %vm15883_vm4 = vmmov %vm15878_vm5  ;;  %v4939_v60 = vrot.slane %v4871_v47, 4  ;;  %8354 = vmatprep.subr.bf16.mxu0 %v8353_v30  ;;  %vm15886_vm7 = vcmask 908288   ;;  %v4742_v27 = vld [vmem:[%s15149_s13 + $0x8] sm:$0xf] }
0x1492   : > { %v4852_v22 = vsel %vm15883_vm4, %v9657_v36, %v9656_v40  ;;  %vm15884_vm6 = vmmov %vm15883_vm4  ;;  %v4956_v31 = vsel %vm15879_vm0, %v4862_v42, %v4940_v6  ;;  %v4941_v13 = vrot.slane %v4872_v41, 4  ;;  %v4892_v61 = vsel %vm15886_vm7, %v9666_v21, 0.0  ;;  %8356 = vmatpush1.bf16.msra.mxu0 %v8355_v17  ;;  %v5065_v30 = vld [vmem:[%s15151_s15 + $0x28] sm:$0xff]  ;;  %v5066_v17 = vld [vmem:[%s15151_s15 + $0x30] sm:$0xff] }
0x1493   : > { %v4851_v45 = vsel %vm15884_vm6, %v9647_v54, %v9646_v52  ;;  %vm15885_vm5 = vmmov %vm15879_vm0  ;;  %v4861_v62 = vsel %vm11258_vm2, %v4852_v22, 0.0  ;;  %v9671_v49 = vunpack.i.l.bf16 %v9670_v35  ;;  %8359 = vmatprep.subr.msk.bf16.mxu0 %vm11386_vm15, %v8357_v18  ;;  %v4896_v24 = vsel %vm11305_vm12, %v4892_v61, 0.0  ;;  %v5060_v22 = vld [vmem:[%s15151_s15] sm:$0xff] }
0x1494   : > { %v4930_v59 = vsel %vm15885_vm5, %v4927_v53, %v4929_v28  ;;  %vm15887_vm10 = vmmov %vm15879_vm0  ;;  %v9672_v12 = vunpack.i.h.bf16 %v9670_v35 }
0x1495   : > { %v4944_v55 = vsel %vm15887_vm10, %v4940_v6, %v4943_v0  ;;  %v8360_v1 = vpack.c.bf16 %v4851_v45, %v4930_v59  ;;  %vm15888_vm11 = vmmov %vm15886_vm7 }
0x1496   : > { %v8363_v53 = vpack.c.bf16 %v4944_v55, %v4956_v31  ;;  %v4891_v48 = vsel %vm15888_vm11, %v9667_v29, 0.0  ;;  %vm15889_vm4 = vmmov %vm15879_vm0 }
0x1497   : > { %v4942_v56 = vsel %vm15889_vm4, %v4939_v60, %v4941_v13  ;;  %vm15890_vm6 = vmmov %vm15879_vm0  ;;  %8362 = vmatpush1.bf16.msk.msra.mxu0 %vm11402_vm8, %v8360_v1  ;;  %v8367_v23 = vpack.c.bf16 %v4896_v24, %v4891_v48  ;;  %vm15893_vm0 = vnez %v15479_v11  ;;  %vm15894_vm8 = vcmask 883712  }
0x1498   : > { %v4955_v52 = vsel %vm15890_vm6, %v4861_v62, %v4939_v60  ;;  %vm15891_vm5 = vmmov %vm15886_vm7  ;;  %8364 = vmatprep.subr.bf16.mxu0 %v8363_v53 }
0x1499   : > { %v4886_v2 = vsel %vm15891_vm5, %v9671_v49, %v9666_v21  ;;  %v8365_v5 = vpack.c.bf16 %v4942_v56, %v4955_v52  ;;  %vm15892_vm15 = vmmov %vm15891_vm5 }
0x149a   : > { %v4885_v44 = vsel %vm15892_vm15, %v9672_v12, %v9667_v29  ;;  %v4895_v36 = vsel %vm11301_vm9, %v4886_v2, 0.0  ;;  %vm15895_vm7 = vmmov %vm15894_vm8 }
0x149b   : > { %8366 = vmatpush1.bf16.msra.mxu0 %v8365_v5  ;;  %v8370_v40 = vpack.c.bf16 %v4895_v36, %v4885_v44  ;;  %vm15897_vm10 = vmmov %vm15889_vm4  ;;  %vm5109_vm4 = vcmask 97280  }
0x149c   : > { %8369 = vmatprep.subr.msk.bf16.mxu0 %vm15582_vm3, %v8367_v23  ;;  %vm15896_vm3 = vmmov 1  }
0x149d   : > { %vm8374_vm11 = vmpackc.low %vm15897_vm10, %vm15896_vm3 }
0x149f   : > { %8372 = vmatpush1.bf16.msk.msra.mxu0 %vm15893_vm0, %v8370_v40  ;;  %v4960_v11 = vpop.permute.xlu1 %4959 }
0x14a0   : > { %v4965_v54 = vpop.permute.xlu0 %4964 }
0x14a2   : > { %7689 = vmatmul.mubr.msk.f32.vlgmr.msra.gmra.mrb[30].mxu0 %vm15894_vm8, %v4741_v25 }
0x14a3   : > { %5049 = vmatprep.mubr.f32.mxu0 %v15257_v10  ;;  %v5077_v21 = vpop.permute.xlu1 %5076 }
0x14a4   : > { %v5082_v35 = vpop.permute.xlu0 %5081 }
0x14a6   : > { %7690 = vmatmul.mubr.msk.f32.gmra.mrb[32].mxu0 %vm15895_vm7, %v4742_v27 }
0x14a7   : > { %5201 = vmatprep.mubr.f32.mxu0 %v15257_v10  ;;  %v5087_v45 = vpop.permute.xlu1 %5086 }
0x14a8   : > { %v5092_v59 = vpop.permute.xlu0 %5091 }
0x14ab   : > { %v5097_v29 = vpop.permute.xlu1 %5096 }
0x14ac   : > { %v12894_v31 = vpop.permute.xlu0 %5101 }
0x14af   : > { %v12896_v18 = vpop.permute.xlu1 %5106 }
0x14b0   : > { %v5268_v62 = vpop.permute.xlu0 %5267 }
0x14b3   : > { %v5273_v56 = vpop.permute.xlu1 %5272 }
0x1575   : > { %v5045_v50 = vpop.f32.mrb[30].mxu0 }
0x1576   : > { %v5047_v7 = vpop.f32.mrb[31].mxu0  ;;  %v5046_v28 = vadd.f32 %v5045_v50, %v4960_v11 }
0x1577   : > { %v5048_v39 = vadd.f32 %v5047_v7, %v4960_v11  ;;  %v5278_v11 = vpop.permute.xlu0 %5277 }
0x1578   : > { %v5056_v0 = vadd.f32 %v5046_v28, %v11207_v16  ;;  %v5061_v16 = vld [vmem:[%s15151_s15 + $0x8] sm:$0xff] }
0x1579   : > { %v5051_v63 = vpop.f32.mrb[32].mxu0  ;;  %v5057_v6 = vadd.f32 %v5048_v39, %v11209_v20  ;;  %v5062_v20 = vld [vmem:[%s15151_s15 + $0x10] sm:$0xff] }
0x157a   : > { %v5052_v14 = vadd.f32 %v5051_v63, %v4965_v54  ;;  %v5053_v19 = vpop.f32.mrb[33].mxu0 }
0x157b   : > { %v5054_v32 = vadd.f32 %v5053_v19, %v4965_v54 }
0x157c   : > { %v5058_v46 = vadd.f32 %v5052_v14, %v11213_v26  ;;  %v5063_v26 = vld [vmem:[%s15151_s15 + $0x18] sm:$0xff] }
0x157d   : > { %v5059_v42 = vadd.f32 %v5054_v32, %v11216_v43  ;;  %v5064_v43 = vld [vmem:[%s15151_s15 + $0x20] sm:$0xff] }
0x157e   : > { %v8376_v47 = vpack.c.bf16 %v5058_v46, %v5056_v0 }
0x157f   : > { %v8373_v41 = vpack.c.bf16 %v5059_v42, %v5057_v6 }
0x1581   : > { %8375 = vmatprep.subr.msk.bf16.mxu0 %vm8374_vm11, %v8373_v41  ;;  %v5283_v41 = vpop.permute.xlu1 %5282 }
0x1582   : > { %8378 = vmatpush1.bf16.msk.msra.mxu0 %vm8374_vm11, %v8376_v47 }
0x1585   : > { %7693 = vmatmul.mubr.msk.f32.vlgmr.msra.gmra.mrb[34].mxu0 %vm5109_vm4, %v5060_v22 }
0x1586   : > { %5207 = vmatprep.mubr.f32.mxu0 %v15257_v10 }
0x1589   : > { %7694 = vmatmul.mubr.msk.f32.gmra.mrb[36].mxu0 %vm5109_vm4, %v5061_v16 }
0x158a   : > { %5213 = vmatprep.mubr.f32.mxu0 %v15257_v10 }
0x158d   : > { %7695 = vmatmul.mubr.msk.f32.gmra.mrb[38].mxu0 %vm5109_vm4, %v5062_v20 }
0x158e   : > { %5219 = vmatprep.mubr.f32.mxu0 %v15257_v10 }
0x1591   : > { %7696 = vmatmul.mubr.msk.f32.gmra.mrb[40].mxu0 %vm5109_vm4, %v5063_v26 }
0x1592   : > { %5225 = vmatprep.mubr.f32.mxu0 %v15257_v10 }
0x1595   : > { %7697 = vmatmul.mubr.msk.f32.gmra.mrb[42].mxu0 %vm5109_vm4, %v5064_v43 }
0x1596   : > { %5231 = vmatprep.mubr.f32.mxu0 %v15257_v10 }
0x1599   : > { %7698 = vmatmul.mubr.msk.f32.gmra.mrb[44].mxu0 %vm5109_vm4, %v5065_v30 }
0x159a   : > { %5237 = vmatprep.mubr.f32.mxu0 %v15257_v10 }
0x159d   : > { %7699 = vmatmul.mubr.msk.f32.gmra.mrb[46].mxu0 %vm5109_vm4, %v5066_v17 }
0x1658   : > { %v5203_v60 = vpop.f32.mrb[34].mxu0 }
0x1659   : > { %v5204_v13 = vadd.f32 %v5203_v60, %v5077_v21  ;;  %v5205_v61 = vpop.f32.mrb[35].mxu0 }
0x165a   : > { %v5206_v49 = vadd.f32 %v5205_v61, %v5077_v21 }
0x165b   : > { %vm5251_vm6 = vcmp.gt.f32.partialorder %v5204_v13, 0.0  ;;  %v5300_v55 = vmul.f32 %v5268_v62, %v5204_v13 }
0x165c   : > { %vm5252_vm5 = vcmp.gt.f32.partialorder %v5206_v49, 0.0  ;;  %v5301_v53 = vmul.f32 %v5268_v62, %v5206_v49  ;;  %v5209_v1 = vpop.f32.mrb[36].mxu0  ;;  %v5293_v62 = vpop.permute.xlu1 %5292 }
0x165d   : > { %v12898_v48 = vsel %vm5251_vm6, %v5204_v13, %v5300_v55  ;;  %v5210_v24 = vadd.f32 %v5209_v1, %v5082_v35  ;;  %v5211_v12 = vpop.f32.mrb[37].mxu0  ;;  %v5288_v13 = vpop.permute.xlu0 %5287 }
0x165e   : > { %15898 = vst [vmem:[#allocation11_spill] sm:$0xff] %v12898_v48  ;;  %v12900_v52 = vsel %vm5252_vm5, %v5206_v49, %v5301_v53  ;;  %v5212_v2 = vadd.f32 %v5211_v12, %v5082_v35 }
0x165f   : > { %15899 = vst [vmem:[#allocation12_spill] sm:$0xff] %v12900_v52  ;;  %vm5253_vm15 = vcmp.gt.f32.partialorder %v5210_v24, 0.0  ;;  %v5302_v23 = vmul.f32 %v5273_v56, %v5210_v24  ;;  %v12904_v5 = vpack.i.bf16 %v12900_v52, %v12898_v48  ;;  %v12924_v19 = vpack.i.bf16 %v12898_v48, %v12900_v52 }
0x1660   : > { %vm5254_vm0 = vcmp.gt.f32.partialorder %v5212_v2, 0.0  ;;  %v5303_v44 = vmul.f32 %v5273_v56, %v5212_v2  ;;  %v5215_v36 = vpop.f32.mrb[38].mxu0 }
0x1661   : > { %v12906_v40 = vsel %vm5253_vm15, %v5210_v24, %v5302_v23  ;;  %v5216_v25 = vadd.f32 %v5215_v36, %v5087_v45  ;;  %v5217_v27 = vpop.f32.mrb[39].mxu0  ;;  %9679 = vrot.lane.b32.xlu0 %v12904_v5, %s15901_s25  ;;  %9674 = vrot.lane.b32.xlu1 %v12904_v5, %s15902_s3 }
0x1662   : > { %15900 = vst [vmem:[#allocation13_spill] sm:$0xff] %v12906_v40  ;;  %v12912_v50 = vsel %vm5254_vm0, %v5212_v2, %v5303_v44  ;;  %v5218_v7 = vadd.f32 %v5217_v27, %v5087_v45  ;;  %v12928_v0 = vpack.i.bf16 %v12906_v40, %v12898_v48 }
0x1663   : > { %15903 = vst [vmem:[#allocation14_spill] sm:$0xff] %v12912_v50  ;;  %v5304_v28 = vmul.f32 %v5278_v11, %v5216_v25  ;;  %v12916_v63 = vpack.i.bf16 %v12912_v50, %v12906_v40  ;;  %vm5255_vm8 = vcmp.gt.f32.partialorder %v5216_v25, 0.0  ;;  %v12940_v20 = vpack.i.bf16 %v12912_v50, %v12900_v52 }
0x1664   : > { %v5305_v54 = vmul.f32 %v5278_v11, %v5218_v7  ;;  %v5221_v39 = vpop.f32.mrb[40].mxu0  ;;  %vm5256_vm7 = vcmp.gt.f32.partialorder %v5218_v7, 0.0  ;;  %15907 = vst [vmem:[#allocation16_spill] sm:$0xff] %v12928_v0 }
0x1665   : > { %15904 = vst [vmem:[#allocation15_spill] sm:$0xff] %v12916_v63  ;;  %v5223_v14 = vpop.f32.mrb[41].mxu0  ;;  %9689 = vrot.lane.b32.xlu0 %v12904_v5, %s15905_s27  ;;  %9684 = vrot.lane.b32.xlu1 %v12904_v5, %s15906_s7  ;;  %v5222_v32 = vadd.f32 %v5221_v39, %v5092_v59  ;;  %v12930_v6 = vsel %vm5255_vm8, %v5216_v25, %v5304_v28  ;;  %15912 = vst [vmem:[#allocation19_spill] sm:$0xff] %v12940_v20  ;;  %vm15935_vm8 = vcmp.ge.s32.totalorder %v10887_v8, 2 }
0x1666   : > { %v5224_v46 = vadd.f32 %v5223_v14, %v5092_v59  ;;  %15908 = vst [vmem:[#allocation17_spill] sm:$0xff] %v12930_v6  ;;  %v12932_v42 = vsel %vm5256_vm7, %v5218_v7, %v5305_v54  ;;  %v12953_v59 = vpack.i.bf16 %v12930_v6, %v12906_v40 }
0x1667   : > { %15909 = vst [vmem:[#allocation18_spill] sm:$0xff] %v12932_v42  ;;  %vm5257_vm3 = vcmp.gt.f32.partialorder %v5222_v32, 0.0  ;;  %v5306_v16 = vmul.f32 %v5283_v41, %v5222_v32  ;;  %v12944_v43 = vpack.i.bf16 %v12932_v42, %v12930_v6 }
0x1668   : > { %v5227_v47 = vpop.f32.mrb[42].mxu0  ;;  %vm5258_vm10 = vcmp.gt.f32.partialorder %v5224_v46, 0.0  ;;  %v5307_v26 = vmul.f32 %v5283_v41, %v5224_v46  ;;  %15914 = vst [vmem:[#allocation21_spill] sm:$0xff] %v12953_v59 }
0x1669   : > { %v5229_v22 = vpop.f32.mrb[43].mxu0  ;;  %9699 = vrot.lane.b32.xlu0 %v12904_v5, %s15910_s28  ;;  %9694 = vrot.lane.b32.xlu1 %v12904_v5, %s15911_s22  ;;  %15913 = vst [vmem:[#allocation20_spill] sm:$0xff] %v12944_v43  ;;  %v5228_v30 = vadd.f32 %v5227_v47, %v5097_v29  ;;  %v12957_v61 = vsel %vm5257_vm3, %v5222_v32, %v5306_v16 }
0x166a   : > { %v5230_v17 = vadd.f32 %v5229_v22, %v5097_v29  ;;  %15915 = vst [vmem:[#allocation22_spill] sm:$0xff] %v12957_v61  ;;  %v12959_v29 = vsel %vm5258_vm10, %v5224_v46, %v5307_v26  ;;  %v13023_v39 = vpack.i.bf16 %v12957_v61, %v12930_v6  ;;  %v5298_v26 = vpop.permute.xlu0 %5297  ;;  %vm15942_vm10 = vcmask 277504  }
0x166b   : > { %15916 = vst [vmem:[#allocation23_spill] sm:$0xff] %v12959_v29  ;;  %v5308_v49 = vmul.f32 %v5288_v13, %v5228_v30  ;;  %vm5259_vm11 = vcmp.gt.f32.partialorder %v5228_v30, 0.0  ;;  %v12975_v56 = vpack.i.bf16 %v12959_v29, %v12957_v61  ;;  %v13015_v28 = vpack.i.bf16 %v12959_v29, %v12932_v42 }
0x166c   : > { %v5233_v21 = vpop.f32.mrb[44].mxu0  ;;  %v5309_v55 = vmul.f32 %v5288_v13, %v5230_v17  ;;  %vm5260_vm4 = vcmp.gt.f32.partialorder %v5230_v17, 0.0  ;;  %15930 = vst [vmem:[#allocation35_spill] sm:$0xff] %v13023_v39 }
0x166d   : > { %v5234_v35 = vadd.f32 %v5233_v21, %v12894_v31  ;;  %v5235_v45 = vpop.f32.mrb[45].mxu0  ;;  %9709 = vrot.lane.b32.xlu0 %v12904_v5, %s15533_s5  ;;  %9704 = vrot.lane.b32.xlu1 %v12904_v5, %s15534_s6  ;;  %15918 = vst [vmem:[#allocation24_spill] sm:$0xff] %v12975_v56  ;;  %v12977_v2 = vsel %vm5259_vm11, %v5228_v30, %v5308_v49  ;;  %15928 = vst [vmem:[#allocation33_spill] sm:$0xff] %v13015_v28 }
0x166e   : > { %v5236_v60 = vadd.f32 %v5235_v45, %v12894_v31  ;;  %v12971_v31 = vpack.i.bf16 %v12932_v42, %v12912_v50  ;;  %15919 = vst [vmem:[#allocation25_spill] sm:$0xff] %v12977_v2  ;;  %v12979_v23 = vsel %vm5260_vm4, %v5230_v17, %v5309_v55  ;;  %v12995_v27 = vpack.i.bf16 %v12977_v2, %v12957_v61  ;;  %vm15943_vm11 = vmmov %vm15942_vm10 }
0x166f   : > { %v5310_v1 = vmul.f32 %v5293_v62, %v5234_v35  ;;  %vm5261_vm6 = vcmp.gt.f32.partialorder %v5234_v35, 0.0  ;;  %15920 = vst [vmem:[#allocation26_spill] sm:$0xff] %v12979_v23  ;;  %v12991_v25 = vpack.i.bf16 %v12979_v23, %v12977_v2  ;;  %v13003_v7 = vpack.i.bf16 %v12979_v23, %v12959_v29  ;;  %vm15944_vm4 = vmmov %vm15942_vm10 }
0x1670   : > { %v12961_v53 = vpop.f32.mrb[46].mxu0  ;;  %v5311_v12 = vmul.f32 %v5293_v62, %v5236_v60  ;;  %vm5262_vm5 = vcmp.gt.f32.partialorder %v5236_v60, 0.0  ;;  %15924 = vst [vmem:[#allocation30_spill] sm:$0xff] %v12995_v27  ;;  %v15959_v42 = vmov 0  }
0x1671   : > { %v12963_v24 = vpop.f32.mrb[47].mxu0  ;;  %9719 = vrot.lane.b32.xlu0 %v12904_v5, %s15481_s21  ;;  %9714 = vrot.lane.b32.xlu1 %v12904_v5, %s15917_s19  ;;  %v12981_v44 = vsel %vm5261_vm6, %v5234_v35, %v5310_v1  ;;  %15923 = vst [vmem:[#allocation29_spill] sm:$0xff] %v12991_v25  ;;  %15926 = vst [vmem:[#allocation31_spill] sm:$0xff] %v13003_v7  ;;  %v5240_v45 = vadd.f32 %v12961_v53, %v12896_v18 }
0x1672   : > { %15921 = vst [vmem:[#allocation27_spill] sm:$0xff] %v12981_v44  ;;  %v12987_v36 = vsel %vm5262_vm5, %v5236_v60, %v5311_v12  ;;  %v13027_v14 = vpack.i.bf16 %v12981_v44, %v12977_v2  ;;  %v5242_v60 = vadd.f32 %v12963_v24, %v12896_v18  ;;  %v5405_v12 = vsel %vm15935_vm8, 1, %v15258_v15  ;;  %vm15945_vm6 = vmmov %vm15944_vm4 }
0x1673   : > { %15922 = vst [vmem:[#allocation28_spill] sm:$0xff] %v12987_v36  ;;  %v13007_v11 = vpack.i.bf16 %v12987_v36, %v12981_v44  ;;  %v13019_v54 = vpack.i.bf16 %v12987_v36, %v12979_v23  ;;  %v5312_v49 = vmul.f32 %v5298_v26, %v5240_v45  ;;  %vm5263_vm15 = vcmp.gt.f32.partialorder %v5240_v45, 0.0 }
0x1674   : > { %v5313_v55 = vmul.f32 %v5298_v26, %v5242_v60  ;;  %vm5264_vm0 = vcmp.gt.f32.partialorder %v5242_v60, 0.0  ;;  %v15939_v15 = vmov 0 }
0x1675   : > { %9734 = vrot.lane.b32.xlu0 %v12916_v63, %s15902_s3  ;;  %9724 = vrot.lane.b32.xlu1 %v12924_v19, %s15426_s29  ;;  %15927 = vst [vmem:[#allocation32_spill] sm:$0xff] %v13007_v11  ;;  %15929 = vst [vmem:[#allocation34_spill] sm:$0xff] %v13019_v54  ;;  %v13155_v1 = vsel %vm5263_vm15, %v5240_v45, %v5312_v49  ;;  %v5409_v49 = vrot.slane %v5405_v12, %v10705_v3 }
0x1676   : > { %15933 = vst [vmem:[#allocation37_spill] sm:$0xff] %v13155_v1  ;;  %v13157_v24 = vsel %vm5264_vm0, %v5242_v60, %v5313_v55  ;;  %v5413_v60 = vrot.slane %v5405_v12, %v10711_v4  ;;  %v13184_v47 = vpack.i.bf16 %v13155_v1, %v12981_v44  ;;  %vm15960_vm0 = vcmp.lt.s32.totalorder %v10887_v8, 14 }
0x1677   : > { %15934 = vst [vmem:[#allocation38_spill] sm:$0xff] %v13157_v24  ;;  %v13172_v45 = vpack.i.bf16 %v13157_v24, %v13155_v1  ;;  %vm13190_vm3 = vcmp.eq.s32.totalorder %v5409_v49, 1  ;;  %v5682_v29 = vsel %vm15960_vm0, 1, %v15959_v42 }
0x1678   : > { %15936 = vst [vmem:[#allocation39_spill] sm:$0xff] %v13184_v47  ;;  %vm13186_vm7 = vcmp.eq.s32.totalorder %v5413_v60, 1  ;;  %v15940_v15 = vsel %vm13190_vm3, 4294967295, %v15939_v15  ;;  %vm13216_vm15 = vmpackc.low %vm13190_vm3, %vm13190_vm3  ;;  %v5690_v52 = vrot.slane %v5682_v29, %v10711_v4  ;;  %v5686_v50 = vrot.slane %v5682_v29, %v10705_v3 }
0x1679   : > { %9744 = vrot.lane.b32.xlu0 %v12916_v63, %s15906_s7  ;;  %9729 = vrot.lane.b32.xlu1 %v12928_v0, %s15925_s26  ;;  %15941 = vst [vmem:[#allocation40_spill] sm:$0xff] %v15940_v15  ;;  %vm13205_vm5 = vmpackc.low %vm13186_vm7, %vm13186_vm7  ;;  %v15965_v4 = vmov 0 }
0x167a   : > { %vm13287_vm8 = vcmp.eq.s32.totalorder %v5690_v52, 1 }
0x167b   : > { %vm13306_vm1 = vmpackc.low %vm13287_vm8, %vm13287_vm8 }
0x167d   : > { %9754 = vrot.lane.b32.xlu0 %v12916_v63, %s15911_s22  ;;  %9739 = vrot.lane.b32.xlu1 %v12916_v63, %s15901_s25 }
0x1681   : > { %9764 = vrot.lane.b32.xlu0 %v12916_v63, %s15534_s6  ;;  %9749 = vrot.lane.b32.xlu1 %v12916_v63, %s15905_s27 }
0x1685   : > { %9774 = vrot.lane.b32.xlu0 %v12916_v63, %s15917_s19  ;;  %9759 = vrot.lane.b32.xlu1 %v12916_v63, %s15910_s28 }
0x1689   : > { %9784 = vrot.lane.b32.xlu0 %v12940_v20, %s15925_s26  ;;  %9769 = vrot.lane.b32.xlu1 %v12916_v63, %s15931_s8 }
0x168d   : > { %9799 = vrot.lane.b32.xlu0 %v12944_v43, %s15901_s25  ;;  %9779 = vrot.lane.b32.xlu1 %v12916_v63, %s15481_s21 }
0x1691   : > { %9809 = vrot.lane.b32.xlu0 %v12944_v43, %s15905_s27  ;;  %9789 = vrot.lane.b32.xlu1 %v12953_v59, %s15426_s29 }
0x1695   : > { %9819 = vrot.lane.b32.xlu0 %v12944_v43, %s15910_s28  ;;  %9794 = vrot.lane.b32.xlu1 %v12944_v43, %s15902_s3 }
0x1699   : > { %9829 = vrot.lane.b32.xlu0 %v12944_v43, %s15931_s8  ;;  %9804 = vrot.lane.b32.xlu1 %v12944_v43, %s15906_s7 }
0x169d   : > { %9839 = vrot.lane.b32.xlu0 %v12944_v43, %s15481_s21  ;;  %9814 = vrot.lane.b32.xlu1 %v12944_v43, %s15911_s22 }
0x16a1   : > { %9844 = vrot.lane.b32.xlu0 %v12971_v31, %s15426_s29  ;;  %9824 = vrot.lane.b32.xlu1 %v12944_v43, %s15534_s6 }
0x16a5   : > { %9849 = vrot.lane.b32.xlu0 %v12975_v56, %s15902_s3  ;;  %9834 = vrot.lane.b32.xlu1 %v12944_v43, %s15917_s19 }
0x16a9   : > { %9859 = vrot.lane.b32.xlu0 %v12975_v56, %s15906_s7  ;;  %9854 = vrot.lane.b32.xlu1 %v12975_v56, %s15901_s25 }
0x16ad   : > { %9869 = vrot.lane.b32.xlu0 %v12975_v56, %s15911_s22  ;;  %9864 = vrot.lane.b32.xlu1 %v12975_v56, %s15905_s27 }
0x16b1   : > { %9879 = vrot.lane.b32.xlu0 %v12975_v56, %s15534_s6  ;;  %9874 = vrot.lane.b32.xlu1 %v12975_v56, %s15910_s28 }
0x16b5   : > { %9889 = vrot.lane.b32.xlu0 %v12975_v56, %s15917_s19  ;;  %9884 = vrot.lane.b32.xlu1 %v12975_v56, %s15931_s8 }
0x16b9   : > { %9909 = vrot.lane.b32.xlu0 %v12991_v25, %s15901_s25  ;;  %9894 = vrot.lane.b32.xlu1 %v12975_v56, %s15481_s21 }
0x16bd   : > { %9919 = vrot.lane.b32.xlu0 %v12991_v25, %s15905_s27  ;;  %9899 = vrot.lane.b32.xlu1 %v12995_v27, %s15426_s29 }
0x16c1   : > { %9929 = vrot.lane.b32.xlu0 %v12991_v25, %s15910_s28  ;;  %9904 = vrot.lane.b32.xlu1 %v12991_v25, %s15902_s3 }
0x16c5   : > { %9939 = vrot.lane.b32.xlu0 %v12991_v25, %s15931_s8  ;;  %9914 = vrot.lane.b32.xlu1 %v12991_v25, %s15906_s7 }
0x16c9   : > { %9949 = vrot.lane.b32.xlu0 %v12991_v25, %s15481_s21  ;;  %9924 = vrot.lane.b32.xlu1 %v12991_v25, %s15911_s22 }
0x16cd   : > { %9954 = vrot.lane.b32.xlu0 %v13003_v7, %s15426_s29  ;;  %9934 = vrot.lane.b32.xlu1 %v12991_v25, %s15534_s6 }
0x16d1   : > { %9959 = vrot.lane.b32.xlu0 %v13007_v11, %s15902_s3  ;;  %9944 = vrot.lane.b32.xlu1 %v12991_v25, %s15917_s19 }
0x16d3   : > { %v13125_v30 = vpop.permute.xlu0 %9679  ;;  %v9675_v17 = vpop.permute.xlu1 %9674 }
0x16d4   : > { %v9677_v55 = vunpack.i.h.bf16 %v9675_v17  ;;  %v9676_v16 = vunpack.i.l.bf16 %v9675_v17 }
0x16d5   : > { %9969 = vrot.lane.b32.xlu0 %v13007_v11, %s15906_s7  ;;  %9964 = vrot.lane.b32.xlu1 %v13007_v11, %s15901_s25 }
0x16d6   : > { %v5377_v17 = vsel %vm15942_vm10, %v9676_v16, %v9677_v55  ;;  %v5398_v51 = vsel %vm15943_vm11, 0.0, %v9676_v16  ;;  %v15949_v16 = vmov 0  ;;  %vm13291_vm10 = vcmp.eq.s32.totalorder %v5686_v50, 1 }
0x16d7   : > { %v13131_v21 = vpop.permute.xlu0 %9689  ;;  %v13133_v35 = vpop.permute.xlu1 %9684  ;;  %v15950_v16 = vsel %vm13216_vm15, 4294967295, %v15949_v16  ;;  %v15966_v4 = vsel %vm13291_vm10, 4294967295, %v15965_v4  ;;  %vm15968_vm11 = vcmask 113664   ;;  %v15972_v50 = vmov 0 }
0x16d8   : > { %15967 = vst [vmem:[#allocation51_spill] sm:$0xff] %v15966_v4  ;;  %v15973_v50 = vsel %vm13306_vm1, 4294967295, %v15972_v50 }
0x16d9   : > { %9979 = vrot.lane.b32.xlu0 %v13007_v11, %s15911_s22  ;;  %9974 = vrot.lane.b32.xlu1 %v13007_v11, %s15905_s27 }
0x16db   : > { %v13143_v13 = vpop.permute.xlu0 %9699  ;;  %v13145_v62 = vpop.permute.xlu1 %9694 }
0x16dd   : > { %9989 = vrot.lane.b32.xlu0 %v13007_v11, %s15534_s6  ;;  %9984 = vrot.lane.b32.xlu1 %v13007_v11, %s15910_s28 }
0x16df   : > { %v13151_v18 = vpop.permute.xlu0 %9709  ;;  %v13153_v53 = vpop.permute.xlu1 %9704 }
0x16e0   : > { %15932 = vst [vmem:[#allocation36_spill] sm:$0xff] %v13151_v18 }
0x16e1   : > { %9999 = vrot.lane.b32.xlu0 %v13007_v11, %s15917_s19  ;;  %9994 = vrot.lane.b32.xlu1 %v13007_v11, %s15931_s8 }
0x16e3   : > { %v13166_v26 = vpop.permute.xlu0 %9719  ;;  %v13168_v10 = vpop.permute.xlu1 %9714 }
0x16e5   : > { %10019 = vrot.lane.b32.xlu0 %v13172_v45, %s15901_s25  ;;  %10004 = vrot.lane.b32.xlu1 %v13007_v11, %s15481_s21 }
0x16e7   : > { %v9735_v22 = vpop.permute.xlu0 %9734  ;;  %v13180_v41 = vpop.permute.xlu1 %9724 }
0x16e8   : > { %v9737_v12 = vunpack.i.h.bf16 %v9735_v22  ;;  %v9736_v32 = vunpack.i.l.bf16 %v9735_v22  ;;  %v15946_v22 = vmov 0 }
0x16e9   : > { %10029 = vrot.lane.b32.xlu0 %v13172_v45, %s15905_s27  ;;  %10009 = vrot.lane.b32.xlu1 %v13184_v47, %s15426_s29  ;;  %v15947_v22 = vsel %vm13205_vm5, 4294967295, %v15946_v22  ;;  %s16065_s27 = smov 95  }
0x16ea   : > { %v5378_v60 = vsel %vm15944_vm4, %v9736_v32, %v9737_v12  ;;  %v5399_v9 = vsel %vm15945_vm6, 0.0, %v9736_v32  ;;  %vm15969_vm4 = vmmov %vm15968_vm11 }
0x16eb   : > { %v8382_v49 = vpack.c.bf16 %v5399_v9, %v5398_v51  ;;  %v13209_v58 = vpop.permute.xlu0 %9744  ;;  %v13211_v2 = vpop.permute.xlu1 %9729  ;;  %v8379_v44 = vpack.c.bf16 %v5378_v60, %v5377_v17  ;;  %vm15970_vm6 = vmmov %vm15969_vm4 }
0x16ec   : > { %15948 = vst [vmem:[#allocation41_spill] sm:$0xff] %v13211_v2  ;;  %vm15971_vm0 = vmmov %vm15969_vm4 }
0x16ed   : > { %10039 = vrot.lane.b32.xlu0 %v13172_v45, %s15910_s28  ;;  %10014 = vrot.lane.b32.xlu1 %v13172_v45, %s15902_s3 }
0x16ee   : > { %8381 = vmatprep.subr.msk.bf16.mxu0 %vm13205_vm5, %v8379_v44 }
0x16ef   : > { %8384 = vmatpush1.bf16.msk.msra.mxu0 %vm13216_vm15, %v8382_v49  ;;  %v13228_v9 = vpop.permute.xlu0 %9754  ;;  %v13230_v51 = vpop.permute.xlu1 %9739 }
0x16f1   : > { %10049 = vrot.lane.b32.xlu0 %v13172_v45, %s15931_s8  ;;  %10024 = vrot.lane.b32.xlu1 %v13172_v45, %s15906_s7 }
0x16f3   : > { %v13236_v32 = vpop.permute.xlu0 %9764  ;;  %v13238_v55 = vpop.permute.xlu1 %9749 }
0x16f4   : > { %15951 = vst [vmem:[#allocation42_spill] sm:$0xff] %v13236_v32  ;;  %15952 = vst [vmem:[#allocation43_spill] sm:$0xff] %v13238_v55  ;;  %v13354_v32 = vld [vmem:[%s15154_s18] sm:$0xff] }
0x16f5   : > { %10054 = vrot.lane.b32.xlu0 %v13015_v28, %s15925_s26  ;;  %10034 = vrot.lane.b32.xlu1 %v13172_v45, %s15911_s22  ;;  %15984 = vst [vmem:[#allocation56_spill] sm:$0xff] %v13354_v32 }
0x16f7   : > { %v13244_v44 = vpop.permute.xlu0 %9774  ;;  %v13246_v12 = vpop.permute.xlu1 %9759 }
0x16f8   : > { %15953 = vst [vmem:[#allocation44_spill] sm:$0xff] %v13246_v12  ;;  %v15962_v12 = vmov 0 }
0x16f9   : > { %10064 = vrot.lane.b32.xlu0 %v13019_v54, %s15925_s26  ;;  %10044 = vrot.lane.b32.xlu1 %v13172_v45, %s15534_s6  ;;  %v15963_v12 = vsel %vm13287_vm8, 4294967295, %v15962_v12  ;;  %vm16023_vm8 = vcmask 146432  }
0x16fa   : > { %15964 = vst [vmem:[#allocation50_spill] sm:$0xff] %v15963_v12 }
0x16fb   : > { %v13252_v17 = vpop.permute.xlu0 %9784  ;;  %v9770_v60 = vpop.permute.xlu1 %9769 }
0x16fc   : > { %15954 = vst [vmem:[#allocation45_spill] sm:$0xff] %v13252_v17  ;;  %v9772_v8 = vunpack.i.h.bf16 %v9770_v60  ;;  %v9771_v42 = vunpack.i.l.bf16 %v9770_v60 }
0x16fd   : > { %10084 = vrot.lane.b32.xlu0 %v12971_v31, %s15955_s4  ;;  %10059 = vrot.lane.b32.xlu1 %v13023_v39, %s15925_s26 }
0x16fe   : > { %v6002_v3 = vsel %vm15968_vm11, %v9771_v42, %v9772_v8  ;;  %v6023_v29 = vsel %vm15969_vm4, 0.0, %v9771_v42  ;;  %vm13317_vm11 = vmpackc.low %vm13291_vm10, %vm13291_vm10  ;;  %vm15980_vm4 = vcmask 277504  }
0x16ff   : > { %v13258_v49 = vpop.permute.xlu0 %9799  ;;  %v13260_v23 = vpop.permute.xlu1 %9779 }
0x1700   : > { %15956 = vst [vmem:[#allocation46_spill] sm:$0xff] %v13260_v23 }
0x1701   : > { %10094 = vrot.lane.b32.xlu0 %v13003_v7, %s15955_s4  ;;  %10069 = vrot.lane.b32.xlu1 %v13027_v14, %s15925_s26 }
0x1703   : > { %v13266_v6 = vpop.permute.xlu0 %9809  ;;  %v13268_v61 = vpop.permute.xlu1 %9789 }
0x1704   : > { %15957 = vst [vmem:[#allocation47_spill] sm:$0xff] %v13266_v6  ;;  %15958 = vst [vmem:[#allocation48_spill] sm:$0xff] %v13268_v61 }
0x1705   : > { %10109 = vrot.lane.b32.xlu0 %v12940_v20, %s15427_s30  ;;  %10074 = vrot.lane.b32.xlu1 %v13172_v45, %s15917_s19 }
0x1707   : > { %v13277_v48 = vpop.permute.xlu0 %9819  ;;  %v9795_v40 = vpop.permute.xlu1 %9794 }
0x1708   : > { %15961 = vst [vmem:[#allocation49_spill] sm:$0xff] %v13277_v48  ;;  %v9797_v42 = vunpack.i.h.bf16 %v9795_v40 }
0x1709   : > { %10119 = vrot.lane.b32.xlu0 %v13015_v28, %s15427_s30  ;;  %10079 = vrot.lane.b32.xlu1 %v12924_v19, %s15955_s4 }
0x170b   : > { %v9830_v61 = vpop.permute.xlu0 %9829  ;;  %v13285_v17 = vpop.permute.xlu1 %9804 }
0x170c   : > { %v9832_v48 = vunpack.i.h.bf16 %v9830_v61  ;;  %v9831_v2 = vunpack.i.l.bf16 %v9830_v61 }
0x170d   : > { %10129 = vrot.lane.b32.xlu0 %v13172_v45, %s15481_s21  ;;  %10089 = vrot.lane.b32.xlu1 %v12953_v59, %s15955_s4 }
0x170e   : > { %v6003_v52 = vsel %vm15970_vm6, %v9831_v2, %v9832_v48  ;;  %v6024_v60 = vsel %vm15971_vm0, 0.0, %v9831_v2  ;;  %v15976_v48 = vmov 0  ;;  %vm15981_vm6 = vmmov %vm15980_vm4 }
0x170f   : > { %v8568_v61 = vpack.c.bf16 %v6024_v60, %v6023_v29  ;;  %v13310_v57 = vpop.permute.xlu0 %9839  ;;  %v13312_v37 = vpop.permute.xlu1 %9814  ;;  %v8565_v34 = vpack.c.bf16 %v6003_v52, %v6002_v3  ;;  %v15977_v48 = vsel %vm13317_vm11, 4294967295, %v15976_v48  ;;  %v9796_v3 = vunpack.i.l.bf16 %v9795_v40  ;;  %vm15982_vm0 = vmmov %vm15980_vm4 }
0x1710   : > { %15974 = vst [vmem:[#allocation52_spill] sm:$0xff] %v13310_v57  ;;  %15975 = vst [vmem:[#allocation53_spill] sm:$0xff] %v13312_v37 }
0x1711   : > { %10134 = vrot.lane.b32.xlu0 %v13019_v54, %s15427_s30  ;;  %10099 = vrot.lane.b32.xlu1 %v12995_v27, %s15955_s4  ;;  %v5400_v4 = vsel %vm15981_vm6, 0.0, %v9796_v3  ;;  %vm15983_vm10 = vmmov %vm15982_vm0 }
0x1712   : > { %8567 = vmatprep.subr.msk.bf16.mxu1 %vm13306_vm1, %v8565_v34 }
0x1713   : > { %8570 = vmatpush1.bf16.msk.msra.mxu1 %vm13317_vm11, %v8568_v61  ;;  %v13329_v2 = vpop.permute.xlu0 %9844  ;;  %v13331_v8 = vpop.permute.xlu1 %9824  ;;  %v5379_v61 = vsel %vm15980_vm4, %v9796_v3, %v9797_v42  ;;  %v7010_v42 = vcombine.high %v13354_v32, %v13354_v32 }
0x1714   : > { %15978 = vst [vmem:[#allocation54_spill] sm:$0xff] %v13329_v2  ;;  %15979 = vst [vmem:[#allocation55_spill] sm:$0xff] %v13331_v8 }
0x1715   : > { %10149 = vrot.lane.b32.xlu0 %v12916_v63, %s15428_s2  ;;  %10104 = vrot.lane.b32.xlu1 %v13184_v47, %s15955_s4 }
0x1716   : > { %7087 = vmatprep.mubr.f32.mxu0 %v7010_v42 }
0x1717   : > { %v9850_v29 = vpop.permute.xlu0 %9849  ;;  %v13337_v52 = vpop.permute.xlu1 %9834 }
0x1718   : > { %v9852_v60 = vunpack.i.h.bf16 %v9850_v29  ;;  %v9851_v34 = vunpack.i.l.bf16 %v9850_v29 }
0x1719   : > { %10159 = vrot.lane.b32.xlu0 %v12975_v56, %s15428_s2  ;;  %10114 = vrot.lane.b32.xlu1 %v12928_v0, %s15427_s30 }
0x171a   : > { %v5380_v12 = vsel %vm15982_vm0, %v9851_v34, %v9852_v60  ;;  %v5401_v8 = vsel %vm15983_vm10, 0.0, %v9851_v34  ;;  %vm15995_vm10 = vcmask 113664  }
0x171b   : > { %v8388_v40 = vpack.c.bf16 %v5401_v8, %v5400_v4  ;;  %v13347_v2 = vpop.permute.xlu0 %9859  ;;  %v13349_v37 = vpop.permute.xlu1 %9854  ;;  %v8385_v29 = vpack.c.bf16 %v5380_v12, %v5379_v61  ;;  %v13386_v61 = vpack.i.bf16 %v13157_v24, %v12987_v36  ;;  %vm15996_vm4 = vmmov %vm15995_vm10 }
0x171c   : > { %vm15997_vm6 = vmmov %vm15996_vm4 }
0x171d   : > { %10169 = vrot.lane.b32.xlu0 %v13007_v11, %s15428_s2  ;;  %10124 = vrot.lane.b32.xlu1 %v13023_v39, %s15427_s30  ;;  %15989 = vst [vmem:[#allocation61_spill] sm:$0xff] %v13386_v61  ;;  %vm15998_vm0 = vmmov %vm15996_vm4 }
0x171e   : > { %8387 = vmatprep.subr.msk.bf16.mxu0 %vm13205_vm5, %v8385_v29 }
0x171f   : > { %8390 = vmatpush1.bf16.msk.msra.mxu0 %vm13216_vm15, %v8388_v40  ;;  %v13366_v12 = vpop.permute.xlu0 %9869  ;;  %v13368_v4 = vpop.permute.xlu1 %9864  ;;  %v5330_v40 = vld [vmem:[%s15154_s18 + $0x10] sm:$0xff] }
0x1720   : > { %15985 = vst [vmem:[#allocation57_spill] sm:$0xff] %v13366_v12  ;;  %15986 = vst [vmem:[#allocation58_spill] sm:$0xff] %v13368_v4  ;;  %v7012_v29 = vcombine.high %v5330_v40, %v5330_v40 }
0x1721   : > { %10174 = vrot.lane.b32.xlu0 %v12940_v20, %s15429_s0  ;;  %10139 = vrot.lane.b32.xlu1 %v13027_v14, %s15427_s30 }
0x1722   : > { %7229 = vmatprep.mubr.f32.mxu1 %v7012_v29 }
0x1723   : > { %v13374_v8 = vpop.permute.xlu0 %9879  ;;  %v13376_v3 = vpop.permute.xlu1 %9874 }
0x1724   : > { %15987 = vst [vmem:[#allocation59_spill] sm:$0xff] %v13374_v8  ;;  %15988 = vst [vmem:[#allocation60_spill] sm:$0xff] %v13376_v3 }
0x1725   : > { %10184 = vrot.lane.b32.xlu0 %v13015_v28, %s15429_s0  ;;  %10144 = vrot.lane.b32.xlu1 %v12904_v5, %s15428_s2 }
0x1727   : > { %v13382_v60 = vpop.permute.xlu0 %9889  ;;  %v9885_v34 = vpop.permute.xlu1 %9884 }
0x1728   : > { %v9887_v29 = vunpack.i.h.bf16 %v9885_v34  ;;  %v9886_v12 = vunpack.i.l.bf16 %v9885_v34 }
0x1729   : > { %10194 = vrot.lane.b32.xlu0 %v13386_v61, %s15426_s29  ;;  %10154 = vrot.lane.b32.xlu1 %v12944_v43, %s15428_s2  ;;  %s16001_s29 = smov 110  }
0x172a   : > { %v6025_v23 = vsel %vm15996_vm4, 0.0, %v9886_v12 }
0x172b   : > { %v13395_v42 = vpop.permute.xlu0 %9909  ;;  %v13397_v8 = vpop.permute.xlu1 %9894 }
0x172c   : > { %15990 = vst [vmem:[#allocation62_spill] sm:$0xff] %v13397_v8 }
0x172d   : > { %10199 = vrot.lane.b32.xlu0 %v13019_v54, %s15429_s0  ;;  %10164 = vrot.lane.b32.xlu1 %v12991_v25, %s15428_s2 }
0x172f   : > { %v13403_v3 = vpop.permute.xlu0 %9919  ;;  %v13405_v32 = vpop.permute.xlu1 %9899 }
0x1730   : > { %15991 = vst [vmem:[#allocation63_spill] sm:$0xff] %v13403_v3  ;;  %15992 = vst [vmem:[#allocation64_spill] sm:$0xff] %v13405_v32  ;;  %v13421_v32 = vpack.i.bf16 %v13155_v1, %v13157_v24 }
0x1731   : > { %10209 = vrot.lane.b32.xlu0 %v12916_v63, %s15533_s5  ;;  %10179 = vrot.lane.b32.xlu1 %v12928_v0, %s15429_s0 }
0x1733   : > { %v13411_v40 = vpop.permute.xlu0 %9929  ;;  %v9905_v36 = vpop.permute.xlu1 %9904 }
0x1734   : > { %15993 = vst [vmem:[#allocation65_spill] sm:$0xff] %v13411_v40  ;;  %v6004_v40 = vsel %vm15995_vm10, %v9886_v12, %v9887_v29  ;;  %vm16004_vm10 = vcmask 277504  }
0x1735   : > { %10224 = vrot.lane.b32.xlu0 %v12975_v56, %s15533_s5  ;;  %10189 = vrot.lane.b32.xlu1 %v13023_v39, %s15429_s0  ;;  %vm16005_vm4 = vmmov %vm16004_vm10 }
0x1737   : > { %v9940_v4 = vpop.permute.xlu0 %9939  ;;  %v13417_v3 = vpop.permute.xlu1 %9914 }
0x1738   : > { %15994 = vst [vmem:[#allocation66_spill] sm:$0xff] %v13417_v3  ;;  %v9942_v8 = vunpack.i.h.bf16 %v9940_v4  ;;  %v9941_v6 = vunpack.i.l.bf16 %v9940_v4 }
0x1739   : > { %10234 = vrot.lane.b32.xlu0 %v13421_v32, %s15925_s26  ;;  %10204 = vrot.lane.b32.xlu1 %v13027_v14, %s15429_s0 }
0x173a   : > { %v6005_v34 = vsel %vm15997_vm6, %v9941_v6, %v9942_v8  ;;  %v6026_v55 = vsel %vm15998_vm0, 0.0, %v9941_v6  ;;  %vm16006_vm6 = vmmov %vm16005_vm4 }
0x173b   : > { %v8574_v3 = vpack.c.bf16 %v6026_v55, %v6025_v23  ;;  %v13431_v57 = vpop.permute.xlu0 %9949  ;;  %v13433_v1 = vpop.permute.xlu1 %9924  ;;  %v8571_v4 = vpack.c.bf16 %v6005_v34, %v6004_v40  ;;  %v9907_v23 = vunpack.i.h.bf16 %v9905_v36  ;;  %v9906_v55 = vunpack.i.l.bf16 %v9905_v36  ;;  %vm16007_vm0 = vmmov %vm16005_vm4 }
0x173c   : > { %15999 = vst [vmem:[#allocation67_spill] sm:$0xff] %v13431_v57  ;;  %16000 = vst [vmem:[#allocation68_spill] sm:$0xff] %v13433_v1  ;;  %v9716_v57 = vunpack.i.l.bf16 %v13168_v10 }
0x173d   : > { %10239 = vrot.lane.b32.xlu0 %v12971_v31, %s16001_s29  ;;  %10214 = vrot.lane.b32.xlu1 %v12944_v43, %s15533_s5 }
0x173e   : > { %8573 = vmatprep.subr.msk.bf16.mxu1 %vm13306_vm1, %v8571_v4  ;;  %v5402_v4 = vsel %vm16005_vm4, 0.0, %v9906_v55 }
0x173f   : > { %8576 = vmatpush1.bf16.msk.msra.mxu1 %vm13317_vm11, %v8574_v3  ;;  %v13443_v12 = vpop.permute.xlu0 %9954  ;;  %v13445_v6 = vpop.permute.xlu1 %9934  ;;  %v5381_v3 = vsel %vm16004_vm10, %v9906_v55, %v9907_v23  ;;  %vm16012_vm10 = vcmask 269312  }
0x1740   : > { %16002 = vst [vmem:[#allocation69_spill] sm:$0xff] %v13443_v12  ;;  %16003 = vst [vmem:[#allocation70_spill] sm:$0xff] %v13445_v6 }
0x1741   : > { %10249 = vrot.lane.b32.xlu0 %v13007_v11, %s15533_s5  ;;  %10219 = vrot.lane.b32.xlu1 %v12924_v19, %s16001_s29  ;;  %vm16015_vm4 = vmmov %vm16012_vm10 }
0x1743   : > { %v9960_v8 = vpop.permute.xlu0 %9959  ;;  %v13451_v40 = vpop.permute.xlu1 %9944 }
0x1744   : > { %v9962_v29 = vunpack.i.h.bf16 %v9960_v8  ;;  %v9961_v34 = vunpack.i.l.bf16 %v9960_v8 }
0x1745   : > { %10254 = vrot.lane.b32.xlu0 %v13386_v61, %s15955_s4  ;;  %10229 = vrot.lane.b32.xlu1 %v12991_v25, %s15533_s5  ;;  %v9707_v61 = vunpack.i.h.bf16 %v13153_v53 }
0x1746   : > { %v5382_v6 = vsel %vm16006_vm6, %v9961_v34, %v9962_v29  ;;  %v5403_v12 = vsel %vm16007_vm0, 0.0, %v9961_v34  ;;  %v9682_v29 = vunpack.i.h.bf16 %v13125_v30  ;;  %v9681_v34 = vunpack.i.l.bf16 %v13125_v30 }
0x1747   : > { %v8394_v36 = vpack.c.bf16 %v5403_v12, %v5402_v4  ;;  %v13461_v1 = vpop.permute.xlu0 %9969  ;;  %v13463_v24 = vpop.permute.xlu1 %9964  ;;  %v8391_v8 = vpack.c.bf16 %v5382_v6, %v5381_v3  ;;  %vm16016_vm6 = vcmask 252928  }
0x1748   : > { %vm16019_vm0 = vmmov %vm16016_vm6 }
0x1749   : > { %10259 = vrot.lane.b32.xlu0 %v13003_v7, %s16001_s29  ;;  %10244 = vrot.lane.b32.xlu1 %v12953_v59, %s16001_s29  ;;  %v16021_v59 = vunpack.i.l.bf16 %v13133_v35 }
0x174a   : > { %8393 = vmatprep.subr.msk.bf16.mxu0 %vm13205_vm5, %v8391_v8  ;;  %v9692_v8 = vunpack.i.h.bf16 %v13131_v21 }
0x174b   : > { %8396 = vmatpush1.bf16.msk.msra.mxu0 %vm13216_vm15, %v8394_v36  ;;  %v13473_v23 = vpop.permute.xlu0 %9979  ;;  %v13475_v12 = vpop.permute.xlu1 %9974  ;;  %v13500_v36 = vsel %vm16012_vm10, %v9681_v34, %v9682_v29  ;;  %v9696_v29 = vunpack.i.l.bf16 %v13145_v62  ;;  %vm16022_vm10 = vcmask 261120  }
0x174c   : > { %16008 = vst [vmem:[#allocation71_spill] sm:$0xff] %v13473_v23  ;;  %16009 = vst [vmem:[#allocation72_spill] sm:$0xff] %v13475_v12  ;;  %v9702_v23 = vunpack.i.h.bf16 %v13143_v13  ;;  %v9701_v12 = vunpack.i.l.bf16 %v13143_v13  ;;  %v9722_v13 = vunpack.i.h.bf16 %v13166_v26 }
0x174d   : > { %10269 = vrot.lane.b32.xlu0 %v12904_v5, %s15535_s1  ;;  %10264 = vrot.lane.b32.xlu1 %v12995_v27, %s16001_s29  ;;  %v9712_v27 = vunpack.i.h.bf16 %v13151_v18 }
0x174f   : > { %v13481_v6 = vpop.permute.xlu0 %9989  ;;  %v13483_v55 = vpop.permute.xlu1 %9984 }
0x1750   : > { %16010 = vst [vmem:[#allocation73_spill] sm:$0xff] %v13481_v6  ;;  %16011 = vst [vmem:[#allocation74_spill] sm:$0xff] %v13483_v55  ;;  %v9691_v6 = vunpack.i.l.bf16 %v13131_v21  ;;  %v13527_v21 = vsel %vm16015_vm4, 0.0, %v9681_v34 }
0x1751   : > { %10284 = vrot.lane.b32.xlu0 %v12944_v43, %s15535_s1  ;;  %10274 = vrot.lane.b32.xlu1 %v12916_v63, %s15535_s1  ;;  %v9687_v43 = vunpack.i.h.bf16 %v13133_v35  ;;  %vm16025_vm4 = vmmov %vm16023_vm8 }
0x1752   : > { %v13530_v7 = vsel %vm16016_vm6, %v9691_v6, %v9692_v8  ;;  %v13548_v34 = vsel %vm16025_vm4, 0.0, %v9701_v12  ;;  %vm16027_vm6 = vcmask 244736  }
0x1753   : > { %v13491_v3 = vpop.permute.xlu0 %9999  ;;  %v13493_v4 = vpop.permute.xlu1 %9994  ;;  %16026 = vst [vmem:[#allocation80_spill] sm:$0xff] %v13548_v34  ;;  %vm16028_vm12 = vmmov %vm16027_vm6 }
0x1755   : > { %10294 = vrot.lane.b32.xlu0 %v13421_v32, %s15427_s30  ;;  %10279 = vrot.lane.b32.xlu1 %v13184_v47, %s16001_s29  ;;  %v9697_v47 = vunpack.i.h.bf16 %v13145_v62  ;;  %s16014_s30 = smov 98   ;;  %v9717_v62 = vunpack.i.h.bf16 %v13168_v10  ;;  %v13545_v10 = vsel %vm16023_vm8, %v9701_v12, %v9702_v23  ;;  %vm16030_vm8 = vcmask 130048  }
0x1756   : > { %16024 = vst [vmem:[#allocation79_spill] sm:$0xff] %v13545_v10  ;;  %v16032_v23 = vunpack.i.l.bf16 %v13153_v53  ;;  %v9912_v10 = vunpack.i.h.bf16 %v13395_v42 }
0x1757   : > { %v13506_v55 = vpop.permute.xlu0 %10019  ;;  %v13508_v63 = vpop.permute.xlu1 %10004  ;;  %v13551_v8 = vsel %vm16027_vm6, %v9696_v29, %v9697_v47  ;;  %vm16039_vm6 = vcmask 269312  }
0x1758   : > { %16013 = vst [vmem:[#allocation75_spill] sm:$0xff] %v13508_v63  ;;  %v13542_v63 = vsel %vm16022_vm10, %v16021_v59, %v9687_v43  ;;  %v9801_v43 = vunpack.i.l.bf16 %v13258_v49  ;;  %v16029_v59 = vunpack.i.l.bf16 %v13151_v18  ;;  %vm16036_vm10 = vcmask 15360  }
0x1759   : > { %10299 = vrot.lane.b32.xlu0 %v12940_v20, %s16014_s30  ;;  %10289 = vrot.lane.b32.xlu1 %v12975_v56, %s15535_s1  ;;  %v13537_v56 = vsel %vm16019_vm0, 0.0, %v9691_v6  ;;  %v9742_v6 = vunpack.i.h.bf16 %v13230_v51  ;;  %vm16035_vm0 = vcmask 7168   ;;  %vm16037_vm4 = vmmov %vm16036_vm10  ;;  %v9911_v18 = vunpack.i.l.bf16 %v13395_v42 }
0x175a   : > { %16020 = vst [vmem:[#allocation78_spill] sm:$0xff] %v13537_v56  ;;  %v9802_v56 = vunpack.i.h.bf16 %v13258_v49  ;;  %v13567_v47 = vsel %vm16030_vm8, %v16029_v59, %v9712_v27  ;;  %v9777_v27 = vunpack.i.h.bf16 %v13244_v44  ;;  %v9776_v59 = vunpack.i.l.bf16 %v13244_v44  ;;  %vm16040_vm8 = vmmov %vm16039_vm6 }
0x175b   : > { %v13532_v30 = vpop.permute.xlu0 %10029  ;;  %v13534_v20 = vpop.permute.xlu1 %10009  ;;  %16031 = vst [vmem:[#allocation81_spill] sm:$0xff] %v13567_v47  ;;  %v9997_v44 = vunpack.i.h.bf16 %v13493_v4  ;;  %v10021_v38 = vunpack.i.l.bf16 %v13506_v55 }
0x175c   : > { %16017 = vst [vmem:[#allocation76_spill] sm:$0xff] %v13532_v30  ;;  %16018 = vst [vmem:[#allocation77_spill] sm:$0xff] %v13534_v20  ;;  %v13554_v30 = vsel %vm16028_vm12, 0.0, %v9696_v29  ;;  %v9741_v20 = vunpack.i.l.bf16 %v13230_v51  ;;  %vm16033_vm12 = vcmask 138240   ;;  %v16034_v51 = vunpack.i.l.bf16 %v13166_v26 }
0x175d   : > { %10309 = vrot.lane.b32.xlu0 %v12991_v25, %s15535_s1  ;;  %10304 = vrot.lane.b32.xlu1 %v12928_v0, %s16014_s30  ;;  %v13572_v12 = vsel %vm16033_vm12, %v16032_v23, %v9707_v61  ;;  %v13580_v29 = vsel %vm16036_vm10, %v9716_v57, %v9717_v62  ;;  %v13583_v25 = vsel %vm16037_vm4, 0.0, %v9716_v57  ;;  %v5460_v57 = vsel %vm16040_vm8, %v9801_v43, %v9802_v56  ;;  %vm16043_vm10 = vmmov %vm16037_vm4 }
0x175e   : > { %v13577_v49 = vsel %vm16035_vm0, %v16034_v51, %v9722_v13  ;;  %v5459_v62 = vsel %vm16039_vm6, %v9741_v20, %v9742_v6  ;;  %v9996_v13 = vunpack.i.l.bf16 %v13493_v4  ;;  %vm16041_vm12 = vcmask 277504   ;;  %vm16044_vm4 = vmmov %vm16039_vm6 }
0x175f   : > { %v13588_v47 = vpop.permute.xlu0 %10039  ;;  %v10015_v61 = vpop.permute.xlu1 %10014  ;;  %vm16042_vm0 = vmmov %vm16041_vm12  ;;  %v6072_v56 = vsel %vm16043_vm10, %v9776_v59, %v9777_v27  ;;  %v5481_v23 = vsel %vm16044_vm4, 0.0, %v9801_v43  ;;  %v16045_v4 = vmov 0  ;;  %v9856_v43 = vunpack.i.l.bf16 %v13349_v37 }
0x1760   : > { %16038 = vst [vmem:[#allocation82_spill] sm:$0xff] %v13588_v47  ;;  %v10017_v51 = vunpack.i.h.bf16 %v10015_v61  ;;  %v10016_v34 = vunpack.i.l.bf16 %v10015_v61  ;;  %vm13614_vm6 = vmpackc.low %vm11262_vm14, %vm13186_vm7  ;;  %vm16055_vm10 = vcmask 113664  }
0x1761   : > { %10319 = vrot.lane.b32.xlu0 %v13015_v28, %s16014_s30  ;;  %10314 = vrot.lane.b32.xlu1 %v13007_v11, %s15535_s1  ;;  %v16046_v4 = vsel %vm13614_vm6, 4294967295, %v16045_v4  ;;  %vm13623_vm8 = vmpackc.low %vm11258_vm2, %vm13190_vm3 }
0x1762   : > { %v5383_v61 = vsel %vm16041_vm12, %v10016_v34, %v10017_v51  ;;  %v5404_v6 = vsel %vm16042_vm0, 0.0, %v10016_v34  ;;  %16047 = vst [vmem:[#allocation83_spill] sm:$0xff] %v16046_v4  ;;  %v9857_v34 = vunpack.i.h.bf16 %v13349_v37  ;;  %vm16051_vm12 = vmmov %vm16044_vm4  ;;  %v6006_v37 = vsel %vm16055_vm10, %v9996_v13, %v9997_v44 }
0x1763   : > { %v8400_v42 = vpack.c.bf16 %v13527_v21, %v5404_v6  ;;  %v10050_v47 = vpop.permute.xlu0 %10049  ;;  %v13607_v0 = vpop.permute.xlu1 %10024  ;;  %v8397_v28 = vpack.c.bf16 %v13500_v36, %v5383_v61  ;;  %v16048_v21 = vmov 0  ;;  %v8403_v36 = vpack.c.bf16 %v5460_v57, %v5459_v62  ;;  %vm13638_vm0 = vmpackc.low %vm11262_vm14, %vm11262_vm14  ;;  %v16134_v4 = vld [vmem:[#allocation76_spill] sm:$0xff] }
0x1764   : > { %v10052_v27 = vunpack.i.h.bf16 %v10050_v47  ;;  %v10051_v51 = vunpack.i.l.bf16 %v10050_v47  ;;  %v16049_v21 = vsel %vm13623_vm8, 4294967295, %v16048_v21  ;;  %v9892_v61 = vunpack.i.h.bf16 %v13382_v60  ;;  %vm16056_vm4 = vmmov %vm16055_vm10 }
0x1765   : > { %16050 = vst [vmem:[#allocation84_spill] sm:$0xff] %v16049_v21  ;;  %v9891_v6 = vunpack.i.l.bf16 %v13382_v60  ;;  %v5462_v11 = vsel %vm16051_vm12, %v9911_v18, %v9912_v10  ;;  %10339 = vrot.lane.b32.xlu0 %v13019_v54, %s16014_s30  ;;  %10324 = vrot.lane.b32.xlu1 %v13023_v39, %s16014_s30  ;;  %v16052_v47 = vmov 0  ;;  %v6027_v62 = vsel %vm16056_vm4, 0.0, %v9996_v13  ;;  %vm16057_vm3 = vmmov %vm16056_vm4 }
0x1766   : > { %v16053_v47 = vsel %vm13638_vm0, 4294967295, %v16052_v47  ;;  %v6007_v60 = vsel %vm16057_vm3, %v10051_v51, %v10052_v27  ;;  %vm16058_vm12 = vmmov %vm16057_vm3  ;;  %8399 = vmatprep.subr.msk.bf16.mxu0 %vm13614_vm6, %v8397_v28  ;;  %v10022_v57 = vunpack.i.h.bf16 %v13506_v55  ;;  %vm16059_vm10 = vcmask 269312  }
0x1767   : > { %16054 = vst [vmem:[#allocation85_spill] sm:$0xff] %v16053_v47  ;;  %v6028_v10 = vsel %vm16058_vm12, 0.0, %v10051_v51  ;;  %v8577_v39 = vpack.c.bf16 %v6007_v60, %v6006_v37  ;;  %8402 = vmatpush1.bf16.msk.msra.mxu0 %vm13623_vm8, %v8400_v42  ;;  %v13652_v15 = vpop.permute.xlu0 %10054  ;;  %v13654_v44 = vpop.permute.xlu1 %10034  ;;  %v5480_v13 = vsel %vm16059_vm10, 0.0, %v9741_v20  ;;  %vm16060_vm3 = vcmask 15360   ;;  %vm13665_vm4 = vmpackc.low %vm11258_vm2, %vm11258_vm2 }
0x1768   : > { %v8580_v54 = vpack.c.bf16 %v6028_v10, %v6027_v62  ;;  %v6093_v27 = vsel %vm16060_vm3, 0.0, %v9776_v59  ;;  %v9837_v51 = vunpack.i.h.bf16 %v13337_v52  ;;  %v9836_v28 = vunpack.i.l.bf16 %v13337_v52  ;;  %8405 = vmatprep.subr.msk.bf16.mxu0 %vm13638_vm0, %v8403_v36  ;;  %vm16064_vm12 = vmmov %vm16059_vm10 }
0x1769   : > { %v16061_v55 = vmov 0  ;;  %v8406_v42 = vpack.c.bf16 %v5481_v23, %v5480_v13  ;;  %v5461_v37 = vsel %vm16064_vm12, %v9856_v43, %v9857_v34  ;;  %v9967_v20 = vunpack.i.h.bf16 %v13463_v24  ;;  %10354 = vrot.lane.b32.xlu0 %v12924_v19, %s16065_s27  ;;  %10329 = vrot.lane.b32.xlu1 %v13172_v45, %s15428_s2  ;;  %vm16066_vm12 = vmmov %vm16059_vm10  ;;  %s16071_s2 = smov 97  }
0x176a   : > { %v16062_v55 = vsel %vm13665_vm4, 4294967295, %v16061_v55  ;;  %v9966_v59 = vunpack.i.l.bf16 %v13463_v24  ;;  %v9746_v52 = vunpack.i.l.bf16 %v13209_v58  ;;  %v5483_v36 = vsel %vm16059_vm10, 0.0, %v9911_v18  ;;  %8579 = vmatprep.subr.msk.bf16.mxu1 %vm13306_vm1, %v8577_v39  ;;  %vm16070_vm14 = vmmov %vm16066_vm12 }
0x176b   : > { %16063 = vst [vmem:[#allocation86_spill] sm:$0xff] %v16062_v55  ;;  %v8409_v23 = vpack.c.bf16 %v5462_v11, %v5461_v37  ;;  %v8583_v34 = vpack.c.bf16 %v6072_v56, %v13580_v29  ;;  %v6074_v62 = vsel %vm16060_vm3, %v9891_v6, %v9892_v61  ;;  %v10002_v24 = vunpack.i.h.bf16 %v13491_v3  ;;  %8408 = vmatpush1.bf16.msk.msra.mxu0 %vm13665_vm4, %v8406_v42  ;;  %v13689_v18 = vpop.permute.xlu0 %10064  ;;  %v13691_v39 = vpop.permute.xlu1 %10044 }
0x176c   : > { %v10001_v60 = vunpack.i.l.bf16 %v13491_v3  ;;  %v5464_v10 = vsel %vm16066_vm12, %v10021_v38, %v10022_v57  ;;  %8582 = vmatpush1.bf16.msk.msra.mxu1 %vm13317_vm11, %v8580_v54  ;;  %v16067_v11 = vunpack.i.l.bf16 %v13180_v41  ;;  %v16068_v29 = vunpack.i.h.bf16 %v13180_v41 }
0x176d   : > { %vm16069_vm10 = vcmask 1039360   ;;  %v8586_v3 = vpack.c.bf16 %v6093_v27, %v13583_v25  ;;  %v6073_v61 = vsel %vm16060_vm3, %v9836_v28, %v9837_v51  ;;  %v5482_v57 = vsel %vm16066_vm12, 0.0, %v9856_v43  ;;  %8411 = vmatprep.subr.msk.bf16.mxu0 %vm13638_vm0, %v8409_v23  ;;  %8585 = vmatprep.subr.msk.bf16.mxu1 %vm13205_vm5, %v8583_v34 }
0x176e   : > { %v13698_v56 = vsel %vm16069_vm10, %v16068_v29, %v16067_v11  ;;  %v8412_v54 = vpack.c.bf16 %v5483_v36, %v5482_v57  ;;  %v9947_v13 = vunpack.i.h.bf16 %v13451_v40  ;;  %v9946_v42 = vunpack.i.l.bf16 %v13451_v40  ;;  %10359 = vrot.lane.b32.xlu0 %v12971_v31, %s16071_s2  ;;  %10334 = vrot.lane.b32.xlu1 %v12904_v5, %s15931_s8  ;;  %vm16072_vm10 = vmmov %vm16060_vm3 }
0x176f   : > { %v5463_v37 = vsel %vm16070_vm14, %v9966_v59, %v9967_v20  ;;  %v6095_v25 = vsel %vm16072_vm10, 0.0, %v9891_v6  ;;  %vm16073_vm3 = vmmov %vm16066_vm12  ;;  %v8589_v51 = vpack.c.bf16 %v6074_v62, %v6073_v61  ;;  %v9862_v36 = vunpack.i.h.bf16 %v13347_v2  ;;  %v13723_v20 = vpop.permute.xlu0 %10084  ;;  %v13725_v34 = vpop.permute.xlu1 %10059 }
0x1770   : > { %v5485_v43 = vsel %vm16073_vm3, 0.0, %v10021_v38  ;;  %v8415_v27 = vpack.c.bf16 %v5464_v10, %v5463_v37  ;;  %v9861_v23 = vunpack.i.l.bf16 %v13347_v2  ;;  %vm16074_vm12 = vmmov %vm16072_vm10  ;;  %8414 = vmatpush1.bf16.msk.msra.mxu0 %vm13665_vm4, %v8412_v54  ;;  %8588 = vmatpush1.bf16.msk.msra.mxu1 %vm13216_vm15, %v8586_v3  ;;  %v16075_v38 = vunpack.i.h.bf16 %v13209_v58 }
0x1771   : > { %v6076_v40 = vsel %vm16074_vm12, %v10001_v60, %v10002_v24  ;;  %vm16076_vm14 = vcmask 261120   ;;  %v9807_v62 = vunpack.i.h.bf16 %v13285_v17  ;;  %v9806_v10 = vunpack.i.l.bf16 %v13285_v17  ;;  %8591 = vmatprep.subr.msk.bf16.mxu1 %vm13205_vm5, %v8589_v51 }
0x1772   : > { %v5529_v6 = vsel %vm16076_vm14, %v9746_v52, %v16075_v38  ;;  %v6094_v24 = vsel %vm16072_vm10, 0.0, %v9836_v28  ;;  %v5484_v11 = vsel %vm16073_vm3, 0.0, %v9966_v59  ;;  %8417 = vmatprep.subr.msk.bf16.mxu0 %vm13638_vm0, %v8415_v27  ;;  %v16077_v29 = vunpack.i.l.bf16 %v13166_v26  ;;  %vm16079_vm14 = vmmov %vm16072_vm10  ;;  %10369 = vrot.lane.b32.xlu0 %v13421_v32, %s15429_s0  ;;  %s16192_s0 = smov 94  }
0x1773   : > { %vm16078_vm12 = vcmask 7168   ;;  %v8592_v3 = vpack.c.bf16 %v6095_v25, %v6094_v24  ;;  %v6075_v61 = vsel %vm16079_vm14, %v9946_v42, %v9947_v13  ;;  %v8418_v57 = vpack.c.bf16 %v5485_v43, %v5484_v11  ;;  %10344 = vrot.lane.b32.xlu1 %v13027_v14, %s16014_s30  ;;  %v13770_v51 = vpop.permute.xlu1 %10069 }
0x1774   : > { %v13741_v58 = vsel %vm16078_vm12, 0.0, %v16077_v29  ;;  %vm16080_vm10 = vcmask 261120   ;;  %v16083_v26 = vunpack.i.l.bf16 %v13180_v41  ;;  %vm16084_vm2 = vcmask 1039360   ;;  %vm16085_vm12 = vmmov %vm16079_vm14  ;;  %v13768_v41 = vpop.permute.xlu0 %10094  ;;  %v16094_v29 = vld [vmem:[#allocation21_spill] sm:$0xff] }
0x1775   : > { %vm13749_vm3 = vmneg %vm16080_vm10  ;;  %v6097_v59 = vsel %vm16085_vm12, 0.0, %v10001_v60  ;;  %v8421_v54 = vpack.c.bf16 %v5529_v6, %v13542_v63  ;;  %v8595_v13 = vpack.c.bf16 %v6076_v40, %v6075_v61  ;;  %v16086_v37 = vunpack.i.l.bf16 %v13133_v35  ;;  %8420 = vmatpush1.bf16.msk.msra.mxu0 %vm13665_vm4, %v8418_v57  ;;  %8594 = vmatpush1.bf16.msk.msra.mxu1 %vm13216_vm15, %v8592_v3  ;;  %v16093_v6 = vld [vmem:[#allocation66_spill] sm:$0xff]  ;;  %v16095_v61 = vld [vmem:[#allocation43_spill] sm:$0xff] }
0x1776   : > { %v13756_v28 = vsel %vm16084_vm2, %v16083_v26, 0.0  ;;  %v9972_v43 = vunpack.i.h.bf16 %v13461_v1  ;;  %v9971_v27 = vunpack.i.l.bf16 %v13461_v1  ;;  %vm16087_vm2 = vmmov %vm16080_vm10  ;;  %v9917_v24 = vunpack.i.h.bf16 %v16093_v6  ;;  %10374 = vrot.lane.b32.xlu0 %v16094_v29, %s16071_s2 }
0x1777   : > { %v8423_v25 = vpack.c.bf16 %v9746_v52, %v16086_v37  ;;  %v5531_v63 = vsel %vm16087_vm2, %v9861_v23, %v9862_v36  ;;  %v16088_v52 = vld [vmem:[#allocation52_spill] sm:$0xff]  ;;  %vm16089_vm14 = vmmov %vm16085_vm12  ;;  %8422 = vmatprep.subr.bf16.mxu0 %v8421_v54  ;;  %8597 = vmatprep.subr.msk.bf16.mxu1 %vm13205_vm5, %v8595_v13  ;;  %v9916_v11 = vunpack.i.l.bf16 %v16093_v6  ;;  %v9752_v57 = vunpack.i.h.bf16 %v16095_v61  ;;  %v16096_v54 = vld [vmem:[#allocation46_spill] sm:$0xff] }
0x1778   : > { %v9842_v60 = vunpack.i.h.bf16 %v16088_v52  ;;  %v6096_v1 = vsel %vm16089_vm14, 0.0, %v9946_v42  ;;  %vm13783_vm10 = vmpackc.low %vm13749_vm3, %vm13749_vm3  ;;  %v9841_v36 = vunpack.i.l.bf16 %v16088_v52  ;;  %10349 = vrot.lane.b32.xlu1 %v12924_v19, %s16071_s2  ;;  %v9782_v13 = vunpack.i.h.bf16 %v16096_v54  ;;  %v13805_v19 = vpop.permute.xlu0 %10109 }
0x1779   : > { %vm16092_vm12 = vmmov %vm16087_vm2  ;;  %v8598_v42 = vpack.c.bf16 %v6097_v59, %v6096_v1  ;;  %v10027_v37 = vunpack.i.h.bf16 %v13607_v0  ;;  %v10026_v52 = vunpack.i.l.bf16 %v13607_v0  ;;  %8425 = vmatpush1.bf16.msk.msra.mxu0 %vm13783_vm10, %v8423_v25  ;;  %16097 = vst [vmem:[#allocation52_spill] sm:$0xff] %v13805_v19  ;;  %v10075_v59 = vpop.permute.xlu1 %10074  ;;  %v5533_v1 = vsel %vm16087_vm2, %v9971_v27, %v9972_v43  ;;  %v16107_v19 = vld [vmem:[#allocation42_spill] sm:$0xff] }
0x177a   : > { %v5530_v38 = vsel %vm16092_vm12, %v9806_v10, %v9807_v62  ;;  %v9781_v6 = vunpack.i.l.bf16 %v16096_v54  ;;  %v10077_v3 = vunpack.i.h.bf16 %v10075_v59  ;;  %v10076_v35 = vunpack.i.l.bf16 %v10075_v59  ;;  %vm16101_vm12 = vmmov %vm16087_vm2  ;;  %v16102_v54 = vld [vmem:[#allocation67_spill] sm:$0xff] }
0x177b   : > { %v8426_v62 = vpack.c.bf16 %v5531_v63, %v5530_v38  ;;  %8600 = vmatpush1.bf16.msk.msra.mxu1 %vm13216_vm15, %v8598_v42  ;;  %v16098_v63 = vld [vmem:[#allocation47_spill] sm:$0xff]  ;;  %vm16099_vm14 = vcmask 7168   ;;  %v8428_v25 = vpack.c.bf16 %v9861_v23, %v9806_v10  ;;  %v5532_v43 = vsel %vm16101_vm12, %v9916_v11, %v9917_v24 }
0x177c   : > { %v9812_v38 = vunpack.i.h.bf16 %v16098_v63  ;;  %v9811_v0 = vunpack.i.l.bf16 %v16098_v63  ;;  %v6143_v26 = vsel %vm16099_vm14, %v9841_v36, %v9842_v60  ;;  %v16100_v42 = vld [vmem:[#allocation31_spill] sm:$0xff]  ;;  %10364 = vrot.lane.b32.xlu1 %v12971_v31, %s16065_s27  ;;  %v9952_v33 = vunpack.i.h.bf16 %v16102_v54  ;;  %vm16105_vm14 = vmmov %vm16101_vm12  ;;  %v13828_v31 = vpop.permute.xlu0 %10119 }
0x177d   : > { %8427 = vmatprep.subr.bf16.mxu0 %v8426_v62  ;;  %10389 = vrot.lane.b32.xlu0 %v16100_v42, %s16071_s2  ;;  %vm16103_vm2 = vcmask 15360   ;;  %v8431_v63 = vpack.c.bf16 %v5533_v1, %v5532_v43  ;;  %v9951_v60 = vunpack.i.l.bf16 %v16102_v54  ;;  %v5534_v2 = vsel %vm16105_vm14, %v10026_v52, %v10027_v37  ;;  %16106 = vst [vmem:[#allocation66_spill] sm:$0xff] %v13828_v31  ;;  %v13830_v24 = vpop.permute.xlu1 %10079 }
0x177e   : > { %v6077_v59 = vsel %vm16103_vm2, %v10076_v35, %v10077_v3  ;;  %vm16104_vm15 = vmmov %vm16103_vm2  ;;  %8430 = vmatpush1.bf16.msk.msra.mxu0 %vm13783_vm10, %v8428_v25  ;;  %vm16110_vm12 = vcmask 7168   ;;  %v10032_v31 = vunpack.i.h.bf16 %v16134_v4 }
0x177f   : > { %v6098_v62 = vsel %vm16104_vm15, 0.0, %v10076_v35  ;;  %v8601_v23 = vpack.c.bf16 %v13577_v49, %v6077_v59  ;;  %v16108_v35 = vunpack.i.l.bf16 %v16095_v61  ;;  %vm16109_vm15 = vcmask 252928   ;;  %vm16111_vm2 = vmmov %vm16110_vm12  ;;  %8432 = vmatprep.subr.bf16.mxu0 %v8431_v63 }
0x1780   : > { %v8604_v10 = vpack.c.bf16 %v13741_v58, %v6098_v62  ;;  %v6142_v43 = vsel %vm16110_vm12, %v9781_v6, %v9782_v13  ;;  %v6164_v37 = vsel %vm16111_vm2, 0.0, %v9841_v36  ;;  %vm16112_vm14 = vmmov %vm16111_vm2  ;;  %v16113_v58 = vld [vmem:[#allocation62_spill] sm:$0xff]  ;;  %v8433_v59 = vpack.c.bf16 %v9971_v27, %v9916_v11  ;;  %v16114_v62 = vld [vmem:[#allocation61_spill] sm:$0xff]  ;;  %10379 = vrot.lane.b32.xlu1 %v13172_v45, %s15533_s5  ;;  %s16194_s5 = smov 96  }
0x1781   : > { %v5585_v1 = vsel %vm16109_vm15, %v16108_v35, %v9752_v57  ;;  %v6163_v49 = vsel %vm16112_vm14, 0.0, %v9781_v6  ;;  %v9897_v54 = vunpack.i.h.bf16 %v16113_v58  ;;  %v9896_v25 = vunpack.i.l.bf16 %v16113_v58  ;;  %10399 = vrot.lane.b32.xlu0 %v16114_v62, %s16001_s29  ;;  %vm16115_vm5 = vmmov %vm16109_vm15  ;;  %8603 = vmatprep.subr.msk.bf16.mxu1 %vm13614_vm6, %v8601_v23  ;;  %v16117_v35 = vld [vmem:[#allocation63_spill] sm:$0xff]  ;;  %s8026_s29 = sshll.u32 %s16514_s24, 3 }
0x1782   : > { %v5586_v57 = vsel %vm16115_vm5, %v9811_v0, %v9812_v38  ;;  %vm16116_vm15 = vmmov %vm16115_vm5  ;;  %v8436_v36 = vpack.c.bf16 %v13530_v7, %v5534_v2  ;;  %v8607_v6 = vpack.c.bf16 %v6143_v26, %v6142_v43  ;;  %v8610_v63 = vpack.c.bf16 %v6164_v37, %v6163_v49  ;;  %8435 = vmatpush1.bf16.msk.msra.mxu0 %vm13783_vm10, %v8433_v59  ;;  %v10130_v38 = vpop.permute.xlu0 %10129  ;;  %v16119_v7 = vld [vmem:[#allocation58_spill] sm:$0xff] }
0x1783   : > { %v5607_v13 = vsel %vm16116_vm15, 0.0, %v9811_v0  ;;  %v9922_v58 = vunpack.i.h.bf16 %v16117_v35  ;;  %v9921_v27 = vunpack.i.l.bf16 %v16117_v35  ;;  %vm16118_vm12 = vmmov %vm16111_vm2  ;;  %8606 = vmatpush1.bf16.msk.msra.mxu1 %vm13623_vm8, %v8604_v10  ;;  %v13857_v0 = vpop.permute.xlu1 %10089  ;;  %v9867_v2 = vunpack.i.h.bf16 %v16119_v7  ;;  %v16123_v10 = vld [vmem:[#allocation75_spill] sm:$0xff]  ;;  %v16124_v35 = vld [vmem:[#allocation78_spill] sm:$0xff] }
0x1784   : > { %v6145_v11 = vsel %vm16118_vm12, %v9951_v60, %v9952_v33  ;;  %v9866_v26 = vunpack.i.l.bf16 %v16119_v7  ;;  %v10132_v23 = vunpack.i.h.bf16 %v10130_v38  ;;  %v10131_v43 = vunpack.i.l.bf16 %v10130_v38  ;;  %8438 = vmatprep.subr.msk.bf16.mxu0 %vm15862_vm13, %v8436_v36  ;;  %8609 = vmatprep.subr.msk.bf16.mxu1 %vm13638_vm0, %v8607_v6  ;;  %vm16122_vm10 = vmmov %vm16111_vm2  ;;  %v16125_v38 = vld [vmem:[#allocation30_spill] sm:$0xff]  ;;  %v16126_v36 = vld [vmem:[#allocation8_spill] sm:$0xff] }
0x1785   : > { %v6144_v40 = vsel %vm16122_vm10, %v9896_v25, %v9897_v54  ;;  %v10007_v49 = vunpack.i.h.bf16 %v16123_v10  ;;  %v10006_v59 = vunpack.i.l.bf16 %v16123_v10  ;;  %v8439_v7 = vpack.c.bf16 %v16124_v35, %v10026_v52  ;;  %10404 = vrot.lane.b32.xlu0 %v16125_v38, %s16071_s2  ;;  %10384 = vrot.lane.b32.xlu1 %v16094_v29, %s16065_s27  ;;  %vm16131_vm15 = vmmov %vm16115_vm5 }
0x1786   : > { %vm16127_vm2 = vnez %v16126_v36  ;;  %v16130_v54 = vunpack.i.l.bf16 %v16095_v61  ;;  %vm16132_vm12 = vmmov %vm16122_vm10  ;;  %v8442_v52 = vpack.c.bf16 %v5586_v57, %v5585_v1  ;;  %v8613_v35 = vpack.c.bf16 %v6145_v11, %v6144_v40  ;;  %v13899_v61 = vpop.permute.xlu0 %10134  ;;  %v16142_v11 = vld [vmem:[#allocation72_spill] sm:$0xff] }
0x1787   : > { %vm13880_vm14 = vmpackc.low %vm16127_vm2, %vm16127_vm2  ;;  %v6166_v10 = vsel %vm16132_vm12, 0.0, %v9951_v60  ;;  %v10031_v29 = vunpack.i.l.bf16 %v16134_v4  ;;  %8612 = vmatpush1.bf16.msk.msra.mxu1 %vm13665_vm4, %v8610_v63  ;;  %16137 = vst [vmem:[#allocation21_spill] sm:$0xff] %v13899_v61  ;;  %v13901_v60 = vpop.permute.xlu1 %10099  ;;  %v9766_v1 = vunpack.i.l.bf16 %v16107_v19 }
0x1788   : > { %v5606_v3 = vsel %vm16131_vm15, 0.0, %v16130_v54  ;;  %vm16133_vm10 = vmmov %vm16115_vm5  ;;  %8615 = vmatprep.subr.msk.bf16.mxu1 %vm13638_vm0, %v8613_v35  ;;  %v16149_v35 = vld [vmem:[#allocation38_spill] sm:$0xff]  ;;  %v10102_v46 = vunpack.i.h.bf16 %v13901_v60 }
0x1789   : > { %v5588_v21 = vsel %vm16133_vm10, %v9921_v27, %v9922_v58  ;;  %vm16135_vm5 = vmmov %vm16132_vm12  ;;  %v8445_v57 = vpack.c.bf16 %v5607_v13, %v5606_v3  ;;  %v9977_v3 = vunpack.i.h.bf16 %v16142_v11  ;;  %v9976_v13 = vunpack.i.l.bf16 %v16142_v11  ;;  %10394 = vrot.lane.b32.xlu1 %v16100_v42, %s16065_s27  ;;  %v16154_v42 = vld [vmem:[#allocation41_spill] sm:$0xff] }
0x178a   : > { %v6147_v36 = vsel %vm16135_vm5, %v10131_v43, %v10132_v23  ;;  %vm16136_vm8 = vmpackc.low %vm11301_vm9, %vm13749_vm3 }
0x178b   : > { %8441 = vmatpush1.bf16.msk.msra.mxu0 %vm16136_vm8, %v8439_v7  ;;  %vm16138_vm15 = vmmov %vm16133_vm10 }
0x178c   : > { %v5587_v4 = vsel %vm16138_vm15, %v9866_v26, %v9867_v2  ;;  %vm16139_vm12 = vmmov %vm16135_vm5  ;;  %8444 = vmatprep.subr.msk.bf16.mxu0 %vm13880_vm14, %v8442_v52  ;;  %v16144_v2 = vld [vmem:[#allocation39_spill] sm:$0xff]  ;;  %vm16148_vm15 = vcmask 138240  }
0x178d   : > { %v6165_v58 = vsel %vm16139_vm12, 0.0, %v9896_v25  ;;  %vm13913_vm8 = vmpackc.low %vm11301_vm9, %vm11301_vm9  ;;  %10414 = vrot.lane.b32.xlu0 %v16144_v2, %s16071_s2  ;;  %v8448_v54 = vpack.c.bf16 %v5588_v21, %v5587_v4  ;;  %v13940_v21 = vpop.permute.xlu0 %10149  ;;  %10409 = vrot.lane.b32.xlu1 %v16125_v38, %s16065_s27 }
0x178e   : > { %v8616_v63 = vpack.c.bf16 %v6166_v10, %v6165_v58  ;;  %vm16143_vm3 = vmmov %vm16135_vm5  ;;  %v16147_v10 = vunpack.i.l.bf16 %v13153_v53  ;;  %v16150_v58 = vld [vmem:[#allocation37_spill] sm:$0xff]  ;;  %16152 = vst [vmem:[#allocation43_spill] sm:$0xff] %v13940_v21  ;;  %v13942_v53 = vpop.permute.xlu1 %10104 }
0x178f   : > { %v6146_v25 = vsel %vm16143_vm3, %v10006_v59, %v10007_v49  ;;  %vm16145_vm5 = vmmov %vm16133_vm10  ;;  %8447 = vmatpush1.bf16.msk.msra.mxu0 %vm13913_vm8, %v8445_v57  ;;  %16153 = vst [vmem:[#allocation46_spill] sm:$0xff] %v13942_v53 }
0x1790   : > { %v5609_v23 = vsel %vm16145_vm5, 0.0, %v9921_v27  ;;  %vm16146_vm10 = vmmov %vm16143_vm3  ;;  %v8619_v7 = vpack.c.bf16 %v6147_v36, %v6146_v25  ;;  %v13929_v52 = vsel %vm16148_vm15, 0.0, %v16147_v10  ;;  %8618 = vmatpush1.bf16.msk.msra.mxu1 %vm13665_vm4, %v8616_v63  ;;  %v9732_v27 = vunpack.i.h.bf16 %v16154_v42  ;;  %8450 = vmatprep.subr.msk.bf16.mxu0 %vm13880_vm14, %v8448_v54  ;;  %v16165_v54 = vld [vmem:[#allocation44_spill] sm:$0xff] }
0x1791   : > { %v6168_v40 = vsel %vm16146_vm10, 0.0, %v10131_v43  ;;  %vm16151_vm12 = vmmov %vm16145_vm5  ;;  %v16155_v43 = vunpack.i.h.bf16 %v13228_v9  ;;  %v16156_v36 = vunpack.i.l.bf16 %v13228_v9  ;;  %vm16157_vm3 = vcmask 244736   ;;  %10424 = vrot.lane.b32.xlu0 %v13172_v45, %s15535_s1  ;;  %10419 = vrot.lane.b32.xlu1 %v16144_v2, %s16065_s27  ;;  %v16179_v2 = vld [vmem:[#allocation13_spill] sm:$0xff] }
0x1792   : > { %v5590_v33 = vsel %vm16151_vm12, %v10031_v29, %v10032_v31  ;;  %v5608_v31 = vsel %vm16145_vm5, 0.0, %v9866_v26  ;;  %v6167_v25 = vsel %vm16146_vm10, 0.0, %v10006_v59  ;;  %8621 = vmatprep.subr.msk.bf16.mxu1 %vm13638_vm0, %v8619_v7  ;;  %vm16159_vm15 = vmmov %vm16157_vm3  ;;  %v16161_v26 = vunpack.i.h.bf16 %v16107_v19  ;;  %v13983_v19 = vpop.permute.xlu0 %10159  ;;  %v13985_v38 = vpop.permute.xlu1 %10114 }
0x1793   : > { %v5655_v4 = vsel %vm16157_vm3, %v16156_v36, %v16155_v43  ;;  %v16158_v57 = vmov %v16156_v36  ;;  %v8451_v10 = vpack.c.bf16 %v5609_v23, %v5608_v31  ;;  %vm16160_vm12 = vmmov %vm16145_vm5  ;;  %v8622_v49 = vpack.c.bf16 %v6168_v40, %v6167_v25  ;;  %v16166_v43 = vld [vmem:[#allocation57_spill] sm:$0xff]  ;;  %16167 = vst [vmem:[#allocation47_spill] sm:$0xff] %v13983_v19 }
0x1794   : > { %v13959_v63 = vsel %vm16159_vm15, 0.0, %v16158_v57  ;;  %v5589_v11 = vsel %vm16160_vm12, %v9976_v13, %v9977_v3  ;;  %vm16162_vm3 = vcmask 138240   ;;  %vm16164_vm10 = vmmov %vm16160_vm12  ;;  %v9762_v3 = vunpack.i.h.bf16 %v16165_v54  ;;  %16168 = vst [vmem:[#allocation31_spill] sm:$0xff] %v13985_v38  ;;  %v16171_v57 = vld [vmem:[#allocation14_spill] sm:$0xff] }
0x1795   : > { %v13969_v59 = vsel %vm16162_vm3, %v9766_v1, %v16161_v26  ;;  %vm16163_vm5 = vmmov %vm16162_vm3  ;;  %v5611_v7 = vsel %vm16164_vm10, 0.0, %v10031_v29  ;;  %v8454_v23 = vpack.c.bf16 %v5590_v33, %v5589_v11  ;;  %v9761_v40 = vunpack.i.l.bf16 %v16165_v54  ;;  %8453 = vmatpush1.bf16.msk.msra.mxu0 %vm13913_vm8, %v8451_v10  ;;  %8624 = vmatpush1.bf16.msk.msra.mxu1 %vm13665_vm4, %v8622_v49  ;;  %v16169_v29 = vld [vmem:[#allocation45_spill] sm:$0xff]  ;;  %v16172_v10 = vld [vmem:[#allocation12_spill] sm:$0xff] }
0x1796   : > { %v13972_v9 = vsel %vm16163_vm5, 0.0, %v9766_v1  ;;  %v9872_v36 = vunpack.i.h.bf16 %v16166_v43  ;;  %v9871_v31 = vunpack.i.l.bf16 %v16166_v43  ;;  %v9731_v33 = vunpack.i.l.bf16 %v16154_v42  ;;  %vm16170_vm15 = vmmov %vm16164_vm10  ;;  %v16174_v54 = vld [vmem:[#allocation53_spill] sm:$0xff]  ;;  %10429 = vrot.lane.b32.xlu0 %v13421_v32, %s16014_s30  ;;  %10439 = vrot.lane.b32.xlu1 %v12904_v5, %s16194_s5  ;;  %v16199_v5 = vld [vmem:[#allocation22_spill] sm:$0xff] }
0x1797   : > { %v9787_v1 = vunpack.i.h.bf16 %v16169_v29  ;;  %v9786_v11 = vunpack.i.l.bf16 %v16169_v29  ;;  %v5610_v25 = vsel %vm16170_vm15, 0.0, %v9976_v13  ;;  %8456 = vmatprep.subr.msk.bf16.mxu0 %vm13880_vm14, %v8454_v23  ;;  %v16173_v26 = vpack.c.bf16 %v16171_v57, %v16172_v10  ;;  %v16175_v23 = vld [vmem:[#allocation49_spill] sm:$0xff] }
0x1798   : > { %v8463_v49 = vpack.c.bf16 %v13959_v63, %v13554_v30  ;;  %v9817_v43 = vunpack.i.h.bf16 %v16174_v54  ;;  %v9816_v42 = vunpack.i.l.bf16 %v16174_v54  ;;  %v8457_v19 = vpack.c.bf16 %v5611_v7, %v5610_v25  ;;  %v16178_v25 = vld [vmem:[#allocation71_spill] sm:$0xff] }
0x1799   : > { %8626 = vmatprep.subr.bf16.mxu1 %v16173_v26  ;;  %v9821_v29 = vunpack.i.l.bf16 %v16175_v23  ;;  %v8460_v57 = vpack.c.bf16 %v5655_v4, %v13551_v8  ;;  %vm16176_vm12 = vcmask 146432   ;;  %vm16177_vm3 = vcmask 244736   ;;  %v16180_v26 = vld [vmem:[#allocation11_spill] sm:$0xff]  ;;  %v14021_v8 = vpop.permute.xlu0 %10169  ;;  %v14023_v4 = vpop.permute.xlu1 %10124 }
0x179a   : > { %v14011_v63 = vsel %vm16176_vm12, %v9761_v40, %v9762_v3  ;;  %v5657_v7 = vsel %vm16177_vm3, %v9871_v31, %v9872_v36  ;;  %v9982_v32 = vunpack.i.h.bf16 %v16178_v25  ;;  %v9981_v10 = vunpack.i.l.bf16 %v16178_v25  ;;  %8459 = vmatpush1.bf16.msk.msra.mxu0 %vm13913_vm8, %v8457_v19  ;;  %16182 = vst [vmem:[#allocation67_spill] sm:$0xff] %v14021_v8  ;;  %16183 = vst [vmem:[#allocation42_spill] sm:$0xff] %v14023_v4  ;;  %v16187_v19 = vld [vmem:[#allocation23_spill] sm:$0xff]  ;;  %v16191_v8 = vld [vmem:[#allocation68_spill] sm:$0xff] }
0x179b   : > { %v16181_v54 = vpack.c.bf16 %v16179_v2, %v16180_v26  ;;  %vm16184_vm5 = vcmask 1031168   ;;  %v9822_v25 = vunpack.i.h.bf16 %v16175_v23  ;;  %8462 = vmatprep.subr.msk.bf16.mxu0 %vm13306_vm1, %v8460_v57  ;;  %v16188_v2 = vld [vmem:[#allocation18_spill] sm:$0xff]  ;;  %v5656_v30 = vsel %vm16177_vm3, %v9816_v42, %v9817_v43  ;;  %10449 = vrot.lane.b32.xlu1 %v13172_v45, %s16194_s5 }
0x179c   : > { %v14026_v3 = vsel %vm16184_vm5, %v9787_v1, 0.0  ;;  %vm16185_vm10 = vmmov %vm16184_vm5  ;;  %v16189_v26 = vpack.c.bf16 %v16187_v19, %v16188_v2  ;;  %v9926_v21 = vunpack.i.l.bf16 %v16191_v8  ;;  %v16196_v23 = vld [vmem:[#allocation54_spill] sm:$0xff]  ;;  %v8466_v19 = vpack.c.bf16 %v5657_v7, %v5656_v30 }
0x179d   : > { %8628 = vmatpush1.bf16.msra.mxu1 %v16181_v54  ;;  %v14029_v36 = vsel %vm16185_vm10, %v9731_v33, %v9786_v11  ;;  %vm16186_vm15 = vmmov %vm16184_vm5  ;;  %v9927_v33 = vunpack.i.h.bf16 %v16191_v8  ;;  %v9847_v57 = vunpack.i.h.bf16 %v16196_v23  ;;  %v9846_v43 = vunpack.i.l.bf16 %v16196_v23  ;;  %v14064_v4 = vpop.permute.xlu0 %10174  ;;  %v14066_v38 = vpop.permute.xlu1 %10139 }
0x179e   : > { %v14032_v13 = vsel %vm16186_vm15, %v9732_v27, %v9787_v1  ;;  %8630 = vmatprep.subr.bf16.mxu1 %v16189_v26  ;;  %vm16190_vm12 = vmmov %vm16184_vm5  ;;  %v16193_v27 = vld [vmem:[#allocation19_spill] sm:$0xff]  ;;  %vm16195_vm5 = vcmask 146432   ;;  %v10037_v8 = vunpack.i.h.bf16 %v13654_v44  ;;  %v10036_v26 = vunpack.i.l.bf16 %v13654_v44  ;;  %8465 = vmatpush1.bf16.msk.msra.mxu0 %vm13317_vm11, %v8463_v49  ;;  %16202 = vst [vmem:[#allocation62_spill] sm:$0xff] %v14064_v4  ;;  %v16207_v49 = vld [vmem:[#allocation28_spill] sm:$0xff] }
0x179f   : > { %v14041_v54 = vsel %vm16190_vm12, %v9786_v11, 0.0  ;;  %10434 = vrot.lane.b32.xlu0 %v16193_v27, %s16192_s0  ;;  %v14051_v1 = vsel %vm16195_vm5, 0.0, %v9821_v29  ;;  %vm16197_vm10 = vmmov %vm16177_vm3  ;;  %v16200_v27 = vld [vmem:[#allocation17_spill] sm:$0xff]  ;;  %16203 = vst [vmem:[#allocation61_spill] sm:$0xff] %v14066_v38  ;;  %8468 = vmatprep.subr.msk.bf16.mxu0 %vm13306_vm1, %v8466_v19  ;;  %v16248_v38 = vld [vmem:[#allocation82_spill] sm:$0xff] }
0x17a0   : > { %v5678_v11 = vsel %vm16197_vm10, 0.0, %v9871_v31  ;;  %vm16198_vm15 = vmmov %vm16177_vm3  ;;  %v16201_v61 = vpack.c.bf16 %v16199_v5, %v16200_v27  ;;  %v10042_v53 = vunpack.i.h.bf16 %v16248_v38 }
0x17a1   : > { %v5659_v2 = vsel %vm16198_vm15, %v9981_v10, %v9982_v32  ;;  %vm16204_vm12 = vmmov %vm16195_vm5 }
0x17a2   : > { %8632 = vmatpush1.bf16.msra.mxu1 %v16201_v61  ;;  %v14069_v31 = vsel %vm16204_vm12, 0.0, %v9761_v40  ;;  %vm16205_vm3 = vmmov %vm16195_vm5  ;;  %v16208_v61 = vld [vmem:[#allocation26_spill] sm:$0xff]  ;;  %v16210_v40 = vld [vmem:[#allocation48_spill] sm:$0xff]  ;;  %vm16214_vm12 = vcmask 1039360  }
0x17a3   : > { %v14074_v7 = vsel %vm16205_vm3, %v9821_v29, %v9822_v25  ;;  %vm16206_vm5 = vmmov %vm16197_vm10  ;;  %v16209_v32 = vpack.c.bf16 %v16207_v49, %v16208_v61  ;;  %v9792_v5 = vunpack.i.h.bf16 %v16210_v40  ;;  %v16212_v29 = vld [vmem:[#allocation15_spill] sm:$0xff]  ;;  %v6234_v61 = vsel %vm16214_vm12, %v9847_v57, 0.0 }
0x17a4   : > { %v5677_v44 = vsel %vm16206_vm5, 0.0, %v9816_v42  ;;  %vm16211_vm10 = vmmov %vm16206_vm5  ;;  %10444 = vrot.lane.b32.xlu0 %v16212_v29, %s16194_s5  ;;  %v9791_v42 = vunpack.i.l.bf16 %v16210_v40  ;;  %v14102_v40 = vpop.permute.xlu0 %10184  ;;  %v14104_v29 = vpop.permute.xlu1 %10144 }
0x17a5   : > { %8634 = vmatprep.subr.bf16.mxu1 %v16209_v32  ;;  %v8469_v27 = vpack.c.bf16 %v5678_v11, %v5677_v44  ;;  %v5658_v30 = vsel %vm16211_vm10, %v9926_v21, %v9927_v33  ;;  %vm16213_vm15 = vmmov %vm16206_vm5  ;;  %v5660_v33 = vsel %vm16206_vm5, %v10036_v26, %v10037_v8  ;;  %v16216_v44 = vld [vmem:[#allocation27_spill] sm:$0xff]  ;;  %v16217_v32 = vld [vmem:[#allocation25_spill] sm:$0xff]  ;;  %16219 = vst [vmem:[#allocation63_spill] sm:$0xff] %v14102_v40 }
0x17a6   : > { %v5680_v19 = vsel %vm16213_vm15, 0.0, %v9981_v10  ;;  %v8472_v49 = vpack.c.bf16 %v5659_v2, %v5658_v30  ;;  %vm16215_vm3 = vmmov %vm16214_vm12  ;;  %v16218_v45 = vpack.c.bf16 %v16216_v44, %v16217_v32  ;;  %16220 = vst [vmem:[#allocation58_spill] sm:$0xff] %v14104_v29  ;;  %v8484_v10 = vpack.c.bf16 %v14074_v7, %v14011_v63  ;;  %v5329_v2 = vld [vmem:[%s15154_s18 + $0x8] sm:$0xff] }
0x17a7   : > { %v6233_v11 = vsel %vm16215_vm3, %v9846_v43, 0.0  ;;  %8471 = vmatpush1.bf16.msk.msra.mxu0 %vm13317_vm11, %v8469_v27  ;;  %v16221_v30 = vld [vmem:[#allocation55_spill] sm:$0xff]  ;;  %vm16222_vm10 = vmmov %vm16206_vm5  ;;  %v16223_v27 = vld [vmem:[#allocation69_spill] sm:$0xff]  ;;  %v16224_v32 = vpack.c.bf16 %v13756_v28, %v16149_v35 }
0x17a8   : > { %8636 = vmatpush1.bf16.msra.mxu1 %v16218_v45  ;;  %v5679_v23 = vsel %vm16222_vm10, 0.0, %v9926_v21  ;;  %v9957_v25 = vunpack.i.h.bf16 %v16223_v27  ;;  %v9956_v44 = vunpack.i.l.bf16 %v16223_v27  ;;  %8474 = vmatprep.subr.msk.bf16.mxu0 %vm13306_vm1, %v8472_v49  ;;  %vm16225_vm15 = vmmov %vm16215_vm3  ;;  %v16227_v27 = vld [vmem:[#allocation16_spill] sm:$0xff]  ;;  %v16228_v49 = vld [vmem:[#allocation50_spill] sm:$0xff]  ;;  %v8643_v28 = vpack.c.bf16 %v6234_v61, %v6233_v11  ;;  %v10195_v11 = vpop.permute.xlu0 %10194 }
0x17a9   : > { %8639 = vmatprep.subr.msk.bf16.mxu1 %vm15862_vm13, %v16224_v32  ;;  %v6212_v63 = vsel %vm16225_vm15, %v9791_v42, %v9846_v43  ;;  %vm16226_vm12 = vmmov %vm16215_vm3  ;;  %v8475_v21 = vpack.c.bf16 %v5680_v19, %v5679_v23  ;;  %10459 = vrot.lane.b32.xlu0 %v16114_v62, %s16071_s2  ;;  %vm16229_vm3 = vnez %v16228_v49  ;;  %v16231_v43 = vld [vmem:[#allocation79_spill] sm:$0xff]  ;;  %v16233_v23 = vld [vmem:[#allocation60_spill] sm:$0xff]  ;;  %v16235_v61 = vpack.c.bf16 %v13698_v56, %v16150_v58  ;;  %s628_s2 = scalar_lea.vmem %s15156_s20, %s8026_s29 }
0x17aa   : > { %v6213_v7 = vsel %vm16226_vm12, %v9792_v5, %v9847_v57  ;;  %10454 = vrot.lane.b32.xlu1 %v16227_v27, %s16192_s0  ;;  %vm15383_vm5 = vmpackc.low %vm13186_vm7, %vm16229_vm3  ;;  %v8478_v42 = vpack.c.bf16 %v16231_v43, %v5660_v33  ;;  %v16232_v57 = vld [vmem:[#allocation56_spill] sm:$0xff]  ;;  %v7011_v5 = vcombine.high %v5329_v2, %v5329_v2  ;;  %v9877_v19 = vunpack.i.h.bf16 %v16233_v23  ;;  %v16234_v45 = vld [vmem:[#allocation65_spill] sm:$0xff]  ;;  %v14147_v33 = vpop.permute.xlu1 %10154 }
0x17ab   : > { %vm16230_vm13 = vmmov %vm16222_vm10  ;;  %7088 = vmatmul.mubr.f32.vlgmr.msra.gmra.mrb[48].mxu0 %v16232_v57  ;;  %v9876_v32 = vunpack.i.l.bf16 %v16233_v23  ;;  %v9932_v8 = vunpack.i.h.bf16 %v16234_v45  ;;  %v9931_v27 = vunpack.i.l.bf16 %v16234_v45  ;;  %16238 = vst [vmem:[#allocation9_spill] sm:$0xff] %v14147_v33  ;;  %v6235_v43 = vsel %vm16226_vm12, %v9956_v44, 0.0  ;;  %v16240_v56 = vld [vmem:[#allocation51_spill] sm:$0xff]  ;;  %v16242_v45 = vld [vmem:[#allocation40_spill] sm:$0xff] }
0x17ac   : > { %v5681_v37 = vsel %vm16230_vm13, 0.0, %v10036_v26  ;;  %8477 = vmatpush1.bf16.msk.msra.mxu0 %vm13317_vm11, %v8475_v21  ;;  %v16236_v26 = vld [vmem:[#allocation10_spill] sm:$0xff]  ;;  %vm16239_vm15 = vmmov %vm16226_vm12  ;;  %v10197_v57 = vunpack.i.h.bf16 %v10195_v11  ;;  %v10196_v23 = vunpack.i.l.bf16 %v10195_v11  ;;  %vm16241_vm13 = vnez %v16240_v56  ;;  %v16245_v11 = vld [vmem:[#allocation80_spill] sm:$0xff]  ;;  %7158 = vmatprep.mubr.f32.mxu0 %v7011_v5 }
0x17ad   : > { %vm16237_vm10 = vnez %v16236_v26  ;;  %v6236_v2 = vsel %vm16239_vm15, %v9957_v25, 0.0  ;;  %8480 = vmatprep.subr.msk.bf16.mxu0 %vm15383_vm5, %v8478_v42  ;;  %v8646_v21 = vpack.c.bf16 %v6213_v7, %v6212_v63  ;;  %v8481_v4 = vpack.c.bf16 %v16245_v11, %v5681_v37  ;;  %v16246_v33 = vld [vmem:[#allocation33_spill] sm:$0xff]  ;;  %v16247_v42 = vld [vmem:[#allocation59_spill] sm:$0xff]  ;;  %vm16250_vm5 = vmmov %vm16226_vm12 }
0x17ae   : > { %8642 = vmatpush1.bf16.msk.msra.mxu1 %vm16237_vm10, %v16235_v61  ;;  %vm16243_vm10 = vnez %v16242_v45  ;;  %v16244_v61 = vld [vmem:[#allocation64_spill] sm:$0xff]  ;;  %10464 = vrot.lane.b32.xlu0 %v16246_v33, %s16192_s0  ;;  %v9881_v29 = vunpack.i.l.bf16 %v16247_v42  ;;  %v10041_v63 = vunpack.i.l.bf16 %v16248_v38  ;;  %vm16249_vm15 = vcmask 146432   ;;  %v14183_v33 = vpop.permute.xlu1 %10164 }
0x17af   : > { %8645 = vmatprep.subr.msk.bf16.mxu1 %vm13880_vm14, %v8643_v28  ;;  %vm15389_vm6 = vmpackc.low %vm16243_vm10, %vm16241_vm13  ;;  %v9902_v26 = vunpack.i.h.bf16 %v16244_v61  ;;  %v9901_v40 = vunpack.i.l.bf16 %v16244_v61  ;;  %10469 = vrot.lane.b32.xlu1 %v16114_v62, %s16065_s27  ;;  %v9882_v28 = vunpack.i.h.bf16 %v16247_v42  ;;  %v5739_v7 = vsel %vm16249_vm15, %v9931_v27, %v9932_v8  ;;  %v14181_v62 = vpop.permute.xlu0 %10199  ;;  %16252 = vst [vmem:[#allocation78_spill] sm:$0xff] %v14183_v33 }
0x17b0   : > { %v8649_v11 = vpack.c.bf16 %v6236_v2, %v6235_v43  ;;  %8483 = vmatpush1.bf16.msk.msra.mxu0 %vm15389_vm6, %v8481_v4  ;;  %16251 = vst [vmem:[#allocation75_spill] sm:$0xff] %v14181_v62  ;;  %vm16253_vm9 = vmmov %vm16249_vm15  ;;  %v10057_v42 = vunpack.i.h.bf16 %v13652_v15  ;;  %vm16273_vm6 = vcmask 146432  }
0x17b1   : > { %v6214_v61 = vsel %vm16226_vm12, %v9901_v40, %v9956_v44  ;;  %v6215_v37 = vsel %vm16250_vm5, %v9902_v26, %v9957_v25  ;;  %v5738_v38 = vsel %vm16253_vm9, %v9876_v32, %v9877_v19  ;;  %vm16254_vm2 = vmmov %vm16253_vm9  ;;  %v16258_v25 = vld [vmem:[#allocation74_spill] sm:$0xff]  ;;  %v16259_v26 = vld [vmem:[#allocation77_spill] sm:$0xff] }
0x17b2   : > { %v5760_v5 = vsel %vm16254_vm2, 0.0, %v9931_v27  ;;  %vm16255_vm15 = vmmov %vm16250_vm5  ;;  %8648 = vmatpush1.bf16.msk.msra.mxu1 %vm13913_vm8, %v8646_v21  ;;  %v9987_v4 = vunpack.i.h.bf16 %v16258_v25  ;;  %v9986_v44 = vunpack.i.l.bf16 %v16258_v25  ;;  %v10012_v2 = vunpack.i.h.bf16 %v16259_v26  ;;  %v16260_v27 = vld [vmem:[#allocation24_spill] sm:$0xff] }
0x17b3   : > { %v6238_v8 = vsel %vm16255_vm15, %v10197_v57, 0.0  ;;  %vm16256_vm12 = vmmov %vm16250_vm5  ;;  %vm16257_vm5 = vnez %v15947_v22  ;;  %v10011_v19 = vunpack.i.l.bf16 %v16259_v26  ;;  %8651 = vmatprep.subr.msk.bf16.mxu1 %vm13880_vm14, %v8649_v11  ;;  %10479 = vrot.lane.b32.xlu0 %v16260_v27, %s16194_s5  ;;  %v8652_v43 = vpack.c.bf16 %v6215_v37, %v6214_v61  ;;  %v14215_v61 = vpop.permute.xlu1 %10179 }
0x17b4   : > { %v6237_v40 = vsel %vm16256_vm12, %v10196_v23, 0.0  ;;  %8486 = vmatprep.subr.msk.bf16.mxu0 %vm16257_vm5, %v8484_v10  ;;  %vm16261_vm9 = vmmov %vm16254_vm2  ;;  %v16262_v10 = vld [vmem:[#allocation20_spill] sm:$0xff]  ;;  %v8490_v62 = vpack.c.bf16 %v5739_v7, %v5738_v38  ;;  %v10056_v25 = vunpack.i.l.bf16 %v13652_v15  ;;  %v16265_v11 = vpack.c.bf16 %v14051_v1, %v14069_v31  ;;  %v14220_v7 = vld [vmem:[%s15154_s18 + $0x18] sm:$0xff] }
0x17b5   : > { %v5741_v21 = vsel %vm16261_vm9, %v10041_v63, %v10042_v53  ;;  %10474 = vrot.lane.b32.xlu1 %v16262_v10, %s16194_s5  ;;  %vm16263_vm2 = vmmov %vm16256_vm12  ;;  %v8655_v56 = vpack.c.bf16 %v6238_v8, %v6237_v40  ;;  %vm16266_vm12 = vnez %v15950_v16  ;;  %v14213_v53 = vpop.permute.xlu0 %10209  ;;  %v16267_v15 = vunpack.i.h.bf16 %v16221_v30 }
0x17b6   : > { %v6216_v33 = vsel %vm16263_vm2, %v10011_v19, %v10196_v23  ;;  %vm16264_vm15 = vmmov %vm16263_vm2  ;;  %8489 = vmatpush1.bf16.msk.msra.mxu0 %vm16266_vm12, %v16265_v11  ;;  %vm16269_vm9 = vcmask 138240   ;;  %v5759_v38 = vsel %vm16273_vm6, 0.0, %v9876_v32  ;;  %8654 = vmatpush1.bf16.msk.msra.mxu1 %vm13913_vm8, %v8652_v43  ;;  %v5762_v32 = vsel %vm16273_vm6, 0.0, %v10041_v63  ;;  %v16278_v43 = vld [vmem:[#allocation35_spill] sm:$0xff]  ;;  %v10545_v63 = vld [vmem:[%s15154_s18 + $0x10] sm:$0xff] }
0x17b7   : > { %v6217_v26 = vsel %vm16264_vm15, %v10012_v2, %v10197_v57  ;;  %v16268_v57 = vunpack.i.l.bf16 %v16221_v30  ;;  %vm16271_vm2 = vmmov %vm16269_vm9  ;;  %8492 = vmatprep.subr.msk.bf16.mxu0 %vm16257_vm5, %v8490_v62  ;;  %v8493_v40 = vpack.c.bf16 %v5760_v5, %v5759_v38  ;;  %v16275_v2 = vld [vmem:[#allocation73_spill] sm:$0xff]  ;;  %8657 = vmatprep.subr.msk.bf16.mxu1 %vm13880_vm14, %v8655_v56  ;;  %v10062_v10 = vunpack.i.h.bf16 %v13725_v34 }
0x17b8   : > { %vm16272_vm15 = vmmov %vm16271_vm2  ;;  %v9991_v30 = vunpack.i.l.bf16 %v16275_v2  ;;  %v8658_v27 = vpack.c.bf16 %v6217_v26, %v6216_v33  ;;  %v10061_v56 = vunpack.i.l.bf16 %v13725_v34  ;;  %v10066_v34 = vunpack.i.l.bf16 %v13689_v18 }
0x17b9   : > { %v14227_v23 = vsel %vm16269_vm9, %v16268_v57, %v16267_v15  ;;  %v16270_v1 = vmov %v16268_v57  ;;  %v14235_v37 = vsel %vm16272_vm15, %v9881_v29, %v9882_v28  ;;  %vm16274_vm13 = vmmov %vm16271_vm2  ;;  %v16277_v28 = vld [vmem:[#allocation34_spill] sm:$0xff]  ;;  %10484 = vrot.lane.b32.xlu1 %v16278_v43, %s16192_s0  ;;  %7230 = vmatmul.mubr.f32.vlgmr.msra.gmra.mrb[20].mxu1 %v10545_v63  ;;  %v14265_v33 = vpop.permute.xlu0 %10224  ;;  %v10067_v15 = vunpack.i.h.bf16 %v13689_v18 }
0x17ba   : > { %v14232_v31 = vsel %vm16271_vm2, 0.0, %v16270_v1  ;;  %v14243_v8 = vsel %vm16274_vm13, 0.0, %v9881_v29  ;;  %vm16276_vm9 = vmmov %vm16273_vm6  ;;  %10489 = vrot.lane.b32.xlu0 %v16277_v28, %s16192_s0  ;;  %v7013_v29 = vcombine.high %v14220_v7, %v14220_v7  ;;  %vm16279_vm13 = vcmask 1031168   ;;  %8495 = vmatpush1.bf16.msk.msra.mxu0 %vm16266_vm12, %v8493_v40  ;;  %v16282_v57 = vld [vmem:[#allocation70_spill] sm:$0xff] }
0x17bb   : > { %v5740_v19 = vsel %vm16276_vm9, %v9986_v44, %v9987_v4  ;;  %v6305_v5 = vsel %vm16279_vm13, %v10057_v42, 0.0  ;;  %vm16280_vm2 = vmmov %vm16279_vm13  ;;  %v8511_v26 = vpack.c.bf16 %v14243_v8, %v14232_v31  ;;  %8660 = vmatpush1.bf16.msk.msra.mxu1 %vm13913_vm8, %v8658_v27  ;;  %v9936_v1 = vunpack.i.l.bf16 %v16282_v57 }
0x17bc   : > { %v8496_v62 = vpack.c.bf16 %v5741_v21, %v5740_v19  ;;  %v6304_v4 = vsel %vm16280_vm2, %v10056_v25, 0.0  ;;  %v14267_v21 = vpop.permute.xlu1 %10189  ;;  %vm16281_vm15 = vmmov %vm16273_vm6  ;;  %v9992_v38 = vunpack.i.h.bf16 %v16275_v2  ;;  %v16283_v19 = vpack.c.bf16 %v14026_v3, %v14041_v54  ;;  %7300 = vmatprep.mubr.f32.mxu1 %v7013_v29 }
0x17bd   : > { %v5761_v11 = vsel %vm16281_vm15, 0.0, %v9986_v44  ;;  %v16284_v44 = vld [vmem:[#allocation32_spill] sm:$0xff]  ;;  %v8508_v18 = vpack.c.bf16 %v14235_v37, %v14227_v23  ;;  %v9937_v28 = vunpack.i.h.bf16 %v16282_v57  ;;  %vm16285_vm9 = vcmask 138240   ;;  %vm16287_vm6 = vmmov %vm16280_vm2  ;;  %v10235_v37 = vpop.permute.xlu0 %10234 }
0x17be   : > { %8498 = vmatprep.subr.msk.bf16.mxu0 %vm16257_vm5, %v8496_v62  ;;  %v8499_v40 = vpack.c.bf16 %v5762_v32, %v5761_v11  ;;  %8663 = vmatprep.subr.msk.bf16.mxu1 %vm13306_vm1, %v16283_v19  ;;  %v14291_v27 = vsel %vm16285_vm9, 0.0, %v9991_v30  ;;  %v8667_v43 = vpack.c.bf16 %v6305_v5, %v6304_v4  ;;  %v10047_v2 = vunpack.i.h.bf16 %v13691_v39  ;;  %v16286_v32 = vld [vmem:[#allocation29_spill] sm:$0xff]  ;;  %vm16288_vm13 = vmmov %vm16280_vm2 }
0x17bf   : > { %10499 = vrot.lane.b32.xlu0 %v16284_v44, %s16194_s5  ;;  %10494 = vrot.lane.b32.xlu1 %v16286_v32, %s16194_s5  ;;  %v6284_v3 = vsel %vm16287_vm6, %v10062_v10, %v10057_v42  ;;  %v6283_v54 = vsel %vm16288_vm13, %v10061_v56, %v10056_v25  ;;  %v10072_v62 = vunpack.i.h.bf16 %v13770_v51  ;;  %v10071_v23 = vunpack.i.l.bf16 %v13770_v51  ;;  %vm16289_vm15 = vmmov %vm16280_vm2 }
0x17c0   : > { %8501 = vmatpush1.bf16.msk.msra.mxu0 %vm16266_vm12, %v8499_v40  ;;  %v14302_v63 = vpop.permute.xlu1 %10204  ;;  %v6307_v5 = vsel %vm16280_vm2, %v10067_v15, 0.0  ;;  %v6306_v4 = vsel %vm16289_vm15, %v10066_v34, 0.0  ;;  %v10046_v29 = vunpack.i.l.bf16 %v13691_v39  ;;  %v16290_v42 = vpack.c.bf16 %v14032_v13, %v14029_v36  ;;  %vm16292_vm6 = vmmov %vm16285_vm9 }
0x17c1   : > { %v10236_v25 = vunpack.i.l.bf16 %v10235_v37  ;;  %v16291_v51 = vpack.c.bf16 %v13969_v59, %v13572_v12  ;;  %v14318_v10 = vsel %vm16285_vm9, 0.0, %v9936_v1  ;;  %v5810_v56 = vsel %vm16292_vm6, %v9991_v30, %v9992_v38  ;;  %vm16293_vm13 = vmmov %vm16292_vm6  ;;  %v7700_v30 = vld [vmem:[#allocation2] ss:$0 sm:$0xff] }
0x17c2   : > { %8666 = vmatpush1.bf16.msk.msra.mxu1 %vm13317_vm11, %v16290_v42  ;;  %v10087_v39 = vunpack.i.h.bf16 %v13723_v20  ;;  %v10086_v11 = vunpack.i.l.bf16 %v13723_v20  ;;  %v5809_v12 = vsel %vm16293_vm13, %v9936_v1, %v9937_v28  ;;  %v8517_v59 = vpack.c.bf16 %v14291_v27, %v14318_v10  ;;  %vm16294_vm15 = vmmov %vm16280_vm2  ;;  %v14340_v1 = vpop.permute.xlu0 %10239 }
0x17c3   : > { %8504 = vmatprep.subr.msk.bf16.mxu0 %vm13638_vm0, %v16291_v51  ;;  %8669 = vmatprep.subr.msk.bf16.mxu1 %vm13306_vm1, %v8667_v43  ;;  %v8670_v13 = vpack.c.bf16 %v6284_v3, %v6283_v54  ;;  %v10081_v36 = vunpack.i.l.bf16 %v13830_v24  ;;  %v8673_v57 = vpack.c.bf16 %v6307_v5, %v6306_v4  ;;  %v6286_v20 = vsel %vm16280_vm2, %v10072_v62, %v10067_v15  ;;  %vm16296_vm9 = vmmov %vm16292_vm6  ;;  %v16310_v51 = vld [vmem:[#allocation52_spill] sm:$0xff] }
0x17c4   : > { %6951 = vrot.lane.b32.xlu0 %v16149_v35, %s16192_s0  ;;  %10504 = vrot.lane.b32.xlu1 %v13027_v14, %s16192_s0  ;;  %v6285_v38 = vsel %vm16294_vm15, %v10071_v23, %v10066_v34  ;;  %v10237_v40 = vunpack.i.h.bf16 %v10235_v37  ;;  %v16295_v35 = vpack.c.bf16 %v13972_v9, %v13929_v52  ;;  %v14342_v19 = vpop.permute.xlu1 %10214  ;;  %v5811_v44 = vsel %vm16296_vm9, %v10046_v29, %v10047_v2  ;;  %vm16297_vm6 = vmmov %vm16280_vm2 }
0x17c5   : > { %v10097_v14 = vunpack.i.h.bf16 %v13768_v41  ;;  %v6308_v28 = vsel %vm16297_vm6, %v10236_v25, 0.0  ;;  %v8514_v52 = vpack.c.bf16 %v5810_v56, %v5809_v12  ;;  %vm16298_vm13 = vcmask 932864   ;;  %vm16301_vm9 = vmmov %vm16297_vm6 }
0x17c6   : > { %8507 = vmatpush1.bf16.msk.msra.mxu0 %vm13665_vm4, %v16295_v35  ;;  %8672 = vmatpush1.bf16.msk.msra.mxu1 %vm13317_vm11, %v8670_v13  ;;  %v6374_v9 = vsel %vm16298_vm13, %v10087_v39, 0.0  ;;  %vm16299_vm2 = vmmov %vm16298_vm13  ;;  %v10096_v34 = vunpack.i.l.bf16 %v13768_v41  ;;  %v10082_v27 = vunpack.i.h.bf16 %v13830_v24  ;;  %v8676_v43 = vpack.c.bf16 %v6286_v20, %v6285_v38  ;;  %v14370_v23 = vpop.permute.xlu0 %10249  ;;  %v16313_v38 = vld [vmem:[#allocation51_spill] sm:$0xff] }
0x17c7   : > { %8510 = vmatprep.subr.msk.bf16.mxu0 %vm13638_vm0, %v8508_v18  ;;  %v6373_v15 = vsel %vm16299_vm2, %v10086_v11, 0.0  ;;  %8675 = vmatprep.subr.msk.bf16.mxu1 %vm13306_vm1, %v8673_v57  ;;  %vm16300_vm15 = vmmov %vm16299_vm2  ;;  %v10092_v32 = vunpack.i.h.bf16 %v13857_v0  ;;  %v10091_v18 = vunpack.i.l.bf16 %v13857_v0  ;;  %v6287_v3 = vsel %vm16301_vm9, %v10237_v40, %v10236_v25 }
0x17c8   : > { %7001 = vperm.xlu0 %8951, %v7700_v30   ;;  %v6372_v2 = vsel %vm16300_vm15, %v10081_v36, 0.0  ;;  %6949 = vrot.lane.b32.xlu1 %v16150_v58, %s16192_s0  ;;  %v10217_v62 = vunpack.i.h.bf16 %v14342_v19  ;;  %v10216_v24 = vunpack.i.l.bf16 %v14342_v19  ;;  %v14372_v37 = vpop.permute.xlu1 %10219  ;;  %vm16302_vm6 = vcmask 138240   ;;  %v16303_v58 = vld [vmem:[#allocation81_spill] sm:$0xff]  ;;  %vm16304_vm13 = vmmov %vm16299_vm2 }
0x17c9   : > { %v8679_v54 = vpack.c.bf16 %v6372_v2, %v6308_v28  ;;  %v5832_v0 = vsel %vm16302_vm6, 0.0, %v10046_v29  ;;  %v8520_v5 = vpack.c.bf16 %v16303_v58, %v5811_v44  ;;  %v8685_v4 = vpack.c.bf16 %v6374_v9, %v6373_v15  ;;  %vm16305_vm15 = vmmov %vm16299_vm2  ;;  %v16316_v19 = vld [vmem:[#allocation5_spill] sm:$0xff] }
0x17ca   : > { %8513 = vmatpush1.bf16.msk.msra.mxu0 %vm13665_vm4, %v8511_v26  ;;  %v6376_v42 = vsel %vm16304_vm13, %v10097_v14, 0.0  ;;  %8678 = vmatpush1.bf16.msk.msra.mxu1 %vm13317_vm11, %v8676_v43  ;;  %v6375_v31 = vsel %vm16299_vm2, %v10096_v34, 0.0  ;;  %v6351_v8 = vsel %vm16305_vm15, %v10082_v27, %v10081_v36  ;;  %v10212_v26 = vunpack.i.h.bf16 %v14213_v53  ;;  %vm16306_vm9 = vmpackc.low %vm13186_vm7, %vm16229_vm3  ;;  %v10255_v30 = vpop.permute.xlu0 %10254 }
0x17cb   : > { %8516 = vmatprep.subr.msk.bf16.mxu0 %vm13638_vm0, %v8514_v52  ;;  %v10211_v29 = vunpack.i.l.bf16 %v14213_v53  ;;  %8681 = vmatprep.subr.msk.bf16.mxu1 %vm16306_vm9, %v8679_v54  ;;  %vm16307_vm6 = vcmask 130048   ;;  %v10112_v10 = vunpack.i.h.bf16 %v16310_v51  ;;  %v10111_v56 = vunpack.i.l.bf16 %v16310_v51  ;;  %vm16311_vm15 = vmmov %vm16299_vm2 }
0x17cc   : > { %vm14393_vm13 = vmneg %vm16307_vm6  ;;  %v6353_v12 = vsel %vm16299_vm2, %v10092_v32, %v10087_v39  ;;  %v8682_v13 = vpack.c.bf16 %v6351_v8, %v6287_v3  ;;  %v6352_v53 = vsel %vm16311_vm15, %v10091_v18, %v10086_v11  ;;  %v10101_v36 = vunpack.i.l.bf16 %v13901_v60  ;;  %v10230_v57 = vpop.permute.xlu1 %10229  ;;  %v16318_v60 = vld [vmem:[#allocation3_spill] sm:$0xff] }
0x17cd   : > { %vm16312_vm7 = vmmov %vm16307_vm6  ;;  %vm16314_vm9 = vnez %v16313_v38  ;;  %v10257_v39 = vunpack.i.h.bf16 %v10255_v30  ;;  %v10256_v40 = vunpack.i.l.bf16 %v10255_v30  ;;  %v10232_v11 = vunpack.i.h.bf16 %v10230_v57 }
0x17ce   : > { %8519 = vmatpush1.bf16.msk.msra.mxu0 %vm13665_vm4, %v8517_v59  ;;  %v5877_v20 = vsel %vm16312_vm7, %v10216_v24, %v10217_v62  ;;  %vm16315_vm6 = vmpackc.low %vm16243_vm10, %vm16314_vm9  ;;  %v10231_v35 = vunpack.i.l.bf16 %v10230_v57  ;;  %vm16317_vm2 = vnez %v16316_v19  ;;  %vm16319_vm15 = vnez %v16318_v60  ;;  %v16320_v59 = vld [vmem:[#allocation36_spill] sm:$0xff] }
0x17cf   : > { %8684 = vmatpush1.bf16.msk.msra.mxu1 %vm16315_vm6, %v8682_v13  ;;  %8522 = vmatprep.subr.msk.bf16.mxu0 %vm16317_vm2, %v8520_v5  ;;  %vm8524_vm11 = vmpackc.low %vm14393_vm13, %vm16319_vm15  ;;  %v16321_v44 = vunpack.i.l.bf16 %v16320_v59  ;;  %v10227_v45 = vunpack.i.h.bf16 %v14265_v33  ;;  %v10226_v52 = vunpack.i.l.bf16 %v14265_v33  ;;  %v8691_v15 = vpack.c.bf16 %v6376_v42, %v6375_v31  ;;  %v14431_v33 = vpop.permute.xlu0 %10259  ;;  %v16335_v13 = vld [vmem:[#allocation31_spill] sm:$0xff] }
0x17d0   : > { %8687 = vmatprep.subr.msk.bf16.mxu1 %vm16257_vm5, %v8685_v4  ;;  %vm16322_vm10 = vmmov %vm16312_vm7  ;;  %v8688_v27 = vpack.c.bf16 %v6353_v12, %v6352_v53  ;;  %vm16323_vm7 = vcmask 924672   ;;  %vm16324_vm6 = vcmask 932864   ;;  %v14433_v3 = vpop.permute.xlu1 %10244  ;;  %v8528_v31 = vpack.c.bf16 %v10216_v24, %v10211_v29 }
0x17d1   : > { %v8523_v28 = vpack.c.bf16 %v16321_v44, %v5832_v0  ;;  %v5876_v9 = vsel %vm16322_vm10, %v10211_v29, %v10212_v26  ;;  %v6443_v2 = vsel %vm16323_vm7, %v10112_v10, 0.0  ;;  %v6355_v32 = vsel %vm16324_vm6, %v10102_v46, %v10097_v14  ;;  %vm16325_vm2 = vmmov %vm16324_vm6  ;;  %v16328_v0 = vld [vmem:[#allocation66_spill] sm:$0xff] }
0x17d2   : > { %v8526_v43 = vpack.c.bf16 %v5877_v20, %v5876_v9  ;;  %v6354_v18 = vsel %vm16325_vm2, %v10101_v36, %v10096_v34  ;;  %vm16326_vm15 = vmmov %vm16322_vm10  ;;  %v10122_v58 = vunpack.i.h.bf16 %v16328_v0  ;;  %v16333_v34 = vld [vmem:[#allocation46_spill] sm:$0xff]  ;;  %v10121_v26 = vunpack.i.l.bf16 %v16328_v0  ;;  %v16343_v9 = vld [vmem:[#allocation21_spill] sm:$0xff] }
0x17d3   : > { %8525 = vmatpush1.bf16.msk.msra.mxu0 %vm8524_vm11, %v8523_v28  ;;  %v5879_v54 = vsel %vm16326_vm15, %v10231_v35, %v10232_v11  ;;  %vm16327_vm10 = vmmov %vm16323_vm7  ;;  %8690 = vmatpush1.bf16.msk.msra.mxu1 %vm16266_vm12, %v8688_v27  ;;  %v10107_v4 = vunpack.i.h.bf16 %v16333_v34  ;;  %v10106_v42 = vunpack.i.l.bf16 %v16333_v34  ;;  %v8694_v12 = vpack.c.bf16 %v6355_v32, %v6354_v18  ;;  %v14463_v24 = vpop.permute.xlu0 %10269  ;;  %v16342_v44 = vld [vmem:[#allocation42_spill] sm:$0xff] }
0x17d4   : > { %v6442_v62 = vsel %vm16327_vm10, %v10111_v56, 0.0  ;;  %vm16329_vm7 = vmmov %vm16325_vm2  ;;  %8527 = vmatprep.subr.bf16.mxu0 %v8526_v43  ;;  %8693 = vmatprep.subr.msk.bf16.mxu1 %vm16257_vm5, %v8691_v15  ;;  %v10117_v25 = vunpack.i.h.bf16 %v16335_v13  ;;  %v10116_v46 = vunpack.i.l.bf16 %v16335_v13  ;;  %v14465_v29 = vpop.permute.xlu1 %10264  ;;  %v8533_v20 = vpack.c.bf16 %v10231_v35, %v10226_v52  ;;  %v16352_v13 = vld [vmem:[#allocation58_spill] sm:$0xff] }
0x17d5   : > { %v6378_v5 = vsel %vm16329_vm7, %v10257_v39, 0.0  ;;  %vm16330_vm1 = vmmov %vm16325_vm2  ;;  %v8703_v11 = vpack.c.bf16 %v6443_v2, %v6442_v62  ;;  %v10127_v28 = vunpack.i.h.bf16 %v16342_v44  ;;  %v10126_v35 = vunpack.i.l.bf16 %v16342_v44  ;;  %v16346_v2 = vld [vmem:[#allocation61_spill] sm:$0xff] }
0x17d6   : > { %v6377_v41 = vsel %vm16330_vm1, %v10256_v40, 0.0  ;;  %vm14447_vm11 = vmpackc.low %vm14393_vm13, %vm14393_vm13  ;;  %v10137_v15 = vunpack.i.h.bf16 %v16343_v9  ;;  %v10136_v27 = vunpack.i.l.bf16 %v16343_v9  ;;  %v10142_v32 = vunpack.i.h.bf16 %v16346_v2 }
0x17d7   : > { %vm16334_vm1 = vmmov %vm16326_vm15  ;;  %v8697_v57 = vpack.c.bf16 %v6378_v5, %v6377_v41  ;;  %8530 = vmatpush1.bf16.msk.msra.mxu0 %vm14447_vm11, %v8528_v31  ;;  %8696 = vmatpush1.bf16.msk.msra.mxu1 %vm16266_vm12, %v8694_v12  ;;  %v10141_v18 = vunpack.i.l.bf16 %v16346_v2  ;;  %v15399_v9 = vunpack.i.l.bf16 %v14370_v23 }
0x17d8   : > { %v5878_v8 = vsel %vm16334_vm1, %v10226_v52, %v10227_v45  ;;  %vm16336_vm13 = vmmov %vm16325_vm2  ;;  %v14483_v45 = vpop.permute.xlu0 %10284  ;;  %v14485_v52 = vpop.permute.xlu1 %10274 }
0x17d9   : > { %v8531_v53 = vpack.c.bf16 %v5879_v54, %v5878_v8  ;;  %v6356_v36 = vsel %vm16336_vm13, %v10106_v42, %v10256_v40  ;;  %vm16337_vm6 = vmmov %vm16325_vm2  ;;  %8699 = vmatprep.subr.msk.bf16.mxu1 %vm16257_vm5, %v8697_v57 }
0x17da   : > { %v6357_v30 = vsel %vm16337_vm6, %v10107_v4, %v10257_v39  ;;  %vm16338_vm2 = vmmov %vm16327_vm10 }
0x17db   : > { %8532 = vmatprep.subr.bf16.mxu0 %v8531_v53  ;;  %v6445_v40 = vsel %vm16338_vm2, %v10122_v58, 0.0  ;;  %vm16339_vm15 = vmmov %vm16338_vm2  ;;  %v8700_v19 = vpack.c.bf16 %v6357_v30, %v6356_v36  ;;  %v10146_v53 = vunpack.i.l.bf16 %v16352_v13  ;;  %v16353_v36 = vld [vmem:[#allocation4_spill] sm:$0xff]  ;;  %v16356_v30 = vld [vmem:[#allocation9_spill] sm:$0xff] }
0x17dc   : > { %v6444_v39 = vsel %vm16339_vm15, %v10121_v26, 0.0  ;;  %vm16340_vm10 = vmmov %vm16338_vm2  ;;  %8535 = vmatpush1.bf16.msk.msra.mxu0 %vm14447_vm11, %v8533_v20  ;;  %v10295_v54 = vpop.permute.xlu0 %10294  ;;  %v14497_v62 = vpop.permute.xlu1 %10279  ;;  %v10157_v57 = vunpack.i.h.bf16 %v16356_v30  ;;  %v10156_v20 = vunpack.i.l.bf16 %v16356_v30  ;;  %v10182_v30 = vunpack.i.h.bf16 %v14215_v61 }
0x17dd   : > { %v6422_v60 = vsel %vm16340_vm10, %v10117_v25, %v10112_v10  ;;  %vm16341_vm7 = vmmov %vm16338_vm2  ;;  %8702 = vmatpush1.bf16.msk.msra.mxu1 %vm16266_vm12, %v8700_v19  ;;  %v8709_v51 = vpack.c.bf16 %v6445_v40, %v6444_v39  ;;  %v10296_v41 = vunpack.i.l.bf16 %v10295_v54  ;;  %v10297_v31 = vunpack.i.h.bf16 %v10295_v54 }
0x17de   : > { %v6421_v59 = vsel %vm16341_vm7, %v10116_v46, %v10111_v56  ;;  %8705 = vmatprep.subr.msk.bf16.mxu1 %vm13638_vm0, %v8703_v11  ;;  %vm16344_vm1 = vmmov %vm16338_vm2  ;;  %v10147_v25 = vunpack.i.h.bf16 %v16352_v13  ;;  %v16370_v13 = vld [vmem:[#allocation75_spill] sm:$0xff] }
0x17df   : > { %v8706_v10 = vpack.c.bf16 %v6422_v60, %v6421_v59  ;;  %v6424_v56 = vsel %vm16344_vm1, %v10127_v28, %v10122_v58  ;;  %vm16345_vm13 = vmmov %vm16344_vm1  ;;  %v16357_v60 = vld [vmem:[#allocation43_spill] sm:$0xff] }
0x17e0   : > { %v6423_v43 = vsel %vm16345_vm13, %v10126_v35, %v10121_v26  ;;  %vm16347_vm6 = vmmov %vm16344_vm1  ;;  %v14507_v8 = vpop.permute.xlu0 %10299  ;;  %v14509_v26 = vpop.permute.xlu1 %10289  ;;  %vm16355_vm13 = vcmask 916480   ;;  %v10152_v59 = vunpack.i.h.bf16 %v16357_v60  ;;  %v10151_v44 = vunpack.i.l.bf16 %v16357_v60  ;;  %v16373_v60 = vld [vmem:[#allocation67_spill] sm:$0xff] }
0x17e1   : > { %v6447_v0 = vsel %vm16347_vm6, %v10137_v15, 0.0  ;;  %vm16348_vm2 = vmmov %vm16344_vm1  ;;  %8708 = vmatpush1.bf16.msk.msra.mxu1 %vm13665_vm4, %v8706_v10  ;;  %v8712_v58 = vpack.c.bf16 %v6424_v56, %v6423_v43 }
0x17e2   : > { %v6446_v5 = vsel %vm16348_vm2, %v10136_v27, 0.0  ;;  %8711 = vmatprep.subr.msk.bf16.mxu1 %vm13638_vm0, %v8709_v51  ;;  %vm16349_vm15 = vmmov %vm16344_vm1  ;;  %v6427_v11 = vsel %vm16348_vm2, %v10297_v31, %v10296_v41  ;;  %v16363_v51 = vld [vmem:[#allocation78_spill] sm:$0xff] }
0x17e3   : > { %v8715_v34 = vpack.c.bf16 %v6447_v0, %v6446_v5  ;;  %v6426_v4 = vsel %vm16349_vm15, %v10142_v32, %v10137_v15  ;;  %vm16350_vm10 = vmmov %vm16344_vm1  ;;  %v8727_v15 = vpack.c.bf16 %v10157_v57, %v10152_v59  ;;  %v10167_v10 = vunpack.i.h.bf16 %v16363_v51  ;;  %v16366_v0 = vld [vmem:[#allocation6_spill] sm:$0xff] }
0x17e4   : > { %v6425_v42 = vsel %vm16350_vm10, %v10141_v18, %v10136_v27  ;;  %vm16351_vm7 = vmmov %vm16344_vm1  ;;  %vm16354_vm1 = vnez %v16353_v36  ;;  %v14524_v39 = vpop.permute.xlu0 %10309  ;;  %v14526_v19 = vpop.permute.xlu1 %10304  ;;  %v10166_v56 = vunpack.i.l.bf16 %v16363_v51  ;;  %v16365_v18 = vld [vmem:[#allocation47_spill] sm:$0xff] }
0x17e5   : > { %v6448_v12 = vsel %vm16351_vm7, %v10296_v41, 0.0  ;;  %8714 = vmatpush1.bf16.msk.msra.mxu1 %vm13665_vm4, %v8712_v58  ;;  %v8718_v46 = vpack.c.bf16 %v6426_v4, %v6425_v42  ;;  %vm8722_vm6 = vmpackc.low %vm16355_vm13, %vm16354_vm1  ;;  %v10162_v54 = vunpack.i.h.bf16 %v16365_v18  ;;  %v10161_v5 = vunpack.i.l.bf16 %v16365_v18  ;;  %v16368_v41 = vld [vmem:[#allocation62_spill] sm:$0xff]  ;;  %v16369_v4 = vld [vmem:[#allocation63_spill] sm:$0xff] }
0x17e6   : > { %8717 = vmatprep.subr.msk.bf16.mxu1 %vm13638_vm0, %v8715_v34  ;;  %v8721_v40 = vpack.c.bf16 %v10147_v25, %v6448_v12  ;;  %vm16358_vm15 = vmmov %vm16355_vm13  ;;  %v10177_v58 = vunpack.i.h.bf16 %v16368_v41  ;;  %v10176_v34 = vunpack.i.l.bf16 %v16368_v41  ;;  %v10187_v42 = vunpack.i.h.bf16 %v16369_v4 }
0x17e7   : > { %v6491_v28 = vsel %vm16358_vm15, %v10146_v53, %v10147_v25  ;;  %vm16359_vm10 = vmmov %vm16355_vm13  ;;  %v10186_v31 = vunpack.i.l.bf16 %v16369_v4  ;;  %v10202_v25 = vunpack.i.h.bf16 %v16370_v13  ;;  %v10201_v53 = vunpack.i.l.bf16 %v16370_v13 }
0x17e8   : > { %v8724_v35 = vpack.c.bf16 %v6491_v28, %v6427_v11  ;;  %vm14535_vm7 = vmpackc.low %vm16359_vm10, %vm16359_vm10  ;;  %v14542_v43 = vpop.permute.xlu0 %10319  ;;  %v14544_v2 = vpop.permute.xlu1 %10314  ;;  %v10206_v13 = vunpack.i.l.bf16 %v14302_v63  ;;  %vm16420_vm0 = vcmask 121856  }
0x17e9   : > { %8720 = vmatpush1.bf16.msk.msra.mxu1 %vm13665_vm4, %v8718_v46  ;;  %vm16362_vm1 = vmmov %vm16359_vm10  ;;  %v8732_v46 = vpack.c.bf16 %v10167_v10, %v10162_v54  ;;  %vm16374_vm10 = vcmask 908288  }
0x17ea   : > { %8723 = vmatprep.subr.msk.bf16.mxu1 %vm8722_vm6, %v8721_v40  ;;  %v6493_v27 = vsel %vm16362_vm1, %v10156_v20, %v10157_v57  ;;  %vm16364_vm13 = vmmov %vm16362_vm1  ;;  %vm16367_vm6 = vnez %v16366_v0  ;;  %v10181_v57 = vunpack.i.l.bf16 %v14215_v61  ;;  %v6569_v28 = vsel %vm16374_vm10, %v10177_v58, 0.0 }
0x17eb   : > { %v6492_v32 = vsel %vm16364_vm13, %v10151_v44, %v10152_v59  ;;  %vm16371_vm2 = vmmov %vm16362_vm1  ;;  %v10172_v59 = vunpack.i.h.bf16 %v16373_v60  ;;  %v10171_v44 = vunpack.i.l.bf16 %v16373_v60  ;;  %v10192_v0 = vunpack.i.h.bf16 %v14267_v21 }
0x17ec   : > { %v8730_v12 = vpack.c.bf16 %v6493_v27, %v6492_v32  ;;  %v6495_v36 = vsel %vm16371_vm2, %v10166_v56, %v10167_v10  ;;  %v14562_v20 = vpop.permute.xlu0 %10339  ;;  %v14564_v11 = vpop.permute.xlu1 %10324  ;;  %vm16372_vm15 = vmmov %vm16362_vm1 }
0x17ed   : > { %8726 = vmatpush1.bf16.msk.msra.mxu1 %vm16367_vm6, %v8724_v35  ;;  %v6494_v40 = vsel %vm16372_vm15, %v10161_v5, %v10162_v54  ;;  %vm16375_vm1 = vmmov %vm16374_vm10  ;;  %v10191_v5 = vunpack.i.l.bf16 %v14267_v21 }
0x17ee   : > { %8729 = vmatprep.subr.msk.bf16.mxu1 %vm14535_vm7, %v8727_v15  ;;  %v6568_v35 = vsel %vm16375_vm1, %v10176_v34, 0.0  ;;  %vm16376_vm13 = vmmov %vm16375_vm1  ;;  %v8735_v27 = vpack.c.bf16 %v6495_v36, %v6494_v40 }
0x17ef   : > { %v14574_v61 = vsel %vm16376_vm13, %v10187_v42, 0.0  ;;  %vm16377_vm6 = vmmov %vm16375_vm1  ;;  %v8742_v36 = vpack.c.bf16 %v6569_v28, %v6568_v35  ;;  %v14611_v28 = vld [vmem:[%s15154_s18 + $0x20] sm:$0xff] }
0x17f0   : > { %v6570_v15 = vsel %vm16377_vm6, %v10186_v31, 0.0  ;;  %vm16378_vm2 = vmmov %vm16375_vm1  ;;  %v14585_v18 = vpop.permute.xlu0 %10354  ;;  %v10330_v54 = vpop.permute.xlu1 %10329  ;;  %16386 = vst [vmem:[#allocation30_spill] sm:$0xff] %v14611_v28 }
0x17f1   : > { %8731 = vmatpush1.bf16.msra.mxu1 %v8730_v12  ;;  %v14578_v51 = vsel %vm16378_vm2, %v10202_v25, 0.0  ;;  %vm16379_vm15 = vmmov %vm16375_vm1  ;;  %v10332_v41 = vunpack.i.h.bf16 %v10330_v54  ;;  %v10331_v4 = vunpack.i.l.bf16 %v10330_v54  ;;  %v10207_v12 = vunpack.i.h.bf16 %v14302_v63 }
0x17f2   : > { %8734 = vmatprep.subr.msk.bf16.mxu1 %vm14535_vm7, %v8732_v46  ;;  %v14581_v10 = vsel %vm16379_vm15, %v10201_v53, 0.0  ;;  %vm16380_vm4 = vmmov %vm16375_vm1  ;;  %v10242_v46 = vunpack.i.h.bf16 %v14340_v1  ;;  %v8748_v40 = vpack.c.bf16 %v14574_v61, %v6570_v15  ;;  %v10262_v15 = vunpack.i.h.bf16 %v14431_v33 }
0x17f3   : > { %v6548_v56 = vsel %vm16380_vm4, %v10182_v30, %v10177_v58  ;;  %vm16381_vm10 = vmmov %vm16375_vm1  ;;  %v10241_v58 = vunpack.i.l.bf16 %v14340_v1  ;;  %vm16382_vm4 = vcmask 916480   ;;  %v8737_v30 = vpack.c.bf16 %v10332_v41, %v10172_v59 }
0x17f4   : > { %v6547_v32 = vsel %vm16381_vm10, %v10181_v57, %v10176_v34  ;;  %v6496_v34 = vsel %vm16382_vm4, %v10171_v44, %v10172_v59  ;;  %vm16383_vm1 = vmmov %vm16382_vm4  ;;  %v8754_v21 = vpack.c.bf16 %v14578_v51, %v14581_v10  ;;  %v14598_v54 = vpop.permute.xlu0 %10359  ;;  %v14600_v63 = vpop.permute.xlu1 %10334  ;;  %v10222_v44 = vunpack.i.h.bf16 %v14372_v37 }
0x17f5   : > { %8736 = vmatpush1.bf16.msra.mxu1 %v8735_v27  ;;  %v6497_v57 = vsel %vm16383_vm1, %v10331_v4, %v10332_v41  ;;  %v8745_v60 = vpack.c.bf16 %v6548_v56, %v6547_v32  ;;  %vm16384_vm13 = vmmov %vm16378_vm2  ;;  %v10221_v59 = vunpack.i.l.bf16 %v14372_v37  ;;  %v14614_v35 = vsel %vm16378_vm2, %v10207_v12, %v10202_v25 }
0x17f6   : > { %v8740_v27 = vpack.c.bf16 %v6497_v57, %v6496_v34  ;;  %v6550_v55 = vsel %vm16384_vm13, %v10192_v0, %v10187_v42  ;;  %vm16385_vm6 = vmmov %vm16378_vm2  ;;  %8739 = vmatprep.subr.msk.bf16.mxu1 %vm14535_vm7, %v8737_v30  ;;  %vm16388_vm10 = vcmask 900096   ;;  %v10252_v37 = vunpack.i.h.bf16 %v14370_v23 }
0x17f7   : > { %v6549_v1 = vsel %vm16385_vm6, %v10191_v5, %v10186_v31  ;;  %vm16387_vm15 = vmmov %vm16378_vm2  ;;  %v14620_v42 = vsel %vm16388_vm10, %v10242_v46, 0.0  ;;  %v10261_v51 = vunpack.i.l.bf16 %v14431_v33  ;;  %v10246_v10 = vunpack.i.l.bf16 %v14433_v3 }
0x17f8   : > { %v14617_v61 = vsel %vm16387_vm15, %v10206_v13, %v10201_v53  ;;  %vm16389_vm4 = vmmov %vm16388_vm10  ;;  %v8751_v25 = vpack.c.bf16 %v6550_v55, %v6549_v1  ;;  %v10247_v53 = vunpack.i.h.bf16 %v14433_v3  ;;  %v10370_v56 = vpop.permute.xlu0 %10369  ;;  %v14633_v32 = vpop.permute.xlu1 %10344  ;;  %v7014_v0 = vcombine.high %v14611_v28, %v14611_v28 }
0x17f9   : > { %v14623_v31 = vsel %vm16389_vm4, %v10241_v58, 0.0  ;;  %8741 = vmatpush1.bf16.msra.mxu1 %v8740_v27  ;;  %v8757_v5 = vpack.c.bf16 %v14614_v35, %v14617_v61  ;;  %vm16390_vm7 = vmmov %vm16389_vm4  ;;  %v10267_v55 = vunpack.i.h.bf16 %v14465_v29  ;;  %v10266_v4 = vunpack.i.l.bf16 %v14465_v29 }
0x17fa   : > { %8744 = vmatprep.subr.msk.bf16.mxu1 %vm13880_vm14, %v8742_v36  ;;  %v14642_v41 = vsel %vm16390_vm7, %v10222_v44, %v10221_v59  ;;  %v10277_v3 = vunpack.i.h.bf16 %v14485_v52  ;;  %v10276_v12 = vunpack.i.l.bf16 %v14485_v52  ;;  %v10371_v13 = vunpack.i.l.bf16 %v10370_v56  ;;  %vm16391_vm1 = vmmov %vm16389_vm4 }
0x17fb   : > { %v6638_v34 = vsel %vm16391_vm1, %v10221_v59, 0.0  ;;  %vm16392_vm13 = vmmov %vm16391_vm1  ;;  %vm16394_vm2 = vcmask 130048   ;;  %v10271_v27 = vunpack.i.l.bf16 %v14463_v24  ;;  %v10287_v59 = vunpack.i.h.bf16 %v14483_v45 }
0x17fc   : > { %v14652_v36 = vsel %vm16392_vm13, %v10262_v15, 0.0  ;;  %vm16393_vm6 = vmmov %vm16391_vm1  ;;  %v14662_v29 = vsel %vm16394_vm2, %v15399_v9, %v10252_v37  ;;  %v14672_v1 = vpop.permute.xlu0 %10374  ;;  %v14674_v44 = vpop.permute.xlu1 %10349  ;;  %v10286_v35 = vunpack.i.l.bf16 %v14483_v45  ;;  %v10302_v45 = vunpack.i.h.bf16 %v14507_v8 }
0x17fd   : > { %8747 = vmatpush1.bf16.msk.msra.mxu1 %vm13913_vm8, %v8745_v60  ;;  %v14655_v30 = vsel %vm16393_vm6, %v10261_v51, 0.0  ;;  %vm16395_vm15 = vmmov %vm16391_vm1  ;;  %v10272_v60 = vunpack.i.h.bf16 %v14463_v24  ;;  %vm16401_vm6 = vcmask 908288   ;;  %v10281_v9 = vunpack.i.l.bf16 %v14497_v62 }
0x17fe   : > { %8750 = vmatprep.subr.msk.bf16.mxu1 %vm13880_vm14, %v8748_v40  ;;  %v14665_v52 = vsel %vm16395_vm15, %v10247_v53, %v10242_v46  ;;  %vm16396_vm10 = vmmov %vm16391_vm1  ;;  %v10372_v46 = vunpack.i.h.bf16 %v10370_v56  ;;  %v6574_v37 = vsel %vm16401_vm6, %v10371_v13, 0.0  ;;  %v8772_v53 = vpack.c.bf16 %v14652_v36, %v14655_v30 }
0x17ff   : > { %v14668_v57 = vsel %vm16396_vm10, %v10246_v10, %v10241_v58  ;;  %vm16397_vm4 = vmmov %vm16391_vm1  ;;  %v10317_v30 = vunpack.i.h.bf16 %v14544_v2 }
0x1800   : > { %v14677_v40 = vsel %vm16397_vm4, %v10267_v55, %v10262_v15  ;;  %7301 = vmatmul.mubr.f32.vlgmr.msra.gmra.mrb[20].mxu1 %v14220_v7  ;;  %vm16398_vm7 = vmmov %vm16391_vm1  ;;  %vm16399_vm1 = vcmask 121856   ;;  %v10301_v15 = vunpack.i.l.bf16 %v14507_v8  ;;  %v10292_v7 = vunpack.i.h.bf16 %v14509_v26  ;;  %v14710_v8 = vpop.permute.xlu0 %10389 }
0x1801   : > { %v14683_v58 = vsel %vm16398_vm7, %v10266_v4, %v10261_v51  ;;  %v14686_v61 = vsel %vm16399_vm1, %v10276_v12, %v10277_v3  ;;  %vm16400_vm13 = vmmov %vm16399_vm1  ;;  %8753 = vmatpush1.bf16.msk.msra.mxu1 %vm13913_vm8, %v8751_v25  ;;  %7371 = vmatprep.mubr.f32.mxu1 %v7014_v0  ;;  %v10291_v51 = vunpack.i.l.bf16 %v14509_v26  ;;  %v8769_v10 = vpack.c.bf16 %v14665_v52, %v14668_v57  ;;  %v14712_v0 = vpop.permute.xlu1 %10364  ;;  %v16404_v26 = vld [vmem:[#allocation8_spill] sm:$0xff] }
0x1802   : > { %v14689_v24 = vsel %vm16400_vm13, 0.0, %v10276_v12  ;;  %8756 = vmatprep.subr.msk.bf16.mxu1 %vm13880_vm14, %v8754_v21  ;;  %vm16402_vm2 = vmmov %vm16399_vm1  ;;  %vm16405_vm10 = vnez %v16404_v26  ;;  %v8760_v3 = vpack.c.bf16 %v6638_v34, %v6574_v37  ;;  %v10282_v52 = vunpack.i.h.bf16 %v14497_v62 }
0x1803   : > { %v14705_v25 = vsel %vm16402_vm2, %v10271_v27, %v10272_v60  ;;  %vm16403_vm15 = vmmov %vm16399_vm1  ;;  %v10307_v60 = vunpack.i.h.bf16 %v14526_v19  ;;  %v10316_v21 = vunpack.i.l.bf16 %v14544_v2  ;;  %v10311_v62 = vunpack.i.l.bf16 %v14524_v39 }
0x1804   : > { %v14708_v56 = vsel %vm16403_vm15, 0.0, %v10271_v27  ;;  %vm15402_vm4 = vmpackc.low %vm16229_vm3, %vm16405_vm10  ;;  %v16412_v27 = vld [vmem:[#allocation7_spill] sm:$0xff]  ;;  %v10400_v37 = vpop.permute.xlu0 %10399 }
0x1805   : > { %vm16406_vm7 = vmmov %vm16399_vm1  ;;  %8759 = vmatpush1.bf16.msk.msra.mxu1 %vm13913_vm8, %v8757_v5  ;;  %v10306_v5 = vunpack.i.l.bf16 %v14526_v19  ;;  %v10402_v19 = vunpack.i.h.bf16 %v10400_v37  ;;  %v10401_v28 = vunpack.i.l.bf16 %v10400_v37 }
0x1806   : > { %v14721_v55 = vsel %vm16406_vm7, %v10286_v35, %v10287_v59  ;;  %vm16407_vm1 = vmmov %vm16401_vm6  ;;  %vm16409_vm6 = vcmask 801792   ;;  %8762 = vmatprep.subr.msk.bf16.mxu1 %vm15402_vm4, %v8760_v3  ;;  %v10322_v59 = vunpack.i.h.bf16 %v14542_v43 }
0x1807   : > { %v6553_v4 = vsel %vm16407_vm1, %v10372_v46, %v10371_v13  ;;  %vm16408_vm13 = vmmov %vm16402_vm2  ;;  %v14735_v57 = vsel %vm16409_vm6, %v10302_v45, 0.0 }
0x1808   : > { %v14725_v12 = vsel %vm16408_vm13, 0.0, %v10286_v35  ;;  %vm16410_vm2 = vmmov %vm16409_vm6  ;;  %v10321_v35 = vunpack.i.l.bf16 %v14542_v43  ;;  %v8763_v46 = vpack.c.bf16 %v14642_v41, %v6553_v4  ;;  %v14761_v33 = vsel %vm16408_vm13, 0.0, %v10291_v51 }
0x1809   : > { %v14738_v13 = vsel %vm16410_vm2, %v10301_v15, 0.0  ;;  %vm16411_vm15 = vmmov %vm16406_vm7  ;;  %vm16413_vm7 = vnez %v16412_v27  ;;  %v10312_v41 = vunpack.i.h.bf16 %v14524_v39  ;;  %vm16415_vm6 = vnez %v15973_v50  ;;  %v5333_v50 = vld [vmem:[%s15154_s18 + $0x28] sm:$0xf] }
0x180a   : > { %v14741_v34 = vsel %vm16411_vm15, %v10291_v51, %v10292_v7  ;;  %vm15401_vm1 = vmpackc.low %vm16314_vm9, %vm16413_vm7  ;;  %v10380_v7 = vpop.permute.xlu1 %10379  ;;  %v16414_v51 = vpack.c.bf16 %v14620_v42, %v14623_v31  ;;  %v14780_v4 = vsel %vm16410_vm2, %v10307_v60, %v10302_v45  ;;  %v14797_v31 = vsel %vm16420_vm0, %v10316_v21, %v10317_v30 }
0x180b   : > { %v10382_v3 = vunpack.i.h.bf16 %v10380_v7  ;;  %v10381_v36 = vunpack.i.l.bf16 %v10380_v7  ;;  %8765 = vmatpush1.bf16.msk.msra.mxu1 %vm15401_vm1, %v8763_v46  ;;  %v8547_v2 = vpack.c.bf16 %v14741_v34, %v14721_v55  ;;  %vm16416_vm15 = vmmov %vm16410_vm2  ;;  %v14788_v55 = vpop.permute.xlu0 %10404  ;;  %vm16418_vm1 = vcmask 130048  }
0x180c   : > { %8768 = vmatprep.subr.msk.bf16.mxu1 %vm16415_vm6, %v16414_v51  ;;  %v14783_v46 = vsel %vm16416_vm15, %v10306_v5, %v10301_v15  ;;  %vm16417_vm13 = vmmov %vm16410_vm2  ;;  %v10342_v45 = vunpack.i.h.bf16 %v14562_v20  ;;  %v10341_v15 = vunpack.i.l.bf16 %v14562_v20  ;;  %v10327_v60 = vunpack.i.h.bf16 %v14564_v11 }
0x180d   : > { %v14786_v37 = vsel %vm16417_vm13, %v10322_v59, 0.0  ;;  %v5881_v39 = vsel %vm16418_vm1, %v10381_v36, %v10382_v3  ;;  %vm16419_vm4 = vmmov %vm16410_vm2  ;;  %vm16421_vm2 = vcmask 900096   ;;  %vm16423_vm1 = vnez %v15977_v48 }
0x180e   : > { %v14790_v34 = vpop.permute.xlu1 %10384  ;;  %v14794_v42 = vsel %vm16419_vm4, %v10321_v35, 0.0  ;;  %v6644_v5 = vsel %vm16421_vm2, %v10402_v19, 0.0  ;;  %vm16422_vm15 = vmmov %vm16421_vm2  ;;  %v8536_v51 = vpack.c.bf16 %v5881_v39, %v14662_v29  ;;  %v8550_v3 = vpack.c.bf16 %v14761_v33, %v14725_v12 }
0x180f   : > { %v6643_v7 = vsel %vm16422_vm15, %v10401_v28, 0.0  ;;  %8771 = vmatpush1.bf16.msk.msra.mxu1 %vm16423_vm1, %v8769_v10  ;;  %v14810_v30 = vsel %vm16420_vm0, 0.0, %v10316_v21  ;;  %v10326_v43 = vunpack.i.l.bf16 %v14564_v11  ;;  %v16424_v20 = vunpack.i.l.bf16 %v14370_v23  ;;  %vm16425_vm4 = vmmov %vm16420_vm0  ;;  %v14825_v21 = vpop.permute.xlu0 %10414 }
0x1810   : > { %8774 = vmatprep.subr.msk.bf16.mxu1 %vm16415_vm6, %v8772_v53  ;;  %v5935_v27 = vsel %vm16425_vm4, %v10311_v62, %v10312_v41  ;;  %vm16426_vm13 = vmmov %vm16420_vm0  ;;  %v8787_v10 = vpack.c.bf16 %v14780_v4, %v14783_v46  ;;  %v8790_v33 = vpack.c.bf16 %v14786_v37, %v14794_v42  ;;  %8537 = vmatprep.subr.bf16.mxu0 %v8536_v51  ;;  %vm16428_vm0 = vcmask 801792  }
0x1811   : > { %v8538_v47 = vpack.c.bf16 %v10381_v36, %v16424_v20  ;;  %v14819_v29 = vsel %vm16426_vm13, 0.0, %v10311_v62  ;;  %v8553_v23 = vpack.c.bf16 %v14797_v31, %v5935_v27  ;;  %v6622_v53 = vsel %vm16421_vm2, %v10281_v9, %v10401_v28  ;;  %vm16427_vm15 = vmmov %vm16421_vm2 }
0x1812   : > { %v14827_v11 = vpop.permute.xlu1 %10394  ;;  %v6623_v12 = vsel %vm16427_vm15, %v10282_v52, %v10402_v19  ;;  %v8778_v36 = vpack.c.bf16 %v6644_v5, %v6643_v7  ;;  %v8556_v41 = vpack.c.bf16 %v14810_v30, %v14819_v29  ;;  %v14837_v62 = vsel %vm16428_vm0, %v10342_v45, 0.0  ;;  %vm16429_vm4 = vmmov %vm16428_vm0 }
0x1813   : > { %8540 = vmatpush1.bf16.msk.msra.mxu0 %vm14447_vm11, %v8538_v47  ;;  %v14840_v4 = vsel %vm16429_vm4, %v10341_v15, 0.0  ;;  %vm16430_vm13 = vmmov %vm16428_vm0  ;;  %v16431_v28 = vpack.c.bf16 %v14686_v61, %v14705_v25  ;;  %v16432_v47 = vpack.c.bf16 %v14677_v40, %v14683_v58  ;;  %v10357_v9 = vunpack.i.h.bf16 %v14585_v18 }
0x1814   : > { %v14843_v46 = vsel %vm16430_vm13, %v10327_v60, %v10322_v59  ;;  %vm16433_vm11 = vmmov %vm16428_vm0  ;;  %v10362_v52 = vunpack.i.h.bf16 %v14598_v54  ;;  %v10361_v27 = vunpack.i.l.bf16 %v14598_v54  ;;  %v10356_v61 = vunpack.i.l.bf16 %v14585_v18  ;;  %v10425_v59 = vpop.permute.xlu0 %10424 }
0x1815   : > { %8543 = vmatprep.subr.msk.bf16.mxu0 %vm13880_vm14, %v16431_v28  ;;  %8777 = vmatpush1.bf16.msk.msra.mxu1 %vm16423_vm1, %v16432_v47  ;;  %v14856_v14 = vsel %vm16433_vm11, %v10326_v43, %v10321_v35  ;;  %v10347_v25 = vunpack.i.h.bf16 %v14633_v32  ;;  %v10346_v40 = vunpack.i.l.bf16 %v14633_v32  ;;  %v8781_v58 = vpack.c.bf16 %v6623_v12, %v6622_v53  ;;  %vm16440_vm13 = vmmov %vm16433_vm11 }
0x1816   : > { %8780 = vmatprep.subr.msk.bf16.mxu1 %vm16415_vm6, %v8778_v36  ;;  %v14866_v19 = vpop.permute.xlu1 %10409  ;;  %v10337_v35 = vunpack.i.h.bf16 %v14600_v63  ;;  %v10336_v43 = vunpack.i.l.bf16 %v14600_v63  ;;  %v16434_v54 = vpack.c.bf16 %v14689_v24, %v14708_v56  ;;  %v10427_v39 = vunpack.i.h.bf16 %v10425_v59 }
0x1817   : > { %v10426_v18 = vunpack.i.l.bf16 %v10425_v59  ;;  %v8796_v31 = vpack.c.bf16 %v14837_v62, %v14840_v4  ;;  %v8793_v32 = vpack.c.bf16 %v14843_v46, %v14856_v14  ;;  %v10377_v60 = vunpack.i.h.bf16 %v14672_v1 }
0x1818   : > { %8546 = vmatpush1.bf16.msk.msra.mxu0 %vm13913_vm8, %v16434_v54  ;;  %v10376_v5 = vunpack.i.l.bf16 %v14672_v1  ;;  %vm16435_vm2 = vcmask 793600   ;;  %v10352_v56 = vunpack.i.h.bf16 %v14674_v44  ;;  %v10351_v7 = vunpack.i.l.bf16 %v14674_v44  ;;  %v10430_v12 = vpop.permute.xlu0 %10429 }
0x1819   : > { %8549 = vmatprep.subr.msk.bf16.mxu0 %vm13880_vm14, %v8547_v2  ;;  %8783 = vmatpush1.bf16.msk.msra.mxu1 %vm16423_vm1, %v8781_v58  ;;  %v14886_v63 = vsel %vm16435_vm2, %v10362_v52, 0.0  ;;  %vm16436_vm15 = vmmov %vm16435_vm2  ;;  %v16437_v51 = vpack.c.bf16 %v14735_v57, %v14738_v13  ;;  %vm16438_vm0 = vcmask 777216   ;;  %v6692_v20 = vsel %vm16440_vm13, %v10347_v25, %v10342_v45 }
0x181a   : > { %v14889_v24 = vsel %vm16436_vm15, %v10361_v27, 0.0  ;;  %v14899_v1 = vsel %vm16438_vm0, %v10357_v9, %v10356_v61  ;;  %vm16439_vm4 = vmmov %vm16438_vm0  ;;  %v6691_v53 = vsel %vm16433_vm11, %v10346_v40, %v10341_v15  ;;  %v14904_v36 = vpop.permute.xlu1 %10419  ;;  %vm16441_vm2 = vcmask 113664  }
0x181b   : > { %8786 = vmatprep.subr.msk.bf16.mxu1 %vm16257_vm5, %v16437_v51  ;;  %v6904_v2 = vsel %vm16439_vm4, %v10356_v61, 0.0  ;;  %v6001_v44 = vsel %vm16441_vm2, %v10336_v43, %v10337_v35  ;;  %vm16442_vm15 = vmmov %vm16441_vm2  ;;  %v10392_v57 = vunpack.i.h.bf16 %v14710_v8  ;;  %vm16443_vm1 = vcmask 121856  }
0x181c   : > { %v6022_v62 = vsel %vm16442_vm15, 0.0, %v10336_v43  ;;  %v5937_v13 = vsel %vm16443_vm1, %v10426_v18, %v10427_v39  ;;  %8552 = vmatpush1.bf16.msk.msra.mxu0 %vm13913_vm8, %v8550_v3  ;;  %v8808_v4 = vpack.c.bf16 %v14886_v63, %v14889_v24  ;;  %vm16444_vm0 = vcmask 793600  }
0x181d   : > { %v14915_v45 = vsel %vm16444_vm0, %v10376_v5, %v10361_v27  ;;  %vm16445_vm4 = vmmov %vm16444_vm0  ;;  %v10431_v46 = vunpack.i.l.bf16 %v10430_v12  ;;  %8555 = vmatprep.subr.msk.bf16.mxu0 %vm13880_vm14, %v8553_v23  ;;  %8789 = vmatpush1.bf16.msk.msra.mxu1 %vm16266_vm12, %v8787_v10  ;;  %v8799_v28 = vpack.c.bf16 %v6692_v20, %v6691_v53  ;;  %v10391_v14 = vunpack.i.l.bf16 %v14710_v8  ;;  %v14937_v27 = vpop.permute.xlu0 %10434 }
0x181e   : > { %v14918_v15 = vsel %vm16445_vm4, %v10377_v60, %v10362_v52  ;;  %vm16446_vm1 = vmmov %vm16444_vm0  ;;  %8792 = vmatprep.subr.msk.bf16.mxu1 %vm16257_vm5, %v8790_v33  ;;  %v10367_v9 = vunpack.i.h.bf16 %v14712_v0  ;;  %v10366_v23 = vunpack.i.l.bf16 %v14712_v0  ;;  %vm16448_vm11 = vcmask 121856   ;;  %v14939_v61 = vpop.permute.xlu1 %10439 }
0x181f   : > { %v14925_v47 = vsel %vm16446_vm1, %v10352_v56, %v10351_v7  ;;  %vm16447_vm13 = vmmov %vm16444_vm0  ;;  %v5958_v10 = vsel %vm16448_vm11, 0.0, %v10426_v18  ;;  %v8559_v52 = vpack.c.bf16 %v6001_v44, %v5937_v13  ;;  %v8811_v8 = vpack.c.bf16 %v14918_v15, %v14915_v45  ;;  %v16468_v44 = vld [vmem:[#allocation83_spill] sm:$0xff] }
0x1820   : > { %v6778_v3 = vsel %vm16447_vm13, %v10351_v7, 0.0  ;;  %vm16449_vm2 = vmmov %vm16444_vm0  ;;  %v10407_v37 = vunpack.i.h.bf16 %v14788_v55  ;;  %v10432_v42 = vunpack.i.h.bf16 %v10430_v12  ;;  %8558 = vmatpush1.bf16.msk.msra.mxu0 %vm13913_vm8, %v8556_v41  ;;  %v10406_v0 = vunpack.i.l.bf16 %v14788_v55  ;;  %v10546_v13 = vld [vmem:[%s15154_s18 + $0x8] sm:$0xff] }
0x1821   : > { %v14944_v25 = vsel %vm16449_vm2, %v10392_v57, 0.0  ;;  %v10387_v33 = vunpack.i.h.bf16 %v14790_v34  ;;  %v10386_v40 = vunpack.i.l.bf16 %v14790_v34  ;;  %vm16450_vm15 = vcmask 801792   ;;  %vm16451_vm0 = vmpackc.low %vm16229_vm3, %vm16405_vm10  ;;  %8795 = vmatpush1.bf16.msk.msra.mxu1 %vm16266_vm12, %v8793_v32  ;;  %v14974_v54 = vpop.permute.xlu0 %10444 }
0x1822   : > { %v6714_v58 = vsel %vm16450_vm15, %v10431_v46, 0.0  ;;  %8561 = vmatprep.subr.msk.bf16.mxu0 %vm16451_vm0, %v8559_v52  ;;  %vm16452_vm4 = vmmov %vm16446_vm1  ;;  %v10397_v55 = vunpack.i.h.bf16 %v14827_v11  ;;  %v10396_v29 = vunpack.i.l.bf16 %v14827_v11  ;;  %v8562_v41 = vpack.c.bf16 %v6022_v62, %v5958_v10  ;;  %8798 = vmatprep.subr.msk.bf16.mxu1 %vm16257_vm5, %v8796_v31  ;;  %v10450_v39 = vpop.permute.xlu1 %10449  ;;  %v16473_v52 = vld [vmem:[#allocation84_spill] sm:$0xff] }
0x1823   : > { %v14964_v30 = vsel %vm16452_vm4, %v10391_v14, 0.0  ;;  %vm16453_vm1 = vcmask 777216   ;;  %v10412_v35 = vunpack.i.h.bf16 %v14866_v19  ;;  %v10411_v43 = vunpack.i.l.bf16 %v14866_v19  ;;  %vm16455_vm11 = vmmov %vm16450_vm15 }
0x1824   : > { %v6906_v34 = vsel %vm16453_vm1, %v10367_v9, 0.0  ;;  %vm16454_vm13 = vmmov %vm16453_vm1  ;;  %v6693_v18 = vsel %vm16455_vm11, %v10432_v42, %v10431_v46  ;;  %v8802_v32 = vpack.c.bf16 %v6778_v3, %v6714_v58  ;;  %v10452_v22 = vunpack.i.h.bf16 %v10450_v39 }
0x1825   : > { %v6905_v59 = vsel %vm16454_vm13, %v10366_v23, 0.0  ;;  %vm16457_vm2 = vmpackc.low %vm16314_vm9, %vm16413_vm7  ;;  %v10451_v31 = vunpack.i.l.bf16 %v10450_v39  ;;  %8801 = vmatpush1.bf16.msk.msra.mxu1 %vm16266_vm12, %v8799_v28  ;;  %v8805_v26 = vpack.c.bf16 %v14925_v47, %v6693_v18  ;;  %v8814_v28 = vpack.c.bf16 %v14944_v25, %v14964_v30 }
0x1826   : > { %8564 = vmatpush1.bf16.msk.msra.mxu0 %vm16457_vm2, %v8562_v41  ;;  %vm16458_vm5 = vmmov %vm16452_vm4  ;;  %v8841_v53 = vpack.c.bf16 %v6904_v2, %v10452_v22  ;;  %v10460_v2 = vpop.permute.xlu0 %10459  ;;  %v10455_v46 = vpop.permute.xlu1 %10454  ;;  %v8847_v3 = vpack.c.bf16 %v6906_v34, %v6905_v59  ;;  %v16472_v47 = vmov 0.0   ;;  %v10416_v25 = vunpack.i.l.bf16 %v14825_v21 }
0x1827   : > { %v14983_v60 = vsel %vm16458_vm5, %v10406_v0, %v10391_v14  ;;  %vm16459_vm15 = vmmov %vm16452_vm4  ;;  %vm16469_vm5 = vnez %v16468_v44  ;;  %v10461_v10 = vunpack.i.l.bf16 %v10460_v2  ;;  %v10421_v58 = vunpack.i.l.bf16 %v14904_v36 }
0x1828   : > { %v14986_v5 = vsel %vm16459_vm15, %v10407_v37, %v10392_v57  ;;  %vm16460_vm0 = vmmov %vm16453_vm1  ;;  %vm16462_vm1 = vcmask 785408   ;;  %8804 = vmatprep.subr.msk.bf16.mxu1 %vm16469_vm5, %v8802_v32  ;;  %v16475_v37 = vld [vmem:[#allocation10_spill] sm:$0xff]  ;;  %v10437_v30 = vunpack.i.h.bf16 %v14937_v27  ;;  %v10441_v34 = vunpack.i.l.bf16 %v14939_v61 }
0x1829   : > { %v6884_v19 = vsel %vm16460_vm0, %v10386_v40, %v10366_v23  ;;  %vm16461_vm4 = vmmov %vm16460_vm0  ;;  %7159 = vmatmul.mubr.f32.vlgmr.msra.gmra.mrb[48].mxu0 %v10546_v13  ;;  %v8817_v14 = vpack.c.bf16 %v14986_v5, %v14983_v60  ;;  %v10462_v23 = vunpack.i.h.bf16 %v10460_v2  ;;  %v16477_v40 = vld [vmem:[#allocation85_spill] sm:$0xff]  ;;  %v10447_v63 = vunpack.i.h.bf16 %v14974_v54 }
0x182a   : > { %v6885_v56 = vsel %vm16461_vm4, %v10387_v33, %v10367_v9  ;;  %vm14995_vm7 = vmpackc.low %vm16405_vm10, %vm16462_vm1  ;;  %7442 = vmatprep.mubr.f32.mxu0 %v16472_v47  ;;  %v10417_v9 = vunpack.i.h.bf16 %v14825_v21  ;;  %vm16474_vm10 = vnez %v16473_v52  ;;  %v10422_v33 = vunpack.i.h.bf16 %v14904_v36  ;;  %v10470_v41 = vpop.permute.xlu1 %10469 }
0x182b   : > { %vm16465_vm13 = vmmov %vm16460_vm0  ;;  %8843 = vmatprep.subr.msk.bf16.mxu0 %vm14995_vm7, %v8841_v53  ;;  %8807 = vmatpush1.bf16.msk.msra.mxu1 %vm16474_vm10, %v8805_v26  ;;  %vm16478_vm4 = vnez %v16477_v40  ;;  %v10436_v21 = vunpack.i.l.bf16 %v14937_v27  ;;  %v10446_v24 = vunpack.i.l.bf16 %v14974_v54  ;;  %v16481_v27 = vld [vmem:[#allocation86_spill] sm:$0xff]  ;;  %v10456_v39 = vunpack.i.l.bf16 %v10455_v46 }
0x182c   : > { %v6908_v51 = vsel %vm16465_vm13, %v10397_v55, 0.0  ;;  %vm16466_vm11 = vmmov %vm16460_vm0  ;;  %8810 = vmatprep.subr.msk.bf16.mxu1 %vm16478_vm4, %v8808_v4  ;;  %v10472_v4 = vunpack.i.h.bf16 %v10470_v41  ;;  %vm16482_vm13 = vnez %v16481_v27 }
0x182d   : > { %v6907_v20 = vsel %vm16466_vm11, %v10396_v29, 0.0  ;;  %vm16467_vm2 = vmmov %vm16462_vm1  ;;  %vm16479_vm1 = vcmask 793600  }
0x182e   : > { %v6833_v12 = vsel %vm16467_vm2, %v10451_v31, %v10452_v22  ;;  %vm16470_vm15 = vmmov %vm16460_vm0  ;;  %v8853_v42 = vpack.c.bf16 %v6908_v51, %v6907_v20  ;;  %v6784_v59 = vsel %vm16479_vm1, %v10462_v23, 0.0 }
0x182f   : > { %v15005_v16 = vsel %vm16470_vm15, %v10411_v43, %v10396_v29  ;;  %vm16471_vm12 = vmmov %vm16460_vm0  ;;  %v8844_v57 = vpack.c.bf16 %v14899_v1, %v6833_v12  ;;  %v8850_v1 = vpack.c.bf16 %v6885_v56, %v6884_v19  ;;  %vm16476_vm0 = vnez %v16475_v37  ;;  %v15039_v29 = vpop.permute.xlu0 %10464  ;;  %8813 = vmatpush1.bf16.msk.msra.mxu1 %vm16482_vm13, %v8811_v8  ;;  %v10475_v19 = vpop.permute.xlu1 %10474 }
0x1830   : > { %v6887_v62 = vsel %vm16471_vm12, %v10412_v35, %v10397_v55  ;;  %v10442_v55 = vunpack.i.h.bf16 %v14939_v61  ;;  %vm16480_vm7 = vmmov %vm16479_vm1  ;;  %v10457_v35 = vunpack.i.h.bf16 %v10455_v46  ;;  %v10471_v43 = vunpack.i.l.bf16 %v10470_v41  ;;  %8816 = vmatprep.subr.msk.bf16.mxu1 %vm16478_vm4, %v8814_v28 }
0x1831   : > { %8846 = vmatpush1.bf16.msk.msra.mxu0 %vm16476_vm0, %v8844_v57  ;;  %v8856_v0 = vpack.c.bf16 %v6887_v62, %v15005_v16  ;;  %v6783_v36 = vsel %vm16480_vm7, %v10461_v10, 0.0  ;;  %vm16483_vm11 = vmmov %vm16479_vm1  ;;  %vm16486_vm15 = vcmask 769024   ;;  %v10467_v31 = vunpack.i.h.bf16 %v15039_v29 }
0x1832   : > { %8849 = vmatprep.subr.msk.bf16.mxu0 %vm13880_vm14, %v8847_v3  ;;  %v6762_v61 = vsel %vm16483_vm11, %v10416_v25, %v10461_v10  ;;  %vm16484_vm2 = vmmov %vm16479_vm1  ;;  %v6975_v45 = vsel %vm16486_vm15, %v10437_v30, 0.0  ;;  %v8820_v22 = vpack.c.bf16 %v6784_v59, %v6783_v36  ;;  %v10466_v60 = vunpack.i.l.bf16 %v15039_v29 }
0x1833   : > { %v6763_v54 = vsel %vm16484_vm2, %v10417_v9, %v10462_v23  ;;  %vm16485_vm5 = vmmov %vm16471_vm12  ;;  %v10480_v11 = vpop.permute.xlu0 %10479  ;;  %vm16491_vm7 = vcmask 785408   ;;  %8819 = vmatpush1.bf16.msk.msra.mxu1 %vm16482_vm13, %v8817_v14  ;;  %v10477_v26 = vunpack.i.h.bf16 %v10475_v19  ;;  %v10476_v57 = vunpack.i.l.bf16 %v10475_v19  ;;  %v10485_v47 = vpop.permute.xlu1 %10484 }
0x1834   : > { %v6910_v18 = vsel %vm16485_vm5, %v10472_v4, 0.0  ;;  %vm16487_vm12 = vmmov %vm16485_vm5  ;;  %v6827_v7 = vsel %vm16491_vm7, %v10441_v34, %v10442_v55  ;;  %v8823_v20 = vpack.c.bf16 %v6763_v54, %v6762_v61  ;;  %8822 = vmatprep.subr.msk.bf16.mxu1 %vm16478_vm4, %v8820_v22  ;;  %v10482_v16 = vunpack.i.h.bf16 %v10480_v11 }
0x1835   : > { %8852 = vmatpush1.bf16.msk.msra.mxu0 %vm13913_vm8, %v8850_v1  ;;  %v6888_v15 = vsel %vm16487_vm12, %v10421_v58, %v10471_v43  ;;  %vm16488_vm10 = vmmov %vm16485_vm5  ;;  %v10481_v62 = vunpack.i.l.bf16 %v10480_v11  ;;  %v8826_v28 = vpack.c.bf16 %v10447_v63, %v10442_v55  ;;  %v10487_v9 = vunpack.i.h.bf16 %v10485_v47  ;;  %v16511_v11 = vld [vmem:[#allocation30_spill] sm:$0xff] }
0x1836   : > { %8855 = vmatprep.subr.msk.bf16.mxu0 %vm13880_vm14, %v8853_v42  ;;  %v6889_v8 = vsel %vm16488_vm10, %v10422_v33, %v10472_v4  ;;  %vm16489_vm0 = vmmov %vm16485_vm5  ;;  %v10486_v23 = vunpack.i.l.bf16 %v10485_v47  ;;  %v8831_v42 = vpack.c.bf16 %v10482_v16, %v10477_v26 }
0x1837   : > { %v6909_v32 = vsel %vm16489_vm0, %v10471_v43, 0.0  ;;  %vm16490_vm1 = vmmov %vm16486_vm15  ;;  %v8862_v44 = vpack.c.bf16 %v6889_v8, %v6888_v15  ;;  %v10490_v13 = vpop.permute.xlu0 %10489  ;;  %8825 = vmatpush1.bf16.msk.msra.mxu1 %vm16482_vm13, %v8823_v20 }
0x1838   : > { %v8859_v5 = vpack.c.bf16 %v6910_v18, %v6909_v32  ;;  %v6974_v56 = vsel %vm16490_vm1, %v10436_v21, 0.0  ;;  %vm16492_vm11 = vmmov %vm16491_vm7  ;;  %v10492_v6 = vunpack.i.h.bf16 %v10490_v13  ;;  %v10491_v1 = vunpack.i.l.bf16 %v10490_v13 }
0x1839   : > { %v6828_v51 = vsel %vm16492_vm11, %v10446_v24, %v10447_v63  ;;  %8858 = vmatpush1.bf16.msk.msra.mxu0 %vm13913_vm8, %v8856_v0  ;;  %vm16493_vm2 = vmmov %vm16490_vm1  ;;  %v8865_v46 = vpack.c.bf16 %v6975_v45, %v6974_v56  ;;  %vm16506_vm11 = vnez %v15977_v48 }
0x183a   : > { %v6954_v53 = vsel %vm16493_vm2, %v10457_v35, %v10437_v30  ;;  %vm16494_vm5 = vmmov %vm16490_vm1  ;;  %8861 = vmatprep.subr.msk.bf16.mxu0 %vm13880_vm14, %v8859_v5  ;;  %v8829_v10 = vpack.c.bf16 %v6828_v51, %v6827_v7 }
0x183b   : > { %v6953_v12 = vsel %vm16494_vm5, %v10456_v39, %v10436_v21  ;;  %vm16495_vm15 = vmmov %vm16491_vm7  ;;  %v10500_v33 = vpop.permute.xlu0 %10499  ;;  %v10495_v21 = vpop.permute.xlu1 %10494 }
0x183c   : > { %vm15081_vm12 = vmpackc.low %vm16495_vm15, %vm16495_vm15  ;;  %v8868_v52 = vpack.c.bf16 %v6954_v53, %v6953_v12  ;;  %v10502_v58 = vunpack.i.h.bf16 %v10500_v33  ;;  %v10501_v30 = vunpack.i.l.bf16 %v10500_v33  ;;  %v10497_v41 = vunpack.i.h.bf16 %v10495_v21 }
0x183d   : > { %vm16498_vm10 = vmmov %vm16490_vm1  ;;  %8864 = vmatpush1.bf16.msk.msra.mxu0 %vm13913_vm8, %v8862_v44  ;;  %8828 = vmatprep.subr.msk.bf16.mxu1 %vm15081_vm12, %v8826_v28  ;;  %v10496_v34 = vunpack.i.l.bf16 %v10495_v21 }
0x183e   : > { %v6977_v3 = vsel %vm16498_vm10, %v10467_v31, 0.0  ;;  %vm16499_vm0 = vmmov %vm16490_vm1  ;;  %8867 = vmatprep.subr.msk.bf16.mxu0 %vm16415_vm6, %v8865_v46  ;;  %8830 = vmatpush1.bf16.msra.mxu1 %v8829_v10  ;;  %v8836_v36 = vpack.c.bf16 %v10502_v58, %v10497_v41 }
0x183f   : > { %v6976_v14 = vsel %vm16499_vm0, %v10466_v60, 0.0  ;;  %vm16500_vm14 = vmmov %vm16491_vm7  ;;  %8833 = vmatprep.subr.msk.bf16.mxu1 %vm15081_vm12, %v8831_v42  ;;  %v10505_v43 = vpop.permute.xlu1 %10504  ;;  %v6952_v39 = vpop.permute.xlu0 %6951 }
0x1840   : > { %v8871_v37 = vpack.c.bf16 %v6977_v3, %v6976_v14  ;;  %v6830_v25 = vsel %vm16500_vm14, %v10481_v62, %v10482_v16  ;;  %vm16501_vm4 = vmmov %vm16491_vm7  ;;  %v10507_v27 = vunpack.i.h.bf16 %v10505_v43  ;;  %v10506_v61 = vunpack.i.l.bf16 %v10505_v43 }
0x1841   : > { %v6829_v0 = vsel %vm16501_vm4, %v10476_v57, %v10477_v26  ;;  %vm16502_vm1 = vmmov %vm16499_vm0  ;;  %8870 = vmatpush1.bf16.msk.msra.mxu0 %vm16506_vm11, %v8868_v52  ;;  %v6980_v8 = vsel %vm16499_vm0, %v6952_v39, 0.0 }
0x1842   : > { %v6956_v40 = vsel %vm16502_vm1, %v10487_v9, %v10467_v31  ;;  %vm16503_vm13 = vmmov %vm16499_vm0  ;;  %8873 = vmatprep.subr.msk.bf16.mxu0 %vm16415_vm6, %v8871_v37  ;;  %v8834_v63 = vpack.c.bf16 %v6830_v25, %v6829_v0 }
0x1843   : > { %v6955_v17 = vsel %vm16503_vm13, %v10486_v23, %v10466_v60  ;;  %vm16504_vm8 = vmmov %vm16499_vm0  ;;  %v6950_v32 = vpop.permute.xlu1 %6949 }
0x1844   : > { %v6979_v55 = vsel %vm16504_vm8, %v10492_v6, 0.0  ;;  %vm16505_vm7 = vmmov %vm16499_vm0  ;;  %v8874_v24 = vpack.c.bf16 %v6956_v40, %v6955_v17  ;;  %8835 = vmatpush1.bf16.msra.mxu1 %v8834_v63 }
0x1845   : > { %v6978_v29 = vsel %vm16505_vm7, %v10491_v1, 0.0  ;;  %vm16507_vm2 = vmmov %vm16501_vm4  ;;  %8838 = vmatprep.subr.msk.bf16.mxu1 %vm15081_vm12, %v8836_v36 }
0x1846   : > { %v8877_v4 = vpack.c.bf16 %v6979_v55, %v6978_v29  ;;  %v6832_v59 = vsel %vm16507_vm2, %v10501_v30, %v10502_v58  ;;  %vm16508_vm5 = vmmov %vm16507_vm2  ;;  %8876 = vmatpush1.bf16.msk.msra.mxu0 %vm16506_vm11, %v8874_v24 }
0x1847   : > { %v6831_v35 = vsel %vm16508_vm5, %v10496_v34, %v10497_v41  ;;  %vm16509_vm15 = vmmov %vm16499_vm0  ;;  %v7002_v60 = vpop.permute.xlu0 %7001 }
0x1848   : > { %8879 = vmatprep.subr.msk.bf16.mxu0 %vm16415_vm6, %v8877_v4  ;;  %v8839_v54 = vpack.c.bf16 %v6832_v59, %v6831_v35  ;;  %v6958_v18 = vsel %vm16509_vm15, %v10507_v27, %v10492_v6  ;;  %vm16510_vm10 = vmmov %vm16499_vm0  ;;  %vm7020_vm6 = vcmask 982016  }
0x1849   : > { %v6957_v45 = vsel %vm16510_vm10, %v10506_v61, %v10491_v1  ;;  %vm16512_vm12 = vmmov %vm16499_vm0 }
0x184a   : > { %v8880_v15 = vpack.c.bf16 %v6958_v18, %v6957_v45  ;;  %8840 = vmatpush1.bf16.msra.mxu1 %v8839_v54  ;;  %v6959_v22 = vsel %vm16512_vm12, %v6950_v32, %v6952_v39 }
0x184c   : > { %8882 = vmatpush1.bf16.msk.msra.mxu0 %vm16506_vm11, %v8880_v15 }
0x184d   : > { %8021 = vmatprep.subr.msk.mxu0 %vm16229_vm3, %v6980_v8  ;;  %7372 = vmatmul.mubr.f32.vlgmr.msra.gmra.mrb[20].mxu1 %v16511_v11 }
0x1850   : > { %8022 = vmatpush1.msk.msra.mxu0 %vm16314_vm9, %v6959_v22 }
0x1851   : > { %8023 = vmatmul.mubr.msk.f32.vlgmr.msra.gmra.mrb[50].mxu0 %vm7020_vm6, %v5333_v50 }
0x18fc   : > { %v7160_v31 = vpop.f32.mrb[48].mxu0 }
0x18fd   : > { %v7162_v48 = vpop.f32.mrb[49].mxu0  ;;  %v8883_v5 = vadd.f32 %v7160_v31, %v7002_v60 }
0x18fe   : > { %v8886_v49 = vadd.f32 %v7162_v48, %v7002_v60 }
0x1920   : > { %v7373_v19 = vpop.f32.mrb[20].mxu1 }
0x1921   : > { %v8884_v56 = vadd.f32 %v8883_v5, %v7373_v19  ;;  %v7375_v7 = vpop.f32.mrb[21].mxu1 }
0x1922   : > { %v8887_v51 = vadd.f32 %v8886_v49, %v7375_v7 }
0x1924   : > { %v7444_v20 = vpop.f32.mrb[50].mxu0 }
0x1925   : > { %v8885_v53 = vadd.f32 %v8884_v56, %v7444_v20  ;;  %v7446_v12 = vpop.f32.mrb[51].mxu0 }
0x1926   : > { %v8888_v44 = vadd.f32 %v8887_v51, %v7446_v12 }
0x1927   : > { %v7449_v16 = vmax.f32 %v8885_v53, 0.0 }
0x1928   : > { %v7450_v62 = vmax.f32 %v8888_v44, 0.0 }
0x1929   : > { %v7451_v38 = vmin.f32 %v7449_v16, 1.0 }
0x192a   : > { %v7452_v26 = vmin.f32 %v7450_v62, 1.0 }
0x192c   : > { %v7455_v57 = vcombine.low %v7451_v38, %v7452_v26 }
0x192e   : > { %7457 = vst [vmem:[%s628_s2] sm:$0xff] %v7455_v57 }
0x192f PF: > { %s32_s23 = sadd.s32 1, %s10553_s23  }
0x1930   : > { %p29_p4 = scmp.ge.s32.totalorder %s32_s23, 4  }
0x1932   :  { %31 = sbr.rel (!%p29_p4) target bundleno = 10 (0xa), region = 157 }

</bundles_post_ra>
